<compile_context>
chip_gen: v6e
topology: v6e:2x2x1
jax: 0.10.0
libtpu: 0.0.40
codegen_flags: <defaults>
</compile_context>

<pallas_src>
import numpy as np
import jax
import jax.numpy as jnp
from jax.experimental import pallas as pl
from jax.experimental.pallas import tpu as pltpu


_BN_EPS = 1e-5
_IN_DIM = 100 + 128        # 228
_IN_DIM_PAD = 256          # sublane/lane-friendly K for the fc matmul


# ------------------------------------------------------------------
# Fused Pallas kernel: fc(+BN+GLU) -> 4 x [up2 + conv3x3 + BN + GLU]
# One grid step = TB samples.
# ------------------------------------------------------------------
def _init_stage_g_kernel(x_ref, fcw_ref, fcs_ref, fcsh_ref,
                         m_ref, bns_ref, bnsh_ref,
                         r1_ref, r2_ref, r3_ref, r4_ref, o_ref):
    # ---- fc: Linear(no bias) + folded BatchNorm1d + GLU, batched over TB ----
    x = x_ref[...].astype(jnp.bfloat16)                        # (TB, 256)
    y = jnp.dot(x, fcw_ref[...], preferred_element_type=jnp.float32)
    y = y * fcs_ref[...] + fcsh_ref[...]                       # (TB, 32*ngf)
    half = y.shape[1] // 2
    v = y[:, :half] * jax.nn.sigmoid(y[:, half:])              # (TB, 16*ngf)

    # Rearrange to the up-block layout: row = h*TB + b, lane = w*Cin + c.
    # This is a plain sublane concat of four 128-lane-aligned slices
    # (no scratch roundtrip, no masked single-row stores).
    row_w = half // 4                                          # 4*ngf (=128)
    xb = jnp.concatenate([v[:, h * row_w:(h + 1) * row_w] for h in range(4)],
                         axis=0)                               # (4*TB, 4*ngf)

    lanes2 = m_ref.shape[2]                                    # 2*W2*Cout (=8*ngf)
    chalf = lanes2 // 2                                        # W2*Cout   (=4*ngf)
    for l, r_ref in enumerate((r1_ref, r2_ref, r3_ref, r4_ref)):
        xb16 = xb.astype(jnp.bfloat16)
        # Row mix: nearest-upsampled rows + the three vertical conv taps,
        # batched over all TB samples at once (R_kh is kron(R_kh, I_TB)).
        u = jnp.concatenate(
            [jnp.dot(r_ref[kh], xb16, preferred_element_type=jnp.float32)
             for kh in range(3)], axis=1)                      # (2H*TB, 12*ngf)
        # Lane mix: one deep-K matmul folds horizontal taps + kh-sum +
        # channel mix; GLU halves are pre-separated in M's column order.
        z = jnp.dot(u.astype(jnp.bfloat16), m_ref[l],
                    preferred_element_type=jnp.float32)        # (2H*TB, 8*ngf)
        z = z * bns_ref[l] + bnsh_ref[l]                       # folded BatchNorm2d
        xb = z[:, :chalf] * jax.nn.sigmoid(z[:, chalf:])       # GLU

    # xb: (64*TB, 64*Cout) with row = h*TB + b  ->  (64, TB, 64*Cout) is a
    # free (layout-preserving) reshape; the store is fully lane-dense.
    o_ref[...] = xb.reshape(o_ref.shape).astype(o_ref.dtype)


def init_stage_g_forward(prep, z_code, c_code, ngf):
    """Forward pass matching INIT_STAGE_G.forward (returns NCHW)."""
    B = z_code.shape[0]
    cout = ngf // 16
    lane_out = 64 * cout                                        # 128 for ngf=32
    tb = prep["r"][0].shape[2] // 4        # static batch tile baked into R

    in_code = jnp.concatenate([c_code, z_code], axis=1)         # (B, 228)
    in_code = jnp.pad(in_code, ((0, 0), (0, _IN_DIM_PAD - in_code.shape[1])))
    g = pl.cdiv(B, tb)
    b_pad = g * tb
    if b_pad != B:
        in_code = jnp.pad(in_code, ((0, b_pad - B), (0, 0)))

    # Advisory cost estimate for XLA's scheduler.
    macs = tb * _IN_DIM_PAD * 32 * ngf
    h = 4
    for _ in range(4):
        macs += 3 * (2 * h * tb) * (h * tb) * (4 * ngf)
        macs += (2 * h * tb) * (12 * ngf) * (8 * ngf)
        h *= 2
    sigmoids = tb * ngf * (16 + (8 + 16 + 32 + 64) * 4)
    w_bytes = sum(int(a.size) * a.dtype.itemsize
                  for a in (prep["fc_w"], prep["fc_scale"], prep["fc_shift"],
                            prep["m"], prep["bn_scale"], prep["bn_shift"],
                            *prep["r"]))
    cost = pl.CostEstimate(
        flops=int(2 * macs * g),
        transcendentals=int(sigmoids * g),
        bytes_accessed=int(w_bytes + b_pad * (_IN_DIM_PAD + 64 * lane_out) * 4))

    out = pl.pallas_call(
        _init_stage_g_kernel,
        out_shape=jax.ShapeDtypeStruct((64, b_pad, lane_out), jnp.float32),
        grid=(g,),
        in_specs=[pl.BlockSpec((tb, _IN_DIM_PAD), lambda i: (i, 0)),
                  pl.BlockSpec(prep["fc_w"].shape, lambda i: (0, 0)),
                  pl.BlockSpec(prep["fc_scale"].shape, lambda i: (0, 0)),
                  pl.BlockSpec(prep["fc_shift"].shape, lambda i: (0, 0)),
                  pl.BlockSpec(prep["m"].shape, lambda i: (0, 0, 0)),
                  pl.BlockSpec(prep["bn_scale"].shape, lambda i: (0, 0, 0)),
                  pl.BlockSpec(prep["bn_shift"].shape, lambda i: (0, 0, 0))]
                 + [pl.BlockSpec(r.shape, lambda i: (0, 0, 0))
                    for r in prep["r"]],
        out_specs=pl.BlockSpec((64, tb, lane_out), lambda i: (0, i, 0)),
        compiler_params=pltpu.CompilerParams(
            dimension_semantics=("parallel",)),
        cost_estimate=cost,
    )(in_code, prep["fc_w"], prep["fc_scale"], prep["fc_shift"],
      prep["m"], prep["bn_scale"], prep["bn_shift"], *prep["r"])

    # (64, B, 64*Cout) with row = h, lane = w*Cout + c  ->  NCHW.
    out = out[:, :B].reshape(64, B, 64, cout)
    return out.transpose(1, 3, 0, 2)


# ------------------------------------------------------------------
# Parameter construction (deterministic, synthetic; PyTorch-layout)
# ------------------------------------------------------------------
def _fold_bn(gamma, beta, mean, var):
    scale = gamma / jnp.sqrt(var + _BN_EPS)
    shift = beta - mean * scale
    return scale[None, :], shift[None, :]


def _make_bn(key, c):
    k1, k2, k3, k4 = jax.random.split(key, 4)
    gamma = 1.0 + 0.02 * jax.random.normal(k1, (c,), jnp.float32)
    beta = 0.02 * jax.random.normal(k2, (c,), jnp.float32)
    mean = 0.1 * jax.random.normal(k3, (c,), jnp.float32)
    var = jax.random.uniform(k4, (c,), jnp.float32, 0.5, 1.5)
    return _fold_bn(gamma, beta, mean, var)


def init_params(key, ngf):
    ks = jax.random.split(key, 12)
    params = {}
    f2 = ngf * 4 * 4 * 2
    params["fc_w"] = 0.02 * jax.random.normal(ks[0], (_IN_DIM, f2), jnp.float32)
    params["fc_bn"] = _make_bn(ks[1], f2)
    chans = [(ngf, ngf // 2), (ngf // 2, ngf // 4),
             (ngf // 4, ngf // 8), (ngf // 8, ngf // 16)]
    params["ups"] = []
    for i, (cin, cout) in enumerate(chans):
        wk, bnk = ks[2 + 2 * i], ks[3 + 2 * i]
        w = 0.05 * jax.random.normal(wk, (3, 3, cin, 2 * cout), jnp.float32)
        params["ups"].append((w, _make_bn(bnk, 2 * cout)))
    return params


def prepare_params(params, ngf, tb):
    """Fold upsample/pad/conv/GLU-split into kernel-ready (bf16) matrices."""
    assert ngf % 32 == 0, "lane-dense layout requires 4*ngf to be a multiple of 128"
    assert tb % 8 == 0, "batch tile must be a multiple of 8 sublanes"
    f2 = ngf * 4 * 4 * 2
    half = f2 // 2
    row_w = 4 * ngf

    # fc: pad K 228->256, permute columns so post-GLU lane n = h*4*ngf + w*ngf + c
    # holds feature (c, h, w) of PyTorch's (ngf, 4, 4) view (same perm per half).
    fc_w = jnp.pad(params["fc_w"], ((0, _IN_DIM_PAD - _IN_DIM), (0, 0)))
    n = np.arange(half)
    h_i = n // row_w
    rem = n % row_w
    w_i = rem // ngf
    c_i = rem % ngf
    orig = c_i * 16 + h_i * 4 + w_i
    perm = np.concatenate([orig, half + orig])
    fc_scale, fc_shift = params["fc_bn"]
    prep = {"fc_w": fc_w[:, perm].astype(jnp.bfloat16),
            "fc_scale": fc_scale[:, perm],
            "fc_shift": fc_shift[:, perm]}

    # upBlocks: row-mix R_kh = kron(R_kh(2H,H), I_TB) (batched over the tile,
    # rows are h-major: h*TB+b) and a deep-K lane-mix M (3*W*Cin, 2*W2*Cout)
    # with the three kh taps stacked along K and GLU halves pre-separated.
    Ms, Rs, bs, bh = [], [], [], []
    H, W = 4, 4
    eye_tb = np.eye(tb, dtype=np.float32)
    for wconv, (sc, sh) in params["ups"]:
        Cin = wconv.shape[2]
        Cout = wconv.shape[3] // 2
        H2, W2 = 2 * H, 2 * W
        # G[kw, j, q] = 1 iff upsampled column q+kw-1 is in range and comes
        # from input column j (nearest upsample: source column = (q+kw-1)//2).
        kw = np.arange(3)[:, None, None]
        j = np.arange(W)[None, :, None]
        q = np.arange(W2)[None, None, :]
        s = q + kw - 1
        G = ((s >= 0) & (s < W2) & (j == s // 2)).astype(np.float32)
        wr = np.asarray(wconv).reshape(3, 3, Cin, 2, Cout)   # split GLU halves
        M = np.einsum("kjq,gkcho->gjchqo", G, wr)            # (kh, j, c, half, q, o)
        Ms.append(M.reshape(3 * W * Cin, 2 * W2 * Cout))     # K-stack the kh taps
        # R_kh[p, i] = 1 iff upsampled row p+kh-1 is in range and comes from row i.
        p = np.arange(H2)[:, None]
        i = np.arange(H)[None, :]
        r_blk = []
        for kh in range(3):
            r = ((p + kh - 1 >= 0) & (p + kh - 1 < H2) &
                 (i == (p + kh - 1) // 2)).astype(np.float32)
            r_blk.append(np.kron(r, eye_tb))                 # batched row mix
        Rs.append(jnp.asarray(np.stack(r_blk), dtype=jnp.bfloat16))
        # Folded BN scale/shift tiled to the kernel's (half, w, c) lane order.
        bs.append(np.tile(np.asarray(sc).reshape(2, 1, Cout),
                          (1, W2, 1)).reshape(1, -1))
        bh.append(np.tile(np.asarray(sh).reshape(2, 1, Cout),
                          (1, W2, 1)).reshape(1, -1))
        H, W = H2, W2

    prep["m"] = jnp.asarray(np.stack(Ms), dtype=jnp.bfloat16)        # (4, 12*ngf, 8*ngf)
    prep["bn_scale"] = jnp.asarray(np.stack(bs), dtype=jnp.float32)  # (4, 1, 8*ngf)
    prep["bn_shift"] = jnp.asarray(np.stack(bh), dtype=jnp.float32)  # (4, 1, 8*ngf)
    prep["r"] = Rs       # (3,8TB,4TB) (3,16TB,8TB) (3,32TB,16TB) (3,64TB,32TB)
    return prep


# ------------------------------------------------------------------
# Pure-JAX reference (correctness check only)
# ------------------------------------------------------------------
def _reference_forward(params, z_code, c_code, ngf):
    in_code = jnp.concatenate([c_code, z_code], axis=1)
    y = in_code @ params["fc_w"]
    s, sh = params["fc_bn"]
    y = y * s + sh
    f = y.shape[1] // 2
    y = y[:, :f] * jax.nn.sigmoid(y[:, f:])
    B = y.shape[0]
    x = y.reshape(B, ngf, 4, 4).transpose(0, 2, 3, 1)
    for w, (sc, sf) in params["ups"]:
        xu = jnp.repeat(jnp.repeat(x, 2, axis=1), 2, axis=2)
        c = jax.lax.conv_general_dilated(
            xu, w, (1, 1), "SAME",
            dimension_numbers=("NHWC", "HWIO", "NHWC"))
        c = c * sc[0] + sf[0]
        co = c.shape[-1] // 2
        x = c[..., :co] * jax.nn.sigmoid(c[..., co:])
    return x.transpose(0, 3, 1, 2)


# ------------------------------------------------------------------
if __name__ == "__main__":
    ngf = 32          # gf_dim; output channels = ngf // 16 = 2
    batch = 16        # per-call batch
    tb = 8            # samples per grid step (batch tile)
    key = jax.random.PRNGKey(0)
    kz, kc, kp = jax.random.split(key, 3)
    z_code = jax.random.normal(kz, (batch, 100), jnp.float32)
    c_code = jax.random.normal(kc, (batch, 128), jnp.float32)
    params = init_params(kp, ngf)
    prep = prepare_params(params, ngf, tb)

    fwd = jax.jit(init_stage_g_forward, static_argnums=3)
    out = jax.block_until_ready(fwd(prep, z_code, c_code, ngf))
    assert out.shape == (batch, ngf // 16, 64, 64), out.shape

    ref = jax.block_until_ready(_reference_forward(params, z_code, c_code, ngf))
    # Tolerance accounts for bf16 matmul operands in the kernel vs. the f32
    # (default-precision) XLA reference; observed error is well below this.
    err = float(jnp.max(jnp.abs(out - ref)))
    assert jnp.allclose(out, ref, atol=3e-3, rtol=3e-3), err

    print("KERNEL_OK")
</pallas_src>

<mosaic_0001>
module attributes {stable_mosaic.version = 11 : i64} {
  func.func @_init_stage_g_kernel(%arg0: i32, %arg1: memref<8x256xf32, #tpu.memory_space<vmem>>, %arg2: memref<256x1024xbf16, #tpu.memory_space<vmem>>, %arg3: memref<1x1024xf32, #tpu.memory_space<vmem>>, %arg4: memref<1x1024xf32, #tpu.memory_space<vmem>>, %arg5: memref<4x384x256xbf16, #tpu.memory_space<vmem>>, %arg6: memref<4x1x256xf32, #tpu.memory_space<vmem>>, %arg7: memref<4x1x256xf32, #tpu.memory_space<vmem>>, %arg8: memref<3x64x32xbf16, #tpu.memory_space<vmem>>, %arg9: memref<3x128x64xbf16, #tpu.memory_space<vmem>>, %arg10: memref<3x256x128xbf16, #tpu.memory_space<vmem>>, %arg11: memref<3x512x256xbf16, #tpu.memory_space<vmem>>, %arg12: memref<64x8x128xf32, #tpu.memory_space<vmem>>) attributes {dimension_semantics = [#tpu.dimension_semantics<parallel>], iteration_bounds = array<i64: 2>, scalar_prefetch = 0 : i64, scratch_operands = 0 : i64, tpu.core_type = #tpu.core_type<tc>, window_params = [{transform_indices = @transform_0, window_bounds = array<i64: 8, 256>}, {pipeline_mode = #tpu.pipeline_mode<synchronous>, transform_indices = @transform_1, window_bounds = array<i64: 256, 1024>}, {pipeline_mode = #tpu.pipeline_mode<synchronous>, transform_indices = @transform_2, window_bounds = array<i64: 1, 1024>}, {pipeline_mode = #tpu.pipeline_mode<synchronous>, transform_indices = @transform_3, window_bounds = array<i64: 1, 1024>}, {pipeline_mode = #tpu.pipeline_mode<synchronous>, transform_indices = @transform_4, window_bounds = array<i64: 4, 384, 256>}, {pipeline_mode = #tpu.pipeline_mode<synchronous>, transform_indices = @transform_5, window_bounds = array<i64: 4, 1, 256>}, {pipeline_mode = #tpu.pipeline_mode<synchronous>, transform_indices = @transform_6, window_bounds = array<i64: 4, 1, 256>}, {pipeline_mode = #tpu.pipeline_mode<synchronous>, transform_indices = @transform_7, window_bounds = array<i64: 3, 64, 32>}, {pipeline_mode = #tpu.pipeline_mode<synchronous>, transform_indices = @transform_8, window_bounds = array<i64: 3, 128, 64>}, {pipeline_mode = #tpu.pipeline_mode<synchronous>, transform_indices = @transform_9, window_bounds = array<i64: 3, 256, 128>}, {pipeline_mode = #tpu.pipeline_mode<synchronous>, transform_indices = @transform_10, window_bounds = array<i64: 3, 512, 256>}, {transform_indices = @transform_11, window_bounds = array<i64: 64, 8, 128>}]} {
    %c0 = arith.constant 0 : index
    %c0_0 = arith.constant 0 : index
    %0 = vector.load %arg1[%c0, %c0_0] : memref<8x256xf32, #tpu.memory_space<vmem>>, vector<8x256xf32>
    %1 = arith.truncf %0 : vector<8x256xf32> to vector<8x256xbf16>
    %c0_1 = arith.constant 0 : index
    %c0_2 = arith.constant 0 : index
    %2 = vector.load %arg2[%c0_1, %c0_2] : memref<256x1024xbf16, #tpu.memory_space<vmem>>, vector<256x1024xbf16>
    %cst = arith.constant dense<0.000000e+00> : vector<8x1024xf32>
    %3 = tpu.matmul %1, %2, %cst {dimension_numbers = #tpu.dot_dimension_numbers<[1], [0], [0], [1], [0, 0, 1, 1], [], []>} : vector<8x256xbf16>, vector<256x1024xbf16>, vector<8x1024xf32> -> vector<8x1024xf32>
    %c0_3 = arith.constant 0 : index
    %c0_4 = arith.constant 0 : index
    %4 = vector.load %arg3[%c0_3, %c0_4] : memref<1x1024xf32, #tpu.memory_space<vmem>>, vector<1x1024xf32>
    %5 = vector.broadcast %4 : vector<1x1024xf32> to vector<8x1024xf32>
    %6 = arith.mulf %3, %5 : vector<8x1024xf32>
    %c0_5 = arith.constant 0 : index
    %c0_6 = arith.constant 0 : index
    %7 = vector.load %arg4[%c0_5, %c0_6] : memref<1x1024xf32, #tpu.memory_space<vmem>>, vector<1x1024xf32>
    %8 = vector.broadcast %7 : vector<1x1024xf32> to vector<8x1024xf32>
    %9 = arith.addf %6, %8 : vector<8x1024xf32>
    %10 = vector.extract_strided_slice %9 {offsets = [0, 0], sizes = [8, 512], strides = [1, 1]} : vector<8x1024xf32> to vector<8x512xf32>
    %11 = vector.extract_strided_slice %9 {offsets = [0, 512], sizes = [8, 512], strides = [1, 1]} : vector<8x1024xf32> to vector<8x512xf32>
    %12 = arith.negf %11 : vector<8x512xf32>
    %13 = math.exp %12 : vector<8x512xf32>
    %cst_7 = arith.constant 1.000000e+00 : f32
    %14 = vector.broadcast %cst_7 : f32 to vector<8x512xf32>
    %15 = arith.addf %14, %13 : vector<8x512xf32>
    %16 = arith.divf %14, %15 : vector<8x512xf32>
    %17 = arith.mulf %10, %16 : vector<8x512xf32>
    %18 = vector.extract_strided_slice %17 {offsets = [0, 0], sizes = [8, 128], strides = [1, 1]} : vector<8x512xf32> to vector<8x128xf32>
    %19 = vector.extract_strided_slice %17 {offsets = [0, 128], sizes = [8, 128], strides = [1, 1]} : vector<8x512xf32> to vector<8x128xf32>
    %20 = vector.extract_strided_slice %17 {offsets = [0, 256], sizes = [8, 128], strides = [1, 1]} : vector<8x512xf32> to vector<8x128xf32>
    %21 = vector.extract_strided_slice %17 {offsets = [0, 384], sizes = [8, 128], strides = [1, 1]} : vector<8x512xf32> to vector<8x128xf32>
    %22 = tpu.concatenate %18, %19, %20, %21 in 0 : vector<8x128xf32>, vector<8x128xf32>, vector<8x128xf32>, vector<8x128xf32> -> vector<32x128xf32>
    %23 = arith.truncf %22 : vector<32x128xf32> to vector<32x128xbf16>
    %c0_8 = arith.constant 0 : index
    %c0_9 = arith.constant 0 : index
    %c0_10 = arith.constant 0 : index
    %24 = vector.load %arg8[%c0_8, %c0_9, %c0_10] : memref<3x64x32xbf16, #tpu.memory_space<vmem>>, vector<1x64x32xbf16>
    %25 = vector.shape_cast %24 : vector<1x64x32xbf16> to vector<64x32xbf16>
    %cst_11 = arith.constant dense<0.000000e+00> : vector<64x128xf32>
    %26 = tpu.matmul %25, %23, %cst_11 {dimension_numbers = #tpu.dot_dimension_numbers<[1], [0], [0], [1], [0, 0, 1, 1], [], []>} : vector<64x32xbf16>, vector<32x128xbf16>, vector<64x128xf32> -> vector<64x128xf32>
    %c1 = arith.constant 1 : index
    %c0_12 = arith.constant 0 : index
    %c0_13 = arith.constant 0 : index
    %27 = vector.load %arg8[%c1, %c0_12, %c0_13] : memref<3x64x32xbf16, #tpu.memory_space<vmem>>, vector<1x64x32xbf16>
    %28 = vector.shape_cast %27 : vector<1x64x32xbf16> to vector<64x32xbf16>
    %cst_14 = arith.constant dense<0.000000e+00> : vector<64x128xf32>
    %29 = tpu.matmul %28, %23, %cst_14 {dimension_numbers = #tpu.dot_dimension_numbers<[1], [0], [0], [1], [0, 0, 1, 1], [], []>} : vector<64x32xbf16>, vector<32x128xbf16>, vector<64x128xf32> -> vector<64x128xf32>
    %c2 = arith.constant 2 : index
    %c0_15 = arith.constant 0 : index
    %c0_16 = arith.constant 0 : index
    %30 = vector.load %arg8[%c2, %c0_15, %c0_16] : memref<3x64x32xbf16, #tpu.memory_space<vmem>>, vector<1x64x32xbf16>
    %31 = vector.shape_cast %30 : vector<1x64x32xbf16> to vector<64x32xbf16>
    %cst_17 = arith.constant dense<0.000000e+00> : vector<64x128xf32>
    %32 = tpu.matmul %31, %23, %cst_17 {dimension_numbers = #tpu.dot_dimension_numbers<[1], [0], [0], [1], [0, 0, 1, 1], [], []>} : vector<64x32xbf16>, vector<32x128xbf16>, vector<64x128xf32> -> vector<64x128xf32>
    %33 = tpu.concatenate %26, %29, %32 in 1 : vector<64x128xf32>, vector<64x128xf32>, vector<64x128xf32> -> vector<64x384xf32>
    %34 = arith.truncf %33 : vector<64x384xf32> to vector<64x384xbf16>
    %c0_18 = arith.constant 0 : index
    %c0_19 = arith.constant 0 : index
    %c0_20 = arith.constant 0 : index
    %35 = vector.load %arg5[%c0_18, %c0_19, %c0_20] : memref<4x384x256xbf16, #tpu.memory_space<vmem>>, vector<1x384x256xbf16>
    %36 = vector.shape_cast %35 : vector<1x384x256xbf16> to vector<384x256xbf16>
    %cst_21 = arith.constant dense<0.000000e+00> : vector<64x256xf32>
    %37 = tpu.matmul %34, %36, %cst_21 {dimension_numbers = #tpu.dot_dimension_numbers<[1], [0], [0], [1], [0, 0, 1, 1], [], []>} : vector<64x384xbf16>, vector<384x256xbf16>, vector<64x256xf32> -> vector<64x256xf32>
    %c0_22 = arith.constant 0 : index
    %c0_23 = arith.constant 0 : index
    %c0_24 = arith.constant 0 : index
    %38 = vector.load %arg6[%c0_22, %c0_23, %c0_24] : memref<4x1x256xf32, #tpu.memory_space<vmem>>, vector<1x1x256xf32>
    %39 = vector.shape_cast %38 : vector<1x1x256xf32> to vector<1x256xf32>
    %40 = vector.broadcast %39 : vector<1x256xf32> to vector<64x256xf32>
    %41 = arith.mulf %37, %40 : vector<64x256xf32>
    %c0_25 = arith.constant 0 : index
    %c0_26 = arith.constant 0 : index
    %c0_27 = arith.constant 0 : index
    %42 = vector.load %arg7[%c0_25, %c0_26, %c0_27] : memref<4x1x256xf32, #tpu.memory_space<vmem>>, vector<1x1x256xf32>
    %43 = vector.shape_cast %42 : vector<1x1x256xf32> to vector<1x256xf32>
    %44 = vector.broadcast %43 : vector<1x256xf32> to vector<64x256xf32>
    %45 = arith.addf %41, %44 : vector<64x256xf32>
    %46 = vector.extract_strided_slice %45 {offsets = [0, 0], sizes = [64, 128], strides = [1, 1]} : vector<64x256xf32> to vector<64x128xf32>
    %47 = vector.extract_strided_slice %45 {offsets = [0, 128], sizes = [64, 128], strides = [1, 1]} : vector<64x256xf32> to vector<64x128xf32>
    %48 = arith.negf %47 : vector<64x128xf32>
    %49 = math.exp %48 : vector<64x128xf32>
    %cst_28 = arith.constant 1.000000e+00 : f32
    %50 = vector.broadcast %cst_28 : f32 to vector<64x128xf32>
    %51 = arith.addf %50, %49 : vector<64x128xf32>
    %52 = arith.divf %50, %51 : vector<64x128xf32>
    %53 = arith.mulf %46, %52 : vector<64x128xf32>
    %54 = arith.truncf %53 : vector<64x128xf32> to vector<64x128xbf16>
    %c0_29 = arith.constant 0 : index
    %c0_30 = arith.constant 0 : index
    %c0_31 = arith.constant 0 : index
    %55 = vector.load %arg9[%c0_29, %c0_30, %c0_31] : memref<3x128x64xbf16, #tpu.memory_space<vmem>>, vector<1x128x64xbf16>
    %56 = vector.shape_cast %55 : vector<1x128x64xbf16> to vector<128x64xbf16>
    %cst_32 = arith.constant dense<0.000000e+00> : vector<128x128xf32>
    %57 = tpu.matmul %56, %54, %cst_32 {dimension_numbers = #tpu.dot_dimension_numbers<[1], [0], [0], [1], [0, 0, 1, 1], [], []>} : vector<128x64xbf16>, vector<64x128xbf16>, vector<128x128xf32> -> vector<128x128xf32>
    %c1_33 = arith.constant 1 : index
    %c0_34 = arith.constant 0 : index
    %c0_35 = arith.constant 0 : index
    %58 = vector.load %arg9[%c1_33, %c0_34, %c0_35] : memref<3x128x64xbf16, #tpu.memory_space<vmem>>, vector<1x128x64xbf16>
    %59 = vector.shape_cast %58 : vector<1x128x64xbf16> to vector<128x64xbf16>
    %cst_36 = arith.constant dense<0.000000e+00> : vector<128x128xf32>
    %60 = tpu.matmul %59, %54, %cst_36 {dimension_numbers = #tpu.dot_dimension_numbers<[1], [0], [0], [1], [0, 0, 1, 1], [], []>} : vector<128x64xbf16>, vector<64x128xbf16>, vector<128x128xf32> -> vector<128x128xf32>
    %c2_37 = arith.constant 2 : index
    %c0_38 = arith.constant 0 : index
    %c0_39 = arith.constant 0 : index
    %61 = vector.load %arg9[%c2_37, %c0_38, %c0_39] : memref<3x128x64xbf16, #tpu.memory_space<vmem>>, vector<1x128x64xbf16>
    %62 = vector.shape_cast %61 : vector<1x128x64xbf16> to vector<128x64xbf16>
    %cst_40 = arith.constant dense<0.000000e+00> : vector<128x128xf32>
    %63 = tpu.matmul %62, %54, %cst_40 {dimension_numbers = #tpu.dot_dimension_numbers<[1], [0], [0], [1], [0, 0, 1, 1], [], []>} : vector<128x64xbf16>, vector<64x128xbf16>, vector<128x128xf32> -> vector<128x128xf32>
    %64 = tpu.concatenate %57, %60, %63 in 1 : vector<128x128xf32>, vector<128x128xf32>, vector<128x128xf32> -> vector<128x384xf32>
    %65 = arith.truncf %64 : vector<128x384xf32> to vector<128x384xbf16>
    %c1_41 = arith.constant 1 : index
    %c0_42 = arith.constant 0 : index
    %c0_43 = arith.constant 0 : index
    %66 = vector.load %arg5[%c1_41, %c0_42, %c0_43] : memref<4x384x256xbf16, #tpu.memory_space<vmem>>, vector<1x384x256xbf16>
    %67 = vector.shape_cast %66 : vector<1x384x256xbf16> to vector<384x256xbf16>
    %cst_44 = arith.constant dense<0.000000e+00> : vector<128x256xf32>
    %68 = tpu.matmul %65, %67, %cst_44 {dimension_numbers = #tpu.dot_dimension_numbers<[1], [0], [0], [1], [0, 0, 1, 1], [], []>} : vector<128x384xbf16>, vector<384x256xbf16>, vector<128x256xf32> -> vector<128x256xf32>
    %c1_45 = arith.constant 1 : index
    %c0_46 = arith.constant 0 : index
    %c0_47 = arith.constant 0 : index
    %69 = vector.load %arg6[%c1_45, %c0_46, %c0_47] : memref<4x1x256xf32, #tpu.memory_space<vmem>>, vector<1x1x256xf32>
    %70 = vector.shape_cast %69 : vector<1x1x256xf32> to vector<1x256xf32>
    %71 = vector.broadcast %70 : vector<1x256xf32> to vector<128x256xf32>
    %72 = arith.mulf %68, %71 : vector<128x256xf32>
    %c1_48 = arith.constant 1 : index
    %c0_49 = arith.constant 0 : index
    %c0_50 = arith.constant 0 : index
    %73 = vector.load %arg7[%c1_48, %c0_49, %c0_50] : memref<4x1x256xf32, #tpu.memory_space<vmem>>, vector<1x1x256xf32>
    %74 = vector.shape_cast %73 : vector<1x1x256xf32> to vector<1x256xf32>
    %75 = vector.broadcast %74 : vector<1x256xf32> to vector<128x256xf32>
    %76 = arith.addf %72, %75 : vector<128x256xf32>
    %77 = vector.extract_strided_slice %76 {offsets = [0, 0], sizes = [128, 128], strides = [1, 1]} : vector<128x256xf32> to vector<128x128xf32>
    %78 = vector.extract_strided_slice %76 {offsets = [0, 128], sizes = [128, 128], strides = [1, 1]} : vector<128x256xf32> to vector<128x128xf32>
    %79 = arith.negf %78 : vector<128x128xf32>
    %80 = math.exp %79 : vector<128x128xf32>
    %cst_51 = arith.constant 1.000000e+00 : f32
    %81 = vector.broadcast %cst_51 : f32 to vector<128x128xf32>
    %82 = arith.addf %81, %80 : vector<128x128xf32>
    %83 = arith.divf %81, %82 : vector<128x128xf32>
    %84 = arith.mulf %77, %83 : vector<128x128xf32>
    %85 = arith.truncf %84 : vector<128x128xf32> to vector<128x128xbf16>
    %c0_52 = arith.constant 0 : index
    %c0_53 = arith.constant 0 : index
    %c0_54 = arith.constant 0 : index
    %86 = vector.load %arg10[%c0_52, %c0_53, %c0_54] : memref<3x256x128xbf16, #tpu.memory_space<vmem>>, vector<1x256x128xbf16>
    %87 = vector.shape_cast %86 : vector<1x256x128xbf16> to vector<256x128xbf16>
    %cst_55 = arith.constant dense<0.000000e+00> : vector<256x128xf32>
    %88 = tpu.matmul %87, %85, %cst_55 {dimension_numbers = #tpu.dot_dimension_numbers<[1], [0], [0], [1], [0, 0, 1, 1], [], []>} : vector<256x128xbf16>, vector<128x128xbf16>, vector<256x128xf32> -> vector<256x128xf32>
    %c1_56 = arith.constant 1 : index
    %c0_57 = arith.constant 0 : index
    %c0_58 = arith.constant 0 : index
    %89 = vector.load %arg10[%c1_56, %c0_57, %c0_58] : memref<3x256x128xbf16, #tpu.memory_space<vmem>>, vector<1x256x128xbf16>
    %90 = vector.shape_cast %89 : vector<1x256x128xbf16> to vector<256x128xbf16>
    %cst_59 = arith.constant dense<0.000000e+00> : vector<256x128xf32>
    %91 = tpu.matmul %90, %85, %cst_59 {dimension_numbers = #tpu.dot_dimension_numbers<[1], [0], [0], [1], [0, 0, 1, 1], [], []>} : vector<256x128xbf16>, vector<128x128xbf16>, vector<256x128xf32> -> vector<256x128xf32>
    %c2_60 = arith.constant 2 : index
    %c0_61 = arith.constant 0 : index
    %c0_62 = arith.constant 0 : index
    %92 = vector.load %arg10[%c2_60, %c0_61, %c0_62] : memref<3x256x128xbf16, #tpu.memory_space<vmem>>, vector<1x256x128xbf16>
    %93 = vector.shape_cast %92 : vector<1x256x128xbf16> to vector<256x128xbf16>
    %cst_63 = arith.constant dense<0.000000e+00> : vector<256x128xf32>
    %94 = tpu.matmul %93, %85, %cst_63 {dimension_numbers = #tpu.dot_dimension_numbers<[1], [0], [0], [1], [0, 0, 1, 1], [], []>} : vector<256x128xbf16>, vector<128x128xbf16>, vector<256x128xf32> -> vector<256x128xf32>
    %95 = tpu.concatenate %88, %91, %94 in 1 : vector<256x128xf32>, vector<256x128xf32>, vector<256x128xf32> -> vector<256x384xf32>
    %96 = arith.truncf %95 : vector<256x384xf32> to vector<256x384xbf16>
    %c2_64 = arith.constant 2 : index
    %c0_65 = arith.constant 0 : index
    %c0_66 = arith.constant 0 : index
    %97 = vector.load %arg5[%c2_64, %c0_65, %c0_66] : memref<4x384x256xbf16, #tpu.memory_space<vmem>>, vector<1x384x256xbf16>
    %98 = vector.shape_cast %97 : vector<1x384x256xbf16> to vector<384x256xbf16>
    %cst_67 = arith.constant dense<0.000000e+00> : vector<256x256xf32>
    %99 = tpu.matmul %96, %98, %cst_67 {dimension_numbers = #tpu.dot_dimension_numbers<[1], [0], [0], [1], [0, 0, 1, 1], [], []>} : vector<256x384xbf16>, vector<384x256xbf16>, vector<256x256xf32> -> vector<256x256xf32>
    %c2_68 = arith.constant 2 : index
    %c0_69 = arith.constant 0 : index
    %c0_70 = arith.constant 0 : index
    %100 = vector.load %arg6[%c2_68, %c0_69, %c0_70] : memref<4x1x256xf32, #tpu.memory_space<vmem>>, vector<1x1x256xf32>
    %101 = vector.shape_cast %100 : vector<1x1x256xf32> to vector<1x256xf32>
    %102 = vector.broadcast %101 : vector<1x256xf32> to vector<256x256xf32>
    %103 = arith.mulf %99, %102 : vector<256x256xf32>
    %c2_71 = arith.constant 2 : index
    %c0_72 = arith.constant 0 : index
    %c0_73 = arith.constant 0 : index
    %104 = vector.load %arg7[%c2_71, %c0_72, %c0_73] : memref<4x1x256xf32, #tpu.memory_space<vmem>>, vector<1x1x256xf32>
    %105 = vector.shape_cast %104 : vector<1x1x256xf32> to vector<1x256xf32>
    %106 = vector.broadcast %105 : vector<1x256xf32> to vector<256x256xf32>
    %107 = arith.addf %103, %106 : vector<256x256xf32>
    %108 = vector.extract_strided_slice %107 {offsets = [0, 0], sizes = [256, 128], strides = [1, 1]} : vector<256x256xf32> to vector<256x128xf32>
    %109 = vector.extract_strided_slice %107 {offsets = [0, 128], sizes = [256, 128], strides = [1, 1]} : vector<256x256xf32> to vector<256x128xf32>
    %110 = arith.negf %109 : vector<256x128xf32>
    %111 = math.exp %110 : vector<256x128xf32>
    %cst_74 = arith.constant 1.000000e+00 : f32
    %112 = vector.broadcast %cst_74 : f32 to vector<256x128xf32>
    %113 = arith.addf %112, %111 : vector<256x128xf32>
    %114 = arith.divf %112, %113 : vector<256x128xf32>
    %115 = arith.mulf %108, %114 : vector<256x128xf32>
    %116 = arith.truncf %115 : vector<256x128xf32> to vector<256x128xbf16>
    %c0_75 = arith.constant 0 : index
    %c0_76 = arith.constant 0 : index
    %c0_77 = arith.constant 0 : index
    %117 = vector.load %arg11[%c0_75, %c0_76, %c0_77] : memref<3x512x256xbf16, #tpu.memory_space<vmem>>, vector<1x512x256xbf16>
    %118 = vector.shape_cast %117 : vector<1x512x256xbf16> to vector<512x256xbf16>
    %cst_78 = arith.constant dense<0.000000e+00> : vector<512x128xf32>
    %119 = tpu.matmul %118, %116, %cst_78 {dimension_numbers = #tpu.dot_dimension_numbers<[1], [0], [0], [1], [0, 0, 1, 1], [], []>} : vector<512x256xbf16>, vector<256x128xbf16>, vector<512x128xf32> -> vector<512x128xf32>
    %c1_79 = arith.constant 1 : index
    %c0_80 = arith.constant 0 : index
    %c0_81 = arith.constant 0 : index
    %120 = vector.load %arg11[%c1_79, %c0_80, %c0_81] : memref<3x512x256xbf16, #tpu.memory_space<vmem>>, vector<1x512x256xbf16>
    %121 = vector.shape_cast %120 : vector<1x512x256xbf16> to vector<512x256xbf16>
    %cst_82 = arith.constant dense<0.000000e+00> : vector<512x128xf32>
    %122 = tpu.matmul %121, %116, %cst_82 {dimension_numbers = #tpu.dot_dimension_numbers<[1], [0], [0], [1], [0, 0, 1, 1], [], []>} : vector<512x256xbf16>, vector<256x128xbf16>, vector<512x128xf32> -> vector<512x128xf32>
    %c2_83 = arith.constant 2 : index
    %c0_84 = arith.constant 0 : index
    %c0_85 = arith.constant 0 : index
    %123 = vector.load %arg11[%c2_83, %c0_84, %c0_85] : memref<3x512x256xbf16, #tpu.memory_space<vmem>>, vector<1x512x256xbf16>
    %124 = vector.shape_cast %123 : vector<1x512x256xbf16> to vector<512x256xbf16>
    %cst_86 = arith.constant dense<0.000000e+00> : vector<512x128xf32>
    %125 = tpu.matmul %124, %116, %cst_86 {dimension_numbers = #tpu.dot_dimension_numbers<[1], [0], [0], [1], [0, 0, 1, 1], [], []>} : vector<512x256xbf16>, vector<256x128xbf16>, vector<512x128xf32> -> vector<512x128xf32>
    %126 = tpu.concatenate %119, %122, %125 in 1 : vector<512x128xf32>, vector<512x128xf32>, vector<512x128xf32> -> vector<512x384xf32>
    %127 = arith.truncf %126 : vector<512x384xf32> to vector<512x384xbf16>
    %c3 = arith.constant 3 : index
    %c0_87 = arith.constant 0 : index
    %c0_88 = arith.constant 0 : index
    %128 = vector.load %arg5[%c3, %c0_87, %c0_88] : memref<4x384x256xbf16, #tpu.memory_space<vmem>>, vector<1x384x256xbf16>
    %129 = vector.shape_cast %128 : vector<1x384x256xbf16> to vector<384x256xbf16>
    %cst_89 = arith.constant dense<0.000000e+00> : vector<512x256xf32>
    %130 = tpu.matmul %127, %129, %cst_89 {dimension_numbers = #tpu.dot_dimension_numbers<[1], [0], [0], [1], [0, 0, 1, 1], [], []>} : vector<512x384xbf16>, vector<384x256xbf16>, vector<512x256xf32> -> vector<512x256xf32>
    %c3_90 = arith.constant 3 : index
    %c0_91 = arith.constant 0 : index
    %c0_92 = arith.constant 0 : index
    %131 = vector.load %arg6[%c3_90, %c0_91, %c0_92] : memref<4x1x256xf32, #tpu.memory_space<vmem>>, vector<1x1x256xf32>
    %132 = vector.shape_cast %131 : vector<1x1x256xf32> to vector<1x256xf32>
    %133 = vector.broadcast %132 : vector<1x256xf32> to vector<512x256xf32>
    %134 = arith.mulf %130, %133 : vector<512x256xf32>
    %c3_93 = arith.constant 3 : index
    %c0_94 = arith.constant 0 : index
    %c0_95 = arith.constant 0 : index
    %135 = vector.load %arg7[%c3_93, %c0_94, %c0_95] : memref<4x1x256xf32, #tpu.memory_space<vmem>>, vector<1x1x256xf32>
    %136 = vector.shape_cast %135 : vector<1x1x256xf32> to vector<1x256xf32>
    %137 = vector.broadcast %136 : vector<1x256xf32> to vector<512x256xf32>
    %138 = arith.addf %134, %137 : vector<512x256xf32>
    %139 = vector.extract_strided_slice %138 {offsets = [0, 0], sizes = [512, 128], strides = [1, 1]} : vector<512x256xf32> to vector<512x128xf32>
    %140 = vector.extract_strided_slice %138 {offsets = [0, 128], sizes = [512, 128], strides = [1, 1]} : vector<512x256xf32> to vector<512x128xf32>
    %141 = arith.negf %140 : vector<512x128xf32>
    %142 = math.exp %141 : vector<512x128xf32>
    %cst_96 = arith.constant 1.000000e+00 : f32
    %143 = vector.broadcast %cst_96 : f32 to vector<512x128xf32>
    %144 = arith.addf %143, %142 : vector<512x128xf32>
    %145 = arith.divf %143, %144 : vector<512x128xf32>
    %146 = arith.mulf %139, %145 : vector<512x128xf32>
    %147 = vector.shape_cast %146 : vector<512x128xf32> to vector<64x8x128xf32>
    %c0_97 = arith.constant 0 : index
    %c0_98 = arith.constant 0 : index
    %c0_99 = arith.constant 0 : index
    %148 = vector.load %arg12[%c0_97, %c0_98, %c0_99] : memref<64x8x128xf32, #tpu.memory_space<vmem>>, vector<64x8x128xf32>
    tpu.vector_store %arg12[%c0_97, %c0_98, %c0_99], %147 {strides = array<i32>} : memref<64x8x128xf32, #tpu.memory_space<vmem>>, vector<64x8x128xf32>,
    return
  }
  func.func @transform_0(%arg0: i32) -> (i32, i32) {
    %c0_i32 = arith.constant 0 : i32
    %c0_i32_0 = arith.constant 0 : i32
    return %arg0, %c0_i32 : i32, i32
  }
  func.func @transform_1(%arg0: i32) -> (i32, i32) {
    %c0_i32 = arith.constant 0 : i32
    %c0_i32_0 = arith.constant 0 : i32
    %c0_i32_1 = arith.constant 0 : i32
    return %c0_i32, %c0_i32_0 : i32, i32
  }
  func.func @transform_2(%arg0: i32) -> (i32, i32) {
    %c0_i32 = arith.constant 0 : i32
    %c0_i32_0 = arith.constant 0 : i32
    %c0_i32_1 = arith.constant 0 : i32
    return %c0_i32, %c0_i32_0 : i32, i32
  }
  func.func @transform_3(%arg0: i32) -> (i32, i32) {
    %c0_i32 = arith.constant 0 : i32
    %c0_i32_0 = arith.constant 0 : i32
    %c0_i32_1 = arith.constant 0 : i32
    return %c0_i32, %c0_i32_0 : i32, i32
  }
  func.func @transform_4(%arg0: i32) -> (i32, i32, i32) {
    %c0_i32 = arith.constant 0 : i32
    %c0_i32_0 = arith.constant 0 : i32
    %c0_i32_1 = arith.constant 0 : i32
    %c0_i32_2 = arith.constant 0 : i32
    return %c0_i32, %c0_i32_0, %c0_i32_1 : i32, i32, i32
  }
  func.func @transform_5(%arg0: i32) -> (i32, i32, i32) {
    %c0_i32 = arith.constant 0 : i32
    %c0_i32_0 = arith.constant 0 : i32
    %c0_i32_1 = arith.constant 0 : i32
    %c0_i32_2 = arith.constant 0 : i32
    return %c0_i32, %c0_i32_0, %c0_i32_1 : i32, i32, i32
  }
  func.func @transform_6(%arg0: i32) -> (i32, i32, i32) {
    %c0_i32 = arith.constant 0 : i32
    %c0_i32_0 = arith.constant 0 : i32
    %c0_i32_1 = arith.constant 0 : i32
    %c0_i32_2 = arith.constant 0 : i32
    return %c0_i32, %c0_i32_0, %c0_i32_1 : i32, i32, i32
  }
  func.func @transform_7(%arg0: i32) -> (i32, i32, i32) {
    %c0_i32 = arith.constant 0 : i32
    %c0_i32_0 = arith.constant 0 : i32
    %c0_i32_1 = arith.constant 0 : i32
    %c0_i32_2 = arith.constant 0 : i32
    return %c0_i32, %c0_i32_0, %c0_i32_1 : i32, i32, i32
  }
  func.func @transform_8(%arg0: i32) -> (i32, i32, i32) {
    %c0_i32 = arith.constant 0 : i32
    %c0_i32_0 = arith.constant 0 : i32
    %c0_i32_1 = arith.constant 0 : i32
    %c0_i32_2 = arith.constant 0 : i32
    return %c0_i32, %c0_i32_0, %c0_i32_1 : i32, i32, i32
  }
  func.func @transform_9(%arg0: i32) -> (i32, i32, i32) {
    %c0_i32 = arith.constant 0 : i32
    %c0_i32_0 = arith.constant 0 : i32
    %c0_i32_1 = arith.constant 0 : i32
    %c0_i32_2 = arith.constant 0 : i32
    return %c0_i32, %c0_i32_0, %c0_i32_1 : i32, i32, i32
  }
  func.func @transform_10(%arg0: i32) -> (i32, i32, i32) {
    %c0_i32 = arith.constant 0 : i32
    %c0_i32_0 = arith.constant 0 : i32
    %c0_i32_1 = arith.constant 0 : i32
    %c0_i32_2 = arith.constant 0 : i32
    return %c0_i32, %c0_i32_0, %c0_i32_1 : i32, i32, i32
  }
  func.func @transform_11(%arg0: i32) -> (i32, i32, i32) {
    %c0_i32 = arith.constant 0 : i32
    %c0_i32_0 = arith.constant 0 : i32
    %c0_i32_1 = arith.constant 0 : i32
    return %c0_i32, %arg0, %c0_i32_0 : i32, i32, i32
  }
}

</mosaic_0001>

<bundles_post_ra>
// kernel: init_stage_g_forward.1
= control target key start
LH: loop header
LB: loop body
LE: loop exit
PB: predicated region body
PF: predicated region fallthrough
CT: control target
= control target key end

     0   :  { %16 = vsyncpa [#allocation3], 0  ;;  %s15768_s0 = inlined_call_operand.vmem [shape: f32[16,256], index: 0, kind: input, shape index: {}]   ;;  %s15769_s1 = inlined_call_operand.hbm [shape: bf16[256,1024], index: 1, kind: input, shape index: {}]   ;;  %s15770_s2 = inlined_call_operand.vmem [shape: f32[1,1024], index: 2, kind: input, shape index: {}]   ;;  %s15771_s3 = inlined_call_operand.vmem [shape: f32[1,1024], index: 3, kind: input, shape index: {}]   ;;  %s15772_s4 = inlined_call_operand.hbm [shape: bf16[4,384,256], index: 4, kind: input, shape index: {}]   ;;  %s15773_s5 = inlined_call_operand.vmem [shape: f32[4,1,256], index: 5, kind: input, shape index: {}]   ;;  %s15774_s6 = inlined_call_operand.vmem [shape: f32[4,1,256], index: 6, kind: input, shape index: {}]   ;;  %s15775_s7 = inlined_call_operand.vmem [shape: bf16[3,64,32], index: 7, kind: input, shape index: {}]   ;;  %s15776_s8 = inlined_call_operand.vmem [shape: bf16[3,128,64], index: 8, kind: input, shape index: {}]   ;;  %s15777_s9 = inlined_call_operand.vmem [shape: bf16[3,256,128], index: 9, kind: input, shape index: {}]   ;;  %s15778_s10 = inlined_call_operand.hbm [shape: bf16[3,512,256], index: 10, kind: input, shape index: {}]   ;;  %s15779_s11 = inlined_call_operand.vmem [shape: f32[64,16,128], index: 11, kind: output, shape index: {}]  }
   0x1   :  { %17 = vsyncpa [#allocation5], 0  ;;  %s12619_s17 = smov 0   ;;  %s12621_s18 = smov 0  }
   0x2   :  { %s12623_s19 = smov 0  }
   0x3 LB: > { %s12632_s20 = sadd.s32 4294967295, %s12549_s19   ;;  %s12634_s21 = sadd.s32 1, %s12549_s19   ;;  %s12549_s19 = sphi %s12623_s19, %s15930_s19   ;;  %s12545_s18 = sphi %s12621_s18, %s15929_s18   ;;  %s12541_s17 = sphi %s12619_s17, %s15928_s17  }
   0x4   : > { %s263_s22 = ssub.s32 %s12549_s19, %s12634_s21  ;;  %s266_s23 = sadd.s32 1, %s12545_s18 }
   0x5   : > { %p264_p0 = scmp.eq.s32.totalorder %s263_s22, 0  ;;  %p276_p1 = scmp.ne.s32.totalorder %s12545_s18, %s12541_s17 }
   0x6   : > { %p277_p2 = scmp.eq.s32.totalorder %s12632_s20, 1  ;;  %p9924_p3 = scmp.ge.s32.totalorder %s12549_s19, 1 }
   0x7   : > { %s12642_s24 = scalar_select %p264_p0, %s12545_s18, %s266_s23  }
   0x8   : > { %p12644_p4 = por %p277_p2, %p276_p1  ;;  %p290_p5 = scmp.lt.s32.totalorder %s12549_s19, 3 }
   0x9   : > { %p11247_p6 = scmp.eq.s32.totalorder %s12632_s20, 0  ;;  %s12551_s27 = smov [#allocation4]  }
   0xa   : > { %p12649_p7 = pnand %p9924_p3, %p290_p5  ;;  %s321_s28 = sshll.u32 %s12551_s27, 4  ;;  %s322_s28 = int_to_ptr.vmem [resolvable:$true] %s321_s28 }
   0xb   : > { %s12552_s30 = smov [#allocation2]   ;;  %s12452_s13 = scalar_lea.vmem %s322_s28, 24576 }
   0xc   : > { %p11237_p8 = pneg %p12649_p7  ;;  %s302_s12 = sshll.u32 %s12552_s30, 4  ;;  %s303_s12 = int_to_ptr.vmem [resolvable:$true] %s302_s12 }
   0xd   : > { %p12453_p11 = scmp.ne.s32.totalorder %s322_s28, %s12452_s13  ;;  %p12460_p0 = scmp.lt.s32.totalorder %s322_s28, %s322_s28 }
   0xe   : > { %p12657_p9 = pnand %p11247_p6, %p11237_p8  ;;  %p12461_p1 = scmp.lt.s32.totalorder %s12452_s13, %s12452_s13 }
  0x10   : > { %p12443_p10 = pneg %p12657_p9  ;;  %p12462_p2 = por %p12461_p1, %p12460_p0 }
  0x12   : > { %p12455_p12 = pnand %p12453_p11, %p12443_p10 }
  0x14   : > { %p12456_p13 = pneg %p12455_p12 }
  0x16   : > { %p12463_p3 = pnand %p12462_p2, %p12456_p13 }
  0x18   : > { %12466 = shalt.err (!%p12463_p3)
}
  0x19   : > { %s12553_s14 = smov 128   ;;  %s12554_s15 = smov 8  }
  0x1a   : > { %11243 = dma.hbm_to_vmem [thread:$0]  (!%p12657_p9), %s15772_s4, 24576, %s322_s28, [#allocation5], %s12553_s14, %s12553_s14, %s12554_s15  }
  0x1b   : > { %s12478_s22 = scalar_lea.vmem %s303_s12, 16384  ;;  %p12486_p12 = scmp.lt.s32.totalorder %s303_s12, %s303_s12 }
  0x1c   : > { %p12479_p5 = scmp.ne.s32.totalorder %s303_s12, %s12478_s22  ;;  %p12487_p13 = scmp.lt.s32.totalorder %s12478_s22, %s12478_s22 }
  0x1e   : > { %p12481_p8 = pnand %p12479_p5, %p12443_p10  ;;  %p12488_p0 = por %p12487_p13, %p12486_p12 }
  0x20   : > { %p12482_p11 = pneg %p12481_p8 }
  0x22   : > { %p12489_p1 = pnand %p12488_p0, %p12482_p11 }
  0x24   : > { %12492 = shalt.err (!%p12489_p1)
}
  0x25   : > { %s12555_s23 = smov 512   ;;  %s12556_s27 = smov 32  }
  0x26   : > { %11240 = dma.hbm_to_vmem [thread:$0]  (!%p12657_p9), %s15769_s1, 16384, %s303_s12, [#allocation3], %s12555_s23, %s12555_s23, %s12556_s27  }
  0x27   : > { %s12557_s28 = smov [#allocation6]  }
  0x28   : > { %s349_s16 = sshll.u32 %s12557_s28, 4  ;;  %s350_s16 = int_to_ptr.vmem [resolvable:$true] %s349_s16 }
  0x29   : > { %s12504_s19 = scalar_lea.vmem %s350_s16, 24576  ;;  %p12512_p8 = scmp.lt.s32.totalorder %s350_s16, %s350_s16 }
  0x2a   : > { %p12505_p2 = scmp.ne.s32.totalorder %s350_s16, %s12504_s19  ;;  %p12513_p11 = scmp.lt.s32.totalorder %s12504_s19, %s12504_s19 }
  0x2c   : > { %p12507_p3 = pnand %p12505_p2, %p12443_p10  ;;  %p12514_p12 = por %p12513_p11, %p12512_p8 }
  0x2e   : > { %p12508_p5 = pneg %p12507_p3 }
  0x30   : > { %p12515_p13 = pnand %p12514_p12, %p12508_p5 }
  0x32   : > { %12518 = shalt.err (!%p12515_p13)
}
  0x33   : > { %11246 = dma.hbm_to_vmem [thread:$0]  (!%p12657_p9), %s15778_s10, 24576, %s350_s16, [#allocation5], %s12553_s14, %s12553_s14, %s12554_s15  }
  0x34   : > { %373 = sbr.rel (%p12649_p7) target bundleno = 3059 (0xbf3), region = 64 }
  0x39   : > { %12532 = dma.done.wait (%p11247_p6), [#allocation3], 16384  }
  0x3a   : > { %12534 = vsyncadd (%p11247_p6), [#allocation3], 4294950912 }
  0x3b   : > { %12536 = dma.done.wait (%p11247_p6), [#allocation5], 49152  }
  0x3c   : > { %12538 = vsyncadd (%p11247_p6), [#allocation5], 4294918144  ;;  %v486_v0 = vld [vmem:[#allocation2 + $0x1c0] sm:$0xff]  ;;  %v487_v2 = vld [vmem:[#allocation2 + $0x1c8] sm:$0xff]  ;;  %p420_p6 = scmp.lt.s32.totalorder %s12632_s20, 1  ;;  %vm1520_vm0 = vcmask 261120  }
  0x3d   : > { %v490_v1 = vld [vmem:[#allocation2 + $0x1e0] sm:$0xff]  ;;  %v491_v4 = vld [vmem:[#allocation2 + $0x1e8] sm:$0xff]  ;;  %vm2428_vm1 = vcmask 523264   ;;  %s417_s12 = sand.u32 1, %s12541_s17  }
  0x3e   : > { %v9993_v3 = vcombine.high %v486_v0, %v490_v1  ;;  %v9992_v5 = vcombine.low %v486_v0, %v490_v1  ;;  %v478_v6 = vld [vmem:[#allocation2 + $0x180] sm:$0xff]  ;;  %v9995_v8 = vcombine.high %v487_v2, %v491_v4  ;;  %v9994_v9 = vcombine.low %v487_v2, %v491_v4  ;;  %v479_v11 = vld [vmem:[#allocation2 + $0x188] sm:$0xff]  ;;  %s421_s26 = scalar_select %p420_p6, %s12632_s20, 1 }
  0x3f   : > { %v482_v7 = vld [vmem:[#allocation2 + $0x1a0] sm:$0xff]  ;;  %v483_v12 = vld [vmem:[#allocation2 + $0x1a8] sm:$0xff]  ;;  %s9933_s17 = sshll.u32 %s417_s12, 9 }
  0x40   : > { %v9985_v10 = vcombine.high %v478_v6, %v482_v7  ;;  %v470_v13 = vld [vmem:[#allocation2 + $0x140] sm:$0xff]  ;;  %1198 = vmatprep.subr.bf16.mxu0 %v9993_v3  ;;  %v9987_v14 = vcombine.high %v479_v11, %v483_v12  ;;  %v471_v16 = vld [vmem:[#allocation2 + $0x148] sm:$0xff]  ;;  %1239 = vmatprep.subr.bf16.mxu1 %v9995_v8  ;;  %v9984_v18 = vcombine.low %v478_v6, %v482_v7  ;;  %s10814_s29 = sshll.u32 %s421_s26, 4  ;;  %s14885_s22 = scalar_lea.vmem [#allocation7], %s9933_s17 }
  0x41   : > { %v474_v15 = vld [vmem:[#allocation2 + $0x160] sm:$0xff]  ;;  %v475_v17 = vld [vmem:[#allocation2 + $0x168] sm:$0xff]  ;;  %1199 = vmatpush1.bf16.msra.mxu0 %v9992_v5  ;;  %1240 = vmatpush1.bf16.msra.mxu1 %v9994_v9  ;;  %v9986_v19 = vcombine.low %v479_v11, %v483_v12  ;;  %s12708_s23 = scalar_lea.vmem %s15768_s0, %s10814_s29  ;;  %s10811_s26 = sshll.u32 (%p12644_p4), %s12632_s20, 3 }
  0x42   : > { %1200 = vmatprep.subr.bf16.mxu0 %v9985_v10  ;;  %v9977_v20 = vcombine.high %v470_v13, %v474_v15  ;;  %1241 = vmatprep.subr.bf16.mxu1 %v9987_v14  ;;  %v9979_v21 = vcombine.high %v471_v16, %v475_v17  ;;  %v462_v22 = vld [vmem:[#allocation2 + $0x100] sm:$0xff]  ;;  %v463_v24 = vld [vmem:[#allocation2 + $0x108] sm:$0xff]  ;;  %v9976_v26 = vcombine.low %v470_v13, %v474_v15  ;;  %s15631_s15 = scalar_lea.vmem (%p12644_p4), %s15779_s11, %s10811_s26 }
  0x43   : > { %v466_v23 = vld [vmem:[#allocation2 + $0x120] sm:$0xff]  ;;  %v467_v25 = vld [vmem:[#allocation2 + $0x128] sm:$0xff]  ;;  %v9978_v27 = vcombine.low %v471_v16, %v475_v17 }
  0x44   : > { %v9969_v28 = vcombine.high %v462_v22, %v466_v23  ;;  %v9971_v29 = vcombine.high %v463_v24, %v467_v25  ;;  %v454_v30 = vld [vmem:[#allocation2 + $0xc0] sm:$0xff]  ;;  %v455_v32 = vld [vmem:[#allocation2 + $0xc8] sm:$0xff]  ;;  %v9968_v34 = vcombine.low %v462_v22, %v466_v23  ;;  %v9970_v35 = vcombine.low %v463_v24, %v467_v25 }
  0x45   : > { %1201 = vmatpush1.bf16.msra.mxu0 %v9984_v18  ;;  %1242 = vmatpush1.bf16.msra.mxu1 %v9986_v19  ;;  %v458_v31 = vld [vmem:[#allocation2 + $0xe0] sm:$0xff]  ;;  %v459_v33 = vld [vmem:[#allocation2 + $0xe8] sm:$0xff] }
  0x46   : > { %1202 = vmatprep.subr.bf16.mxu0 %v9977_v20  ;;  %1243 = vmatprep.subr.bf16.mxu1 %v9979_v21  ;;  %v9961_v36 = vcombine.high %v454_v30, %v458_v31  ;;  %v9963_v37 = vcombine.high %v455_v32, %v459_v33  ;;  %v446_v38 = vld [vmem:[#allocation2 + $0x80] sm:$0xff]  ;;  %v447_v40 = vld [vmem:[#allocation2 + $0x88] sm:$0xff]  ;;  %v9960_v42 = vcombine.low %v454_v30, %v458_v31 }
  0x47   : > { %v450_v39 = vld [vmem:[#allocation2 + $0xa0] sm:$0xff]  ;;  %v451_v41 = vld [vmem:[#allocation2 + $0xa8] sm:$0xff]  ;;  %v9962_v43 = vcombine.low %v455_v32, %v459_v33 }
  0x48   : > { %v9953_v44 = vcombine.high %v446_v38, %v450_v39  ;;  %v9955_v45 = vcombine.high %v447_v40, %v451_v41  ;;  %v438_v46 = vld [vmem:[#allocation2 + $0x40] sm:$0xff]  ;;  %v439_v48 = vld [vmem:[#allocation2 + $0x48] sm:$0xff]  ;;  %v9952_v50 = vcombine.low %v446_v38, %v450_v39  ;;  %v9954_v51 = vcombine.low %v447_v40, %v451_v41 }
  0x49   : > { %1203 = vmatpush1.bf16.msra.mxu0 %v9976_v26  ;;  %1244 = vmatpush1.bf16.msra.mxu1 %v9978_v27  ;;  %v442_v47 = vld [vmem:[#allocation2 + $0x60] sm:$0xff]  ;;  %v443_v49 = vld [vmem:[#allocation2 + $0x68] sm:$0xff] }
  0x4a   : > { %1204 = vmatprep.subr.bf16.mxu0 %v9969_v28  ;;  %1245 = vmatprep.subr.bf16.mxu1 %v9971_v29  ;;  %v9945_v52 = vcombine.high %v438_v46, %v442_v47  ;;  %v427_v53 = vld [vmem:[%s12708_s23 + $0x8] sm:$0xff]  ;;  %v9947_v54 = vcombine.high %v439_v48, %v443_v49  ;;  %v430_v55 = vld [vmem:[#allocation2] sm:$0xff]  ;;  %v9944_v60 = vcombine.low %v438_v46, %v442_v47 }
  0x4b   : > { %v434_v56 = vld [vmem:[#allocation2 + $0x20] sm:$0xff]  ;;  %v12711_v57 = vpack.c.bf16 %v427_v53, %v427_v53  ;;  %v431_v58 = vld [vmem:[#allocation2 + $0x8] sm:$0xff]  ;;  %v9946_v61 = vcombine.low %v439_v48, %v443_v49 }
  0x4c   : > { %v435_v59 = vld [vmem:[#allocation2 + $0x28] sm:$0xff]  ;;  %v9937_v62 = vcombine.high %v430_v55, %v434_v56  ;;  %v550_v0 = vld [vmem:[#allocation2 + $0x3c0] sm:$0xff]  ;;  %v9936_v4 = vcombine.low %v430_v55, %v434_v56 }
  0x4d   : > { %1205 = vmatpush1.bf16.msra.mxu0 %v9968_v34  ;;  %1246 = vmatpush1.bf16.msra.mxu1 %v9970_v35  ;;  %v9939_v63 = vcombine.high %v431_v58, %v435_v59  ;;  %v554_v1 = vld [vmem:[#allocation2 + $0x3e0] sm:$0xff]  ;;  %v551_v2 = vld [vmem:[#allocation2 + $0x3c8] sm:$0xff]  ;;  %v9938_v5 = vcombine.low %v431_v58, %v435_v59 }
  0x4e   : > { %1206 = vmatprep.subr.bf16.mxu0 %v9961_v36  ;;  %1247 = vmatprep.subr.bf16.mxu1 %v9963_v37  ;;  %v555_v3 = vld [vmem:[#allocation2 + $0x3e8] sm:$0xff]  ;;  %v10057_v6 = vcombine.high %v550_v0, %v554_v1  ;;  %v542_v8 = vld [vmem:[#allocation2 + $0x380] sm:$0xff]  ;;  %v10056_v12 = vcombine.low %v550_v0, %v554_v1 }
  0x4f   : > { %1230 = vmatprep.mubr.bf16.mxu0 %v12711_v57  ;;  %1271 = vmatprep.mubr.bf16.mxu1 %v12711_v57  ;;  %v10059_v7 = vcombine.high %v551_v2, %v555_v3  ;;  %v546_v9 = vld [vmem:[#allocation2 + $0x3a0] sm:$0xff]  ;;  %v543_v10 = vld [vmem:[#allocation2 + $0x388] sm:$0xff]  ;;  %v10058_v13 = vcombine.low %v551_v2, %v555_v3  ;;  %v489_v2 = vld [vmem:[#allocation2 + $0x1d8] sm:$0xff] }
  0x50   : > { %v547_v11 = vld [vmem:[#allocation2 + $0x3a8] sm:$0xff]  ;;  %v10049_v14 = vcombine.high %v542_v8, %v546_v9  ;;  %v534_v16 = vld [vmem:[#allocation2 + $0x340] sm:$0xff]  ;;  %v10048_v20 = vcombine.low %v542_v8, %v546_v9  ;;  %v493_v3 = vld [vmem:[#allocation2 + $0x1f8] sm:$0xff] }
  0x51   : > { %1207 = vmatpush1.bf16.msra.mxu0 %v9960_v42  ;;  %1248 = vmatpush1.bf16.msra.mxu1 %v9962_v43  ;;  %v10051_v15 = vcombine.high %v543_v10, %v547_v11  ;;  %v538_v17 = vld [vmem:[#allocation2 + $0x360] sm:$0xff]  ;;  %v535_v18 = vld [vmem:[#allocation2 + $0x348] sm:$0xff]  ;;  %v10050_v21 = vcombine.low %v543_v10, %v547_v11  ;;  %v484_v8 = vld [vmem:[#allocation2 + $0x1b0] sm:$0xff] }
  0x52   : > { %1208 = vmatprep.subr.bf16.mxu0 %v9953_v44  ;;  %1249 = vmatprep.subr.bf16.mxu1 %v9955_v45  ;;  %v539_v19 = vld [vmem:[#allocation2 + $0x368] sm:$0xff]  ;;  %v10041_v22 = vcombine.high %v534_v16, %v538_v17  ;;  %v526_v24 = vld [vmem:[#allocation2 + $0x300] sm:$0xff]  ;;  %v10040_v28 = vcombine.low %v534_v16, %v538_v17  ;;  %v481_v11 = vld [vmem:[#allocation2 + $0x198] sm:$0xff] }
  0x53   : > { %v10043_v23 = vcombine.high %v535_v18, %v539_v19  ;;  %v530_v25 = vld [vmem:[#allocation2 + $0x320] sm:$0xff]  ;;  %v527_v26 = vld [vmem:[#allocation2 + $0x308] sm:$0xff]  ;;  %v10042_v29 = vcombine.low %v535_v18, %v539_v19  ;;  %v472_v16 = vld [vmem:[#allocation2 + $0x150] sm:$0xff]  ;;  %v9998_v18 = vcombine.low %v489_v2, %v493_v3 }
  0x54   : > { %v531_v27 = vld [vmem:[#allocation2 + $0x328] sm:$0xff]  ;;  %v10033_v30 = vcombine.high %v526_v24, %v530_v25  ;;  %v518_v32 = vld [vmem:[#allocation2 + $0x2c0] sm:$0xff]  ;;  %v10032_v36 = vcombine.low %v526_v24, %v530_v25  ;;  %v476_v17 = vld [vmem:[#allocation2 + $0x170] sm:$0xff] }
  0x55   : > { %1209 = vmatpush1.bf16.msra.mxu0 %v9952_v50  ;;  %1250 = vmatpush1.bf16.msra.mxu1 %v9954_v51  ;;  %v10035_v31 = vcombine.high %v527_v26, %v531_v27  ;;  %v522_v33 = vld [vmem:[#allocation2 + $0x2e0] sm:$0xff]  ;;  %v519_v34 = vld [vmem:[#allocation2 + $0x2c8] sm:$0xff]  ;;  %v10034_v39 = vcombine.low %v527_v26, %v531_v27  ;;  %v464_v24 = vld [vmem:[#allocation2 + $0x110] sm:$0xff]  ;;  %v9981_v27 = vcombine.high %v472_v16, %v476_v17 }
  0x56   : > { %1210 = vmatprep.subr.bf16.mxu0 %v9945_v52  ;;  %1251 = vmatprep.subr.bf16.mxu1 %v9947_v54  ;;  %v523_v35 = vld [vmem:[#allocation2 + $0x2e8] sm:$0xff]  ;;  %v510_v37 = vld [vmem:[#allocation2 + $0x280] sm:$0xff]  ;;  %v10025_v40 = vcombine.high %v518_v32, %v522_v33  ;;  %v10024_v44 = vcombine.low %v518_v32, %v522_v33  ;;  %v468_v25 = vld [vmem:[#allocation2 + $0x130] sm:$0xff] }
  0x57   : > { %v514_v38 = vld [vmem:[#allocation2 + $0x2a0] sm:$0xff]  ;;  %v511_v41 = vld [vmem:[#allocation2 + $0x288] sm:$0xff]  ;;  %v10027_v43 = vcombine.high %v519_v34, %v523_v35  ;;  %v10026_v47 = vcombine.low %v519_v34, %v523_v35  ;;  %v456_v32 = vld [vmem:[#allocation2 + $0xd0] sm:$0xff]  ;;  %v9973_v35 = vcombine.high %v464_v24, %v468_v25 }
  0x58   : > { %v515_v42 = vld [vmem:[#allocation2 + $0x2a8] sm:$0xff]  ;;  %v502_v45 = vld [vmem:[#allocation2 + $0x240] sm:$0xff]  ;;  %v10017_v48 = vcombine.high %v510_v37, %v514_v38  ;;  %v10016_v52 = vcombine.low %v510_v37, %v514_v38  ;;  %v460_v33 = vld [vmem:[#allocation2 + $0xf0] sm:$0xff] }
  0x59   : > { %1211 = vmatpush1.bf16.msra.mxu0 %v9944_v60  ;;  %1252 = vmatpush1.bf16.msra.mxu1 %v9946_v61  ;;  %v506_v46 = vld [vmem:[#allocation2 + $0x260] sm:$0xff]  ;;  %v503_v49 = vld [vmem:[#allocation2 + $0x248] sm:$0xff]  ;;  %v10019_v51 = vcombine.high %v511_v41, %v515_v42  ;;  %v10018_v55 = vcombine.low %v511_v41, %v515_v42  ;;  %v461_v37 = vld [vmem:[#allocation2 + $0xf8] sm:$0xff] }
  0x5a   : > { %1212 = vmatprep.subr.bf16.mxu0 %v9937_v62  ;;  %1253 = vmatprep.subr.bf16.mxu1 %v9939_v63  ;;  %v507_v50 = vld [vmem:[#allocation2 + $0x268] sm:$0xff]  ;;  %v494_v53 = vld [vmem:[#allocation2 + $0x200] sm:$0xff]  ;;  %v10009_v56 = vcombine.high %v502_v45, %v506_v46  ;;  %v10008_v61 = vcombine.low %v502_v45, %v506_v46  ;;  %v488_v62 = vld [vmem:[#allocation2 + $0x1d0] sm:$0xff]  ;;  %v9964_v46 = vcombine.low %v456_v32, %v460_v33 }
  0x5b   : > { %v498_v54 = vld [vmem:[#allocation2 + $0x220] sm:$0xff]  ;;  %v495_v58 = vld [vmem:[#allocation2 + $0x208] sm:$0xff]  ;;  %v10011_v60 = vcombine.high %v503_v49, %v507_v50  ;;  %v492_v63 = vld [vmem:[#allocation2 + $0x1f0] sm:$0xff]  ;;  %v10010_v0 = vcombine.low %v503_v49, %v507_v50 }
  0x5c   : > { %v499_v59 = vld [vmem:[#allocation2 + $0x228] sm:$0xff]  ;;  %v10001_v1 = vcombine.high %v494_v53, %v498_v54  ;;  %v9997_v10 = vcombine.high %v488_v62, %v492_v63  ;;  %v452_v41 = vld [vmem:[#allocation2 + $0xb0] sm:$0xff] }
  0x5d   : > { %1213 = vmatpush1.bf16.msra.mxu0 %v9936_v4  ;;  %1254 = vmatpush1.bf16.msra.mxu1 %v9938_v5  ;;  %v10003_v4 = vcombine.high %v495_v58, %v499_v59  ;;  %v426_v5 = vld [vmem:[%s12708_s23] sm:$0xff]  ;;  %v10002_v9 = vcombine.low %v495_v58, %v499_v59 }
  0x5e   : > { %1214 = vmatprep.subr.bf16.mxu0 %v10057_v6  ;;  %1255 = vmatprep.subr.bf16.mxu1 %v10059_v7  ;;  %v10000_v6 = vcombine.low %v494_v53, %v498_v54  ;;  %v480_v7 = vld [vmem:[#allocation2 + $0x190] sm:$0xff] }
  0x5f   : > { %v9989_v19 = vcombine.high %v480_v7, %v484_v8 }
  0x61   : > { %1215 = vmatpush2.bf16.msra.mxu0 %v10056_v12  ;;  %1256 = vmatpush2.bf16.msra.mxu1 %v10058_v13  ;;  %v485_v12 = vld [vmem:[#allocation2 + $0x1b8] sm:$0xff]  ;;  %v9999_v13 = vcombine.high %v489_v2, %v493_v3 }
  0x62   : > { %1216 = vmatprep.subr.bf16.mxu0 %v10049_v14  ;;  %1257 = vmatprep.subr.bf16.mxu1 %v10051_v15  ;;  %v12716_v14 = vpack.c.bf16 %v426_v5, %v426_v5  ;;  %v9996_v15 = vcombine.low %v488_v62, %v492_v63  ;;  %v9990_v26 = vcombine.low %v481_v11, %v485_v12  ;;  %v557_v5 = vld [vmem:[#allocation2 + $0x3f8] sm:$0xff] }
  0x65   : > { %1217 = vmatpush2.bf16.msra.mxu0 %v10048_v20  ;;  %1258 = vmatpush2.bf16.msra.mxu1 %v10050_v21  ;;  %v473_v20 = vld [vmem:[#allocation2 + $0x158] sm:$0xff] }
  0x66   : > { %1218 = vmatprep.subr.bf16.mxu0 %v10041_v22  ;;  %1259 = vmatprep.subr.bf16.mxu1 %v10043_v23  ;;  %v477_v21 = vld [vmem:[#allocation2 + $0x178] sm:$0xff]  ;;  %v9991_v22 = vcombine.high %v481_v11, %v485_v12  ;;  %v9988_v23 = vcombine.low %v480_v7, %v484_v8  ;;  %v544_v8 = vld [vmem:[#allocation2 + $0x390] sm:$0xff] }
  0x67   : > { %v9982_v34 = vcombine.low %v473_v20, %v477_v21  ;;  %v545_v12 = vld [vmem:[#allocation2 + $0x398] sm:$0xff] }
  0x69   : > { %1219 = vmatpush2.bf16.msra.mxu0 %v10040_v28  ;;  %1260 = vmatpush2.bf16.msra.mxu1 %v10042_v29  ;;  %v465_v28 = vld [vmem:[#allocation2 + $0x118] sm:$0xff] }
  0x6a   : > { %1220 = vmatprep.subr.bf16.mxu0 %v10033_v30  ;;  %1261 = vmatprep.subr.bf16.mxu1 %v10035_v31  ;;  %v469_v29 = vld [vmem:[#allocation2 + $0x138] sm:$0xff]  ;;  %v9983_v30 = vcombine.high %v473_v20, %v477_v21  ;;  %v9980_v31 = vcombine.low %v472_v16, %v476_v17  ;;  %v536_v17 = vld [vmem:[#allocation2 + $0x350] sm:$0xff] }
  0x6b   : > { %v9975_v38 = vcombine.high %v465_v28, %v469_v29  ;;  %v9974_v42 = vcombine.low %v465_v28, %v469_v29  ;;  %v537_v21 = vld [vmem:[#allocation2 + $0x358] sm:$0xff] }
  0x6c   : > { %v529_v29 = vld [vmem:[#allocation2 + $0x318] sm:$0xff] }
  0x6d   : > { %1221 = vmatpush2.bf16.msra.mxu0 %v10032_v36  ;;  %1262 = vmatpush2.bf16.msra.mxu1 %v10034_v39  ;;  %v457_v36 = vld [vmem:[#allocation2 + $0xd8] sm:$0xff]  ;;  %v9972_v39 = vcombine.low %v464_v24, %v468_v25  ;;  %v528_v25 = vld [vmem:[#allocation2 + $0x310] sm:$0xff] }
  0x6e   : > { %1222 = vmatprep.subr.bf16.mxu0 %v10025_v40  ;;  %1263 = vmatprep.subr.bf16.mxu1 %v10027_v43  ;;  %v448_v40 = vld [vmem:[#allocation2 + $0x90] sm:$0xff]  ;;  %v449_v43 = vld [vmem:[#allocation2 + $0x98] sm:$0xff]  ;;  %v9967_v45 = vcombine.high %v457_v36, %v461_v37  ;;  %v9966_v49 = vcombine.low %v457_v36, %v461_v37 }
  0x6f   : > { %v9957_v50 = vcombine.high %v448_v40, %v452_v41  ;;  %v9956_v54 = vcombine.low %v448_v40, %v452_v41  ;;  %v521_v37 = vld [vmem:[#allocation2 + $0x2d8] sm:$0xff]  ;;  %v512_v41 = vld [vmem:[#allocation2 + $0x290] sm:$0xff] }
  0x71   : > { %1223 = vmatpush2.bf16.msra.mxu0 %v10024_v44  ;;  %1264 = vmatpush2.bf16.msra.mxu1 %v10026_v47  ;;  %v453_v44 = vld [vmem:[#allocation2 + $0xb8] sm:$0xff]  ;;  %v440_v47 = vld [vmem:[#allocation2 + $0x50] sm:$0xff] }
  0x72   : > { %1224 = vmatprep.subr.bf16.mxu0 %v10017_v48  ;;  %1265 = vmatprep.subr.bf16.mxu1 %v10019_v51  ;;  %v444_v48 = vld [vmem:[#allocation2 + $0x70] sm:$0xff]  ;;  %v441_v51 = vld [vmem:[#allocation2 + $0x58] sm:$0xff]  ;;  %v9959_v53 = vcombine.high %v449_v43, %v453_v44  ;;  %v9958_v58 = vcombine.low %v449_v43, %v453_v44 }
  0x73   : > { %v9949_v59 = vcombine.high %v440_v47, %v444_v48  ;;  %v9948_v63 = vcombine.low %v440_v47, %v444_v48  ;;  %v513_v44 = vld [vmem:[#allocation2 + $0x298] sm:$0xff]  ;;  %v504_v48 = vld [vmem:[#allocation2 + $0x250] sm:$0xff] }
  0x75   : > { %1225 = vmatpush2.bf16.msra.mxu0 %v10016_v52  ;;  %1266 = vmatpush2.bf16.msra.mxu1 %v10018_v55  ;;  %v445_v52 = vld [vmem:[#allocation2 + $0x78] sm:$0xff]  ;;  %v432_v55 = vld [vmem:[#allocation2 + $0x10] sm:$0xff] }
  0x76   : > { %1226 = vmatprep.subr.bf16.mxu0 %v10009_v56  ;;  %1267 = vmatprep.subr.bf16.mxu1 %v10011_v60  ;;  %v436_v56 = vld [vmem:[#allocation2 + $0x30] sm:$0xff]  ;;  %v433_v60 = vld [vmem:[#allocation2 + $0x18] sm:$0xff]  ;;  %v9951_v62 = vcombine.high %v441_v51, %v445_v52  ;;  %v9950_v2 = vcombine.low %v441_v51, %v445_v52 }
  0x77   : > { %v9941_v3 = vcombine.high %v432_v55, %v436_v56  ;;  %v9940_v7 = vcombine.low %v432_v55, %v436_v56  ;;  %v505_v52 = vld [vmem:[#allocation2 + $0x258] sm:$0xff]  ;;  %v496_v56 = vld [vmem:[#allocation2 + $0x210] sm:$0xff] }
  0x79   : > { %1227 = vmatpush2.bf16.msra.mxu0 %v10008_v61  ;;  %1268 = vmatpush2.bf16.msra.mxu1 %v10010_v0  ;;  %v437_v61 = vld [vmem:[#allocation2 + $0x38] sm:$0xff]  ;;  %v552_v0 = vld [vmem:[#allocation2 + $0x3d0] sm:$0xff] }
  0x7a   : > { %1228 = vmatprep.subr.bf16.mxu0 %v10001_v1  ;;  %1269 = vmatprep.subr.bf16.mxu1 %v10003_v4  ;;  %v556_v1 = vld [vmem:[#allocation2 + $0x3f0] sm:$0xff]  ;;  %v553_v4 = vld [vmem:[#allocation2 + $0x3d8] sm:$0xff] }
  0x7b   : > { %v10061_v11 = vcombine.high %v552_v0, %v556_v1  ;;  %v10060_v16 = vcombine.low %v552_v0, %v556_v1 }
  0x7d   : > { %1229 = vmatpush2.bf16.msra.mxu0 %v10000_v6  ;;  %1270 = vmatpush2.bf16.msra.mxu1 %v10002_v9  ;;  %v9943_v6 = vcombine.high %v433_v60, %v437_v61  ;;  %v548_v9 = vld [vmem:[#allocation2 + $0x3b0] sm:$0xff] }
  0x7e   : > { %1280 = vmatprep.subr.bf16.mxu0 %v9997_v10  ;;  %1321 = vmatprep.subr.bf16.mxu1 %v9999_v13  ;;  %v9942_v10 = vcombine.low %v433_v60, %v437_v61  ;;  %v549_v13 = vld [vmem:[#allocation2 + $0x3b8] sm:$0xff]  ;;  %v10053_v20 = vcombine.high %v544_v8, %v548_v9  ;;  %v10052_v24 = vcombine.low %v544_v8, %v548_v9 }
  0x7f   : > { %v497_v61 = vld [vmem:[#allocation2 + $0x218] sm:$0xff] }
  0x80   : > { %1231 = vmatmul.mubr.bf16.vlgmr.msra.gmra.mxu0 %v12716_v14  ;;  %1272 = vmatmul.mubr.bf16.vlgmr.msra.gmra.mxu1 %v12716_v14 }
  0x81   : > { %1281 = vmatpush1.bf16.msra.mxu0 %v9996_v15  ;;  %1322 = vmatpush1.bf16.msra.mxu1 %v9998_v18  ;;  %v10063_v15 = vcombine.high %v553_v4, %v557_v5  ;;  %v540_v18 = vld [vmem:[#allocation2 + $0x370] sm:$0xff] }
  0x82   : > { %1282 = vmatprep.subr.bf16.mxu0 %v9989_v19  ;;  %1323 = vmatprep.subr.bf16.mxu1 %v9991_v22  ;;  %v10062_v19 = vcombine.low %v553_v4, %v557_v5  ;;  %v541_v22 = vld [vmem:[#allocation2 + $0x378] sm:$0xff]  ;;  %v10045_v28 = vcombine.high %v536_v17, %v540_v18 }
  0x83   : > { %1312 = vmatprep.mubr.bf16.mxu0 %v12711_v57  ;;  %1353 = vmatprep.mubr.bf16.mxu1 %v12711_v57  ;;  %v9965_v57 = vcombine.high %v456_v32, %v460_v33  ;;  %v10044_v32 = vcombine.low %v536_v17, %v540_v18  ;;  %v520_v33 = vld [vmem:[#allocation2 + $0x2d0] sm:$0xff] }
  0x85   : > { %1283 = vmatpush1.bf16.msra.mxu0 %v9988_v23  ;;  %1324 = vmatpush1.bf16.msra.mxu1 %v9990_v26  ;;  %v10055_v23 = vcombine.high %v545_v12, %v549_v13  ;;  %v532_v26 = vld [vmem:[#allocation2 + $0x330] sm:$0xff] }
  0x86   : > { %1284 = vmatprep.subr.bf16.mxu0 %v9981_v27  ;;  %1325 = vmatprep.subr.bf16.mxu1 %v9983_v30  ;;  %v10054_v27 = vcombine.low %v545_v12, %v549_v13  ;;  %v533_v30 = vld [vmem:[#allocation2 + $0x338] sm:$0xff]  ;;  %v10037_v36 = vcombine.high %v528_v25, %v532_v26  ;;  %v10036_v40 = vcombine.low %v528_v25, %v532_v26 }
  0x89   : > { %1285 = vmatpush1.bf16.msra.mxu0 %v9980_v31  ;;  %1326 = vmatpush1.bf16.msra.mxu1 %v9982_v34  ;;  %v10047_v31 = vcombine.high %v537_v21, %v541_v22  ;;  %v524_v34 = vld [vmem:[#allocation2 + $0x2f0] sm:$0xff] }
  0x8a   : > { %1286 = vmatprep.subr.bf16.mxu0 %v9973_v35  ;;  %1327 = vmatprep.subr.bf16.mxu1 %v9975_v38  ;;  %v10046_v35 = vcombine.low %v537_v21, %v541_v22  ;;  %v525_v38 = vld [vmem:[#allocation2 + $0x2f8] sm:$0xff]  ;;  %v10029_v43 = vcombine.high %v520_v33, %v524_v34  ;;  %v10028_v47 = vcombine.low %v520_v33, %v524_v34  ;;  %v1362_v21 = vld [vmem:[%s15770_s2] sm:$0xff] }
  0x8d   : > { %1287 = vmatpush1.bf16.msra.mxu0 %v9972_v39  ;;  %1328 = vmatpush1.bf16.msra.mxu1 %v9974_v42  ;;  %v10039_v39 = vcombine.high %v529_v29, %v533_v30  ;;  %v516_v42 = vld [vmem:[#allocation2 + $0x2b0] sm:$0xff] }
  0x8e   : > { %1288 = vmatprep.subr.bf16.mxu0 %v9965_v57  ;;  %1329 = vmatprep.subr.bf16.mxu1 %v9967_v45  ;;  %v10038_v57 = vcombine.low %v529_v29, %v533_v30  ;;  %v517_v45 = vld [vmem:[#allocation2 + $0x2b8] sm:$0xff]  ;;  %v10021_v51 = vcombine.high %v512_v41, %v516_v42  ;;  %v10020_v55 = vcombine.low %v512_v41, %v516_v42 }
  0x91   : > { %1289 = vmatpush1.bf16.msra.mxu0 %v9964_v46  ;;  %1330 = vmatpush1.bf16.msra.mxu1 %v9966_v49  ;;  %v10031_v46 = vcombine.high %v521_v37, %v525_v38  ;;  %v508_v49 = vld [vmem:[#allocation2 + $0x270] sm:$0xff] }
  0x92   : > { %1290 = vmatprep.subr.bf16.mxu0 %v9957_v50  ;;  %1331 = vmatprep.subr.bf16.mxu1 %v9959_v53  ;;  %v10030_v50 = vcombine.low %v521_v37, %v525_v38  ;;  %v509_v53 = vld [vmem:[#allocation2 + $0x278] sm:$0xff]  ;;  %v10013_v60 = vcombine.high %v504_v48, %v508_v49  ;;  %v10012_v0 = vcombine.low %v504_v48, %v508_v49 }
  0x93   : > { %v10014_v1 = vcombine.low %v505_v52, %v509_v53 }
  0x95   : > { %1291 = vmatpush1.bf16.msra.mxu0 %v9956_v54  ;;  %1332 = vmatpush1.bf16.msra.mxu1 %v9958_v58  ;;  %v10023_v54 = vcombine.high %v513_v44, %v517_v45  ;;  %v500_v58 = vld [vmem:[#allocation2 + $0x230] sm:$0xff] }
  0x96   : > { %1292 = vmatprep.subr.bf16.mxu0 %v9949_v59  ;;  %1333 = vmatprep.subr.bf16.mxu1 %v9951_v62  ;;  %v10022_v59 = vcombine.low %v513_v44, %v517_v45  ;;  %v501_v62 = vld [vmem:[#allocation2 + $0x238] sm:$0xff]  ;;  %v10004_v4 = vcombine.low %v496_v56, %v500_v58 }
  0x97   : > { %v10006_v5 = vcombine.low %v497_v61, %v501_v62 }
  0x99   : > { %1293 = vmatpush1.bf16.msra.mxu0 %v9948_v63  ;;  %1334 = vmatpush1.bf16.msra.mxu1 %v9950_v2  ;;  %v10015_v63 = vcombine.high %v505_v52, %v509_v53  ;;  %v10005_v2 = vcombine.high %v496_v56, %v500_v58 }
  0x9a   : > { %1294 = vmatprep.subr.bf16.mxu0 %v9941_v3  ;;  %1335 = vmatprep.subr.bf16.mxu1 %v9943_v6  ;;  %v10007_v3 = vcombine.high %v497_v61, %v501_v62  ;;  %v11285_v6 = vld [vmem:[%s15775_s7] sm:$0xff]  }
  0x9d   : > { %1295 = vmatpush1.bf16.msra.mxu0 %v9940_v7  ;;  %1336 = vmatpush1.bf16.msra.mxu1 %v9942_v10  ;;  %v11286_v7 = vld [vmem:[%s15775_s7 + $0x20] sm:$0xff]  }
  0x9e   : > { %1296 = vmatprep.subr.bf16.mxu0 %v10061_v11  ;;  %1337 = vmatprep.subr.bf16.mxu1 %v10063_v15 }
  0xa1   : > { %1297 = vmatpush2.bf16.msra.mxu0 %v10060_v16  ;;  %1338 = vmatpush2.bf16.msra.mxu1 %v10062_v19  ;;  %v1364_v16 = vlaneseq }
  0xa2   : > { %1298 = vmatprep.subr.bf16.mxu0 %v10053_v20  ;;  %1339 = vmatprep.subr.bf16.mxu1 %v10055_v23 }
  0xa3   : > { %v12740_v17 = vshrl.u32 %v1364_v16, 7 }
  0xa5   : > { %1299 = vmatpush2.bf16.msra.mxu0 %v10052_v24  ;;  %1340 = vmatpush2.bf16.msra.mxu1 %v10054_v27  ;;  %v1382_v18 = vsub.s32 4, %v12740_v17  ;;  %v1390_v19 = vsub.s32 6, %v12740_v17  ;;  %v1386_v20 = vsub.s32 5, %v12740_v17  ;;  %v1394_v22 = vsub.s32 7, %v12740_v17  ;;  %v12752_v24 = vld [vmem:[%s15771_s3] sm:$0xff] }
  0xa6   : > { %1300 = vmatprep.subr.bf16.mxu0 %v10045_v28  ;;  %1341 = vmatprep.subr.bf16.mxu1 %v10047_v31  ;;  %v12762_v61 = vsub.s32 1, %v12740_v17  ;;  %v1374_v62 = vsub.s32 2, %v12740_v17 }
  0xa7   : > { %v1383_v23 = vrot.slane %v1362_v21, %v1382_v18  ;;  %v1391_v25 = vrot.slane %v1362_v21, %v1390_v19  ;;  %v1433_v26 = vrot.slane %v12752_v24, %v1382_v18  ;;  %v1387_v27 = vrot.slane %v1362_v21, %v1386_v20 }
  0xa8   : > { %v1441_v29 = vrot.slane %v12752_v24, %v1390_v19  ;;  %v1395_v30 = vrot.slane %v1362_v21, %v1394_v22  ;;  %v1437_v33 = vrot.slane %v12752_v24, %v1386_v20  ;;  %15822 = vst [vmem:[#allocation11_spill] sm:$0xff] %v12762_v61 }
  0xa9   : > { %1301 = vmatpush2.bf16.msra.mxu0 %v10044_v32  ;;  %1342 = vmatpush2.bf16.msra.mxu1 %v10046_v35 }
  0xaa   : > { %1302 = vmatprep.subr.bf16.mxu0 %v10037_v36  ;;  %1343 = vmatprep.subr.bf16.mxu1 %v10039_v39  ;;  %v1445_v36 = vrot.slane %v12752_v24, %v1394_v22 }
  0xad   : > { %1303 = vmatpush2.bf16.msra.mxu0 %v10036_v40  ;;  %1344 = vmatpush2.bf16.msra.mxu1 %v10038_v57 }
  0xae   : > { %1304 = vmatprep.subr.bf16.mxu0 %v10029_v43  ;;  %1345 = vmatprep.subr.bf16.mxu1 %v10031_v46 }
  0xb1   : > { %1305 = vmatpush2.bf16.msra.mxu0 %v10028_v47  ;;  %1346 = vmatpush2.bf16.msra.mxu1 %v10030_v50 }
  0xb2   : > { %1306 = vmatprep.subr.bf16.mxu0 %v10021_v51  ;;  %1347 = vmatprep.subr.bf16.mxu1 %v10023_v54 }
  0xb5   : > { %1307 = vmatpush2.bf16.msra.mxu0 %v10020_v55  ;;  %1348 = vmatpush2.bf16.msra.mxu1 %v10022_v59 }
  0xb6   : > { %1308 = vmatprep.subr.bf16.mxu0 %v10013_v60  ;;  %1349 = vmatprep.subr.bf16.mxu1 %v10015_v63  ;;  %v12759_v60 = vsub.s32 0, %v12740_v17  ;;  %v1378_v63 = vsub.s32 3, %v12740_v17 }
  0xb8   : > { %15821 = vst [vmem:[#allocation10_spill] sm:$0xff] %v12759_v60 }
  0xb9   : > { %1309 = vmatpush2.bf16.msra.mxu0 %v10012_v0  ;;  %1350 = vmatpush2.bf16.msra.mxu1 %v10014_v1  ;;  %v1367_v0 = vrot.slane %v1362_v21, %v12759_v60  ;;  %v1371_v1 = vrot.slane %v1362_v21, %v12762_v61 }
  0xba   : > { %1310 = vmatprep.subr.bf16.mxu0 %v10005_v2  ;;  %1351 = vmatprep.subr.bf16.mxu1 %v10007_v3  ;;  %v1375_v2 = vrot.slane %v1362_v21, %v1374_v62  ;;  %v1379_v3 = vrot.slane %v1362_v21, %v1378_v63 }
  0xbd   : > { %1311 = vmatpush2.bf16.msra.mxu0 %v10004_v4  ;;  %1352 = vmatpush2.bf16.msra.mxu1 %v10006_v5  ;;  %v1417_v5 = vrot.slane %v12752_v24, %v12759_v60 }
  0xc0   : > { %1313 = vmatmul.mubr.bf16.vlgmr.msra.gmra.mxu0 %v12716_v14  ;;  %1354 = vmatmul.mubr.bf16.vlgmr.msra.gmra.mxu1 %v12716_v14 }
  0xc1   : > { %10945 = vmatprep.mubr.msk.bf16.mxu0 %vm1520_vm0, %v11285_v6  ;;  %10957 = vmatprep.mubr.msk.bf16.mxu1 %vm1520_vm0, %v11286_v7  ;;  %v1421_v7 = vrot.slane %v12752_v24, %v12762_v61 }
 0x140   : > { %v12732_v8 = vpop.f32.mrf.mxu0  ;;  %v12734_v9 = vpop.f32.mrf.mxu1 }
 0x141   : > { %v1404_v4 = vmul.f32 %v1367_v0, %v12732_v8  ;;  %v11332_v0 = vld [vmem:[#allocation4 + $0xc4] ss:$8 sps:$4 sm:$0xff]  }
 0x142   : > { %v12736_v10 = vpop.f32.mrf.mxu0  ;;  %v12738_v14 = vpop.f32.mrf.mxu1 }
 0x143   : > { %v1405_v6 = vmul.f32 %v1371_v1, %v12736_v10  ;;  %v1454_v18 = vadd.f32 %v1417_v5, %v1404_v4  ;;  %v11330_v1 = vld [vmem:[#allocation4 + $0xc0] ss:$8 sps:$4 sm:$0xff]   ;;  %v11344_v4 = vld [vmem:[#allocation4 + $0xa4] ss:$8 sps:$4 sm:$0xff]  }
 0x144   : > { %v1236_v11 = vpop.f32.mrf.mxu0  ;;  %v1277_v12 = vpop.f32.mrf.mxu1  ;;  %v11342_v5 = vld [vmem:[#allocation4 + $0xa0] ss:$8 sps:$4 sm:$0xff]  }
 0x145   : > { %v1406_v11 = vmul.f32 %v1375_v2, %v12734_v9  ;;  %v1425_v12 = vrot.slane %v12752_v24, %v1374_v62  ;;  %v1455_v8 = vadd.f32 %v1421_v7, %v1405_v6  ;;  %v11329_v62 = vld [vmem:[#allocation4 + $0xd4] ss:$8 sps:$4 sm:$0xff]   ;;  %v11345_v7 = vld [vmem:[#allocation4 + $0x150] ss:$8 sps:$4 sm:$0xff]  }
 0x146   : > { %v1237_v13 = vpop.f32.mrf.mxu0  ;;  %v1278_v15 = vpop.f32.mrf.mxu1  ;;  %v11338_v2 = vld [vmem:[#allocation4 + $0xb4] ss:$8 sps:$4 sm:$0xff]  }
 0x147   : > { %v1407_v13 = vmul.f32 %v1379_v3, %v12738_v14  ;;  %v1429_v15 = vrot.slane %v12752_v24, %v1378_v63  ;;  %v1456_v20 = vadd.f32 %v1425_v12, %v1406_v11  ;;  %v11299_v14 = vld [vmem:[#allocation4 + $0x74] ss:$8 sps:$4 sm:$0xff]   ;;  %v11287_v24 = vld [vmem:[%s15775_s7 + $0x8] sm:$0xff]   ;;  %v11327_v63 = vld [vmem:[#allocation4 + $0xd0] ss:$8 sps:$4 sm:$0xff]  }
 0x148   : > { %v11336_v3 = vld [vmem:[#allocation4 + $0xb0] ss:$8 sps:$4 sm:$0xff]   ;;  %v11347_v6 = vld [vmem:[#allocation4 + $0x154] ss:$8 sps:$4 sm:$0xff]  }
 0x149   : > { %v1457_v21 = vadd.f32 %v1429_v15, %v1407_v13  ;;  %v11350_v11 = vld [vmem:[#allocation4 + $0x94] ss:$8 sps:$4 sm:$0xff]   ;;  %v11348_v12 = vld [vmem:[#allocation4 + $0x90] ss:$8 sps:$4 sm:$0xff]   ;;  %v11353_v13 = vld [vmem:[#allocation4 + $0x144] ss:$8 sps:$4 sm:$0xff]  }
 0x14a   : > { %v11351_v15 = vld [vmem:[#allocation4 + $0x140] ss:$8 sps:$4 sm:$0xff]  }
 0x180   : > { %v1314_v28 = vpop.f32.mrf.mxu0  ;;  %v1355_v32 = vpop.f32.mrf.mxu1 }
 0x181   : > { %v1408_v31 = vmul.f32 %v1383_v23, %v1314_v28  ;;  %v1410_v34 = vmul.f32 %v1391_v25, %v1355_v32  ;;  %v11288_v28 = vld [vmem:[%s15775_s7 + $0x28] sm:$0xff]  }
 0x182   : > { %v1316_v35 = vpop.f32.mrf.mxu0  ;;  %v1357_v39 = vpop.f32.mrf.mxu1  ;;  %v11302_v32 = vld [vmem:[#allocation4 + $0x64] ss:$8 sps:$4 sm:$0xff]  }
 0x183   : > { %v1458_v37 = vadd.f32 %v1433_v26, %v1408_v31  ;;  %v1409_v38 = vmul.f32 %v1387_v27, %v1316_v35  ;;  %v1460_v40 = vadd.f32 %v1441_v29, %v1410_v34  ;;  %v1411_v41 = vmul.f32 %v1395_v30, %v1357_v39  ;;  %v11289_v29 = vld [vmem:[%s15775_s7 + $0x10] sm:$0xff]   ;;  %v11300_v34 = vld [vmem:[#allocation4 + $0x60] ss:$8 sps:$4 sm:$0xff]   ;;  %v11290_v35 = vld [vmem:[%s15775_s7 + $0x18] sm:$0xff]  }
 0x184   : > { %v1318_v42 = vpop.f32.mrf.mxu0  ;;  %v1359_v44 = vpop.f32.mrf.mxu1  ;;  %v11291_v30 = vld [vmem:[%s15775_s7 + $0x30] sm:$0xff]  }
 0x185   : > { %v10064_v57 = vmul.f32 -1.442695, %v1458_v37  ;;  %v1459_v43 = vadd.f32 %v1437_v33, %v1409_v38  ;;  %v10066_v45 = vmul.f32 -1.442695, %v1460_v40  ;;  %v1461_v46 = vadd.f32 %v1445_v36, %v1411_v41  ;;  %v11297_v31 = vld [vmem:[#allocation4 + $0x70] ss:$8 sps:$4 sm:$0xff]  }
 0x186   : > { %v1319_v47 = vpop.f32.mrf.mxu0  ;;  %v1360_v49 = vpop.f32.mrf.mxu1  ;;  %v11335_v33 = vld [vmem:[#allocation4 + $0x174] ss:$8 sps:$4 sm:$0xff]   ;;  %v11292_v37 = vld [vmem:[%s15775_s7 + $0x40] sm:$0xff]   ;;  %v11303_v39 = vld [vmem:[#allocation4 + $0x50] ss:$8 sps:$4 sm:$0xff]  }
 0x187   : > { %11945 = vpow2.f32 %v10064_v57  ;;  %v10065_v48 = vmul.f32 -1.442695, %v1459_v43  ;;  %v10067_v50 = vmul.f32 -1.442695, %v1461_v46  ;;  %v11293_v36 = vld [vmem:[%s15775_s7 + $0x38] sm:$0xff]   ;;  %v11294_v42 = vld [vmem:[%s15775_s7 + $0x48] sm:$0xff]  }
 0x188   : > { %11947 = vpow2.f32 %v10066_v45  ;;  %v11305_v38 = vld [vmem:[#allocation4 + $0x54] ss:$8 sps:$4 sm:$0xff]   ;;  %v11308_v40 = vld [vmem:[#allocation4 + $0x44] ss:$8 sps:$4 sm:$0xff]   ;;  %v11306_v41 = vld [vmem:[#allocation4 + $0x40] ss:$8 sps:$4 sm:$0xff]  }
 0x189   : > { %11949 = vpow2.f32 %v10065_v48  ;;  %v11311_v57 = vld [vmem:[#allocation4 + $0x34] ss:$8 sps:$4 sm:$0xff]   ;;  %v11333_v44 = vld [vmem:[#allocation4 + $0x170] ss:$8 sps:$4 sm:$0xff]   ;;  %v11341_v45 = vld [vmem:[#allocation4 + $0x164] ss:$8 sps:$4 sm:$0xff]  }
 0x18a   : > { %11951 = vpow2.f32 %v10067_v50  ;;  %v11295_v43 = vld [vmem:[%s15775_s7 + $0x50] sm:$0xff]   ;;  %v11314_v47 = vld [vmem:[#allocation4 + $0x24] ss:$8 sps:$4 sm:$0xff]   ;;  %v11339_v48 = vld [vmem:[#allocation4 + $0x160] ss:$8 sps:$4 sm:$0xff]  }
 0x18b   : > { %v11309_v46 = vld [vmem:[#allocation4 + $0x30] ss:$8 sps:$4 sm:$0xff]   ;;  %v11312_v49 = vld [vmem:[#allocation4 + $0x20] ss:$8 sps:$4 sm:$0xff]  }
 0x18c   : > { %v11296_v50 = vld [vmem:[%s15775_s7 + $0x58] sm:$0xff]  }
 0x194   : > { %v11946_v51 = vpop.eup %11945 }
 0x195   : > { %v11948_v52 = vpop.eup %11947  ;;  %v1474_v53 = vadd.f32 1.0, %v11946_v51  ;;  %v11317_v51 = vld [vmem:[#allocation4 + $0x14] ss:$8 sps:$4 sm:$0xff]  }
 0x196   : > { %v11950_v54 = vpop.eup %11949  ;;  %v1476_v55 = vadd.f32 1.0, %v11948_v52  ;;  %v11315_v52 = vld [vmem:[#allocation4 + $0x10] ss:$8 sps:$4 sm:$0xff]  }
 0x197   : > { %v11952_v56 = vpop.eup %11951  ;;  %11953 = vrcp.f32 %v1474_v53  ;;  %v1475_v58 = vadd.f32 1.0, %v11950_v54  ;;  %v11320_v53 = vld [vmem:[#allocation4 + $0x4] ss:$8 sps:$4 sm:$0xff]   ;;  %v11318_v54 = vld [vmem:[#allocation4] ss:$8 sps:$4 sm:$0xff]  }
 0x198   : > { %11955 = vrcp.f32 %v1476_v55  ;;  %v1477_v59 = vadd.f32 1.0, %v11952_v56  ;;  %v11323_v55 = vld [vmem:[#allocation4 + $0xf4] ss:$8 sps:$4 sm:$0xff]   ;;  %v11321_v56 = vld [vmem:[#allocation4 + $0xf0] ss:$8 sps:$4 sm:$0xff]  }
 0x199   : > { %11957 = vrcp.f32 %v1475_v58  ;;  %v11326_v58 = vld [vmem:[#allocation4 + $0xe4] ss:$8 sps:$4 sm:$0xff]  }
 0x19a   : > { %11959 = vrcp.f32 %v1477_v59  ;;  %v11324_v59 = vld [vmem:[#allocation4 + $0xe0] ss:$8 sps:$4 sm:$0xff]  }
 0x1a4   : > { %v11954_v16 = vpop.eup %11953 }
 0x1a5   : > { %v11956_v17 = vpop.eup %11955  ;;  %v1486_v10 = vmul.f32 %v11954_v16, %v1454_v18  ;;  %v11356_v16 = vld [vmem:[#allocation4 + $0x84] ss:$8 sps:$4 sm:$0xff]   ;;  %v11359_v18 = vld [vmem:[#allocation4 + $0x134] ss:$8 sps:$4 sm:$0xff]  }
 0x1a6   : > { %v11958_v19 = vpop.eup %11957  ;;  %v1488_v25 = vmul.f32 %v11956_v17, %v1456_v20  ;;  %v11354_v17 = vld [vmem:[#allocation4 + $0x80] ss:$8 sps:$4 sm:$0xff]  }
 0x1a7   : > { %v11960_v22 = vpop.eup %11959  ;;  %v1487_v23 = vmul.f32 %v11958_v19, %v1455_v8  ;;  %v11357_v8 = vld [vmem:[#allocation4 + $0x130] ss:$8 sps:$4 sm:$0xff]   ;;  %v11362_v19 = vld [vmem:[#allocation4 + $0x124] ss:$8 sps:$4 sm:$0xff]   ;;  %v11360_v20 = vld [vmem:[#allocation4 + $0x120] ss:$8 sps:$4 sm:$0xff]  }
 0x1a8   : > { %v1489_v26 = vmul.f32 %v11960_v22, %v1457_v21  ;;  %v11365_v21 = vld [vmem:[#allocation4 + $0x114] ss:$8 sps:$4 sm:$0xff]   ;;  %v11363_v22 = vld [vmem:[#allocation4 + $0x110] ss:$8 sps:$4 sm:$0xff]  }
 0x1a9   : > { %v1490_v27 = vpack.c.bf16 %v1487_v23, %v1486_v10  ;;  %v11368_v10 = vld [vmem:[#allocation4 + $0x104] ss:$8 sps:$4 sm:$0xff]   ;;  %v11366_v23 = vld [vmem:[#allocation4 + $0x100] ss:$8 sps:$4 sm:$0xff]  }
 0x1aa   : > { %v1491_v9 = vpack.c.bf16 %v1489_v26, %v1488_v25  ;;  %v15780_v25 = vmov 0  }
 0x1ac   : > { %10941 = vmatprep.subr.bf16.mxu0 %v1491_v9  ;;  %10953 = vmatprep.subr.bf16.mxu1 %v1491_v9 }
 0x1ad   : > { %10942 = vmatpush3.bf16.msra.mxu0 %v1491_v9  ;;  %10954 = vmatpush3.bf16.msra.mxu1 %v1491_v9 }
 0x1ae   : > { %10943 = vmatprep.subr.bf16.mxu0 %v1490_v27  ;;  %10955 = vmatprep.subr.bf16.mxu1 %v1490_v27 }
 0x1b1   : > { %10944 = vmatpush3.bf16.msra.mxu0 %v1490_v27  ;;  %10956 = vmatpush3.bf16.msra.mxu1 %v1490_v27 }
 0x1b2   : > { %10965 = vmatprep.subr.bf16.mxu0 %v1491_v9  ;;  %2110 = vmatprep.subr.bf16.mxu1 %v11299_v14 }
 0x1b4   : > { %10946 = vmatmul.mubr.msk.bf16.vlgmr.msra.gmra.mxu0 %vm1520_vm0, %v11287_v24  ;;  %10958 = vmatmul.mubr.msk.bf16.vlgmr.msra.gmra.mxu1 %vm1520_vm0, %v11288_v28 }
 0x1b5   : > { %10966 = vmatpush3.bf16.msra.mxu0 %v1491_v9  ;;  %10949 = vmatprep.mubr.msk.bf16.mxu0 %vm1520_vm0, %v11289_v29 }
 0x1b6   : > { %10967 = vmatprep.subr.bf16.mxu0 %v1490_v27  ;;  %10961 = vmatprep.mubr.msk.bf16.mxu1 %vm1520_vm0, %v11291_v30 }
 0x1b7   : > { %2111 = vmatpush1.bf16.msra.mxu1 %v11297_v31 }
 0x1b8   : > { %2112 = vmatprep.subr.bf16.mxu1 %v11302_v32 }
 0x1b9   : > { %10968 = vmatpush3.bf16.msra.mxu0 %v1490_v27 }
 0x1ba   : > { %2183 = vmatprep.subr.bf16.mxu0 %v11335_v33 }
 0x1bb   : > { %2113 = vmatpush1.bf16.msra.mxu1 %v11300_v34 }
 0x1bc   : > { %10950 = vmatmul.mubr.msk.bf16.gmra.mxu0 %vm1520_vm0, %v11290_v35  ;;  %10962 = vmatmul.mubr.msk.bf16.gmra.mxu1 %vm1520_vm0, %v11293_v36 }
 0x1bd   : > { %10969 = vmatprep.mubr.msk.bf16.mxu0 %vm1520_vm0, %v11292_v37  ;;  %2114 = vmatprep.subr.bf16.mxu1 %v11305_v38 }
 0x1bf   : > { %2115 = vmatpush1.bf16.msra.mxu1 %v11303_v39 }
 0x1c0   : > { %2116 = vmatprep.subr.bf16.mxu1 %v11308_v40 }
 0x1c3   : > { %2117 = vmatpush1.bf16.msra.mxu1 %v11306_v41 }
 0x1c4   : > { %10970 = vmatmul.mubr.msk.bf16.vlgmr.msra.gmra.mxu0 %vm1520_vm0, %v11294_v42  ;;  %2118 = vmatprep.subr.bf16.mxu1 %v11311_v57 }
 0x1c5   : > { %10973 = vmatprep.mubr.msk.bf16.mxu0 %vm1520_vm0, %v11295_v43  ;;  %2184 = vmatpush1.bf16.msra.mxu0 %v11333_v44 }
 0x1c6   : > { %2185 = vmatprep.subr.bf16.mxu0 %v11341_v45 }
 0x1c7   : > { %2119 = vmatpush1.bf16.msra.mxu1 %v11309_v46 }
 0x1c8   : > { %2120 = vmatprep.subr.bf16.mxu1 %v11314_v47 }
 0x1c9   : > { %2186 = vmatpush1.bf16.msra.mxu0 %v11339_v48 }
 0x1ca   : > { %2187 = vmatprep.subr.bf16.mxu0 %v11347_v6 }
 0x1cb   : > { %2121 = vmatpush1.bf16.msra.mxu1 %v11312_v49 }
 0x1cc   : > { %10974 = vmatmul.mubr.msk.bf16.gmra.mxu0 %vm1520_vm0, %v11296_v50  ;;  %2122 = vmatprep.subr.bf16.mxu1 %v11317_v51 }
 0x1cd   : > { %2188 = vmatpush1.bf16.msra.mxu0 %v11345_v7  ;;  %2215 = vmatprep.mubr.bf16.mxu0 %v15780_v25 }
 0x1ce   : > { %2189 = vmatprep.subr.bf16.mxu0 %v11353_v13 }
 0x1cf   : > { %2123 = vmatpush1.bf16.msra.mxu1 %v11315_v52 }
 0x1d0   : > { %2124 = vmatprep.subr.bf16.mxu1 %v11320_v53 }
 0x1d1   : > { %2190 = vmatpush1.bf16.msra.mxu0 %v11351_v15  ;;  %v12848_v15 = vld [vmem:[%s15774_s6] sm:$0x3] }
 0x1d2   : > { %2191 = vmatprep.subr.bf16.mxu0 %v11359_v18 }
 0x1d3   : > { %2125 = vmatpush1.bf16.msra.mxu1 %v11318_v54 }
 0x1d4   : > { %2126 = vmatprep.subr.bf16.mxu1 %v11323_v55 }
 0x1d5   : > { %2192 = vmatpush1.bf16.msra.mxu0 %v11357_v8  ;;  %v12854_v8 = vrot.slane %v12848_v15, %v12762_v61 }
 0x1d6   : > { %2193 = vmatprep.subr.bf16.mxu0 %v11362_v19 }
 0x1d7   : > { %2127 = vmatpush2.bf16.msra.mxu1 %v11321_v56 }
 0x1d8   : > { %2128 = vmatprep.subr.bf16.mxu1 %v11326_v58 }
 0x1d9   : > { %2194 = vmatpush1.bf16.msra.mxu0 %v11360_v20 }
 0x1da   : > { %2195 = vmatprep.subr.bf16.mxu0 %v11365_v21 }
 0x1db   : > { %2129 = vmatpush2.bf16.msra.mxu1 %v11324_v59  ;;  %v11369_v59 = vld [vmem:[%s15776_s8] sm:$0xff]  }
 0x1dc   : > { %2130 = vmatprep.subr.bf16.mxu1 %v11329_v62  ;;  %v11370_v62 = vld [vmem:[%s15776_s8 + $0x40] sm:$0xff]  }
 0x1dd   : > { %2196 = vmatpush1.bf16.msra.mxu0 %v11363_v22 }
 0x1de   : > { %2197 = vmatprep.subr.bf16.mxu0 %v11368_v10 }
 0x1df   : > { %2131 = vmatpush2.bf16.msra.mxu1 %v11327_v63 }
 0x1e0   : > { %2132 = vmatprep.subr.bf16.mxu1 %v11332_v0 }
 0x1e1   : > { %2198 = vmatpush1.bf16.msra.mxu0 %v11366_v23 }
 0x1e3   : > { %2133 = vmatpush2.bf16.msra.mxu1 %v11330_v1 }
 0x1e4   : > { %2134 = vmatprep.subr.bf16.mxu1 %v11338_v2 }
 0x1e7   : > { %2135 = vmatpush2.bf16.msra.mxu1 %v11336_v3 }
 0x1e8   : > { %2136 = vmatprep.subr.bf16.mxu1 %v11344_v4 }
 0x1eb   : > { %2137 = vmatpush2.bf16.msra.mxu1 %v11342_v5 }
 0x1ec   : > { %2138 = vmatprep.subr.bf16.mxu1 %v11350_v11  ;;  %v12837_v11 = vld [vmem:[%s15773_s5] sm:$0x3] }
 0x1ed   : > { %v12843_v13 = vrot.slane %v12837_v11, %v12762_v61 }
 0x1ef   : > { %2139 = vmatpush2.bf16.msra.mxu1 %v11348_v12 }
 0x1f0   : > { %2140 = vmatprep.subr.bf16.mxu1 %v11356_v16 }
 0x1f3   : > { %2141 = vmatpush2.bf16.msra.mxu1 %v11354_v17 }
 0x274   : > { %v10947_v26 = vpop.f32.mrf.mxu0  ;;  %v10959_v27 = vpop.f32.mrf.mxu1 }
 0x276   : > { %v1567_v9 = vpop.f32.mrf.mxu0  ;;  %v1673_v14 = vpop.f32.mrf.mxu1 }
 0x278   : > { %v10948_v24 = vpop.f32.mrf.mxu0  ;;  %v10960_v28 = vpop.f32.mrf.mxu1 }
 0x279   : > { %v1814_v31 = vpack.c.bf16 %v10960_v28, %v10959_v27  ;;  %v1813_v57 = vpack.c.bf16 %v10948_v24, %v10947_v26 }
 0x27a   : > { %v1570_v29 = vpop.f32.mrf.mxu0  ;;  %v1676_v30 = vpop.f32.mrf.mxu1 }
 0x27b   : > { %v1810_v32 = vpack.c.bf16 %v1570_v29, %v1567_v9  ;;  %v1811_v33 = vpack.c.bf16 %v1676_v30, %v1673_v14 }
 0x27c   : > { %v10951_v34 = vpop.f32.mrf.mxu0  ;;  %v10963_v35 = vpop.f32.mrf.mxu1 }
 0x27d   : > { %2142 = vmatprep.mubr.bf16.mxu1 %v1811_v33 }
 0x27e   : > { %v1583_v36 = vpop.f32.mrf.mxu0  ;;  %2143 = vmatmul.mubr.bf16.vlgmr.msra.gmra.mxu1 %v1810_v32  ;;  %v1689_v37 = vpop.f32.mrf.mxu1 }
 0x27f   : > { %2152 = vmatprep.mubr.bf16.mxu1 %v1814_v31 }
 0x280   : > { %v10952_v38 = vpop.f32.mrf.mxu0  ;;  %v10964_v39 = vpop.f32.mrf.mxu1 }
 0x281   : > { %v1820_v47 = vpack.c.bf16 %v10964_v39, %v10963_v35  ;;  %v1819_v53 = vpack.c.bf16 %v10952_v38, %v10951_v34 }
 0x282   : > { %v1586_v40 = vpop.f32.mrf.mxu0  ;;  %v1692_v41 = vpop.f32.mrf.mxu1 }
 0x283   : > { %v1817_v42 = vpack.c.bf16 %v1692_v41, %v1689_v37  ;;  %v1816_v49 = vpack.c.bf16 %v1586_v40, %v1583_v36 }
 0x284   : > { %v10971_v43 = vpop.f32.mrf.mxu0 }
 0x286   : > { %v1779_v44 = vpop.f32.mrf.mxu0  ;;  %2153 = vmatmul.mubr.bf16.gmra.mxu1 %v1813_v57 }
 0x287   : > { %2162 = vmatprep.mubr.bf16.mxu1 %v1817_v42 }
 0x288   : > { %v10972_v45 = vpop.f32.mrf.mxu0 }
 0x289   : > { %v1815_v52 = vpack.c.bf16 %v10972_v45, %v10971_v43 }
 0x28a   : > { %v1782_v46 = vpop.f32.mrf.mxu0 }
 0x28b   : > { %v1812_v48 = vpack.c.bf16 %v1782_v46, %v1779_v44 }
 0x28c   : > { %v10975_v50 = vpop.f32.mrf.mxu0 }
 0x28d   : > { %2216 = vmatmul.mubr.bf16.vlgmr.msra.gmra.mxu0 %v1812_v48 }
 0x28e   : > { %2163 = vmatmul.mubr.bf16.gmra.mxu1 %v1816_v49  ;;  %2225 = vmatprep.mubr.bf16.mxu0 %v15780_v25  ;;  %v1795_v51 = vpop.f32.mrf.mxu0 }
 0x28f   : > { %2172 = vmatprep.mubr.bf16.mxu1 %v1820_v47 }
 0x290   : > { %v10976_v54 = vpop.f32.mrf.mxu0 }
 0x291   : > { %v1821_v58 = vpack.c.bf16 %v10976_v54, %v10975_v50 }
 0x292   : > { %v1798_v55 = vpop.f32.mrf.mxu0 }
 0x293   : > { %v1818_v56 = vpack.c.bf16 %v1798_v55, %v1795_v51 }
 0x295   : > { %2226 = vmatmul.mubr.bf16.gmra.mxu0 %v1815_v52 }
 0x296   : > { %2173 = vmatmul.mubr.bf16.gmra.mxu1 %v1819_v53  ;;  %2235 = vmatprep.mubr.bf16.mxu0 %v15780_v25 }
 0x297   : > { %11009 = vmatprep.mubr.msk.bf16.mxu1 %vm2428_vm1, %v11370_v62 }
 0x29d   : > { %2236 = vmatmul.mubr.bf16.gmra.mxu0 %v1818_v56 }
 0x29e   : > { %2245 = vmatprep.mubr.bf16.mxu0 %v15780_v25 }
 0x2a5   : > { %2246 = vmatmul.mubr.bf16.gmra.mxu0 %v1821_v58 }
 0x2a6   : > { %10985 = vmatprep.mubr.msk.bf16.mxu0 %vm2428_vm1, %v11369_v59 }
 0x33e   : > { %v2144_v63 = vpop.f32.mrf.mxu1 }
 0x340   : > { %v2146_v0 = vpop.f32.mrf.mxu1 }
 0x342   : > { %v2148_v1 = vpop.f32.mrf.mxu1 }
 0x344   : > { %v2150_v2 = vpop.f32.mrf.mxu1 }
 0x346   : > { %v12830_v3 = vpop.f32.mrf.mxu1 }
 0x348   : > { %v2156_v4 = vpop.f32.mrf.mxu1 }
 0x34a   : > { %v12832_v5 = vpop.f32.mrf.mxu1 }
 0x34c   : > { %v2160_v6 = vpop.f32.mrf.mxu1 }
 0x34d   : > { %v2217_v7 = vpop.f32.mrf.mxu0 }
 0x34e   : > { %v12839_v12 = vadd.f32 %v2217_v7, %v2144_v63  ;;  %v12850_v16 = vpop.f32.mrf.mxu1 }
 0x34f   : > { %v2219_v17 = vpop.f32.mrf.mxu0 }
 0x350   : > { %v2220_v18 = vadd.f32 %v2219_v17, %v2146_v0  ;;  %v2166_v22 = vpop.f32.mrf.mxu1 }
 0x351   : > { %v2221_v19 = vpop.f32.mrf.mxu0 }
 0x352   : > { %v2269_v20 = vmul.f32 %v12843_v13, %v2220_v18  ;;  %v12857_v21 = vadd.f32 %v2221_v19, %v2148_v1  ;;  %v12863_v24 = vpop.f32.mrf.mxu1 }
 0x353   : > { %v2223_v10 = vpop.f32.mrf.mxu0 }
 0x354   : > { %v2297_v23 = vadd.f32 %v12854_v8, %v2269_v20  ;;  %v2224_v26 = vadd.f32 %v2223_v10, %v2150_v2  ;;  %v2170_v32 = vpop.f32.mrf.mxu1  ;;  %v2261_v20 = vrot.slane %v12837_v11, %v12759_v60 }
 0x355   : > { %v12860_v27 = vpop.f32.mrf.mxu0 }
 0x356   : > { %v10156_v9 = vmul.f32 -1.442695, %v2297_v23  ;;  %v2271_v14 = vmul.f32 %v12843_v13, %v2224_v26  ;;  %v12870_v35 = vpop.f32.mrf.mxu1  ;;  %v2268_v26 = vmul.f32 %v2261_v20, %v12839_v12 }
 0x357   : > { %v2229_v28 = vpop.f32.mrf.mxu0 }
 0x358   : > { %11961 = vpow2.f32 %v10156_v9  ;;  %v2299_v29 = vadd.f32 %v12854_v8, %v2271_v14  ;;  %v2230_v39 = vadd.f32 %v2229_v28, %v2156_v4  ;;  %v2176_v40 = vpop.f32.mrf.mxu1  ;;  %v2289_v9 = vrot.slane %v12848_v15, %v12759_v60 }
 0x359   : > { %v12866_v30 = vpop.f32.mrf.mxu0  ;;  %v2270_v14 = vmul.f32 %v2261_v20, %v12857_v21 }
 0x35a   : > { %v10157_v31 = vmul.f32 -1.442695, %v2299_v29  ;;  %v2273_v48 = vmul.f32 %v12843_v13, %v2230_v39  ;;  %v12879_v49 = vpop.f32.mrf.mxu1  ;;  %v2296_v28 = vadd.f32 %v2289_v9, %v2268_v26  ;;  %v11398_v26 = vld [vmem:[#allocation4 + $0x1e4] ss:$8 sps:$4 sm:$0xff]  }
 0x35b   : > { %v2233_v33 = vpop.f32.mrf.mxu0  ;;  %v2298_v29 = vadd.f32 %v2289_v9, %v2270_v14  ;;  %v11374_v14 = vld [vmem:[%s15776_s8 + $0x18] sm:$0xff]  }
 0x35c   : > { %11963 = vpow2.f32 %v10157_v31  ;;  %v2234_v41 = vadd.f32 %v2233_v33, %v2160_v6  ;;  %v2301_v63 = vadd.f32 %v12854_v8, %v2273_v48  ;;  %v2180_v1 = vpop.f32.mrf.mxu1 }
 0x35d   : > { %v12868_v34 = vpop.f32.mrf.mxu0 }
 0x35e   : > { %v2275_v50 = vmul.f32 %v12843_v13, %v2234_v41  ;;  %v2238_v48 = vadd.f32 %v12868_v34, %v12850_v16 }
 0x35f   : > { %v2239_v36 = vpop.f32.mrf.mxu0 }
 0x360   : > { %v2240_v37 = vadd.f32 %v2239_v36, %v2166_v22  ;;  %v2303_v0 = vadd.f32 %v12854_v8, %v2275_v50  ;;  %v10158_v22 = vmul.f32 -1.442695, %v2301_v63  ;;  %v2232_v50 = vadd.f32 %v12866_v30, %v12832_v5 }
 0x361   : > { %v12872_v38 = vpop.f32.mrf.mxu0 }
 0x362   : > { %v2277_v57 = vmul.f32 %v12843_v13, %v2240_v37  ;;  %v10159_v19 = vmul.f32 -1.442695, %v2303_v0 }
 0x363   : > { %v2243_v42 = vpop.f32.mrf.mxu0 }
 0x364   : > { %v2244_v43 = vadd.f32 %v2243_v42, %v2170_v32  ;;  %v2305_v52 = vadd.f32 %v12854_v8, %v2277_v57 }
 0x365   : > { %v11962_v44 = vpop.eup %11961  ;;  %v12875_v45 = vpop.f32.mrf.mxu0 }
 0x366   : > { %v2336_v46 = vadd.f32 1.0, %v11962_v44  ;;  %v2279_v47 = vmul.f32 %v12843_v13, %v2244_v43  ;;  %v10160_v4 = vmul.f32 -1.442695, %v2305_v52  ;;  %v2242_v44 = vadd.f32 %v12872_v38, %v12863_v24 }
 0x367   : > { %v2249_v51 = vpop.f32.mrf.mxu0 }
 0x368   : > { %v2307_v53 = vadd.f32 %v12854_v8, %v2279_v47  ;;  %v2250_v54 = vadd.f32 %v2249_v51, %v2176_v40  ;;  %11965 = vrcp.f32 %v2336_v46  ;;  %v2248_v46 = vadd.f32 %v12875_v45, %v12870_v35 }
 0x369   : > { %v11964_v55 = vpop.eup %11963  ;;  %v2251_v56 = vpop.f32.mrf.mxu0  ;;  %v2278_v51 = vmul.f32 %v2261_v20, %v2242_v44  ;;  %v11411_v44 = vld [vmem:[#allocation4 + $0x190] ss:$8 sps:$4 sm:$0xff]  }
 0x36a   : > { %v2337_v58 = vadd.f32 1.0, %v11964_v55  ;;  %v10161_v59 = vmul.f32 -1.442695, %v2307_v53  ;;  %v2281_v62 = vmul.f32 %v12843_v13, %v2250_v54  ;;  %v2252_v47 = vadd.f32 %v2251_v56, %v12879_v49 }
 0x36b   : > { %v2253_v2 = vpop.f32.mrf.mxu0  ;;  %v2280_v52 = vmul.f32 %v2261_v20, %v2248_v46  ;;  %v2228_v54 = vadd.f32 %v12860_v27, %v12830_v3  ;;  %v2306_v35 = vadd.f32 %v2289_v9, %v2278_v51  ;;  %v11416_v46 = vld [vmem:[#allocation4 + $0x184] ss:$8 sps:$4 sm:$0xff]   ;;  %v11419_v51 = vld [vmem:[#allocation4 + $0x274] ss:$8 sps:$4 sm:$0xff]  }
 0x36c   : > { %11967 = vrcp.f32 %v2337_v58  ;;  %v2309_v6 = vadd.f32 %v12854_v8, %v2281_v62  ;;  %v2254_v7 = vadd.f32 %v2253_v2, %v2180_v1  ;;  %v2282_v53 = vmul.f32 %v2261_v20, %v2252_v47  ;;  %v11384_v47 = vld [vmem:[%s15776_s8 + $0x88] sm:$0xff]  }
 0x36d   : > { %11969 = vpow2.f32 %v10161_v59  ;;  %v2276_v58 = vmul.f32 %v2261_v20, %v2238_v48  ;;  %v2274_v59 = vmul.f32 %v2261_v20, %v2232_v50  ;;  %v2308_v45 = vadd.f32 %v2289_v9, %v2280_v52  ;;  %v11385_v48 = vld [vmem:[%s15776_s8 + $0x90] sm:$0xff]   ;;  %v11414_v50 = vld [vmem:[#allocation4 + $0x180] ss:$8 sps:$4 sm:$0xff]  }
 0x36e   : > { %v10162_v17 = vmul.f32 -1.442695, %v2309_v6  ;;  %v2283_v18 = vmul.f32 %v12843_v13, %v2254_v7  ;;  %11971 = vpow2.f32 %v10160_v4  ;;  %v2310_v49 = vadd.f32 %v2289_v9, %v2282_v53  ;;  %v11417_v52 = vld [vmem:[#allocation4 + $0x270] ss:$8 sps:$4 sm:$0xff]   ;;  %v11422_v53 = vld [vmem:[#allocation4 + $0x264] ss:$8 sps:$4 sm:$0xff]  }
 0x36f   : > { %v2272_v62 = vmul.f32 %v2261_v20, %v2228_v54  ;;  %v2304_v16 = vadd.f32 %v2289_v9, %v2276_v58  ;;  %v2302_v0 = vadd.f32 %v2289_v9, %v2274_v59  ;;  %v11372_v20 = vld [vmem:[%s15776_s8 + $0x48] sm:$0xff]   ;;  %v11386_v54 = vld [vmem:[%s15776_s8 + $0x98] sm:$0xff]  }
 0x370   : > { %v2311_v10 = vadd.f32 %v12854_v8, %v2283_v18  ;;  %11973 = vpow2.f32 %v10162_v17  ;;  %v11395_v18 = vld [vmem:[#allocation4 + $0x1f4] ss:$8 sps:$4 sm:$0xff]   ;;  %v11420_v58 = vld [vmem:[#allocation4 + $0x260] ss:$8 sps:$4 sm:$0xff]   ;;  %v11428_v59 = vld [vmem:[#allocation4 + $0x244] ss:$8 sps:$4 sm:$0xff]  }
 0x371   : > { %11975 = vpow2.f32 %v10159_v19  ;;  %v2300_v3 = vadd.f32 %v2289_v9, %v2272_v62  ;;  %v11371_v19 = vld [vmem:[%s15776_s8 + $0x8] sm:$0xff]   ;;  %v11429_v62 = vld [vmem:[#allocation4 + $0x230] ss:$8 sps:$4 sm:$0xff]  }
 0x372   : > { %v10163_v23 = vmul.f32 -1.442695, %v2311_v10  ;;  %11977 = vpow2.f32 %v10158_v22  ;;  %v11373_v22 = vld [vmem:[%s15776_s8 + $0x10] sm:$0xff]   ;;  %v11396_v9 = vld [vmem:[#allocation4 + $0x1e0] ss:$8 sps:$4 sm:$0xff]  }
 0x373   : > { %v11376_v10 = vld [vmem:[%s15776_s8 + $0x50] sm:$0xff]  }
 0x374   : > { %11979 = vpow2.f32 %v10163_v23  ;;  %v11393_v23 = vld [vmem:[#allocation4 + $0x1f0] ss:$8 sps:$4 sm:$0xff]  }
 0x375   : > { %v11966_v13 = vpop.eup %11965 }
 0x376   : > { %v2360_v31 = vmul.f32 %v11966_v13, %v2296_v28  ;;  %v11378_v13 = vld [vmem:[%s15776_s8 + $0x58] sm:$0xff]   ;;  %v11375_v28 = vld [vmem:[%s15776_s8 + $0x20] sm:$0xff]  }
 0x379   : > { %v11968_v11 = vpop.eup %11967 }
 0x37a   : > { %v2361_v32 = vmul.f32 %v11968_v11, %v2298_v29  ;;  %v11970_v33 = vpop.eup %11969  ;;  %v11381_v29 = vld [vmem:[%s15776_s8 + $0x60] sm:$0xff]   ;;  %v11401_v11 = vld [vmem:[#allocation4 + $0x1d4] ss:$8 sps:$4 sm:$0xff]  }
 0x37b   : > { %v11972_v36 = vpop.eup %11971  ;;  %v2341_v39 = vadd.f32 1.0, %v11970_v33  ;;  %v11377_v33 = vld [vmem:[%s15776_s8 + $0x28] sm:$0xff]  }
 0x37c   : > { %v12896_v8 = vpack.c.bf16 %v2361_v32, %v2360_v31  ;;  %v2340_v41 = vadd.f32 1.0, %v11972_v36  ;;  %v11399_v31 = vld [vmem:[#allocation4 + $0x1d0] ss:$8 sps:$4 sm:$0xff]   ;;  %v11404_v32 = vld [vmem:[#allocation4 + $0x1c4] ss:$8 sps:$4 sm:$0xff]  }
 0x37d   : > { %v11974_v37 = vpop.eup %11973  ;;  %11981 = vrcp.f32 %v2341_v39  ;;  %v11383_v36 = vld [vmem:[%s15776_s8 + $0x68] sm:$0xff]   ;;  %v11387_v39 = vld [vmem:[%s15776_s8 + $0x70] sm:$0xff]  }
 0x37e   : > { %v2342_v12 = vadd.f32 1.0, %v11974_v37  ;;  %v11976_v40 = vpop.eup %11975  ;;  %v11379_v37 = vld [vmem:[%s15776_s8 + $0x30] sm:$0xff]  }
 0x37f   : > { %v11978_v15 = vpop.eup %11977  ;;  %v2339_v21 = vadd.f32 1.0, %v11976_v40  ;;  %v11407_v40 = vld [vmem:[#allocation4 + $0x1b4] ss:$8 sps:$4 sm:$0xff]  }
 0x380   : > { %11983 = vrcp.f32 %v2342_v12  ;;  %v2338_v43 = vadd.f32 1.0, %v11978_v15  ;;  %v11402_v12 = vld [vmem:[#allocation4 + $0x1c0] ss:$8 sps:$4 sm:$0xff]   ;;  %v11380_v15 = vld [vmem:[%s15776_s8 + $0x38] sm:$0xff]  }
 0x381   : > { %v11980_v42 = vpop.eup %11979  ;;  %11985 = vrcp.f32 %v2340_v41  ;;  %v11410_v41 = vld [vmem:[#allocation4 + $0x1a4] ss:$8 sps:$4 sm:$0xff]  }
 0x382   : > { %v2343_v57 = vadd.f32 1.0, %v11980_v42  ;;  %v11388_v42 = vld [vmem:[%s15776_s8 + $0x78] sm:$0xff]  }
 0x384   : > { %11987 = vrcp.f32 %v2343_v57  ;;  %v11408_v57 = vld [vmem:[#allocation4 + $0x1a0] ss:$8 sps:$4 sm:$0xff]  }
 0x385   : > { %11989 = vrcp.f32 %v2339_v21  ;;  %v11382_v21 = vld [vmem:[%s15776_s8 + $0x80] sm:$0xff]  }
 0x386   : > { %11991 = vrcp.f32 %v2338_v43  ;;  %v11413_v43 = vld [vmem:[#allocation4 + $0x194] ss:$8 sps:$4 sm:$0xff]  }
 0x38a   : > { %v11982_v55 = vpop.eup %11981 }
 0x38b   : > { %v2365_v5 = vmul.f32 %v11982_v55, %v2306_v35  ;;  %v11389_v55 = vld [vmem:[%s15776_s8 + $0xa0] sm:$0xff]   ;;  %v11390_v35 = vld [vmem:[%s15776_s8 + $0xa8] sm:$0xff]  }
 0x38d   : > { %v11984_v24 = vpop.eup %11983 }
 0x38e   : > { %v11986_v38 = vpop.eup %11985  ;;  %v2366_v34 = vmul.f32 %v11984_v24, %v2308_v45  ;;  %v11425_v24 = vld [vmem:[#allocation4 + $0x254] ss:$8 sps:$4 sm:$0xff]  }
 0x38f   : > { %v2364_v2 = vmul.f32 %v11986_v38, %v2304_v16  ;;  %v11423_v38 = vld [vmem:[#allocation4 + $0x250] ss:$8 sps:$4 sm:$0xff]   ;;  %v11434_v16 = vld [vmem:[#allocation4 + $0x224] ss:$8 sps:$4 sm:$0xff]  }
 0x390   : > { %v11391_v45 = vld [vmem:[%s15776_s8 + $0xb0] sm:$0xff]  }
 0x391   : > { %v11988_v56 = vpop.eup %11987  ;;  %v2370_v27 = vpack.c.bf16 %v2365_v5, %v2364_v2  ;;  %v11437_v5 = vld [vmem:[#allocation4 + $0x214] ss:$8 sps:$4 sm:$0xff]  }
 0x392   : > { %v2367_v63 = vmul.f32 %v11988_v56, %v2310_v49  ;;  %v11990_v30 = vpop.eup %11989  ;;  %v11426_v49 = vld [vmem:[#allocation4 + $0x240] ss:$8 sps:$4 sm:$0xff]   ;;  %v11431_v56 = vld [vmem:[#allocation4 + $0x234] ss:$8 sps:$4 sm:$0xff]  }
 0x393   : > { %v11992_v4 = vpop.eup %11991  ;;  %v2363_v6 = vmul.f32 %v11990_v30, %v2302_v0  ;;  %v11435_v30 = vld [vmem:[#allocation4 + $0x210] ss:$8 sps:$4 sm:$0xff]   ;;  %v11440_v0 = vld [vmem:[#allocation4 + $0x204] ss:$8 sps:$4 sm:$0xff]   ;;  %v11443_v2 = vld [vmem:[#allocation4 + $0x2f4] ss:$8 sps:$4 sm:$0xff]  }
 0x394   : > { %v2371_v1 = vpack.c.bf16 %v2367_v63, %v2366_v34  ;;  %v2362_v7 = vmul.f32 %v11992_v4, %v2300_v3  ;;  %v11392_v34 = vld [vmem:[%s15776_s8 + $0xb8] sm:$0xff]   ;;  %v11432_v63 = vld [vmem:[#allocation4 + $0x220] ss:$8 sps:$4 sm:$0xff]   ;;  %v11446_v3 = vld [vmem:[#allocation4 + $0x2e4] ss:$8 sps:$4 sm:$0xff]  }
 0x395   : > { %v11441_v4 = vld [vmem:[#allocation4 + $0x2f0] ss:$8 sps:$4 sm:$0xff]  }
 0x396   : > { %10977 = vmatprep.subr.bf16.mxu0 %v2371_v1  ;;  %11001 = vmatprep.subr.bf16.mxu1 %v2371_v1  ;;  %v2369_v17 = vpack.c.bf16 %v2363_v6, %v2362_v7  ;;  %v11449_v6 = vld [vmem:[#allocation4 + $0x2d4] ss:$8 sps:$4 sm:$0xff]   ;;  %v11447_v7 = vld [vmem:[#allocation4 + $0x2d0] ss:$8 sps:$4 sm:$0xff]  }
 0x397   : > { %10978 = vmatpush3.bf16.msra.mxu0 %v2371_v1  ;;  %11002 = vmatpush3.bf16.msra.mxu1 %v2371_v1 }
 0x398   : > { %10979 = vmatprep.subr.bf16.mxu0 %v2370_v27  ;;  %11003 = vmatprep.subr.bf16.mxu1 %v2370_v27 }
 0x39b   : > { %10980 = vmatpush3.bf16.msra.mxu0 %v2370_v27  ;;  %11004 = vmatpush3.bf16.msra.mxu1 %v2370_v27 }
 0x39c   : > { %10981 = vmatprep.subr.bf16.mxu0 %v2369_v17  ;;  %11005 = vmatprep.subr.bf16.mxu1 %v2369_v17 }
 0x39f   : > { %10982 = vmatpush3.bf16.msra.mxu0 %v2369_v17  ;;  %11006 = vmatpush3.bf16.msra.mxu1 %v2369_v17 }
 0x3a0   : > { %10983 = vmatprep.subr.bf16.mxu0 %v12896_v8  ;;  %11007 = vmatprep.subr.bf16.mxu1 %v12896_v8 }
 0x3a3   : > { %10984 = vmatpush3.bf16.msra.mxu0 %v12896_v8  ;;  %11008 = vmatpush3.bf16.msra.mxu1 %v12896_v8 }
 0x3a4   : > { %11025 = vmatprep.subr.bf16.mxu0 %v2371_v1  ;;  %3219 = vmatprep.subr.bf16.mxu1 %v11395_v18  ;;  %v11450_v18 = vld [vmem:[#allocation4 + $0x2c0] ss:$8 sps:$4 sm:$0xff]  }
 0x3a6   : > { %10986 = vmatmul.mubr.msk.bf16.vlgmr.msra.gmra.mxu0 %vm2428_vm1, %v11371_v19  ;;  %11010 = vmatmul.mubr.msk.bf16.vlgmr.msra.gmra.mxu1 %vm2428_vm1, %v11372_v20  ;;  %v11455_v19 = vld [vmem:[#allocation4 + $0x2b4] ss:$8 sps:$4 sm:$0xff]   ;;  %v11453_v20 = vld [vmem:[#allocation4 + $0x2b0] ss:$8 sps:$4 sm:$0xff]  }
 0x3a7   : > { %11026 = vmatpush3.bf16.msra.mxu0 %v2371_v1  ;;  %10989 = vmatprep.mubr.msk.bf16.mxu0 %vm2428_vm1, %v11373_v22  ;;  %v11438_v1 = vld [vmem:[#allocation4 + $0x200] ss:$8 sps:$4 sm:$0xff]   ;;  %v11458_v22 = vld [vmem:[#allocation4 + $0x2a4] ss:$8 sps:$4 sm:$0xff]  }
 0x3a8   : > { %11027 = vmatprep.subr.bf16.mxu0 %v2370_v27  ;;  %11013 = vmatprep.mubr.msk.bf16.mxu1 %vm2428_vm1, %v11376_v10  ;;  %v11456_v10 = vld [vmem:[#allocation4 + $0x2a0] ss:$8 sps:$4 sm:$0xff]  }
 0x3a9   : > { %3220 = vmatpush1.bf16.msra.mxu1 %v11393_v23  ;;  %v11461_v23 = vld [vmem:[#allocation4 + $0x294] ss:$8 sps:$4 sm:$0xff]  }
 0x3aa   : > { %3221 = vmatprep.subr.bf16.mxu1 %v11398_v26  ;;  %v11459_v26 = vld [vmem:[#allocation4 + $0x290] ss:$8 sps:$4 sm:$0xff]  }
 0x3ab   : > { %11028 = vmatpush3.bf16.msra.mxu0 %v2370_v27  ;;  %v11444_v27 = vld [vmem:[#allocation4 + $0x2e0] ss:$8 sps:$4 sm:$0xff]  }
 0x3ac   : > { %11029 = vmatprep.subr.bf16.mxu0 %v2369_v17 }
 0x3ad   : > { %3222 = vmatpush1.bf16.msra.mxu1 %v11396_v9  ;;  %v11464_v9 = vld [vmem:[#allocation4 + $0x284] ss:$8 sps:$4 sm:$0xff]  }
 0x3ae   : > { %10990 = vmatmul.mubr.msk.bf16.gmra.mxu0 %vm2428_vm1, %v11374_v14  ;;  %11014 = vmatmul.mubr.msk.bf16.gmra.mxu1 %vm2428_vm1, %v11378_v13  ;;  %v11462_v14 = vld [vmem:[#allocation4 + $0x280] ss:$8 sps:$4 sm:$0xff]  }
 0x3af   : > { %11030 = vmatpush3.bf16.msra.mxu0 %v2369_v17  ;;  %10993 = vmatprep.mubr.msk.bf16.mxu0 %vm2428_vm1, %v11375_v28  ;;  %v11452_v17 = vld [vmem:[#allocation4 + $0x2c4] ss:$8 sps:$4 sm:$0xff]  }
 0x3b0   : > { %11031 = vmatprep.subr.bf16.mxu0 %v12896_v8  ;;  %11017 = vmatprep.mubr.msk.bf16.mxu1 %vm2428_vm1, %v11381_v29 }
 0x3b1   : > { %3223 = vmatprep.subr.bf16.mxu1 %v11401_v11 }
 0x3b2   : > { %3224 = vmatpush1.bf16.msra.mxu1 %v11399_v31 }
 0x3b3   : > { %11032 = vmatpush3.bf16.msra.mxu0 %v12896_v8  ;;  %3225 = vmatprep.subr.bf16.mxu1 %v11404_v32  ;;  %v11405_v8 = vld [vmem:[#allocation4 + $0x1b0] ss:$8 sps:$4 sm:$0xff]  }
 0x3b4   : > { %3332 = vmatprep.subr.bf16.mxu0 %v11443_v2 }
 0x3b6   : > { %10994 = vmatmul.mubr.msk.bf16.gmra.mxu0 %vm2428_vm1, %v11377_v33  ;;  %11018 = vmatmul.mubr.msk.bf16.gmra.mxu1 %vm2428_vm1, %v11383_v36 }
 0x3b7   : > { %10997 = vmatprep.mubr.msk.bf16.mxu0 %vm2428_vm1, %v11379_v37  ;;  %11021 = vmatprep.mubr.msk.bf16.mxu1 %vm2428_vm1, %v11387_v39 }
 0x3b8   : > { %3226 = vmatpush1.bf16.msra.mxu1 %v11402_v12 }
 0x3b9   : > { %3227 = vmatprep.subr.bf16.mxu1 %v11407_v40 }
 0x3bc   : > { %3228 = vmatpush1.bf16.msra.mxu1 %v11405_v8 }
 0x3bd   : > { %3229 = vmatprep.subr.bf16.mxu1 %v11410_v41 }
 0x3be   : > { %10998 = vmatmul.mubr.msk.bf16.gmra.mxu0 %vm2428_vm1, %v11380_v15  ;;  %11022 = vmatmul.mubr.msk.bf16.gmra.mxu1 %vm2428_vm1, %v11388_v42 }
 0x3bf   : > { %11033 = vmatprep.mubr.msk.bf16.mxu0 %vm2428_vm1, %v11382_v21 }
 0x3c0   : > { %3230 = vmatpush1.bf16.msra.mxu1 %v11408_v57 }
 0x3c1   : > { %3231 = vmatprep.subr.bf16.mxu1 %v11413_v43 }
 0x3c4   : > { %3232 = vmatpush1.bf16.msra.mxu1 %v11411_v44 }
 0x3c5   : > { %3233 = vmatprep.subr.bf16.mxu1 %v11416_v46 }
 0x3c6   : > { %11034 = vmatmul.mubr.msk.bf16.vlgmr.msra.gmra.mxu0 %vm2428_vm1, %v11384_v47 }
 0x3c7   : > { %11037 = vmatprep.mubr.msk.bf16.mxu0 %vm2428_vm1, %v11385_v48  ;;  %3333 = vmatpush1.bf16.msra.mxu0 %v11441_v4 }
 0x3c8   : > { %3234 = vmatpush1.bf16.msra.mxu1 %v11414_v50  ;;  %3334 = vmatprep.subr.bf16.mxu0 %v11446_v3 }
 0x3c9   : > { %3235 = vmatprep.subr.bf16.mxu1 %v11419_v51 }
 0x3cb   : > { %3335 = vmatpush1.bf16.msra.mxu0 %v11444_v27 }
 0x3cc   : > { %3236 = vmatpush2.bf16.msra.mxu1 %v11417_v52  ;;  %3336 = vmatprep.subr.bf16.mxu0 %v11449_v6 }
 0x3cd   : > { %3237 = vmatprep.subr.bf16.mxu1 %v11422_v53 }
 0x3ce   : > { %11038 = vmatmul.mubr.msk.bf16.gmra.mxu0 %vm2428_vm1, %v11386_v54 }
 0x3cf   : > { %11041 = vmatprep.mubr.msk.bf16.mxu0 %vm2428_vm1, %v11389_v55  ;;  %3337 = vmatpush1.bf16.msra.mxu0 %v11447_v7 }
 0x3d0   : > { %3238 = vmatpush2.bf16.msra.mxu1 %v11420_v58  ;;  %3338 = vmatprep.subr.bf16.mxu0 %v11452_v17 }
 0x3d1   : > { %3239 = vmatprep.subr.bf16.mxu1 %v11425_v24 }
 0x3d3   : > { %3339 = vmatpush1.bf16.msra.mxu0 %v11450_v18 }
 0x3d4   : > { %3240 = vmatpush2.bf16.msra.mxu1 %v11423_v38  ;;  %3340 = vmatprep.subr.bf16.mxu0 %v11455_v19 }
 0x3d5   : > { %3241 = vmatprep.subr.bf16.mxu1 %v11428_v59 }
 0x3d6   : > { %11042 = vmatmul.mubr.msk.bf16.gmra.mxu0 %vm2428_vm1, %v11390_v35 }
 0x3d7   : > { %11045 = vmatprep.mubr.msk.bf16.mxu0 %vm2428_vm1, %v11391_v45  ;;  %3341 = vmatpush1.bf16.msra.mxu0 %v11453_v20 }
 0x3d8   : > { %3242 = vmatpush2.bf16.msra.mxu1 %v11426_v49  ;;  %3342 = vmatprep.subr.bf16.mxu0 %v11458_v22 }
 0x3d9   : > { %3243 = vmatprep.subr.bf16.mxu1 %v11431_v56 }
 0x3db   : > { %3343 = vmatpush1.bf16.msra.mxu0 %v11456_v10 }
 0x3dc   : > { %3244 = vmatpush2.bf16.msra.mxu1 %v11429_v62  ;;  %3344 = vmatprep.subr.bf16.mxu0 %v11461_v23 }
 0x3dd   : > { %3245 = vmatprep.subr.bf16.mxu1 %v11434_v16 }
 0x3de   : > { %11046 = vmatmul.mubr.msk.bf16.gmra.mxu0 %vm2428_vm1, %v11392_v34 }
 0x3df   : > { %3364 = vmatprep.mubr.bf16.mxu0 %v15780_v25  ;;  %3345 = vmatpush1.bf16.msra.mxu0 %v11459_v26 }
 0x3e0   : > { %3246 = vmatpush2.bf16.msra.mxu1 %v11432_v63  ;;  %3346 = vmatprep.subr.bf16.mxu0 %v11464_v9 }
 0x3e1   : > { %3247 = vmatprep.subr.bf16.mxu1 %v11437_v5 }
 0x3e3   : > { %3347 = vmatpush1.bf16.msra.mxu0 %v11462_v14 }
 0x3e4   : > { %3248 = vmatpush2.bf16.msra.mxu1 %v11435_v30 }
 0x3e5   : > { %3249 = vmatprep.subr.bf16.mxu1 %v11440_v0 }
 0x3e8   : > { %3250 = vmatpush2.bf16.msra.mxu1 %v11438_v1 }
 0x466   : > { %v10987_v13 = vpop.f32.mrf.mxu0  ;;  %v11011_v28 = vpop.f32.mrf.mxu1 }
 0x468   : > { %v2487_v29 = vpop.f32.mrf.mxu0  ;;  %v2665_v11 = vpop.f32.mrf.mxu1 }
 0x46a   : > { %v10988_v31 = vpop.f32.mrf.mxu0  ;;  %v11012_v32 = vpop.f32.mrf.mxu1 }
 0x46b   : > { %v2910_v37 = vpack.c.bf16 %v11012_v32, %v11011_v28  ;;  %v2909_v46 = vpack.c.bf16 %v10988_v31, %v10987_v13 }
 0x46c   : > { %v2490_v33 = vpop.f32.mrf.mxu0  ;;  %v2668_v36 = vpop.f32.mrf.mxu1 }
 0x46d   : > { %v2906_v39 = vpack.c.bf16 %v2490_v33, %v2487_v29  ;;  %v2907_v12 = vpack.c.bf16 %v2668_v36, %v2665_v11 }
 0x46e   : > { %v10991_v40 = vpop.f32.mrf.mxu0  ;;  %v11015_v8 = vpop.f32.mrf.mxu1 }
 0x46f   : > { %3251 = vmatprep.mubr.bf16.mxu1 %v2907_v12 }
 0x470   : > { %v2503_v41 = vpop.f32.mrf.mxu0  ;;  %3252 = vmatmul.mubr.bf16.vlgmr.msra.gmra.mxu1 %v2906_v39  ;;  %v2681_v15 = vpop.f32.mrf.mxu1 }
 0x471   : > { %3261 = vmatprep.mubr.bf16.mxu1 %v2910_v37 }
 0x472   : > { %v10992_v42 = vpop.f32.mrf.mxu0  ;;  %v11016_v21 = vpop.f32.mrf.mxu1 }
 0x473   : > { %v2916_v54 = vpack.c.bf16 %v11016_v21, %v11015_v8  ;;  %v2915_v56 = vpack.c.bf16 %v10992_v42, %v10991_v40 }
 0x474   : > { %v2506_v57 = vpop.f32.mrf.mxu0  ;;  %v2684_v43 = vpop.f32.mrf.mxu1 }
 0x475   : > { %v2913_v44 = vpack.c.bf16 %v2684_v43, %v2681_v15  ;;  %v2912_v55 = vpack.c.bf16 %v2506_v57, %v2503_v41 }
 0x476   : > { %v10995_v47 = vpop.f32.mrf.mxu0  ;;  %v11019_v48 = vpop.f32.mrf.mxu1 }
 0x478   : > { %v2519_v50 = vpop.f32.mrf.mxu0  ;;  %3262 = vmatmul.mubr.bf16.gmra.mxu1 %v2909_v46  ;;  %v2697_v52 = vpop.f32.mrf.mxu1 }
 0x479   : > { %3271 = vmatprep.mubr.bf16.mxu1 %v2913_v44 }
 0x47a   : > { %v10996_v51 = vpop.f32.mrf.mxu0  ;;  %v11020_v24 = vpop.f32.mrf.mxu1 }
 0x47b   : > { %v2922_v0 = vpack.c.bf16 %v11020_v24, %v11019_v48  ;;  %v2921_v18 = vpack.c.bf16 %v10996_v51, %v10995_v47 }
 0x47c   : > { %v2522_v53 = vpop.f32.mrf.mxu0  ;;  %v2700_v35 = vpop.f32.mrf.mxu1 }
 0x47d   : > { %v2919_v49 = vpack.c.bf16 %v2700_v35, %v2697_v52  ;;  %v2918_v2 = vpack.c.bf16 %v2522_v53, %v2519_v50 }
 0x47e   : > { %v10999_v58 = vpop.f32.mrf.mxu0  ;;  %v11023_v16 = vpop.f32.mrf.mxu1 }
 0x480   : > { %v2535_v38 = vpop.f32.mrf.mxu0  ;;  %3272 = vmatmul.mubr.bf16.gmra.mxu1 %v2912_v55  ;;  %v2713_v5 = vpop.f32.mrf.mxu1  ;;  %v13022_v55 = vld [vmem:[%s15773_s5 + $0x2] sm:$0x3] }
 0x481   : > { %3281 = vmatprep.mubr.bf16.mxu1 %v2916_v54  ;;  %v13028_v24 = vrot.slane %v13022_v55, %v12762_v61 }
 0x482   : > { %v11000_v59 = vpop.f32.mrf.mxu0  ;;  %v11024_v3 = vpop.f32.mrf.mxu1 }
 0x483   : > { %v2928_v10 = vpack.c.bf16 %v11024_v3, %v11023_v16  ;;  %v2927_v13 = vpack.c.bf16 %v11000_v59, %v10999_v58 }
 0x484   : > { %v2538_v45 = vpop.f32.mrf.mxu0  ;;  %v2716_v6 = vpop.f32.mrf.mxu1 }
 0x485   : > { %v2925_v17 = vpack.c.bf16 %v2716_v6, %v2713_v5  ;;  %v2924_v23 = vpack.c.bf16 %v2538_v45, %v2535_v38  ;;  %v13033_v38 = vld [vmem:[%s15774_s6 + $0x2] sm:$0x3] }
 0x486   : > { %v11035_v62 = vpop.f32.mrf.mxu0 }
 0x488   : > { %v2843_v34 = vpop.f32.mrf.mxu0  ;;  %3282 = vmatmul.mubr.bf16.gmra.mxu1 %v2915_v56 }
 0x489   : > { %3291 = vmatprep.mubr.bf16.mxu1 %v2919_v49  ;;  %v13039_v49 = vrot.slane %v13033_v38, %v12762_v61 }
 0x48a   : > { %v11036_v63 = vpop.f32.mrf.mxu0 }
 0x48b   : > { %v2911_v7 = vpack.c.bf16 %v11036_v63, %v11035_v62 }
 0x48c   : > { %v2846_v30 = vpop.f32.mrf.mxu0 }
 0x48d   : > { %v2908_v1 = vpack.c.bf16 %v2846_v30, %v2843_v34 }
 0x48e   : > { %v11039_v4 = vpop.f32.mrf.mxu0 }
 0x48f   : > { %3365 = vmatmul.mubr.bf16.vlgmr.msra.gmra.mxu0 %v2908_v1  ;;  %v11466_v1 = vld [vmem:[%s15777_s9 + $0x80] sm:$0xff]  }
 0x490   : > { %3292 = vmatmul.mubr.bf16.gmra.mxu1 %v2918_v2  ;;  %3374 = vmatprep.mubr.bf16.mxu0 %v15780_v25  ;;  %v2859_v27 = vpop.f32.mrf.mxu0 }
 0x491   : > { %3301 = vmatprep.mubr.bf16.mxu1 %v2922_v0  ;;  %v11465_v0 = vld [vmem:[%s15777_s9] sm:$0xff]  }
 0x492   : > { %v11040_v19 = vpop.f32.mrf.mxu0 }
 0x493   : > { %v2917_v14 = vpack.c.bf16 %v11040_v19, %v11039_v4 }
 0x494   : > { %v2862_v20 = vpop.f32.mrf.mxu0 }
 0x495   : > { %v2914_v22 = vpack.c.bf16 %v2862_v20, %v2859_v27 }
 0x496   : > { %v11043_v26 = vpop.f32.mrf.mxu0 }
 0x497   : > { %3375 = vmatmul.mubr.bf16.gmra.mxu0 %v2911_v7 }
 0x498   : > { %3302 = vmatmul.mubr.bf16.gmra.mxu1 %v2921_v18  ;;  %3384 = vmatprep.mubr.bf16.mxu0 %v15780_v25  ;;  %v2875_v9 = vpop.f32.mrf.mxu0 }
 0x499   : > { %3311 = vmatprep.mubr.bf16.mxu1 %v2925_v17 }
 0x49a   : > { %v11044_v28 = vpop.f32.mrf.mxu0 }
 0x49b   : > { %v2923_v33 = vpack.c.bf16 %v11044_v28, %v11043_v26 }
 0x49c   : > { %v2878_v29 = vpop.f32.mrf.mxu0 }
 0x49d   : > { %v2920_v11 = vpack.c.bf16 %v2878_v29, %v2875_v9 }
 0x49e   : > { %v11047_v31 = vpop.f32.mrf.mxu0 }
 0x49f   : > { %3385 = vmatmul.mubr.bf16.gmra.mxu0 %v2914_v22 }
 0x4a0   : > { %3312 = vmatmul.mubr.bf16.gmra.mxu1 %v2924_v23  ;;  %3394 = vmatprep.mubr.bf16.mxu0 %v15780_v25  ;;  %v2891_v32 = vpop.f32.mrf.mxu0 }
 0x4a1   : > { %3321 = vmatprep.mubr.bf16.mxu1 %v2928_v10 }
 0x4a2   : > { %v11048_v36 = vpop.f32.mrf.mxu0 }
 0x4a3   : > { %v2929_v12 = vpack.c.bf16 %v11048_v36, %v11047_v31 }
 0x4a4   : > { %v2894_v37 = vpop.f32.mrf.mxu0 }
 0x4a5   : > { %v2926_v39 = vpack.c.bf16 %v2894_v37, %v2891_v32 }
 0x4a7   : > { %3395 = vmatmul.mubr.bf16.gmra.mxu0 %v2917_v14 }
 0x4a8   : > { %3322 = vmatmul.mubr.bf16.gmra.mxu1 %v2927_v13  ;;  %3404 = vmatprep.mubr.bf16.mxu0 %v15780_v25 }
 0x4a9   : > { %11113 = vmatprep.mubr.bf16.mxu1 %v11466_v1 }
 0x4af   : > { %3405 = vmatmul.mubr.bf16.gmra.mxu0 %v2920_v11 }
 0x4b0   : > { %3414 = vmatprep.mubr.bf16.mxu0 %v15780_v25 }
 0x4b7   : > { %3415 = vmatmul.mubr.bf16.gmra.mxu0 %v2923_v33 }
 0x4b8   : > { %3424 = vmatprep.mubr.bf16.mxu0 %v15780_v25 }
 0x4bf   : > { %3425 = vmatmul.mubr.bf16.gmra.mxu0 %v2926_v39 }
 0x4c0   : > { %3434 = vmatprep.mubr.bf16.mxu0 %v15780_v25 }
 0x4c7   : > { %3435 = vmatmul.mubr.bf16.gmra.mxu0 %v2929_v12 }
 0x4c8   : > { %11065 = vmatprep.mubr.bf16.mxu0 %v11465_v0 }
 0x530   : > { %v3253_v40 = vpop.f32.mrf.mxu1 }
 0x532   : > { %v3255_v8 = vpop.f32.mrf.mxu1 }
 0x534   : > { %v3257_v41 = vpop.f32.mrf.mxu1 }
 0x536   : > { %v3259_v15 = vpop.f32.mrf.mxu1 }
 0x538   : > { %v3263_v42 = vpop.f32.mrf.mxu1 }
 0x53a   : > { %v3265_v21 = vpop.f32.mrf.mxu1 }
 0x53c   : > { %v3267_v57 = vpop.f32.mrf.mxu1 }
 0x53e   : > { %v3269_v43 = vpop.f32.mrf.mxu1 }
 0x540   : > { %v3273_v44 = vpop.f32.mrf.mxu1 }
 0x542   : > { %v3275_v46 = vpop.f32.mrf.mxu1 }
 0x544   : > { %v3277_v47 = vpop.f32.mrf.mxu1 }
 0x546   : > { %v3279_v48 = vpop.f32.mrf.mxu1 }
 0x548   : > { %v13011_v50 = vpop.f32.mrf.mxu1 }
 0x54a   : > { %v13013_v51 = vpop.f32.mrf.mxu1 }
 0x54c   : > { %v13015_v52 = vpop.f32.mrf.mxu1 }
 0x54e   : > { %v13017_v53 = vpop.f32.mrf.mxu1 }
 0x54f   : > { %v3366_v54 = vpop.f32.mrf.mxu0 }
 0x550   : > { %v13024_v58 = vadd.f32 %v3366_v54, %v3253_v40  ;;  %v13035_v59 = vpop.f32.mrf.mxu1 }
 0x551   : > { %v3368_v35 = vpop.f32.mrf.mxu0 }
 0x552   : > { %v3369_v45 = vadd.f32 %v3368_v35, %v3255_v8  ;;  %v13044_v34 = vpop.f32.mrf.mxu1 }
 0x553   : > { %v3370_v56 = vpop.f32.mrf.mxu0 }
 0x554   : > { %v3459_v62 = vmul.f32 %v13028_v24, %v3369_v45  ;;  %v13042_v16 = vadd.f32 %v3370_v56, %v3257_v41  ;;  %v13056_v6 = vpop.f32.mrf.mxu1 }
 0x555   : > { %v3372_v63 = vpop.f32.mrf.mxu0 }
 0x556   : > { %v3504_v5 = vadd.f32 %v13039_v49, %v3459_v62  ;;  %v3373_v30 = vadd.f32 %v3372_v63, %v3259_v15  ;;  %v13062_v23 = vpop.f32.mrf.mxu1 }
 0x557   : > { %v3376_v2 = vpop.f32.mrf.mxu0 }
 0x558   : > { %v10294_v4 = vmul.f32 -1.442695, %v3504_v5  ;;  %v3461_v3 = vmul.f32 %v13028_v24, %v3373_v30  ;;  %v13054_v27 = vadd.f32 %v3376_v2, %v3263_v42  ;;  %v13068_v31 = vpop.f32.mrf.mxu1 }
 0x559   : > { %v3378_v7 = vpop.f32.mrf.mxu0 }
 0x55a   : > { %11993 = vpow2.f32 %v10294_v4  ;;  %v3506_v17 = vadd.f32 %v13039_v49, %v3461_v3  ;;  %v3379_v18 = vadd.f32 %v3378_v7, %v3265_v21  ;;  %v13074_v8 = vpop.f32.mrf.mxu1 }
 0x55b   : > { %v3380_v19 = vpop.f32.mrf.mxu0 }
 0x55c   : > { %v10295_v20 = vmul.f32 -1.442695, %v3506_v17  ;;  %v3463_v22 = vmul.f32 %v13028_v24, %v3379_v18  ;;  %v13060_v10 = vadd.f32 %v3380_v19, %v3267_v57 }
 0x55d   : > { %v3382_v26 = vpop.f32.mrf.mxu0 }
 0x55e   : > { %11995 = vpow2.f32 %v10295_v20  ;;  %v3508_v9 = vadd.f32 %v13039_v49, %v3463_v22  ;;  %v3383_v14 = vadd.f32 %v3382_v26, %v3269_v43 }
 0x55f   : > { %v3386_v13 = vpop.f32.mrf.mxu0 }
 0x560   : > { %v10296_v28 = vmul.f32 -1.442695, %v3508_v9  ;;  %v3465_v29 = vmul.f32 %v13028_v24, %v3383_v14  ;;  %v13066_v11 = vadd.f32 %v3386_v13, %v3273_v44  ;;  %v13109_v14 = vrot.slane %v13033_v38, %v12759_v60 }
 0x561   : > { %v3388_v32 = vpop.f32.mrf.mxu0 }
 0x562   : > { %11997 = vpow2.f32 %v10296_v28  ;;  %v3510_v33 = vadd.f32 %v13039_v49, %v3465_v29  ;;  %v3389_v36 = vadd.f32 %v3388_v32, %v3275_v46  ;;  %v13078_v46 = vpop.f32.mrf.mxu1 }
 0x563   : > { %v3390_v37 = vpop.f32.mrf.mxu0 }
 0x564   : > { %v10297_v39 = vmul.f32 -1.442695, %v3510_v33  ;;  %v3467_v12 = vmul.f32 %v13028_v24, %v3389_v36  ;;  %v13072_v40 = vadd.f32 %v3390_v37, %v3277_v47  ;;  %v13089_v1 = vpop.f32.mrf.mxu1 }
 0x565   : > { %v3392_v41 = vpop.f32.mrf.mxu0 }
 0x566   : > { %11999 = vpow2.f32 %v10297_v39  ;;  %v3512_v15 = vadd.f32 %v13039_v49, %v3467_v12  ;;  %v3393_v42 = vadd.f32 %v3392_v41, %v3279_v48  ;;  %v13098_v19 = vpop.f32.mrf.mxu1 }
 0x567   : > { %v11994_v21 = vpop.eup %11993  ;;  %v3396_v57 = vpop.f32.mrf.mxu0 }
 0x568   : > { %v3583_v43 = vadd.f32 1.0, %v11994_v21  ;;  %v10298_v44 = vmul.f32 -1.442695, %v3512_v15  ;;  %v3469_v54 = vmul.f32 %v13028_v24, %v3393_v42  ;;  %v13081_v35 = vadd.f32 %v3396_v57, %v13011_v50  ;;  %v3315_v33 = vpop.f32.mrf.mxu1 }
 0x569   : > { %v3398_v47 = vpop.f32.mrf.mxu0 }
 0x56a   : > { %12001 = vrcp.f32 %v3583_v43  ;;  %v3514_v45 = vadd.f32 %v13039_v49, %v3469_v54  ;;  %v3399_v56 = vadd.f32 %v3398_v47, %v13013_v51  ;;  %v13095_v51 = vrot.slane %v13022_v55, %v12759_v60  ;;  %v13123_v21 = vpop.f32.mrf.mxu1 }
 0x56b   : > { %v11996_v62 = vpop.eup %11995  ;;  %12003 = vpow2.f32 %v10298_v44  ;;  %v3400_v48 = vpop.f32.mrf.mxu0 }
 0x56c   : > { %v3584_v63 = vadd.f32 1.0, %v11996_v62  ;;  %v10299_v5 = vmul.f32 -1.442695, %v3514_v45  ;;  %v3471_v30 = vmul.f32 %v13028_v24, %v3399_v56  ;;  %v13087_v0 = vadd.f32 %v3400_v48, %v13015_v52  ;;  %v3319_v48 = vpop.f32.mrf.mxu1 }
 0x56d   : > { %v3402_v50 = vpop.f32.mrf.mxu0  ;;  %v3458_v55 = vmul.f32 %v13095_v51, %v13024_v58  ;;  %v3460_v39 = vmul.f32 %v13095_v51, %v13042_v16  ;;  %v3462_v16 = vmul.f32 %v13095_v51, %v13054_v27 }
 0x56e   : > { %12005 = vrcp.f32 %v3584_v63  ;;  %v3516_v2 = vadd.f32 %v13039_v49, %v3471_v30  ;;  %v3403_v4 = vadd.f32 %v3402_v50, %v13017_v53 }
 0x56f   : > { %v11998_v3 = vpop.eup %11997  ;;  %12007 = vpow2.f32 %v10299_v5  ;;  %v3406_v7 = vpop.f32.mrf.mxu0  ;;  %v3503_v38 = vadd.f32 %v13109_v14, %v3458_v55  ;;  %v3505_v54 = vadd.f32 %v13109_v14, %v3460_v39  ;;  %v3507_v50 = vadd.f32 %v13109_v14, %v3462_v16 }
 0x570   : > { %v3585_v17 = vadd.f32 1.0, %v11998_v3  ;;  %v10300_v18 = vmul.f32 -1.442695, %v3516_v2  ;;  %v3473_v52 = vmul.f32 %v13028_v24, %v3403_v4  ;;  %v13101_v20 = vadd.f32 %v3406_v7, %v13035_v59  ;;  %v13138_v7 = vpop.f32.mrf.mxu1 }
 0x571   : > { %v3408_v22 = vpop.f32.mrf.mxu0  ;;  %v3464_v2 = vmul.f32 %v13095_v51, %v13060_v10 }
 0x572   : > { %12009 = vrcp.f32 %v3585_v17  ;;  %v3518_v53 = vadd.f32 %v13039_v49, %v3473_v52  ;;  %v3409_v26 = vadd.f32 %v3408_v22, %v13044_v34 }
 0x573   : > { %v12000_v9 = vpop.eup %11999  ;;  %12011 = vpow2.f32 %v10300_v18  ;;  %v3410_v13 = vpop.f32.mrf.mxu0 }
 0x574   : > { %v3586_v28 = vadd.f32 1.0, %v12000_v9  ;;  %v10301_v29 = vmul.f32 -1.442695, %v3518_v53  ;;  %v3475_v59 = vmul.f32 %v13028_v24, %v3409_v26  ;;  %v13113_v32 = vadd.f32 %v3410_v13, %v13056_v6  ;;  %v3325_v13 = vpop.f32.mrf.mxu1 }
 0x575   : > { %v3412_v36 = vpop.f32.mrf.mxu0  ;;  %v3509_v26 = vadd.f32 %v13109_v14, %v3464_v2 }
 0x576   : > { %12013 = vrcp.f32 %v3586_v28  ;;  %v3520_v34 = vadd.f32 %v13039_v49, %v3475_v59  ;;  %v3413_v58 = vadd.f32 %v3412_v36, %v13062_v23 }
 0x577   : > { %v12002_v37 = vpop.eup %12001  ;;  %12015 = vpow2.f32 %v10301_v29  ;;  %v13120_v12 = vpop.f32.mrf.mxu0 }
 0x578   : > { %v12004_v41 = vpop.eup %12003  ;;  %v10302_v15 = vmul.f32 -1.442695, %v3520_v34  ;;  %v3477_v6 = vmul.f32 %v13028_v24, %v3413_v58  ;;  %v3631_v43 = vmul.f32 %v12002_v37, %v3503_v38  ;;  %v3468_v38 = vmul.f32 %v13095_v51, %v13072_v40 }
 0x579   : > { %v3587_v42 = vadd.f32 1.0, %v12004_v41  ;;  %v3418_v57 = vpop.f32.mrf.mxu0 }
 0x57a   : > { %12017 = vpow2.f32 %v10302_v15  ;;  %v3522_v23 = vadd.f32 %v13039_v49, %v3477_v6  ;;  %v3419_v10 = vadd.f32 %v3418_v57, %v13074_v8  ;;  %v13155_v15 = vpop.f32.mrf.mxu1  ;;  %v3513_v16 = vadd.f32 %v13109_v14, %v3468_v38 }
 0x57b   : > { %v12006_v44 = vpop.eup %12005  ;;  %v13129_v47 = vpop.f32.mrf.mxu0  ;;  %12019 = vrcp.f32 %v3587_v42  ;;  %v3474_v38 = vmul.f32 %v13095_v51, %v13101_v20 }
 0x57c   : > { %v12008_v45 = vpop.eup %12007  ;;  %v10303_v56 = vmul.f32 -1.442695, %v3522_v23  ;;  %v3632_v5 = vmul.f32 %v12006_v44, %v3505_v54  ;;  %v3479_v6 = vmul.f32 %v13028_v24, %v3419_v10 }
 0x57d   : > { %v3588_v62 = vadd.f32 1.0, %v12008_v45  ;;  %v3422_v63 = vpop.f32.mrf.mxu0 }
 0x57e   : > { %12021 = vpow2.f32 %v10303_v56  ;;  %v13136_v27 = vpack.c.bf16 %v3632_v5, %v3631_v43  ;;  %v3423_v29 = vadd.f32 %v3422_v63, %v13089_v1  ;;  %v3329_v5 = vpop.f32.mrf.mxu1 }
 0x57f   : > { %v12010_v30 = vpop.eup %12009  ;;  %12023 = vrcp.f32 %v3588_v62  ;;  %v13134_v4 = vpop.f32.mrf.mxu0 }
 0x580   : > { %v12012_v3 = vpop.eup %12011  ;;  %v3633_v52 = vmul.f32 %v12010_v30, %v3507_v50  ;;  %v3481_v42 = vmul.f32 %v13028_v24, %v3423_v29  ;;  %v3524_v30 = vadd.f32 %v13039_v49, %v3479_v6 }
 0x581   : > { %v3589_v17 = vadd.f32 1.0, %v12012_v3  ;;  %v3428_v18 = vpop.f32.mrf.mxu0 }
 0x582   : > { %v3429_v22 = vadd.f32 %v3428_v18, %v3315_v33  ;;  %v3466_v33 = vmul.f32 %v13095_v51, %v13066_v11  ;;  %v3526_v50 = vadd.f32 %v13039_v49, %v3481_v42 }
 0x583   : > { %v12014_v53 = vpop.eup %12013  ;;  %v13141_v9 = vpop.f32.mrf.mxu0  ;;  %12025 = vrcp.f32 %v3589_v17 }
 0x584   : > { %v12016_v55 = vpop.eup %12015  ;;  %v3634_v36 = vmul.f32 %v12014_v53, %v3509_v26  ;;  %v3483_v34 = vmul.f32 %v13028_v24, %v3429_v22  ;;  %v3511_v54 = vadd.f32 %v13109_v14, %v3466_v33  ;;  %v3470_v53 = vmul.f32 %v13095_v51, %v13081_v35 }
 0x585   : > { %v3590_v28 = vadd.f32 1.0, %v12016_v55  ;;  %v3432_v59 = vpop.f32.mrf.mxu0  ;;  %v3472_v26 = vmul.f32 %v13095_v51, %v13087_v0 }
 0x586   : > { %v3433_v58 = vadd.f32 %v3432_v59, %v3319_v48  ;;  %v13152_v8 = vpack.c.bf16 %v3634_v36, %v3633_v52  ;;  %v3528_v11 = vadd.f32 %v13039_v49, %v3483_v34  ;;  %v10304_v59 = vmul.f32 -1.442695, %v3524_v30 }
 0x587   : > { %v12018_v37 = vpop.eup %12017  ;;  %12027 = vrcp.f32 %v3590_v28  ;;  %v13150_v39 = vpop.f32.mrf.mxu0  ;;  %v10305_v28 = vmul.f32 -1.442695, %v3526_v50  ;;  %v3515_v34 = vadd.f32 %v13109_v14, %v3470_v53  ;;  %v3431_v30 = vadd.f32 %v13141_v9, %v13123_v21 }
 0x588   : > { %v3591_v41 = vadd.f32 1.0, %v12018_v37  ;;  %v3485_v1 = vmul.f32 %v13028_v24, %v3433_v58  ;;  %v12020_v43 = vpop.eup %12019  ;;  %v10306_v18 = vmul.f32 -1.442695, %v3528_v11  ;;  %v3517_v58 = vadd.f32 %v13109_v14, %v3472_v26 }
 0x589   : > { %v3438_v57 = vpop.f32.mrf.mxu0  ;;  %v3635_v3 = vmul.f32 %v12020_v43, %v3511_v54  ;;  %v3437_v50 = vadd.f32 %v13150_v39, %v13138_v7  ;;  %v3417_v21 = vadd.f32 %v13120_v12, %v13068_v31 }
 0x58a   : > { %v3530_v40 = vadd.f32 %v13039_v49, %v3485_v1  ;;  %v3439_v23 = vadd.f32 %v3438_v57, %v3325_v13  ;;  %12029 = vrcp.f32 %v3591_v41  ;;  %v3519_v1 = vadd.f32 %v13109_v14, %v3474_v38  ;;  %v11469_v38 = vld [vmem:[%s15777_s9 + $0x10] sm:$0xff]  }
 0x58b   : > { %v12022_v44 = vpop.eup %12021  ;;  %v13163_v45 = vpop.f32.mrf.mxu0  ;;  %v3478_v53 = vmul.f32 %v13095_v51, %v3417_v21  ;;  %v11532_v21 = vld [vmem:[#allocation4 + $0x300] ss:$8 sps:$4 sm:$0xff]  }
 0x58c   : > { %v12024_v56 = vpop.eup %12023  ;;  %v3592_v62 = vadd.f32 1.0, %v12022_v44  ;;  %v10307_v48 = vmul.f32 -1.442695, %v3530_v40  ;;  %v3487_v63 = vmul.f32 %v13028_v24, %v3439_v23 }
 0x58d   : > { %v3442_v2 = vpop.f32.mrf.mxu0  ;;  %v3636_v17 = vmul.f32 %v12024_v56, %v3513_v16 }
 0x58e   : > { %12031 = vrcp.f32 %v3592_v62  ;;  %v3532_v52 = vadd.f32 %v13039_v49, %v3487_v63  ;;  %v3443_v22 = vadd.f32 %v3442_v2, %v3329_v5  ;;  %v3441_v2 = vadd.f32 %v13163_v45, %v13155_v15 }
 0x58f   : > { %v13173_v55 = vpack.c.bf16 %v3636_v17, %v3635_v3  ;;  %12033 = vpow2.f32 %v10307_v48  ;;  %v3427_v3 = vadd.f32 %v13134_v4, %v13098_v19  ;;  %v3421_v17 = vadd.f32 %v13129_v47, %v13078_v46 }
 0x590   : > { %v10308_v10 = vmul.f32 -1.442695, %v3532_v52  ;;  %v3489_v13 = vmul.f32 %v13028_v24, %v3443_v22  ;;  %v12026_v29 = vpop.eup %12025  ;;  %12035 = vpow2.f32 %v10306_v18  ;;  %v3476_v24 = vmul.f32 %v13095_v51, %v13113_v32 }
 0x591   : > { %v3637_v0 = vmul.f32 %v12026_v29, %v3515_v34  ;;  %v3484_v18 = vmul.f32 %v13095_v51, %v3431_v30  ;;  %v3486_v52 = vmul.f32 %v13095_v51, %v3437_v50  ;;  %v3488_v22 = vmul.f32 %v13095_v51, %v3441_v2  ;;  %v11489_v30 = vld [vmem:[%s15777_s9 + $0xc0] sm:$0xff]  }
 0x592   : > { %v3534_v36 = vadd.f32 %v13039_v49, %v3489_v13  ;;  %12037 = vpow2.f32 %v10308_v10  ;;  %v3521_v6 = vadd.f32 %v13109_v14, %v3476_v24  ;;  %v3482_v7 = vmul.f32 %v13095_v51, %v3427_v3  ;;  %v11472_v24 = vld [vmem:[%s15777_s9 + $0x90] sm:$0xff]   ;;  %v11528_v50 = vld [vmem:[#allocation4 + $0x324] ss:$8 sps:$4 sm:$0xff]   ;;  %v11526_v2 = vld [vmem:[#allocation4 + $0x320] ss:$8 sps:$4 sm:$0xff]  }
 0x593   : > { %12039 = vpow2.f32 %v10305_v28  ;;  %v3480_v45 = vmul.f32 %v13095_v51, %v3421_v17  ;;  %v3529_v19 = vadd.f32 %v13109_v14, %v3484_v18  ;;  %v3531_v46 = vadd.f32 %v13109_v14, %v3486_v52  ;;  %v11531_v3 = vld [vmem:[#allocation4 + $0x314] ss:$8 sps:$4 sm:$0xff]   ;;  %v11491_v17 = vld [vmem:[%s15777_s9 + $0xc8] sm:$0xff]   ;;  %v11529_v52 = vld [vmem:[#allocation4 + $0x310] ss:$8 sps:$4 sm:$0xff]  }
 0x594   : > { %v12028_v35 = vpop.eup %12027  ;;  %v10309_v37 = vmul.f32 -1.442695, %v3534_v36  ;;  %12041 = vpow2.f32 %v10304_v59  ;;  %v3533_v47 = vadd.f32 %v13109_v14, %v3488_v22  ;;  %v3527_v26 = vadd.f32 %v13109_v14, %v3482_v7  ;;  %v11495_v18 = vld [vmem:[%s15777_s9 + $0xd0] sm:$0xff]   ;;  %v11534_v22 = vld [vmem:[#allocation4 + $0x304] ss:$8 sps:$4 sm:$0xff]   ;;  %v11496_v7 = vld [vmem:[%s15777_s9 + $0xd8] sm:$0xff]  }
 0x595   : > { %v3638_v33 = vmul.f32 %v12028_v35, %v3517_v58  ;;  %v3525_v28 = vadd.f32 %v13109_v14, %v3480_v45  ;;  %v3523_v34 = vadd.f32 %v13109_v14, %v3478_v53  ;;  %v11511_v14 = vld [vmem:[#allocation4 + $0x374] ss:$8 sps:$4 sm:$0xff]   ;;  %v11537_v45 = vld [vmem:[#allocation4 + $0x3f0] ss:$8 sps:$4 sm:$0xff]   ;;  %v11500_v53 = vld [vmem:[%s15777_s9 + $0xe8] sm:$0xff]  }
 0x596   : > { %12043 = vpow2.f32 %v10309_v37 }
 0x597   : > { %v13183_v41 = vpack.c.bf16 %v3638_v33, %v3637_v0  ;;  %v12030_v49 = vpop.eup %12029  ;;  %v11467_v0 = vld [vmem:[%s15777_s9 + $0x8] sm:$0xff]  }
 0x598   : > { %v3639_v57 = vmul.f32 %v12030_v49, %v3519_v1  ;;  %v11468_v33 = vld [vmem:[%s15777_s9 + $0x88] sm:$0xff]   ;;  %v11509_v49 = vld [vmem:[#allocation4 + $0x370] ss:$8 sps:$4 sm:$0xff]  }
 0x599   : > { %v11514_v1 = vld [vmem:[#allocation4 + $0x364] ss:$8 sps:$4 sm:$0xff]  }
 0x59b   : > { %v12032_v42 = vpop.eup %12031 }
 0x59c   : > { %v3640_v43 = vmul.f32 %v12032_v42, %v3521_v6  ;;  %v12034_v11 = vpop.eup %12033  ;;  %v11512_v6 = vld [vmem:[#allocation4 + $0x360] ss:$8 sps:$4 sm:$0xff]   ;;  %v11470_v42 = vld [vmem:[%s15777_s9 + $0x18] sm:$0xff]  }
 0x59d   : > { %v12036_v23 = vpop.eup %12035  ;;  %v3596_v44 = vadd.f32 1.0, %v12034_v11  ;;  %v11478_v11 = vld [vmem:[%s15777_s9 + $0xa0] sm:$0xff]  }
 0x59e   : > { %v13187_v40 = vpack.c.bf16 %v3640_v43, %v3639_v57  ;;  %v3595_v16 = vadd.f32 1.0, %v12036_v23  ;;  %v11474_v57 = vld [vmem:[%s15777_s9 + $0x98] sm:$0xff]   ;;  %v11471_v43 = vld [vmem:[%s15777_s9 + $0x20] sm:$0xff]  }
 0x59f   : > { %v12038_v20 = vpop.eup %12037  ;;  %12045 = vrcp.f32 %v3596_v44  ;;  %v11517_v23 = vld [vmem:[#allocation4 + $0x354] ss:$8 sps:$4 sm:$0xff]   ;;  %v11520_v44 = vld [vmem:[#allocation4 + $0x344] ss:$8 sps:$4 sm:$0xff]  }
 0x5a0   : > { %v3597_v54 = vadd.f32 1.0, %v12038_v20  ;;  %v12040_v32 = vpop.eup %12039  ;;  %v11515_v20 = vld [vmem:[#allocation4 + $0x350] ss:$8 sps:$4 sm:$0xff]  }
 0x5a1   : > { %v12042_v56 = vpop.eup %12041  ;;  %v3594_v48 = vadd.f32 1.0, %v12040_v32  ;;  %v11480_v32 = vld [vmem:[%s15777_s9 + $0xa8] sm:$0xff]  }
 0x5a2   : > { %12047 = vrcp.f32 %v3597_v54  ;;  %v3593_v5 = vadd.f32 1.0, %v12042_v56  ;;  %v11473_v54 = vld [vmem:[%s15777_s9 + $0x28] sm:$0xff]   ;;  %v11484_v56 = vld [vmem:[%s15777_s9 + $0xb0] sm:$0xff]  }
 0x5a3   : > { %v12044_v62 = vpop.eup %12043  ;;  %12049 = vrcp.f32 %v3595_v16  ;;  %v11475_v16 = vld [vmem:[%s15777_s9 + $0x30] sm:$0xff]  }
 0x5a4   : > { %v3598_v63 = vadd.f32 1.0, %v12044_v62  ;;  %v11518_v62 = vld [vmem:[#allocation4 + $0x340] ss:$8 sps:$4 sm:$0xff]  }
 0x5a6   : > { %12051 = vrcp.f32 %v3598_v63  ;;  %v11476_v63 = vld [vmem:[%s15777_s9 + $0x38] sm:$0xff]  }
 0x5a7   : > { %12053 = vrcp.f32 %v3594_v48  ;;  %v11525_v48 = vld [vmem:[#allocation4 + $0x334] ss:$8 sps:$4 sm:$0xff]  }
 0x5a8   : > { %12055 = vrcp.f32 %v3593_v5  ;;  %v11486_v5 = vld [vmem:[%s15777_s9 + $0xb8] sm:$0xff]  }
 0x5ac   : > { %v12046_v9 = vpop.eup %12045 }
 0x5ad   : > { %v3644_v12 = vmul.f32 %v12046_v9, %v3529_v19  ;;  %v11539_v9 = vld [vmem:[#allocation4 + $0x3f4] ss:$8 sps:$4 sm:$0xff]   ;;  %v11542_v19 = vld [vmem:[#allocation4 + $0x3e4] ss:$8 sps:$4 sm:$0xff]  }
 0x5af   : > { %v12048_v39 = vpop.eup %12047 }
 0x5b0   : > { %v12050_v15 = vpop.eup %12049  ;;  %v3645_v10 = vmul.f32 %v12048_v39, %v3531_v46  ;;  %v11483_v39 = vld [vmem:[%s15777_s9 + $0x60] sm:$0xff]  }
 0x5b1   : > { %v3643_v59 = vmul.f32 %v12050_v15, %v3527_v26  ;;  %v11499_v15 = vld [vmem:[%s15777_s9 + $0xe0] sm:$0xff]   ;;  %v11487_v26 = vld [vmem:[%s15777_s9 + $0x70] sm:$0xff]  }
 0x5b2   : > { %v11540_v46 = vld [vmem:[#allocation4 + $0x3e0] ss:$8 sps:$4 sm:$0xff]  }
 0x5b3   : > { %v12052_v4 = vpop.eup %12051  ;;  %v3653_v58 = vpack.c.bf16 %v3644_v12, %v3643_v59  ;;  %v11548_v12 = vld [vmem:[#allocation4 + $0x3c4] ss:$8 sps:$4 sm:$0xff]   ;;  %v11504_v59 = vld [vmem:[%s15777_s9 + $0xf8] sm:$0xff]  }
 0x5b4   : > { %v3646_v31 = vmul.f32 %v12052_v4, %v3533_v47  ;;  %v12054_v13 = vpop.eup %12053  ;;  %v11545_v47 = vld [vmem:[#allocation4 + $0x3d4] ss:$8 sps:$4 sm:$0xff]   ;;  %v11485_v4 = vld [vmem:[%s15777_s9 + $0x68] sm:$0xff]  }
 0x5b5   : > { %v12056_v36 = vpop.eup %12055  ;;  %v3642_v35 = vmul.f32 %v12054_v13, %v3525_v28  ;;  %v11546_v13 = vld [vmem:[#allocation4 + $0x3c0] ss:$8 sps:$4 sm:$0xff]   ;;  %v11551_v28 = vld [vmem:[#allocation4 + $0x3b4] ss:$8 sps:$4 sm:$0xff]  }
 0x5b6   : > { %v3654_v29 = vpack.c.bf16 %v3646_v31, %v3645_v10  ;;  %v3641_v51 = vmul.f32 %v12056_v36, %v3523_v34  ;;  %v11503_v10 = vld [vmem:[%s15777_s9 + $0xf0] sm:$0xff]   ;;  %v11490_v36 = vld [vmem:[%s15777_s9 + $0x100] sm:$0xff]  }
 0x5b7   : > { %v11543_v31 = vld [vmem:[#allocation4 + $0x3d0] ss:$8 sps:$4 sm:$0xff]  }
 0x5b8   : > { %11049 = vmatprep.subr.bf16.mxu0 %v3654_v29  ;;  %11097 = vmatprep.subr.bf16.mxu1 %v3654_v29  ;;  %v3652_v37 = vpack.c.bf16 %v3642_v35, %v3641_v51  ;;  %v11549_v34 = vld [vmem:[#allocation4 + $0x3b0] ss:$8 sps:$4 sm:$0xff]   ;;  %v11552_v35 = vld [vmem:[#allocation4 + $0x3a0] ss:$8 sps:$4 sm:$0xff]  }
 0x5b9   : > { %11050 = vmatpush3.bf16.msra.mxu0 %v3654_v29  ;;  %11098 = vmatpush3.bf16.msra.mxu1 %v3654_v29  ;;  %v11492_v51 = vld [vmem:[%s15777_s9 + $0x108] sm:$0xff]  }
 0x5ba   : > { %11051 = vmatprep.subr.bf16.mxu0 %v3653_v58  ;;  %11099 = vmatprep.subr.bf16.mxu1 %v3653_v58 }
 0x5bd   : > { %11052 = vmatpush3.bf16.msra.mxu0 %v3653_v58  ;;  %11100 = vmatpush3.bf16.msra.mxu1 %v3653_v58 }
 0x5be   : > { %11053 = vmatprep.subr.bf16.mxu0 %v3652_v37  ;;  %11101 = vmatprep.subr.bf16.mxu1 %v3652_v37 }
 0x5c1   : > { %11054 = vmatpush3.bf16.msra.mxu0 %v3652_v37  ;;  %11102 = vmatpush3.bf16.msra.mxu1 %v3652_v37 }
 0x5c2   : > { %11055 = vmatprep.subr.bf16.mxu0 %v13187_v40  ;;  %11103 = vmatprep.subr.bf16.mxu1 %v13187_v40 }
 0x5c5   : > { %11056 = vmatpush3.bf16.msra.mxu0 %v13187_v40  ;;  %11104 = vmatpush3.bf16.msra.mxu1 %v13187_v40 }
 0x5c6   : > { %11057 = vmatprep.subr.bf16.mxu0 %v13183_v41  ;;  %11105 = vmatprep.subr.bf16.mxu1 %v13183_v41 }
 0x5c9   : > { %11058 = vmatpush3.bf16.msra.mxu0 %v13183_v41  ;;  %11106 = vmatpush3.bf16.msra.mxu1 %v13183_v41 }
 0x5ca   : > { %11059 = vmatprep.subr.bf16.mxu0 %v13173_v55  ;;  %11107 = vmatprep.subr.bf16.mxu1 %v13173_v55 }
 0x5cd   : > { %11060 = vmatpush3.bf16.msra.mxu0 %v13173_v55  ;;  %11108 = vmatpush3.bf16.msra.mxu1 %v13173_v55 }
 0x5ce   : > { %11061 = vmatprep.subr.bf16.mxu0 %v13152_v8  ;;  %11109 = vmatprep.subr.bf16.mxu1 %v13152_v8 }
 0x5d1   : > { %11062 = vmatpush3.bf16.msra.mxu0 %v13152_v8  ;;  %11110 = vmatpush3.bf16.msra.mxu1 %v13152_v8 }
 0x5d2   : > { %11063 = vmatprep.subr.bf16.mxu0 %v13136_v27  ;;  %11111 = vmatprep.subr.bf16.mxu1 %v13136_v27 }
 0x5d5   : > { %11064 = vmatpush3.bf16.msra.mxu0 %v13136_v27  ;;  %11112 = vmatpush3.bf16.msra.mxu1 %v13136_v27 }
 0x5d6   : > { %11145 = vmatprep.subr.bf16.mxu0 %v3654_v29  ;;  %4861 = vmatprep.subr.bf16.mxu1 %v11511_v14  ;;  %v11557_v14 = vld [vmem:[#allocation4 + $0x394] ss:$8 sps:$4 sm:$0xff]  }
 0x5d8   : > { %11066 = vmatmul.mubr.bf16.vlgmr.msra.gmra.mxu0 %v11467_v0  ;;  %11114 = vmatmul.mubr.bf16.vlgmr.msra.gmra.mxu1 %v11468_v33  ;;  %v11555_v0 = vld [vmem:[#allocation4 + $0x390] ss:$8 sps:$4 sm:$0xff]  }
 0x5d9   : > { %11146 = vmatpush3.bf16.msra.mxu0 %v3654_v29  ;;  %11069 = vmatprep.mubr.bf16.mxu0 %v11469_v38  ;;  %v11488_v29 = vld [vmem:[%s15777_s9 + $0x78] sm:$0xff]   ;;  %v11560_v38 = vld [vmem:[#allocation4 + $0x384] ss:$8 sps:$4 sm:$0xff]  }
 0x5da   : > { %11147 = vmatprep.subr.bf16.mxu0 %v3653_v58  ;;  %11117 = vmatprep.mubr.bf16.mxu1 %v11472_v24  ;;  %v11494_v33 = vld [vmem:[%s15777_s9 + $0x118] sm:$0xff]   ;;  %v11497_v24 = vld [vmem:[%s15777_s9 + $0x120] sm:$0xff]  }
 0x5db   : > { %4862 = vmatpush1.bf16.msra.mxu1 %v11509_v49  ;;  %v11558_v49 = vld [vmem:[#allocation4 + $0x380] ss:$8 sps:$4 sm:$0xff]  }
 0x5dc   : > { %4863 = vmatprep.subr.bf16.mxu1 %v11514_v1  ;;  %v11498_v1 = vld [vmem:[%s15777_s9 + $0x128] sm:$0xff]  }
 0x5dd   : > { %11148 = vmatpush3.bf16.msra.mxu0 %v3653_v58  ;;  %v11554_v58 = vld [vmem:[#allocation4 + $0x3a4] ss:$8 sps:$4 sm:$0xff]  }
 0x5de   : > { %11149 = vmatprep.subr.bf16.mxu0 %v3652_v37 }
 0x5df   : > { %4864 = vmatpush1.bf16.msra.mxu1 %v11512_v6  ;;  %v11501_v6 = vld [vmem:[%s15777_s9 + $0x130] sm:$0xff]  }
 0x5e0   : > { %11070 = vmatmul.mubr.bf16.gmra.mxu0 %v11470_v42  ;;  %11118 = vmatmul.mubr.bf16.gmra.mxu1 %v11474_v57  ;;  %v11502_v42 = vld [vmem:[%s15777_s9 + $0x138] sm:$0xff]   ;;  %v11505_v57 = vld [vmem:[%s15777_s9 + $0x140] sm:$0xff]  }
 0x5e1   : > { %11150 = vmatpush3.bf16.msra.mxu0 %v3652_v37  ;;  %11073 = vmatprep.mubr.bf16.mxu0 %v11471_v43  ;;  %v11493_v37 = vld [vmem:[%s15777_s9 + $0x110] sm:$0xff]   ;;  %v11506_v43 = vld [vmem:[%s15777_s9 + $0x148] sm:$0xff]  }
 0x5e2   : > { %11151 = vmatprep.subr.bf16.mxu0 %v13187_v40  ;;  %11121 = vmatprep.mubr.bf16.mxu1 %v11478_v11  ;;  %v11507_v11 = vld [vmem:[%s15777_s9 + $0x150] sm:$0xff]  }
 0x5e3   : > { %4865 = vmatprep.subr.bf16.mxu1 %v11517_v23  ;;  %v11508_v23 = vld [vmem:[%s15777_s9 + $0x158] sm:$0xff]  }
 0x5e4   : > { %4866 = vmatpush1.bf16.msra.mxu1 %v11515_v20  ;;  %v11521_v20 = vld [vmem:[%s15777_s9 + $0x160] sm:$0xff]  }
 0x5e5   : > { %11152 = vmatpush3.bf16.msra.mxu0 %v13187_v40  ;;  %4867 = vmatprep.subr.bf16.mxu1 %v11520_v44  ;;  %v11523_v40 = vld [vmem:[#allocation4 + $0x330] ss:$8 sps:$4 sm:$0xff]   ;;  %v11563_v44 = vld [vmem:[#allocation4 + $0x474] ss:$8 sps:$4 sm:$0xff]  }
 0x5e6   : > { %11153 = vmatprep.subr.bf16.mxu0 %v13183_v41 }
 0x5e8   : > { %11074 = vmatmul.mubr.bf16.gmra.mxu0 %v11473_v54  ;;  %11122 = vmatmul.mubr.bf16.gmra.mxu1 %v11480_v32  ;;  %v11561_v54 = vld [vmem:[#allocation4 + $0x470] ss:$8 sps:$4 sm:$0xff]   ;;  %v11566_v32 = vld [vmem:[#allocation4 + $0x464] ss:$8 sps:$4 sm:$0xff]  }
 0x5e9   : > { %11154 = vmatpush3.bf16.msra.mxu0 %v13183_v41  ;;  %11077 = vmatprep.mubr.bf16.mxu0 %v11475_v16  ;;  %v11477_v41 = vld [vmem:[%s15777_s9 + $0x40] sm:$0xff]   ;;  %v11522_v16 = vld [vmem:[%s15777_s9 + $0x168] sm:$0xff]  }
 0x5ea   : > { %11155 = vmatprep.subr.bf16.mxu0 %v13173_v55  ;;  %11125 = vmatprep.mubr.bf16.mxu1 %v11484_v56  ;;  %v11564_v56 = vld [vmem:[#allocation4 + $0x460] ss:$8 sps:$4 sm:$0xff]  }
 0x5eb   : > { %4868 = vmatpush1.bf16.msra.mxu1 %v11518_v62  ;;  %v11535_v62 = vld [vmem:[%s15777_s9 + $0x170] sm:$0xff]  }
 0x5ec   : > { %4869 = vmatprep.subr.bf16.mxu1 %v11525_v48  ;;  %v11569_v48 = vld [vmem:[#allocation4 + $0x454] ss:$8 sps:$4 sm:$0xff]  }
 0x5ed   : > { %11156 = vmatpush3.bf16.msra.mxu0 %v13173_v55  ;;  %v11479_v55 = vld [vmem:[%s15777_s9 + $0x48] sm:$0xff]  }
 0x5ee   : > { %11157 = vmatprep.subr.bf16.mxu0 %v13152_v8 }
 0x5ef   : > { %4870 = vmatpush1.bf16.msra.mxu1 %v11523_v40  ;;  %v11567_v40 = vld [vmem:[#allocation4 + $0x450] ss:$8 sps:$4 sm:$0xff]  }
 0x5f0   : > { %11078 = vmatmul.mubr.bf16.gmra.mxu0 %v11476_v63  ;;  %11126 = vmatmul.mubr.bf16.gmra.mxu1 %v11486_v5  ;;  %v11572_v63 = vld [vmem:[#allocation4 + $0x444] ss:$8 sps:$4 sm:$0xff]   ;;  %v11536_v5 = vld [vmem:[%s15777_s9 + $0x178] sm:$0xff]  }
 0x5f1   : > { %11158 = vmatpush3.bf16.msra.mxu0 %v13152_v8  ;;  %11081 = vmatprep.mubr.bf16.mxu0 %v11477_v41  ;;  %v11481_v8 = vld [vmem:[%s15777_s9 + $0x50] sm:$0xff]   ;;  %v11570_v41 = vld [vmem:[#allocation4 + $0x440] ss:$8 sps:$4 sm:$0xff]  }
 0x5f2   : > { %11159 = vmatprep.subr.bf16.mxu0 %v13136_v27  ;;  %11129 = vmatprep.mubr.bf16.mxu1 %v11489_v30  ;;  %v11575_v30 = vld [vmem:[#allocation4 + $0x434] ss:$8 sps:$4 sm:$0xff]  }
 0x5f3   : > { %4871 = vmatprep.subr.bf16.mxu1 %v11528_v50  ;;  %v11573_v50 = vld [vmem:[#allocation4 + $0x430] ss:$8 sps:$4 sm:$0xff]  }
 0x5f4   : > { %4872 = vmatpush1.bf16.msra.mxu1 %v11526_v2  ;;  %v11578_v2 = vld [vmem:[#allocation4 + $0x424] ss:$8 sps:$4 sm:$0xff]  }
 0x5f5   : > { %11160 = vmatpush3.bf16.msra.mxu0 %v13136_v27  ;;  %4873 = vmatprep.subr.bf16.mxu1 %v11531_v3  ;;  %v11482_v27 = vld [vmem:[%s15777_s9 + $0x58] sm:$0xff]   ;;  %v11576_v3 = vld [vmem:[#allocation4 + $0x420] ss:$8 sps:$4 sm:$0xff]  }
 0x5f6   : > { %5054 = vmatprep.subr.bf16.mxu0 %v11563_v44 }
 0x5f8   : > { %11082 = vmatmul.mubr.bf16.gmra.mxu0 %v11479_v55  ;;  %11130 = vmatmul.mubr.bf16.gmra.mxu1 %v11491_v17  ;;  %v11581_v55 = vld [vmem:[#allocation4 + $0x414] ss:$8 sps:$4 sm:$0xff]   ;;  %v11579_v17 = vld [vmem:[#allocation4 + $0x410] ss:$8 sps:$4 sm:$0xff]  }
 0x5f9   : > { %11085 = vmatprep.mubr.bf16.mxu0 %v11481_v8  ;;  %11133 = vmatprep.mubr.bf16.mxu1 %v11495_v18  ;;  %v11584_v8 = vld [vmem:[#allocation4 + $0x404] ss:$8 sps:$4 sm:$0xff]   ;;  %v11582_v18 = vld [vmem:[#allocation4 + $0x400] ss:$8 sps:$4 sm:$0xff]  }
 0x5fa   : > { %4874 = vmatpush1.bf16.msra.mxu1 %v11529_v52 }
 0x5fb   : > { %4875 = vmatprep.subr.bf16.mxu1 %v11534_v22 }
 0x5fe   : > { %4876 = vmatpush1.bf16.msra.mxu1 %v11532_v21 }
 0x5ff   : > { %4877 = vmatprep.subr.bf16.mxu1 %v11539_v9 }
 0x600   : > { %11086 = vmatmul.mubr.bf16.gmra.mxu0 %v11482_v27  ;;  %11134 = vmatmul.mubr.bf16.gmra.mxu1 %v11496_v7 }
 0x601   : > { %11089 = vmatprep.mubr.bf16.mxu0 %v11483_v39  ;;  %11137 = vmatprep.mubr.bf16.mxu1 %v11499_v15 }
 0x602   : > { %4878 = vmatpush2.bf16.msra.mxu1 %v11537_v45 }
 0x603   : > { %4879 = vmatprep.subr.bf16.mxu1 %v11542_v19 }
 0x606   : > { %4880 = vmatpush2.bf16.msra.mxu1 %v11540_v46 }
 0x607   : > { %4881 = vmatprep.subr.bf16.mxu1 %v11545_v47 }
 0x608   : > { %11090 = vmatmul.mubr.bf16.gmra.mxu0 %v11485_v4  ;;  %11138 = vmatmul.mubr.bf16.gmra.mxu1 %v11500_v53 }
 0x609   : > { %11093 = vmatprep.mubr.bf16.mxu0 %v11487_v26  ;;  %11141 = vmatprep.mubr.bf16.mxu1 %v11503_v10 }
 0x60a   : > { %4882 = vmatpush2.bf16.msra.mxu1 %v11543_v31 }
 0x60b   : > { %4883 = vmatprep.subr.bf16.mxu1 %v11548_v12 }
 0x60e   : > { %4884 = vmatpush2.bf16.msra.mxu1 %v11546_v13 }
 0x60f   : > { %4885 = vmatprep.subr.bf16.mxu1 %v11551_v28 }
 0x610   : > { %11094 = vmatmul.mubr.bf16.gmra.mxu0 %v11488_v29  ;;  %11142 = vmatmul.mubr.bf16.gmra.mxu1 %v11504_v59 }
 0x611   : > { %11161 = vmatprep.mubr.bf16.mxu0 %v11490_v36 }
 0x612   : > { %4886 = vmatpush2.bf16.msra.mxu1 %v11549_v34 }
 0x613   : > { %4887 = vmatprep.subr.bf16.mxu1 %v11554_v58 }
 0x616   : > { %4888 = vmatpush2.bf16.msra.mxu1 %v11552_v35 }
 0x617   : > { %4889 = vmatprep.subr.bf16.mxu1 %v11557_v14 }
 0x618   : > { %11162 = vmatmul.mubr.bf16.vlgmr.msra.gmra.mxu0 %v11492_v51 }
 0x619   : > { %11165 = vmatprep.mubr.bf16.mxu0 %v11493_v37  ;;  %5055 = vmatpush1.bf16.msra.mxu0 %v11561_v54 }
 0x61a   : > { %4890 = vmatpush2.bf16.msra.mxu1 %v11555_v0  ;;  %5056 = vmatprep.subr.bf16.mxu0 %v11566_v32 }
 0x61b   : > { %4891 = vmatprep.subr.bf16.mxu1 %v11560_v38 }
 0x61d   : > { %5057 = vmatpush1.bf16.msra.mxu0 %v11564_v56 }
 0x61e   : > { %4892 = vmatpush2.bf16.msra.mxu1 %v11558_v49  ;;  %5058 = vmatprep.subr.bf16.mxu0 %v11569_v48 }
 0x61f   : > { %11193 = vmatprep.subr.bf16.mxu1 %v15780_v25 }
 0x620   : > { %11166 = vmatmul.mubr.bf16.gmra.mxu0 %v11494_v33 }
 0x621   : > { %11169 = vmatprep.mubr.bf16.mxu0 %v11497_v24  ;;  %5059 = vmatpush1.bf16.msra.mxu0 %v11567_v40 }
 0x622   : > { %5060 = vmatprep.subr.bf16.mxu0 %v11572_v63 }
 0x625   : > { %5061 = vmatpush1.bf16.msra.mxu0 %v11570_v41 }
 0x626   : > { %5062 = vmatprep.subr.bf16.mxu0 %v11575_v30 }
 0x628   : > { %11170 = vmatmul.mubr.bf16.gmra.mxu0 %v11498_v1 }
 0x629   : > { %11173 = vmatprep.mubr.bf16.mxu0 %v11501_v6  ;;  %5063 = vmatpush1.bf16.msra.mxu0 %v11573_v50 }
 0x62a   : > { %5064 = vmatprep.subr.bf16.mxu0 %v11578_v2 }
 0x62d   : > { %5065 = vmatpush1.bf16.msra.mxu0 %v11576_v3 }
 0x62e   : > { %5066 = vmatprep.subr.bf16.mxu0 %v11581_v55 }
 0x630   : > { %11174 = vmatmul.mubr.bf16.gmra.mxu0 %v11502_v42 }
 0x631   : > { %11177 = vmatprep.mubr.bf16.mxu0 %v11505_v57  ;;  %5067 = vmatpush1.bf16.msra.mxu0 %v11579_v17 }
 0x632   : > { %5068 = vmatprep.subr.bf16.mxu0 %v11584_v8 }
 0x635   : > { %5069 = vmatpush1.bf16.msra.mxu0 %v11582_v18 }
 0x636   : > { %6025 = vmatprep.subr.bf16.mxu0 %v15780_v25 }
 0x638   : > { %11178 = vmatmul.mubr.bf16.gmra.mxu0 %v11506_v43 }
 0x639   : > { %11181 = vmatprep.mubr.bf16.mxu0 %v11507_v11 }
 0x640   : > { %11182 = vmatmul.mubr.bf16.gmra.mxu0 %v11508_v23 }
 0x641   : > { %11185 = vmatprep.mubr.bf16.mxu0 %v11521_v20 }
 0x648   : > { %11186 = vmatmul.mubr.bf16.gmra.mxu0 %v11522_v16 }
 0x649   : > { %11189 = vmatprep.mubr.bf16.mxu0 %v11535_v62 }
 0x650   : > { %11190 = vmatmul.mubr.bf16.gmra.mxu0 %v11536_v5 }
 0x651   : > { %5086 = vmatprep.mubr.bf16.mxu0 %v15780_v25 }
 0x698   : > { %v11067_v52 = vpop.f32.mrf.mxu0  ;;  %v11115_v22 = vpop.f32.mrf.mxu1 }
 0x69a   : > { %v3817_v21 = vpop.f32.mrf.mxu0  ;;  %v4107_v9 = vpop.f32.mrf.mxu1 }
 0x69c   : > { %v11068_v27 = vpop.f32.mrf.mxu0  ;;  %v11116_v7 = vpop.f32.mrf.mxu1 }
 0x69d   : > { %v4528_v45 = vpack.c.bf16 %v11116_v7, %v11115_v22  ;;  %v4527_v29 = vpack.c.bf16 %v11068_v27, %v11067_v52 }
 0x69e   : > { %v3820_v39 = vpop.f32.mrf.mxu0  ;;  %v4110_v15 = vpop.f32.mrf.mxu1 }
 0x69f   : > { %v4524_v19 = vpack.c.bf16 %v3820_v39, %v3817_v21  ;;  %v4525_v46 = vpack.c.bf16 %v4110_v15, %v4107_v9 }
 0x6a0   : > { %v11071_v47 = vpop.f32.mrf.mxu0  ;;  %v11119_v4 = vpop.f32.mrf.mxu1 }
 0x6a1   : > { %4893 = vmatprep.mubr.bf16.mxu1 %v4525_v46 }
 0x6a2   : > { %v3833_v53 = vpop.f32.mrf.mxu0  ;;  %4894 = vmatmul.mubr.bf16.vlgmr.msra.gmra.mxu1 %v4524_v19  ;;  %v4123_v26 = vpop.f32.mrf.mxu1 }
 0x6a3   : > { %4903 = vmatprep.mubr.bf16.mxu1 %v4528_v45 }
 0x6a4   : > { %v11072_v10 = vpop.f32.mrf.mxu0  ;;  %v11120_v31 = vpop.f32.mrf.mxu1 }
 0x6a5   : > { %v4534_v37 = vpack.c.bf16 %v11120_v31, %v11119_v4  ;;  %v4533_v42 = vpack.c.bf16 %v11072_v10, %v11071_v47 }
 0x6a6   : > { %v3836_v12 = vpop.f32.mrf.mxu0  ;;  %v4126_v13 = vpop.f32.mrf.mxu1 }
 0x6a7   : > { %v4531_v28 = vpack.c.bf16 %v4126_v13, %v4123_v26  ;;  %v4530_v14 = vpack.c.bf16 %v3836_v12, %v3833_v53 }
 0x6a8   : > { %v11075_v59 = vpop.f32.mrf.mxu0  ;;  %v11123_v36 = vpop.f32.mrf.mxu1 }
 0x6aa   : > { %v3849_v34 = vpop.f32.mrf.mxu0  ;;  %4904 = vmatmul.mubr.bf16.gmra.mxu1 %v4527_v29  ;;  %v4139_v35 = vpop.f32.mrf.mxu1 }
 0x6ab   : > { %4913 = vmatprep.mubr.bf16.mxu1 %v4531_v28 }
 0x6ac   : > { %v11076_v58 = vpop.f32.mrf.mxu0  ;;  %v11124_v33 = vpop.f32.mrf.mxu1 }
 0x6ad   : > { %v4540_v54 = vpack.c.bf16 %v11124_v33, %v11123_v36  ;;  %v4539_v41 = vpack.c.bf16 %v11076_v58, %v11075_v59 }
 0x6ae   : > { %v3852_v51 = vpop.f32.mrf.mxu0  ;;  %v4142_v49 = vpop.f32.mrf.mxu1 }
 0x6af   : > { %v4537_v6 = vpack.c.bf16 %v4142_v49, %v4139_v35  ;;  %v4536_v32 = vpack.c.bf16 %v3852_v51, %v3849_v34 }
 0x6b0   : > { %v11079_v0 = vpop.f32.mrf.mxu0  ;;  %v11127_v43 = vpop.f32.mrf.mxu1 }
 0x6b2   : > { %v3865_v38 = vpop.f32.mrf.mxu0  ;;  %4914 = vmatmul.mubr.bf16.gmra.mxu1 %v4530_v14  ;;  %v4155_v20 = vpop.f32.mrf.mxu1 }
 0x6b3   : > { %4923 = vmatprep.mubr.bf16.mxu1 %v4534_v37 }
 0x6b4   : > { %v11080_v24 = vpop.f32.mrf.mxu0  ;;  %v11128_v56 = vpop.f32.mrf.mxu1 }
 0x6b5   : > { %v4546_v8 = vpack.c.bf16 %v11128_v56, %v11127_v43  ;;  %v4545_v45 = vpack.c.bf16 %v11080_v24, %v11079_v0 }
 0x6b6   : > { %v3868_v1 = vpop.f32.mrf.mxu0  ;;  %v4158_v40 = vpop.f32.mrf.mxu1 }
 0x6b7   : > { %v4543_v5 = vpack.c.bf16 %v4158_v40, %v4155_v20  ;;  %v4542_v18 = vpack.c.bf16 %v3868_v1, %v3865_v38 }
 0x6b8   : > { %v13384_v57 = vpop.f32.mrf.mxu0  ;;  %v11131_v50 = vpop.f32.mrf.mxu1 }
 0x6ba   : > { %v3881_v11 = vpop.f32.mrf.mxu0  ;;  %4924 = vmatmul.mubr.bf16.gmra.mxu1 %v4533_v42  ;;  %v4171_v55 = vpop.f32.mrf.mxu1 }
 0x6bb   : > { %4933 = vmatprep.mubr.bf16.mxu1 %v4537_v6 }
 0x6bc   : > { %v11084_v23 = vpop.f32.mrf.mxu0  ;;  %v11132_v22 = vpop.f32.mrf.mxu1 }
 0x6bd   : > { %v4552_v10 = vpack.c.bf16 %v11132_v22, %v11131_v50  ;;  %v4551_v58 = vpack.c.bf16 %v11084_v23, %v13384_v57 }
 0x6be   : > { %v3884_v44 = vpop.f32.mrf.mxu0  ;;  %v4174_v27 = vpop.f32.mrf.mxu1 }
 0x6bf   : > { %v4549_v15 = vpack.c.bf16 %v4174_v27, %v4171_v55  ;;  %v4548_v12 = vpack.c.bf16 %v3884_v44, %v3881_v11 }
 0x6c0   : > { %v13386_v16 = vpop.f32.mrf.mxu0  ;;  %v11135_v46 = vpop.f32.mrf.mxu1 }
 0x6c2   : > { %v13388_v62 = vpop.f32.mrf.mxu0  ;;  %4934 = vmatmul.mubr.bf16.gmra.mxu1 %v4536_v32  ;;  %v4187_v53 = vpop.f32.mrf.mxu1 }
 0x6c3   : > { %4943 = vmatprep.mubr.bf16.mxu1 %v4540_v54 }
 0x6c4   : > { %v13390_v48 = vpop.f32.mrf.mxu0  ;;  %v11136_v28 = vpop.f32.mrf.mxu1 }
 0x6c5   : > { %v4558_v33 = vpack.c.bf16 %v11136_v28, %v11135_v46  ;;  %v4557_v43 = vpack.c.bf16 %v13390_v48, %v13386_v16 }
 0x6c6   : > { %v3900_v63 = vpop.f32.mrf.mxu0  ;;  %v4190_v59 = vpop.f32.mrf.mxu1 }
 0x6c7   : > { %v4555_v34 = vpack.c.bf16 %v4190_v59, %v4187_v53  ;;  %v4554_v38 = vpack.c.bf16 %v3900_v63, %v13388_v62 }
 0x6c8   : > { %v13392_v30 = vpop.f32.mrf.mxu0  ;;  %v11139_v51 = vpop.f32.mrf.mxu1 }
 0x6ca   : > { %v13394_v2 = vpop.f32.mrf.mxu0  ;;  %4944 = vmatmul.mubr.bf16.gmra.mxu1 %v4539_v41  ;;  %v4203_v14 = vpop.f32.mrf.mxu1 }
 0x6cb   : > { %4953 = vmatprep.mubr.bf16.mxu1 %v4543_v5 }
 0x6cc   : > { %v13396_v3 = vpop.f32.mrf.mxu0  ;;  %v11140_v49 = vpop.f32.mrf.mxu1 }
 0x6cd   : > { %v4564_v32 = vpack.c.bf16 %v11140_v49, %v11139_v51  ;;  %v4563_v41 = vpack.c.bf16 %v13396_v3, %v13392_v30 }
 0x6ce   : > { %v13398_v17 = vpop.f32.mrf.mxu0  ;;  %v4206_v6 = vpop.f32.mrf.mxu1 }
 0x6cf   : > { %v4561_v57 = vpack.c.bf16 %v4206_v6, %v4203_v14  ;;  %v4560_v56 = vpack.c.bf16 %v13398_v17, %v13394_v2 }
 0x6d0   : > { %v13400_v52 = vpop.f32.mrf.mxu0  ;;  %v11143_v23 = vpop.f32.mrf.mxu1 }
 0x6d2   : > { %v13402_v21 = vpop.f32.mrf.mxu0  ;;  %4954 = vmatmul.mubr.bf16.gmra.mxu1 %v4542_v18  ;;  %v4219_v44 = vpop.f32.mrf.mxu1 }
 0x6d3   : > { %4963 = vmatprep.mubr.bf16.mxu1 %v4546_v8 }
 0x6d4   : > { %v13404_v9 = vpop.f32.mrf.mxu0  ;;  %v11144_v40 = vpop.f32.mrf.mxu1 }
 0x6d5   : > { %v4569_v7 = vpack.c.bf16 %v13404_v9, %v13400_v52  ;;  %v4570_v17 = vpack.c.bf16 %v11144_v40, %v11143_v23 }
 0x6d6   : > { %v13408_v39 = vpop.f32.mrf.mxu0  ;;  %v4222_v48 = vpop.f32.mrf.mxu1 }
 0x6d7   : > { %v4567_v5 = vpack.c.bf16 %v4222_v48, %v4219_v44  ;;  %v4566_v8 = vpack.c.bf16 %v13408_v39, %v13402_v21 }
 0x6d8   : > { %v11163_v19 = vpop.f32.mrf.mxu0 }
 0x6da   : > { %v4397_v47 = vpop.f32.mrf.mxu0  ;;  %4964 = vmatmul.mubr.bf16.gmra.mxu1 %v4545_v45 }
 0x6db   : > { %4973 = vmatprep.mubr.bf16.mxu1 %v4549_v15 }
 0x6dc   : > { %v11164_v4 = vpop.f32.mrf.mxu0 }
 0x6dd   : > { %v4529_v36 = vpack.c.bf16 %v11164_v4, %v11163_v19 }
 0x6de   : > { %v4400_v26 = vpop.f32.mrf.mxu0 }
 0x6df   : > { %v4526_v31 = vpack.c.bf16 %v4400_v26, %v4397_v47 }
 0x6e0   : > { %v11167_v13 = vpop.f32.mrf.mxu0 }
 0x6e1   : > { %5087 = vmatmul.mubr.bf16.vlgmr.msra.gmra.mxu0 %v4526_v31 }
 0x6e2   : > { %4974 = vmatmul.mubr.bf16.gmra.mxu1 %v4548_v12  ;;  %5096 = vmatprep.mubr.bf16.mxu0 %v15780_v25  ;;  %v4413_v29 = vpop.f32.mrf.mxu0 }
 0x6e3   : > { %4983 = vmatprep.mubr.bf16.mxu1 %v4552_v10 }
 0x6e4   : > { %v11168_v35 = vpop.f32.mrf.mxu0 }
 0x6e5   : > { %v4535_v42 = vpack.c.bf16 %v11168_v35, %v11167_v13 }
 0x6e6   : > { %v4416_v37 = vpop.f32.mrf.mxu0 }
 0x6e7   : > { %v4532_v0 = vpack.c.bf16 %v4416_v37, %v4413_v29 }
 0x6e8   : > { %v11171_v24 = vpop.f32.mrf.mxu0 }
 0x6e9   : > { %5097 = vmatmul.mubr.bf16.gmra.mxu0 %v4529_v36 }
 0x6ea   : > { %4984 = vmatmul.mubr.bf16.gmra.mxu1 %v4551_v58  ;;  %5106 = vmatprep.mubr.bf16.mxu0 %v15780_v25  ;;  %v4429_v1 = vpop.f32.mrf.mxu0 }
 0x6eb   : > { %4993 = vmatprep.mubr.bf16.mxu1 %v4555_v34 }
 0x6ec   : > { %v11172_v11 = vpop.f32.mrf.mxu0 }
 0x6ed   : > { %v4541_v63 = vpack.c.bf16 %v11172_v11, %v11171_v24 }
 0x6ee   : > { %v4432_v20 = vpop.f32.mrf.mxu0 }
 0x6ef   : > { %v4538_v54 = vpack.c.bf16 %v4432_v20, %v4429_v1 }
 0x6f0   : > { %v11175_v62 = vpop.f32.mrf.mxu0 }
 0x6f1   : > { %5107 = vmatmul.mubr.bf16.gmra.mxu0 %v4532_v0 }
 0x6f2   : > { %4994 = vmatmul.mubr.bf16.gmra.mxu1 %v4554_v38  ;;  %5116 = vmatprep.mubr.bf16.mxu0 %v15780_v25  ;;  %v4445_v16 = vpop.f32.mrf.mxu0 }
 0x6f3   : > { %5003 = vmatprep.mubr.bf16.mxu1 %v4558_v33 }
 0x6f4   : > { %v11176_v50 = vpop.f32.mrf.mxu0 }
 0x6f5   : > { %v4547_v30 = vpack.c.bf16 %v11176_v50, %v11175_v62 }
 0x6f6   : > { %v4448_v2 = vpop.f32.mrf.mxu0 }
 0x6f7   : > { %v4544_v55 = vpack.c.bf16 %v4448_v2, %v4445_v16 }
 0x6f8   : > { %v11179_v18 = vpop.f32.mrf.mxu0 }
 0x6f9   : > { %5117 = vmatmul.mubr.bf16.gmra.mxu0 %v4535_v42 }
 0x6fa   : > { %5004 = vmatmul.mubr.bf16.gmra.mxu1 %v4557_v43  ;;  %5126 = vmatprep.mubr.bf16.mxu0 %v15780_v25  ;;  %v4461_v22 = vpop.f32.mrf.mxu0 }
 0x6fb   : > { %5013 = vmatprep.mubr.bf16.mxu1 %v4561_v57 }
 0x6fc   : > { %v11180_v3 = vpop.f32.mrf.mxu0 }
 0x6fd   : > { %v4553_v39 = vpack.c.bf16 %v11180_v3, %v11179_v18  ;;  %v13498_v18 = vld [vmem:[%s15774_s6 + $0x4] sm:$0x3] }
 0x6fe   : > { %v4464_v27 = vpop.f32.mrf.mxu0 }
 0x6ff   : > { %v4550_v15 = vpack.c.bf16 %v4464_v27, %v4461_v22  ;;  %v13504_v27 = vrot.slane %v13498_v18, %v12762_v61 }
 0x700   : > { %v11183_v45 = vpop.f32.mrf.mxu0 }
 0x701   : > { %5127 = vmatmul.mubr.bf16.gmra.mxu0 %v4538_v54 }
 0x702   : > { %5014 = vmatmul.mubr.bf16.gmra.mxu1 %v4560_v56  ;;  %5136 = vmatprep.mubr.bf16.mxu0 %v15780_v25  ;;  %v4477_v21 = vpop.f32.mrf.mxu0 }
 0x703   : > { %5023 = vmatprep.mubr.bf16.mxu1 %v4564_v32 }
 0x704   : > { %v11184_v19 = vpop.f32.mrf.mxu0 }
 0x705   : > { %v4559_v9 = vpack.c.bf16 %v11184_v19, %v11183_v45 }
 0x706   : > { %v4480_v46 = vpop.f32.mrf.mxu0 }
 0x707   : > { %v4556_v47 = vpack.c.bf16 %v4480_v46, %v4477_v21 }
 0x708   : > { %v11187_v4 = vpop.f32.mrf.mxu0 }
 0x709   : > { %5137 = vmatmul.mubr.bf16.gmra.mxu0 %v4541_v63 }
 0x70a   : > { %5024 = vmatmul.mubr.bf16.gmra.mxu1 %v4563_v41  ;;  %5146 = vmatprep.mubr.bf16.mxu0 %v15780_v25  ;;  %v4493_v52 = vpop.f32.mrf.mxu0 }
 0x70b   : > { %5033 = vmatprep.mubr.bf16.mxu1 %v4567_v5 }
 0x711   : > { %5147 = vmatmul.mubr.bf16.gmra.mxu0 %v4544_v55  ;;  %v13487_v55 = vld [vmem:[%s15773_s5 + $0x4] sm:$0x3] }
 0x712   : > { %5034 = vmatmul.mubr.bf16.gmra.mxu1 %v4566_v8  ;;  %5156 = vmatprep.mubr.bf16.mxu0 %v15780_v25  ;;  %v13493_v8 = vrot.slane %v13487_v55, %v12762_v61  ;;  %v11854_v61 = vld [vmem:[#allocation6 + $0x534] ss:$8 sps:$4 sm:$0xff]  }
 0x713   : > { %5043 = vmatprep.mubr.bf16.mxu1 %v4570_v17 }
 0x719   : > { %5157 = vmatmul.mubr.bf16.gmra.mxu0 %v4547_v30 }
 0x71a   : > { %5044 = vmatmul.mubr.bf16.gmra.mxu1 %v4569_v7  ;;  %5166 = vmatprep.mubr.bf16.mxu0 %v15780_v25  ;;  %v11188_v7 = vpop.f32.mrf.mxu0 }
 0x71b   : > { %v4565_v12 = vpack.c.bf16 %v11188_v7, %v11187_v4 }
 0x71c   : > { %v4496_v53 = vpop.f32.mrf.mxu0 }
 0x71d   : > { %v4562_v26 = vpack.c.bf16 %v4496_v53, %v4493_v52 }
 0x71e   : > { %v11191_v10 = vpop.f32.mrf.mxu0 }
 0x720   : > { %v4509_v31 = vpop.f32.mrf.mxu0 }
 0x721   : > { %5167 = vmatmul.mubr.bf16.gmra.mxu0 %v4550_v15 }
 0x722   : > { %5176 = vmatprep.mubr.bf16.mxu0 %v15780_v25  ;;  %v11192_v13 = vpop.f32.mrf.mxu0 }
 0x723   : > { %v4571_v59 = vpack.c.bf16 %v11192_v13, %v11191_v10 }
 0x724   : > { %v4512_v28 = vpop.f32.mrf.mxu0 }
 0x725   : > { %v4568_v29 = vpack.c.bf16 %v4512_v28, %v4509_v31 }
 0x729   : > { %5177 = vmatmul.mubr.bf16.gmra.mxu0 %v4553_v39 }
 0x72a   : > { %5186 = vmatprep.mubr.bf16.mxu0 %v15780_v25 }
 0x731   : > { %5187 = vmatmul.mubr.bf16.gmra.mxu0 %v4556_v47 }
 0x732   : > { %5196 = vmatprep.mubr.bf16.mxu0 %v15780_v25 }
 0x739   : > { %5197 = vmatmul.mubr.bf16.gmra.mxu0 %v4559_v9 }
 0x73a   : > { %5206 = vmatprep.mubr.bf16.mxu0 %v15780_v25 }
 0x741   : > { %5207 = vmatmul.mubr.bf16.gmra.mxu0 %v4562_v26 }
 0x742   : > { %5216 = vmatprep.mubr.bf16.mxu0 %v15780_v25 }
 0x749   : > { %5217 = vmatmul.mubr.bf16.gmra.mxu0 %v4565_v12 }
 0x74a   : > { %5226 = vmatprep.mubr.bf16.mxu0 %v15780_v25 }
 0x751   : > { %5227 = vmatmul.mubr.bf16.gmra.mxu0 %v4568_v29 }
 0x752   : > { %5236 = vmatprep.mubr.bf16.mxu0 %v15780_v25 }
 0x759   : > { %5237 = vmatmul.mubr.bf16.gmra.mxu0 %v4571_v59 }
 0x762   : > { %v4895_v36 = vpop.f32.mrf.mxu1 }
 0x764   : > { %v4897_v34 = vpop.f32.mrf.mxu1 }
 0x766   : > { %v4899_v58 = vpop.f32.mrf.mxu1 }
 0x768   : > { %v4901_v35 = vpop.f32.mrf.mxu1 }
 0x76a   : > { %v4905_v51 = vpop.f32.mrf.mxu1 }
 0x76c   : > { %v4907_v37 = vpop.f32.mrf.mxu1 }
 0x76e   : > { %v4909_v14 = vpop.f32.mrf.mxu1 }
 0x770   : > { %v4911_v0 = vpop.f32.mrf.mxu1 }
 0x772   : > { %v4915_v33 = vpop.f32.mrf.mxu1 }
 0x774   : > { %v13438_v38 = vpop.f32.mrf.mxu1 }
 0x776   : > { %v13440_v24 = vpop.f32.mrf.mxu1 }
 0x778   : > { %v13442_v49 = vpop.f32.mrf.mxu1 }
 0x77a   : > { %v13444_v1 = vpop.f32.mrf.mxu1 }
 0x77c   : > { %v13446_v6 = vpop.f32.mrf.mxu1 }
 0x77e   : > { %v13448_v42 = vpop.f32.mrf.mxu1 }
 0x780   : > { %v13450_v57 = vpop.f32.mrf.mxu1 }
 0x782   : > { %v13452_v43 = vpop.f32.mrf.mxu1 }
 0x784   : > { %v13454_v11 = vpop.f32.mrf.mxu1 }
 0x786   : > { %v13456_v23 = vpop.f32.mrf.mxu1 }
 0x788   : > { %v13458_v20 = vpop.f32.mrf.mxu1 }
 0x78a   : > { %v13460_v44 = vpop.f32.mrf.mxu1 }
 0x78c   : > { %v13462_v54 = vpop.f32.mrf.mxu1 }
 0x78e   : > { %v13464_v32 = vpop.f32.mrf.mxu1 }
 0x790   : > { %v13466_v56 = vpop.f32.mrf.mxu1 }
 0x792   : > { %v13468_v62 = vpop.f32.mrf.mxu1 }
 0x794   : > { %v13470_v40 = vpop.f32.mrf.mxu1 }
 0x796   : > { %v13472_v16 = vpop.f32.mrf.mxu1 }
 0x798   : > { %v13474_v48 = vpop.f32.mrf.mxu1 }
 0x79a   : > { %v13476_v63 = vpop.f32.mrf.mxu1 }
 0x79c   : > { %v13478_v5 = vpop.f32.mrf.mxu1 }
 0x79e   : > { %v13480_v41 = vpop.f32.mrf.mxu1 }
 0x7a0   : > { %v13482_v50 = vpop.f32.mrf.mxu1 }
 0x7a1   : > { %v5088_v2 = vpop.f32.mrf.mxu0 }
 0x7a2   : > { %v13489_v17 = vadd.f32 %v5088_v2, %v4895_v36  ;;  %v13500_v22 = vpop.f32.mrf.mxu1 }
 0x7a3   : > { %v5090_v30 = vpop.f32.mrf.mxu0 }
 0x7a4   : > { %v5091_v3 = vadd.f32 %v5090_v30, %v4897_v34  ;;  %v13509_v39 = vpop.f32.mrf.mxu1 }
 0x7a5   : > { %v5092_v15 = vpop.f32.mrf.mxu0 }
 0x7a6   : > { %v5261_v45 = vmul.f32 %v13493_v8, %v5091_v3  ;;  %v13507_v21 = vadd.f32 %v5092_v15, %v4899_v58  ;;  %v13515_v53 = vpop.f32.mrf.mxu1 }
 0x7a7   : > { %v5094_v19 = vpop.f32.mrf.mxu0 }
 0x7a8   : > { %v5338_v46 = vadd.f32 %v13504_v27, %v5261_v45  ;;  %v5095_v47 = vadd.f32 %v5094_v19, %v4901_v35  ;;  %v13521_v59 = vpop.f32.mrf.mxu1 }
 0x7a9   : > { %v5098_v4 = vpop.f32.mrf.mxu0 }
 0x7aa   : > { %v10472_v52 = vmul.f32 -1.442695, %v5338_v46  ;;  %v5263_v9 = vmul.f32 %v13493_v8, %v5095_v47  ;;  %v13513_v7 = vadd.f32 %v5098_v4, %v4905_v51 }
 0x7ab   : > { %v5100_v26 = vpop.f32.mrf.mxu0 }
 0x7ac   : > { %12057 = vpow2.f32 %v10472_v52  ;;  %v5340_v10 = vadd.f32 %v13504_v27, %v5263_v9  ;;  %v5101_v31 = vadd.f32 %v5100_v26, %v4907_v37  ;;  %v13527_v37 = vpop.f32.mrf.mxu1 }
 0x7ad   : > { %v5102_v12 = vpop.f32.mrf.mxu0 }
 0x7ae   : > { %v10473_v13 = vmul.f32 -1.442695, %v5340_v10  ;;  %v5265_v28 = vmul.f32 %v13493_v8, %v5101_v31  ;;  %v13519_v29 = vadd.f32 %v5102_v12, %v4909_v14  ;;  %v13535_v47 = vpop.f32.mrf.mxu1 }
 0x7af   : > { %v5104_v36 = vpop.f32.mrf.mxu0 }
 0x7b0   : > { %12059 = vpow2.f32 %v10473_v13  ;;  %v5342_v34 = vadd.f32 %v13504_v27, %v5265_v28  ;;  %v5105_v58 = vadd.f32 %v5104_v36, %v4911_v0  ;;  %v13540_v12 = vpop.f32.mrf.mxu1 }
 0x7b1   : > { %v5108_v35 = vpop.f32.mrf.mxu0 }
 0x7b2   : > { %v10474_v51 = vmul.f32 -1.442695, %v5342_v34  ;;  %v5267_v2 = vmul.f32 %v13493_v8, %v5105_v58  ;;  %v13525_v30 = vadd.f32 %v5108_v35, %v4915_v33 }
 0x7b3   : > { %v5110_v3 = vpop.f32.mrf.mxu0 }
 0x7b4   : > { %12061 = vpow2.f32 %v10474_v51  ;;  %v5344_v14 = vadd.f32 %v13504_v27, %v5267_v2  ;;  %v5111_v15 = vadd.f32 %v5110_v3, %v13438_v38  ;;  %v13551_v3 = vpop.f32.mrf.mxu1 }
 0x7b5   : > { %v5112_v45 = vpop.f32.mrf.mxu0 }
 0x7b6   : > { %v10475_v19 = vmul.f32 -1.442695, %v5344_v14  ;;  %v5269_v46 = vmul.f32 %v13493_v8, %v5111_v15  ;;  %v13533_v0 = vadd.f32 %v5112_v45, %v13440_v24 }
 0x7b7   : > { %v5114_v4 = vpop.f32.mrf.mxu0 }
 0x7b8   : > { %12063 = vpow2.f32 %v10475_v19  ;;  %v5346_v33 = vadd.f32 %v13504_v27, %v5269_v46  ;;  %v5115_v52 = vadd.f32 %v5114_v4, %v13442_v49 }
 0x7b9   : > { %v12058_v9 = vpop.eup %12057  ;;  %v5118_v26 = vpop.f32.mrf.mxu0 }
 0x7ba   : > { %v5497_v10 = vadd.f32 1.0, %v12058_v9  ;;  %v10476_v31 = vmul.f32 -1.442695, %v5346_v33  ;;  %v5271_v38 = vmul.f32 %v13493_v8, %v5115_v52  ;;  %v13543_v13 = vadd.f32 %v5118_v26, %v13444_v1  ;;  %v13560_v33 = vpop.f32.mrf.mxu1 }
 0x7bb   : > { %v5120_v24 = vpop.f32.mrf.mxu0 }
 0x7bc   : > { %12065 = vrcp.f32 %v5497_v10  ;;  %v5348_v28 = vadd.f32 %v13504_v27, %v5271_v38  ;;  %v5121_v36 = vadd.f32 %v5120_v24, %v13446_v6  ;;  %v13557_v6 = vrot.slane %v13487_v55, %v12759_v60 }
 0x7bd   : > { %v12060_v34 = vpop.eup %12059  ;;  %12067 = vpow2.f32 %v10476_v31  ;;  %v5122_v49 = vpop.f32.mrf.mxu0  ;;  %v13571_v31 = vrot.slane %v13498_v18, %v12759_v60  ;;  %v11851_v60 = vld [vmem:[#allocation6 + $0x394] ss:$8 sps:$4 sm:$0xff]  }
 0x7be   : > { %v5498_v58 = vadd.f32 1.0, %v12060_v34  ;;  %v10477_v35 = vmul.f32 -1.442695, %v5348_v28  ;;  %v5273_v51 = vmul.f32 %v13493_v8, %v5121_v36  ;;  %v13549_v2 = vadd.f32 %v5122_v49, %v13448_v42  ;;  %v13577_v34 = vpop.f32.mrf.mxu1 }
 0x7bf   : > { %v5124_v1 = vpop.f32.mrf.mxu0  ;;  %v5260_v55 = vmul.f32 %v13557_v6, %v13489_v17 }
 0x7c0   : > { %12069 = vrcp.f32 %v5498_v58  ;;  %v5350_v14 = vadd.f32 %v13504_v27, %v5273_v51  ;;  %v5125_v15 = vadd.f32 %v5124_v1, %v13450_v57 }
 0x7c1   : > { %v12062_v45 = vpop.eup %12061  ;;  %12071 = vpow2.f32 %v10477_v35  ;;  %v5128_v19 = vpop.f32.mrf.mxu0  ;;  %v5337_v18 = vadd.f32 %v13571_v31, %v5260_v55  ;;  %v5262_v35 = vmul.f32 %v13557_v6, %v13507_v21  ;;  %v5264_v21 = vmul.f32 %v13557_v6, %v13513_v7 }
 0x7c2   : > { %v5499_v46 = vadd.f32 1.0, %v12062_v45  ;;  %v10478_v4 = vmul.f32 -1.442695, %v5350_v14  ;;  %v5275_v42 = vmul.f32 %v13493_v8, %v5125_v15  ;;  %v13563_v52 = vadd.f32 %v5128_v19, %v13452_v43  ;;  %v13587_v45 = vpop.f32.mrf.mxu1 }
 0x7c3   : > { %v5130_v9 = vpop.f32.mrf.mxu0 }
 0x7c4   : > { %12073 = vrcp.f32 %v5499_v46  ;;  %v5352_v57 = vadd.f32 %v13504_v27, %v5275_v42  ;;  %v5131_v26 = vadd.f32 %v5130_v9, %v13454_v11  ;;  %v5339_v42 = vadd.f32 %v13571_v31, %v5262_v35  ;;  %v13595_v55 = vpop.f32.mrf.mxu1 }
 0x7c5   : > { %v12064_v10 = vpop.eup %12063  ;;  %12075 = vpow2.f32 %v10478_v4  ;;  %v5132_v38 = vpop.f32.mrf.mxu0 }
 0x7c6   : > { %v5500_v24 = vadd.f32 1.0, %v12064_v10  ;;  %v10479_v28 = vmul.f32 -1.442695, %v5352_v57  ;;  %v5277_v43 = vmul.f32 %v13493_v8, %v5131_v26  ;;  %v13575_v36 = vadd.f32 %v5132_v38, %v13456_v23 }
 0x7c7   : > { %v5134_v11 = vpop.f32.mrf.mxu0 }
 0x7c8   : > { %12077 = vrcp.f32 %v5500_v24  ;;  %v5354_v49 = vadd.f32 %v13504_v27, %v5277_v43  ;;  %v5135_v17 = vadd.f32 %v5134_v11, %v13458_v20  ;;  %v5341_v43 = vadd.f32 %v13571_v31, %v5264_v21 }
 0x7c9   : > { %v12066_v58 = vpop.eup %12065  ;;  %12079 = vpow2.f32 %v10479_v28  ;;  %v13584_v51 = vpop.f32.mrf.mxu0  ;;  %v5266_v11 = vmul.f32 %v13557_v6, %v13519_v29 }
 0x7ca   : > { %v12068_v1 = vpop.eup %12067  ;;  %v10480_v23 = vmul.f32 -1.442695, %v5354_v49  ;;  %v5279_v14 = vmul.f32 %v13493_v8, %v5135_v17  ;;  %v5593_v46 = vmul.f32 %v12066_v58, %v5337_v18  ;;  %v13604_v58 = vpop.f32.mrf.mxu1 }
 0x7cb   : > { %v5501_v15 = vadd.f32 1.0, %v12068_v1  ;;  %v5140_v19 = vpop.f32.mrf.mxu0 }
 0x7cc   : > { %12081 = vpow2.f32 %v10480_v23  ;;  %v5356_v20 = vadd.f32 %v13504_v27, %v5279_v14 }
 0x7cd   : > { %v12070_v4 = vpop.eup %12069  ;;  %12083 = vrcp.f32 %v5501_v15  ;;  %v13593_v9 = vpop.f32.mrf.mxu0  ;;  %v5343_v15 = vadd.f32 %v13571_v31, %v5266_v11 }
 0x7ce   : > { %v12072_v57 = vpop.eup %12071  ;;  %v10481_v26 = vmul.f32 -1.442695, %v5356_v20  ;;  %v5594_v24 = vmul.f32 %v12070_v4, %v5339_v42  ;;  %v5268_v20 = vmul.f32 %v13557_v6, %v13525_v30  ;;  %v5270_v30 = vmul.f32 %v13557_v6, %v13533_v0 }
 0x7cf   : > { %v5502_v10 = vadd.f32 1.0, %v12072_v57  ;;  %v5144_v38 = vpop.f32.mrf.mxu0 }
 0x7d0   : > { %12085 = vpow2.f32 %v10481_v26  ;;  %v13602_v7 = vpack.c.bf16 %v5594_v24, %v5593_v46  ;;  %v5145_v23 = vadd.f32 %v5144_v38, %v13466_v56  ;;  %v13612_v46 = vpop.f32.mrf.mxu1  ;;  %v5345_v24 = vadd.f32 %v13571_v31, %v5268_v20 }
 0x7d1   : > { %v12074_v28 = vpop.eup %12073  ;;  %12087 = vrcp.f32 %v5502_v10  ;;  %v13600_v49 = vpop.f32.mrf.mxu0 }
 0x7d2   : > { %v12076_v17 = vpop.eup %12075  ;;  %v5595_v1 = vmul.f32 %v12074_v28, %v5341_v43  ;;  %v5283_v10 = vmul.f32 %v13493_v8, %v5145_v23 }
 0x7d3   : > { %v5503_v18 = vadd.f32 1.0, %v12076_v17  ;;  %v5150_v35 = vpop.f32.mrf.mxu0  ;;  %v13625_v17 = vpop.f32.mrf.mxu1 }
 0x7d4   : > { %v5151_v21 = vadd.f32 %v5150_v35, %v13470_v40  ;;  %v5141_v35 = vadd.f32 %v5140_v19, %v13462_v54 }
 0x7d5   : > { %v12078_v14 = vpop.eup %12077  ;;  %v13610_v29 = vpop.f32.mrf.mxu0  ;;  %12089 = vrcp.f32 %v5503_v18 }
 0x7d6   : > { %v12080_v4 = vpop.eup %12079  ;;  %v5596_v26 = vmul.f32 %v12078_v14, %v5343_v15  ;;  %v5360_v15 = vadd.f32 %v13504_v27, %v5283_v10  ;;  %v13636_v19 = vpop.f32.mrf.mxu1 }
 0x7d7   : > { %v5504_v42 = vadd.f32 1.0, %v12080_v4  ;;  %v5154_v57 = vpop.f32.mrf.mxu0  ;;  %v5347_v4 = vadd.f32 %v13571_v31, %v5270_v30 }
 0x7d8   : > { %v5155_v56 = vadd.f32 %v5154_v57, %v13474_v48  ;;  %v13622_v43 = vpack.c.bf16 %v5596_v26, %v5595_v1  ;;  %v5285_v48 = vmul.f32 %v13493_v8, %v5151_v21  ;;  %v5281_v21 = vmul.f32 %v13493_v8, %v5141_v35 }
 0x7d9   : > { %v12082_v38 = vpop.eup %12081  ;;  %12091 = vrcp.f32 %v5504_v42  ;;  %v13620_v28 = vpop.f32.mrf.mxu0 }
 0x7da   : > { %v12084_v11 = vpop.eup %12083  ;;  %v5287_v40 = vmul.f32 %v13493_v8, %v5155_v56  ;;  %v5505_v18 = vadd.f32 1.0, %v12082_v38  ;;  %v5362_v10 = vadd.f32 %v13504_v27, %v5285_v48 }
 0x7db   : > { %v5160_v23 = vpop.f32.mrf.mxu0  ;;  %v5597_v14 = vmul.f32 %v12084_v11, %v5345_v24 }
 0x7dc   : > { %v5364_v0 = vadd.f32 %v13504_v27, %v5287_v40  ;;  %v5161_v20 = vadd.f32 %v5160_v23, %v13478_v5  ;;  %12093 = vrcp.f32 %v5505_v18  ;;  %v10483_v5 = vmul.f32 -1.442695, %v5360_v15 }
 0x7dd   : > { %v12086_v1 = vpop.eup %12085  ;;  %v13633_v42 = vpop.f32.mrf.mxu0  ;;  %v5272_v40 = vmul.f32 %v13557_v6, %v13543_v13  ;;  %v5274_v23 = vmul.f32 %v13557_v6, %v13549_v2  ;;  %v5358_v15 = vadd.f32 %v13504_v27, %v5281_v21 }
 0x7de   : > { %v12088_v57 = vpop.eup %12087  ;;  %v5506_v26 = vadd.f32 1.0, %v12086_v1  ;;  %v10485_v56 = vmul.f32 -1.442695, %v5364_v0  ;;  %v5289_v54 = vmul.f32 %v13493_v8, %v5161_v20  ;;  %v13649_v20 = vpop.f32.mrf.mxu1  ;;  %v10484_v1 = vmul.f32 -1.442695, %v5362_v10 }
 0x7df   : > { %v5164_v38 = vpop.f32.mrf.mxu0  ;;  %v5598_v24 = vmul.f32 %v12088_v57, %v5347_v4  ;;  %v5349_v57 = vadd.f32 %v13571_v31, %v5272_v40 }
 0x7e0   : > { %12095 = vrcp.f32 %v5506_v26  ;;  %v5366_v30 = vadd.f32 %v13504_v27, %v5289_v54  ;;  %v5165_v11 = vadd.f32 %v5164_v38, %v13482_v50  ;;  %v5351_v26 = vadd.f32 %v13571_v31, %v5274_v23  ;;  %v13663_v10 = vpop.f32.mrf.mxu1 }
 0x7e1   : > { %v5168_v0 = vpop.f32.mrf.mxu0  ;;  %v13646_v18 = vpack.c.bf16 %v5598_v24, %v5597_v14  ;;  %12097 = vpow2.f32 %v10485_v56  ;;  %v10482_v24 = vmul.f32 -1.442695, %v5358_v15 }
 0x7e2   : > { %v10486_v35 = vmul.f32 -1.442695, %v5366_v30  ;;  %v5291_v48 = vmul.f32 %v13493_v8, %v5165_v11  ;;  %v13653_v50 = vadd.f32 %v5168_v0, %v13500_v22  ;;  %v12090_v13 = vpop.eup %12089  ;;  %12099 = vpow2.f32 %v10483_v5  ;;  %v11587_v11 = vld [vmem:[#allocation6 + $0x4] ss:$8 sps:$4 sm:$0xff]   ;;  %v11590_v0 = vld [vmem:[#allocation6 + $0xd4] ss:$8 sps:$4 sm:$0xff]  }
 0x7e3   : > { %v5170_v4 = vpop.f32.mrf.mxu0  ;;  %v5599_v30 = vmul.f32 %v12090_v13, %v5349_v57  ;;  %6057 = vmatprep.mubr.bf16.mxu0 %v11587_v11  ;;  %6161 = vmatprep.mubr.bf16.mxu1 %v11590_v0 }
 0x7e4   : > { %v5368_v2 = vadd.f32 %v13504_v27, %v5291_v48  ;;  %v5171_v14 = vadd.f32 %v5170_v4, %v13509_v39  ;;  %12101 = vpow2.f32 %v10486_v35  ;;  %v5276_v35 = vmul.f32 %v13557_v6, %v13563_v52 }
 0x7e5   : > { %v5172_v56 = vpop.f32.mrf.mxu0  ;;  %12103 = vpow2.f32 %v10484_v1 }
 0x7e6   : > { %v12092_v54 = vpop.eup %12091  ;;  %v10487_v38 = vmul.f32 -1.442695, %v5368_v2  ;;  %v5293_v21 = vmul.f32 %v13493_v8, %v5171_v14  ;;  %v13661_v22 = vadd.f32 %v5172_v56, %v13515_v53  ;;  %v5278_v53 = vmul.f32 %v13557_v6, %v13575_v36 }
 0x7e7   : > { %v5174_v5 = vpop.f32.mrf.mxu0  ;;  %v5600_v39 = vmul.f32 %v12092_v54, %v5351_v26  ;;  %v5353_v26 = vadd.f32 %v13571_v31, %v5276_v35 }
 0x7e8   : > { %v5370_v40 = vadd.f32 %v13504_v27, %v5293_v21  ;;  %v5175_v23 = vadd.f32 %v5174_v5, %v13521_v59  ;;  %12105 = vpow2.f32 %v10487_v38  ;;  %v13677_v59 = vpop.f32.mrf.mxu1  ;;  %v5355_v56 = vadd.f32 %v13571_v31, %v5278_v53 }
 0x7e9   : > { %v5178_v48 = vpop.f32.mrf.mxu0  ;;  %v13671_v4 = vpack.c.bf16 %v5600_v39, %v5599_v30  ;;  %12107 = vpow2.f32 %v10482_v24  ;;  %v12094_v52 = vpop.eup %12093 }
 0x7ea   : > { %v10488_v15 = vmul.f32 -1.442695, %v5370_v40  ;;  %v5295_v1 = vmul.f32 %v13493_v8, %v5175_v23  ;;  %v13675_v13 = vadd.f32 %v5178_v48, %v13527_v37  ;;  %v13687_v5 = vpop.f32.mrf.mxu1  ;;  %v5601_v39 = vmul.f32 %v12094_v52, %v5353_v26 }
 0x7eb   : > { %v5180_v2 = vpop.f32.mrf.mxu0 }
 0x7ec   : > { %12109 = vpow2.f32 %v10488_v15  ;;  %v5372_v36 = vadd.f32 %v13504_v27, %v5295_v1  ;;  %v5181_v14 = vadd.f32 %v5180_v2, %v13535_v47  ;;  %v13697_v2 = vpop.f32.mrf.mxu1 }
 0x7ed   : > { %v12096_v57 = vpop.eup %12095  ;;  %v5182_v54 = vpop.f32.mrf.mxu0 }
 0x7ee   : > { %v10489_v38 = vmul.f32 -1.442695, %v5372_v36  ;;  %v5297_v37 = vmul.f32 %v13493_v8, %v5181_v14  ;;  %v13685_v21 = vadd.f32 %v5182_v54, %v13540_v12  ;;  %v12098_v24 = vpop.eup %12097  ;;  %v5602_v11 = vmul.f32 %v12096_v57, %v5355_v56 }
 0x7ef   : > { %v5184_v30 = vpop.f32.mrf.mxu0  ;;  %v12100_v23 = vpop.eup %12099  ;;  %v5510_v48 = vadd.f32 1.0, %v12098_v24 }
 0x7f0   : > { %12111 = vpow2.f32 %v10489_v38  ;;  %v5374_v47 = vadd.f32 %v13504_v27, %v5297_v37  ;;  %v5185_v40 = vadd.f32 %v5184_v30, %v13551_v3  ;;  %v13691_v35 = vpack.c.bf16 %v5602_v11, %v5601_v39  ;;  %v13705_v24 = vpop.f32.mrf.mxu1 }
 0x7f1   : > { %v5188_v0 = vpop.f32.mrf.mxu0  ;;  %v12102_v53 = vpop.eup %12101  ;;  %v5508_v26 = vadd.f32 1.0, %v12100_v23 }
 0x7f2   : > { %v10490_v15 = vmul.f32 -1.442695, %v5374_v47  ;;  %v5299_v12 = vmul.f32 %v13493_v8, %v5185_v40  ;;  %v13695_v1 = vadd.f32 %v5188_v0, %v13560_v33  ;;  %v5511_v52 = vadd.f32 1.0, %v12102_v53  ;;  %v12104_v14 = vpop.eup %12103 }
 0x7f3   : > { %v5190_v36 = vpop.f32.mrf.mxu0  ;;  %v5509_v30 = vadd.f32 1.0, %v12104_v14 }
 0x7f4   : > { %12113 = vpow2.f32 %v10490_v15  ;;  %v5376_v3 = vadd.f32 %v13504_v27, %v5299_v12  ;;  %v5191_v57 = vadd.f32 %v5190_v36, %v13577_v34  ;;  %v13710_v12 = vpop.f32.mrf.mxu1 }
 0x7f5   : > { %v5192_v56 = vpop.f32.mrf.mxu0  ;;  %v12106_v54 = vpop.eup %12105  ;;  %12115 = vrcp.f32 %v5510_v48 }
 0x7f6   : > { %v10491_v38 = vmul.f32 -1.442695, %v5376_v3  ;;  %v5301_v37 = vmul.f32 %v13493_v8, %v5191_v57  ;;  %v13703_v33 = vadd.f32 %v5192_v56, %v13587_v45  ;;  %12117 = vrcp.f32 %v5511_v52  ;;  %v12108_v47 = vpop.eup %12107 }
 0x7f7   : > { %v5512_v39 = vadd.f32 1.0, %v12106_v54  ;;  %v5194_v11 = vpop.f32.mrf.mxu0  ;;  %v5507_v15 = vadd.f32 1.0, %v12108_v47  ;;  %v5159_v57 = vadd.f32 %v13620_v28, %v13476_v63  ;;  %v5149_v63 = vadd.f32 %v13600_v49, %v13468_v62 }
 0x7f8   : > { %12119 = vpow2.f32 %v10491_v38  ;;  %v5378_v34 = vadd.f32 %v13504_v27, %v5301_v37  ;;  %v5195_v40 = vadd.f32 %v5194_v11, %v13595_v55  ;;  %v5143_v11 = vadd.f32 %v13593_v9, %v13464_v32 }
 0x7f9   : > { %v12110_v23 = vpop.eup %12109  ;;  %12121 = vrcp.f32 %v5512_v39  ;;  %v5198_v0 = vpop.f32.mrf.mxu0 }
 0x7fa   : > { %12123 = vrcp.f32 %v5508_v26  ;;  %v5513_v53 = vadd.f32 1.0, %v12110_v23  ;;  %v10492_v48 = vmul.f32 -1.442695, %v5378_v34  ;;  %v5303_v45 = vmul.f32 %v13493_v8, %v5195_v40 }
 0x7fb   : > { %12125 = vrcp.f32 %v5509_v30  ;;  %v13713_v52 = vadd.f32 %v5198_v0, %v13604_v58  ;;  %v5200_v36 = vpop.f32.mrf.mxu0  ;;  %v5163_v26 = vadd.f32 %v13633_v42, %v13480_v41  ;;  %v5139_v30 = vadd.f32 %v13584_v51, %v13460_v44 }
 0x7fc   : > { %12127 = vrcp.f32 %v5513_v53  ;;  %v5380_v14 = vadd.f32 %v13504_v27, %v5303_v45  ;;  %v5201_v55 = vadd.f32 %v5200_v36, %v13612_v46  ;;  %v13727_v46 = vpop.f32.mrf.mxu1  ;;  %v5153_v41 = vadd.f32 %v13610_v29, %v13472_v16 }
 0x7fd   : > { %v12112_v3 = vpop.eup %12111  ;;  %12129 = vpow2.f32 %v10492_v48  ;;  %v5202_v56 = vpop.f32.mrf.mxu0  ;;  %v5288_v44 = vmul.f32 %v13557_v6, %v5159_v57  ;;  %v5290_v51 = vmul.f32 %v13557_v6, %v5163_v26  ;;  %v5280_v34 = vmul.f32 %v13557_v6, %v5139_v30 }
 0x7fe   : > { %v5514_v54 = vadd.f32 1.0, %v12112_v3  ;;  %v10493_v38 = vmul.f32 -1.442695, %v5380_v14  ;;  %v5305_v58 = vmul.f32 %v13493_v8, %v5201_v55  ;;  %v13723_v37 = vadd.f32 %v5202_v56, %v13625_v17 }
 0x7ff   : > { %12131 = vrcp.f32 %v5507_v15  ;;  %v5204_v28 = vpop.f32.mrf.mxu0  ;;  %v5284_v40 = vmul.f32 %v13557_v6, %v5149_v63  ;;  %v5286_v23 = vmul.f32 %v13557_v6, %v5153_v41  ;;  %v5292_v53 = vmul.f32 %v13557_v6, %v13653_v50 }
 0x800   : > { %12133 = vrcp.f32 %v5514_v54  ;;  %v5382_v42 = vadd.f32 %v13504_v27, %v5305_v58  ;;  %v5205_v39 = vadd.f32 %v5204_v28, %v13636_v19  ;;  %v13742_v19 = vpop.f32.mrf.mxu1  ;;  %v5282_v36 = vmul.f32 %v13557_v6, %v5143_v11 }
 0x801   : > { %v12114_v17 = vpop.eup %12113  ;;  %12135 = vpow2.f32 %v10493_v38  ;;  %v5208_v47 = vpop.f32.mrf.mxu0  ;;  %v5365_v14 = vadd.f32 %v13571_v31, %v5288_v44  ;;  %v5367_v55 = vadd.f32 %v13571_v31, %v5290_v51  ;;  %v5363_v58 = vadd.f32 %v13571_v31, %v5286_v23 }
 0x802   : > { %v5515_v62 = vadd.f32 1.0, %v12114_v17  ;;  %v10494_v49 = vmul.f32 -1.442695, %v5382_v42  ;;  %v5307_v16 = vmul.f32 %v13493_v8, %v5205_v39  ;;  %v12116_v29 = vpop.eup %12115  ;;  %v13746_v32 = vadd.f32 %v5208_v47, %v13649_v20  ;;  %v13760_v38 = vpop.f32.mrf.mxu1 }
 0x803   : > { %v5210_v9 = vpop.f32.mrf.mxu0  ;;  %v12118_v0 = vpop.eup %12117  ;;  %v5369_v42 = vadd.f32 %v13571_v31, %v5292_v53  ;;  %v5294_v11 = vmul.f32 %v13557_v6, %v13661_v22  ;;  %v5606_v47 = vmul.f32 %v12116_v29, %v5363_v58  ;;  %v5357_v29 = vadd.f32 %v13571_v31, %v5280_v34 }
 0x804   : > { %12137 = vrcp.f32 %v5515_v62  ;;  %v5384_v48 = vadd.f32 %v13504_v27, %v5307_v16  ;;  %v5211_v45 = vadd.f32 %v5210_v9, %v13663_v10  ;;  %v5361_v10 = vadd.f32 %v13571_v31, %v5284_v40  ;;  %v13774_v23 = vpop.f32.mrf.mxu1 }
 0x805   : > { %v12120_v15 = vpop.eup %12119  ;;  %12139 = vpow2.f32 %v10494_v49  ;;  %v5212_v20 = vpop.f32.mrf.mxu0  ;;  %v5607_v63 = vmul.f32 %v12118_v0, %v5365_v14  ;;  %v5359_v40 = vadd.f32 %v13571_v31, %v5282_v36  ;;  %v5371_v36 = vadd.f32 %v13571_v31, %v5294_v11 }
 0x806   : > { %v12122_v3 = vpop.eup %12121  ;;  %v5516_v57 = vadd.f32 1.0, %v12120_v15  ;;  %v10495_v26 = vmul.f32 -1.442695, %v5384_v48  ;;  %v5309_v56 = vmul.f32 %v13493_v8, %v5211_v45  ;;  %v13757_v50 = vadd.f32 %v5212_v20, %v13677_v59 }
 0x807   : > { %v12124_v54 = vpop.eup %12123  ;;  %v5214_v30 = vpop.f32.mrf.mxu0  ;;  %v5608_v41 = vmul.f32 %v12122_v3, %v5367_v55  ;;  %v5296_v48 = vmul.f32 %v13557_v6, %v13675_v13 }
 0x808   : > { %v12126_v28 = vpop.eup %12125  ;;  %12141 = vrcp.f32 %v5516_v57  ;;  %v5386_v39 = vadd.f32 %v13504_v27, %v5309_v56  ;;  %v5215_v17 = vadd.f32 %v5214_v30, %v13687_v5  ;;  %v5604_v20 = vmul.f32 %v12124_v54, %v5359_v40  ;;  %v5041_v57 = vpop.f32.mrf.mxu1 }
 0x809   : > { %v12128_v59 = vpop.eup %12127  ;;  %12143 = vpow2.f32 %v10495_v26  ;;  %v13768_v44 = vpop.f32.mrf.mxu0  ;;  %v13770_v51 = vpack.c.bf16 %v5608_v41, %v5607_v63  ;;  %v5605_v5 = vmul.f32 %v12126_v28, %v5361_v10  ;;  %v5373_v58 = vadd.f32 %v13571_v31, %v5296_v48 }
 0x80a   : > { %v12130_v62 = vpop.eup %12129  ;;  %v10496_v49 = vmul.f32 -1.442695, %v5386_v39  ;;  %v5311_v16 = vmul.f32 %v13493_v8, %v5215_v17  ;;  %v5609_v0 = vmul.f32 %v12128_v59, %v5369_v42  ;;  %v5298_v54 = vmul.f32 %v13557_v6, %v13685_v21  ;;  %v13804_v39 = vpop.f32.mrf.mxu1 }
 0x80b   : > { %v5517_v9 = vadd.f32 1.0, %v12130_v62  ;;  %6026 = vmatpush1.bf16.msra.mxu0 %v13770_v51  ;;  %11209 = vmatpush1.bf16.msra.mxu1 %v13770_v51  ;;  %v13778_v22 = vpop.f32.mrf.mxu0  ;;  %v13789_v55 = vpack.c.bf16 %v5606_v47, %v5605_v5  ;;  %v5300_v62 = vmul.f32 %v13557_v6, %v13695_v1 }
 0x80c   : > { %v12132_v53 = vpop.eup %12131  ;;  %12145 = vpow2.f32 %v10496_v49  ;;  %v5388_v45 = vadd.f32 %v13504_v27, %v5311_v16  ;;  %6027 = vmatprep.subr.bf16.mxu0 %v15780_v25  ;;  %11194 = vmatprep.subr.bf16.mxu1 %v15780_v25  ;;  %v5375_v47 = vadd.f32 %v13571_v31, %v5298_v54 }
 0x80d   : > { %v12134_v15 = vpop.eup %12133  ;;  %12147 = vrcp.f32 %v5517_v9  ;;  %v13787_v14 = vpop.f32.mrf.mxu0  ;;  %v5603_v56 = vmul.f32 %v12132_v53, %v5357_v29 }
 0x80e   : > { %v12136_v34 = vpop.eup %12135  ;;  %v10497_v3 = vmul.f32 -1.442695, %v5388_v45  ;;  %v5610_v10 = vmul.f32 %v12134_v15, %v5371_v36  ;;  %v5047_v9 = vpop.f32.mrf.mxu1  ;;  %v5377_v45 = vadd.f32 %v13571_v31, %v5300_v62 }
 0x80f   : > { %v5518_v13 = vadd.f32 1.0, %v12136_v34  ;;  %6028 = vmatpush1.bf16.msra.mxu0 %v13789_v55  ;;  %11210 = vmatpush1.bf16.msra.mxu1 %v13789_v55  ;;  %v5224_v26 = vpop.f32.mrf.mxu0  ;;  %v13800_v41 = vpack.c.bf16 %v5604_v20, %v5603_v56  ;;  %v5221_v34 = vadd.f32 %v13778_v22, %v13705_v24 }
 0x810   : > { %12149 = vpow2.f32 %v10497_v3  ;;  %6029 = vmatprep.subr.bf16.mxu0 %v15780_v25  ;;  %11195 = vmatprep.subr.bf16.mxu1 %v15780_v25  ;;  %v13802_v28 = vpack.c.bf16 %v5610_v10, %v5609_v0  ;;  %v5225_v40 = vadd.f32 %v5224_v26, %v13727_v46  ;;  %v5302_v46 = vmul.f32 %v13557_v6, %v13703_v33 }
 0x811   : > { %v12138_v30 = vpop.eup %12137  ;;  %12151 = vrcp.f32 %v5518_v13  ;;  %v13798_v63 = vpop.f32.mrf.mxu0 }
 0x812   : > { %v12140_v42 = vpop.eup %12139  ;;  %v5611_v11 = vmul.f32 %v12138_v30, %v5373_v58  ;;  %v5315_v13 = vmul.f32 %v13493_v8, %v5225_v40  ;;  %v5379_v22 = vadd.f32 %v13571_v31, %v5302_v46 }
 0x813   : > { %v5519_v17 = vadd.f32 1.0, %v12140_v42  ;;  %6030 = vmatpush1.bf16.msra.mxu0 %v13800_v41  ;;  %11211 = vmatpush1.bf16.msra.mxu1 %v13800_v41  ;;  %v5230_v59 = vpop.f32.mrf.mxu0 }
 0x814   : > { %6031 = vmatprep.subr.bf16.mxu0 %v15780_v25  ;;  %11196 = vmatprep.subr.bf16.mxu1 %v15780_v25  ;;  %v5231_v0 = vadd.f32 %v5230_v59, %v13760_v38 }
 0x815   : > { %v12142_v21 = vpop.eup %12141  ;;  %v13813_v49 = vpop.f32.mrf.mxu0  ;;  %12153 = vrcp.f32 %v5519_v17  ;;  %v5313_v17 = vmul.f32 %v13493_v8, %v5221_v34 }
 0x816   : > { %v12144_v16 = vpop.eup %12143  ;;  %v5612_v29 = vmul.f32 %v12142_v21, %v5375_v47  ;;  %v5317_v26 = vmul.f32 %v13493_v8, %v5231_v0  ;;  %v5392_v21 = vadd.f32 %v13504_v27, %v5315_v13  ;;  %v5304_v0 = vmul.f32 %v13557_v6, %v13713_v52 }
 0x817   : > { %v5520_v5 = vadd.f32 1.0, %v12144_v16  ;;  %6032 = vmatpush1.bf16.msra.mxu0 %v13691_v35  ;;  %11212 = vmatpush1.bf16.msra.mxu1 %v13691_v35  ;;  %v5234_v53 = vpop.f32.mrf.mxu0 }
 0x818   : > { %v5235_v48 = vadd.f32 %v5234_v53, %v5041_v57  ;;  %6033 = vmatprep.subr.bf16.mxu0 %v15780_v25  ;;  %11197 = vmatprep.subr.bf16.mxu1 %v15780_v25  ;;  %v13826_v38 = vpack.c.bf16 %v5612_v29, %v5611_v11  ;;  %v13831_v57 = vpop.f32.mrf.mxu1  ;;  %v5394_v47 = vadd.f32 %v13504_v27, %v5317_v26 }
 0x819   : > { %v12146_v1 = vpop.eup %12145  ;;  %12155 = vrcp.f32 %v5520_v5  ;;  %v13824_v15 = vpop.f32.mrf.mxu0  ;;  %v5306_v53 = vmul.f32 %v13557_v6, %v13723_v37  ;;  %v5381_v37 = vadd.f32 %v13571_v31, %v5304_v0 }
 0x81a   : > { %v12148_v36 = vpop.eup %12147  ;;  %v5521_v20 = vadd.f32 1.0, %v12146_v1  ;;  %v5319_v3 = vmul.f32 %v13493_v8, %v5235_v48  ;;  %v5051_v11 = vpop.f32.mrf.mxu1  ;;  %v10500_v46 = vmul.f32 -1.442695, %v5394_v47 }
 0x81b   : > { %6034 = vmatpush1.bf16.msra.mxu0 %v13671_v4  ;;  %11213 = vmatpush1.bf16.msra.mxu1 %v13671_v4  ;;  %v5240_v33 = vpop.f32.mrf.mxu0  ;;  %v5613_v56 = vmul.f32 %v12148_v36, %v5377_v45  ;;  %v5390_v45 = vadd.f32 %v13504_v27, %v5313_v17 }
 0x81c   : > { %v5396_v10 = vadd.f32 %v13504_v27, %v5319_v3  ;;  %v5241_v58 = vadd.f32 %v5240_v33, %v5047_v9  ;;  %6035 = vmatprep.subr.bf16.mxu0 %v15780_v25  ;;  %11198 = vmatprep.subr.bf16.mxu1 %v15780_v25  ;;  %12157 = vrcp.f32 %v5521_v20  ;;  %v10499_v20 = vmul.f32 -1.442695, %v5392_v21 }
 0x81d   : > { %v12150_v24 = vpop.eup %12149  ;;  %v13841_v30 = vpop.f32.mrf.mxu0  ;;  %v10498_v13 = vmul.f32 -1.442695, %v5390_v45  ;;  %v5233_v45 = vadd.f32 %v13813_v49, %v13774_v23 }
 0x81e   : > { %v12152_v54 = vpop.eup %12151  ;;  %v5522_v42 = vadd.f32 1.0, %v12150_v24  ;;  %v5321_v59 = vmul.f32 %v13493_v8, %v5241_v58  ;;  %v10501_v40 = vmul.f32 -1.442695, %v5396_v10 }
 0x81f   : > { %6036 = vmatpush1.bf16.msra.mxu0 %v13646_v18  ;;  %11214 = vmatpush1.bf16.msra.mxu1 %v13646_v18  ;;  %v5244_v62 = vpop.f32.mrf.mxu0  ;;  %v5614_v16 = vmul.f32 %v12152_v54, %v5379_v22 }
 0x820   : > { %12159 = vrcp.f32 %v5522_v42  ;;  %v5398_v9 = vadd.f32 %v13504_v27, %v5321_v59  ;;  %v5245_v5 = vadd.f32 %v5244_v62, %v5051_v11  ;;  %6037 = vmatprep.subr.bf16.mxu0 %v15780_v25  ;;  %11199 = vmatprep.subr.bf16.mxu1 %v15780_v25 }
 0x821   : > { %v13856_v29 = vpack.c.bf16 %v5614_v16, %v5613_v56  ;;  %12161 = vpow2.f32 %v10501_v40  ;;  %v5310_v56 = vmul.f32 %v13557_v6, %v13757_v50 }
 0x822   : > { %v10502_v48 = vmul.f32 -1.442695, %v5398_v9  ;;  %v5323_v1 = vmul.f32 %v13493_v8, %v5245_v5  ;;  %v12154_v36 = vpop.eup %12153  ;;  %v5383_v8 = vadd.f32 %v13571_v31, %v5306_v53 }
 0x823   : > { %6038 = vmatpush1.bf16.msra.mxu0 %v13622_v43  ;;  %11215 = vmatpush1.bf16.msra.mxu1 %v13622_v43  ;;  %v5615_v26 = vmul.f32 %v12154_v36, %v5381_v37  ;;  %v5387_v22 = vadd.f32 %v13571_v31, %v5310_v56  ;;  %v5318_v37 = vmul.f32 %v13557_v6, %v5233_v45  ;;  %v11624_v45 = vld [vmem:[#allocation6 + $0x130] ss:$8 sps:$4 sm:$0xff]  }
 0x824   : > { %v5400_v52 = vadd.f32 %v13504_v27, %v5323_v1  ;;  %6039 = vmatprep.subr.bf16.mxu0 %v15780_v25  ;;  %11200 = vmatprep.subr.bf16.mxu1 %v15780_v25  ;;  %12163 = vpow2.f32 %v10502_v48  ;;  %v5308_v27 = vmul.f32 %v13557_v6, %v13746_v32  ;;  %v5239_v48 = vadd.f32 %v13824_v15, %v13804_v39 }
 0x825   : > { %12165 = vpow2.f32 %v10500_v46  ;;  %v5243_v1 = vadd.f32 %v13841_v30, %v13831_v57  ;;  %v5229_v46 = vadd.f32 %v13798_v63, %v13742_v19  ;;  %v5219_v57 = vadd.f32 %v13768_v44, %v13697_v2 }
 0x826   : > { %v12156_v34 = vpop.eup %12155  ;;  %v10503_v3 = vmul.f32 -1.442695, %v5400_v52  ;;  %12167 = vpow2.f32 %v10499_v20  ;;  %v5385_v24 = vadd.f32 %v13571_v31, %v5308_v27  ;;  %v5320_v36 = vmul.f32 %v13557_v6, %v5239_v48  ;;  %v11626_v48 = vld [vmem:[#allocation6 + $0x134] ss:$8 sps:$4 sm:$0xff]  }
 0x827   : > { %6040 = vmatpush1.bf16.msra.mxu0 %v13602_v7  ;;  %11216 = vmatpush1.bf16.msra.mxu1 %v13602_v7  ;;  %v5616_v33 = vmul.f32 %v12156_v34, %v5383_v8  ;;  %v5322_v20 = vmul.f32 %v13557_v6, %v5243_v1  ;;  %v5223_v52 = vadd.f32 %v13787_v14, %v13710_v12  ;;  %v11621_v1 = vld [vmem:[#allocation6 + $0x60] ss:$8 sps:$4 sm:$0xff]  }
 0x828   : > { %6041 = vmatprep.subr.bf16.mxu0 %v15780_v25  ;;  %11201 = vmatprep.subr.bf16.mxu1 %v15780_v25  ;;  %12169 = vpow2.f32 %v10503_v3  ;;  %v5316_v30 = vmul.f32 %v13557_v6, %v5229_v46  ;;  %v5397_v23 = vadd.f32 %v13571_v31, %v5320_v36  ;;  %v5395_v8 = vadd.f32 %v13571_v31, %v5318_v37  ;;  %v11629_v46 = vld [vmem:[#allocation6 + $0x74] ss:$8 sps:$4 sm:$0xff]   ;;  %v11632_v36 = vld [vmem:[#allocation6 + $0x144] ss:$8 sps:$4 sm:$0xff]  }
 0x829   : > { %v13875_v10 = vpack.c.bf16 %v5616_v33, %v5615_v26  ;;  %v12158_v58 = vpop.eup %12157  ;;  %12171 = vpow2.f32 %v10498_v13  ;;  %v5399_v19 = vadd.f32 %v13571_v31, %v5322_v20  ;;  %v5314_v49 = vmul.f32 %v13557_v6, %v5223_v52  ;;  %v11627_v20 = vld [vmem:[#allocation6 + $0x70] ss:$8 sps:$4 sm:$0xff]   ;;  %v11635_v52 = vld [vmem:[#allocation6 + $0x84] ss:$8 sps:$4 sm:$0xff]   ;;  %v11638_v37 = vld [vmem:[#allocation6 + $0x154] ss:$8 sps:$4 sm:$0xff]  }
 0x82a   : > { %v5617_v42 = vmul.f32 %v12158_v58, %v5385_v24  ;;  %v5312_v3 = vmul.f32 %v13557_v6, %v5219_v57  ;;  %v5393_v13 = vadd.f32 %v13571_v31, %v5316_v30  ;;  %v11641_v57 = vld [vmem:[#allocation6 + $0x94] ss:$8 sps:$4 sm:$0xff]   ;;  %v11644_v30 = vld [vmem:[#allocation6 + $0x164] ss:$8 sps:$4 sm:$0xff]  }
 0x82b   : > { %v5391_v33 = vadd.f32 %v13571_v31, %v5314_v49  ;;  %v11645_v49 = vld [vmem:[#allocation6 + $0xa0] ss:$8 sps:$4 sm:$0xff]  }
 0x82c   : > { %v5389_v6 = vadd.f32 %v13571_v31, %v5312_v3  ;;  %v11585_v31 = vld [vmem:[#allocation6] ss:$8 sps:$4 sm:$0xff]   ;;  %v11659_v3 = vld [vmem:[#allocation6 + $0xc4] ss:$8 sps:$4 sm:$0xff]  }
 0x82d   : > { %v12160_v54 = vpop.eup %12159 }
 0x82e   : > { %v5618_v32 = vmul.f32 %v12160_v54, %v5387_v22  ;;  %v12162_v50 = vpop.eup %12161 }
 0x82f   : > { %v5526_v47 = vadd.f32 1.0, %v12162_v50  ;;  %v11596_v50 = vld [vmem:[#allocation6 + $0xe4] ss:$8 sps:$4 sm:$0xff]  }
 0x830   : > { %v13879_v17 = vpack.c.bf16 %v5618_v32, %v5617_v42  ;;  %v11588_v42 = vld [vmem:[#allocation6 + $0xd0] ss:$8 sps:$4 sm:$0xff]   ;;  %v11593_v32 = vld [vmem:[#allocation6 + $0x14] ss:$8 sps:$4 sm:$0xff]  }
 0x831   : > { %v12164_v59 = vpop.eup %12163 }
 0x832   : > { %v5527_v11 = vadd.f32 1.0, %v12164_v59  ;;  %v12166_v21 = vpop.eup %12165  ;;  %v11591_v59 = vld [vmem:[#allocation6 + $0x10] ss:$8 sps:$4 sm:$0xff]  }
 0x833   : > { %v12168_v62 = vpop.eup %12167  ;;  %v5525_v40 = vadd.f32 1.0, %v12166_v21  ;;  %v11599_v21 = vld [vmem:[#allocation6 + $0x24] ss:$8 sps:$4 sm:$0xff]  }
 0x834   : > { %12173 = vrcp.f32 %v5527_v11  ;;  %v5524_v0 = vadd.f32 1.0, %v12168_v62  ;;  %v11594_v11 = vld [vmem:[#allocation6 + $0xe0] ss:$8 sps:$4 sm:$0xff]   ;;  %v11605_v62 = vld [vmem:[#allocation6 + $0x34] ss:$8 sps:$4 sm:$0xff]  }
 0x835   : > { %v12170_v16 = vpop.eup %12169  ;;  %12175 = vrcp.f32 %v5526_v47  ;;  %v11602_v47 = vld [vmem:[#allocation6 + $0xf4] ss:$8 sps:$4 sm:$0xff]  }
 0x836   : > { %v5528_v9 = vadd.f32 1.0, %v12170_v16  ;;  %v12172_v5 = vpop.eup %12171  ;;  %v11608_v16 = vld [vmem:[#allocation6 + $0x104] ss:$8 sps:$4 sm:$0xff]  }
 0x837   : > { %v5523_v53 = vadd.f32 1.0, %v12172_v5  ;;  %v11617_v5 = vld [vmem:[#allocation6 + $0x54] ss:$8 sps:$4 sm:$0xff]  }
 0x838   : > { %12177 = vrcp.f32 %v5528_v9  ;;  %v11614_v9 = vld [vmem:[#allocation6 + $0x114] ss:$8 sps:$4 sm:$0xff]  }
 0x839   : > { %12179 = vrcp.f32 %v5525_v40  ;;  %v11611_v40 = vld [vmem:[#allocation6 + $0x44] ss:$8 sps:$4 sm:$0xff]  }
 0x83a   : > { %12181 = vrcp.f32 %v5524_v0  ;;  %v11620_v0 = vld [vmem:[#allocation6 + $0x124] ss:$8 sps:$4 sm:$0xff]  }
 0x83b   : > { %12183 = vrcp.f32 %v5523_v53  ;;  %v11623_v53 = vld [vmem:[#allocation6 + $0x64] ss:$8 sps:$4 sm:$0xff]  }
 0x841   : > { %v12174_v39 = vpop.eup %12173 }
 0x842   : > { %v12176_v15 = vpop.eup %12175  ;;  %v5623_v34 = vmul.f32 %v12174_v39, %v5397_v23  ;;  %v11734_v39 = vld [vmem:[#allocation4 + $0x5f4] ss:$8 sps:$4 sm:$0xff]   ;;  %v11642_v23 = vld [vmem:[#allocation6 + $0x160] ss:$8 sps:$4 sm:$0xff]  }
 0x843   : > { %v5622_v2 = vmul.f32 %v12176_v15, %v5395_v8  ;;  %v11636_v15 = vld [vmem:[#allocation6 + $0x150] ss:$8 sps:$4 sm:$0xff]  }
 0x844   : > { %v11648_v8 = vld [vmem:[#allocation6 + $0x170] ss:$8 sps:$4 sm:$0xff]  }
 0x845   : > { %v12178_v63 = vpop.eup %12177 }
 0x846   : > { %v5624_v12 = vmul.f32 %v12178_v63, %v5399_v19  ;;  %v12180_v14 = vpop.eup %12179  ;;  %v11647_v19 = vld [vmem:[#allocation6 + $0xa4] ss:$8 sps:$4 sm:$0xff]   ;;  %v11650_v63 = vld [vmem:[#allocation6 + $0x174] ss:$8 sps:$4 sm:$0xff]  }
 0x847   : > { %v12182_v44 = vpop.eup %12181  ;;  %v5621_v27 = vmul.f32 %v12180_v14, %v5393_v13  ;;  %v11654_v14 = vld [vmem:[#allocation6 + $0x180] ss:$8 sps:$4 sm:$0xff]   ;;  %v11662_v13 = vld [vmem:[#allocation6 + $0x194] ss:$8 sps:$4 sm:$0xff]  }
 0x848   : > { %v13903_v26 = vpack.c.bf16 %v5624_v12, %v5623_v34  ;;  %v12184_v56 = vpop.eup %12183  ;;  %v5620_v24 = vmul.f32 %v12182_v44, %v5391_v33  ;;  %v11653_v34 = vld [vmem:[#allocation6 + $0xb4] ss:$8 sps:$4 sm:$0xff]   ;;  %v11651_v12 = vld [vmem:[#allocation6 + $0xb0] ss:$8 sps:$4 sm:$0xff]   ;;  %v11665_v44 = vld [vmem:[#allocation6 + $0x1a4] ss:$8 sps:$4 sm:$0xff]  }
 0x849   : > { %v13911_v58 = vpack.c.bf16 %v5622_v2, %v5621_v27  ;;  %v5619_v22 = vmul.f32 %v12184_v56, %v5389_v6  ;;  %v11660_v2 = vld [vmem:[#allocation6 + $0x190] ss:$8 sps:$4 sm:$0xff]   ;;  %v11668_v33 = vld [vmem:[#allocation6 + $0x204] ss:$8 sps:$4 sm:$0xff]   ;;  %v11663_v27 = vld [vmem:[#allocation6 + $0x1a0] ss:$8 sps:$4 sm:$0xff]  }
 0x84a   : > { %6042 = vmatpush2.bf16.msra.mxu0 %v13903_v26  ;;  %11217 = vmatpush2.bf16.msra.mxu1 %v13903_v26  ;;  %v11666_v56 = vld [vmem:[#allocation6 + $0x200] ss:$8 sps:$4 sm:$0xff]   ;;  %v11671_v6 = vld [vmem:[#allocation6 + $0x1b4] ss:$8 sps:$4 sm:$0xff]  }
 0x84b   : > { %6043 = vmatprep.subr.bf16.mxu0 %v15780_v25  ;;  %11202 = vmatprep.subr.bf16.mxu1 %v15780_v25  ;;  %v13917_v54 = vpack.c.bf16 %v5620_v24, %v5619_v22  ;;  %v11729_v24 = vld [vmem:[#allocation4 + $0x4f0] ss:$8 sps:$4 sm:$0xff]   ;;  %v11749_v22 = vld [vmem:[#allocation4 + $0x4e4] ss:$8 sps:$4 sm:$0xff]  }
 0x84e   : > { %6044 = vmatpush2.bf16.msra.mxu0 %v13911_v58  ;;  %11218 = vmatpush2.bf16.msra.mxu1 %v13911_v58 }
 0x84f   : > { %6045 = vmatprep.subr.bf16.mxu0 %v15780_v25  ;;  %11203 = vmatprep.subr.bf16.mxu1 %v15780_v25 }
 0x852   : > { %6046 = vmatpush2.bf16.msra.mxu0 %v13917_v54  ;;  %11219 = vmatpush2.bf16.msra.mxu1 %v13917_v54 }
 0x853   : > { %6047 = vmatprep.subr.bf16.mxu0 %v15780_v25  ;;  %11204 = vmatprep.subr.bf16.mxu1 %v15780_v25 }
 0x856   : > { %6048 = vmatpush2.bf16.msra.mxu0 %v13879_v17  ;;  %11220 = vmatpush2.bf16.msra.mxu1 %v13879_v17 }
 0x857   : > { %6049 = vmatprep.subr.bf16.mxu0 %v15780_v25  ;;  %11205 = vmatprep.subr.bf16.mxu1 %v15780_v25 }
 0x85a   : > { %6050 = vmatpush2.bf16.msra.mxu0 %v13875_v10  ;;  %11221 = vmatpush2.bf16.msra.mxu1 %v13875_v10 }
 0x85b   : > { %6051 = vmatprep.subr.bf16.mxu0 %v15780_v25  ;;  %11206 = vmatprep.subr.bf16.mxu1 %v15780_v25 }
 0x85e   : > { %6052 = vmatpush2.bf16.msra.mxu0 %v13856_v29  ;;  %11222 = vmatpush2.bf16.msra.mxu1 %v13856_v29 }
 0x85f   : > { %6053 = vmatprep.subr.bf16.mxu0 %v15780_v25  ;;  %11207 = vmatprep.subr.bf16.mxu1 %v15780_v25 }
 0x862   : > { %6054 = vmatpush2.bf16.msra.mxu0 %v13826_v38  ;;  %11223 = vmatpush2.bf16.msra.mxu1 %v13826_v38 }
 0x863   : > { %6055 = vmatprep.subr.bf16.mxu0 %v15780_v25  ;;  %11208 = vmatprep.subr.bf16.mxu1 %v15780_v25 }
 0x866   : > { %6056 = vmatpush2.bf16.msra.mxu0 %v13802_v28  ;;  %11224 = vmatpush2.bf16.msra.mxu1 %v13802_v28 }
 0x867   : > { %6699 = vmatprep.subr.bf16.mxu0 %v15780_v25  ;;  %7373 = vmatprep.subr.bf16.mxu1 %v15780_v25 }
 0x869   : > { %6058 = vmatmul.mubr.bf16.vlgmr.msra.gmra.mxu0 %v11585_v31  ;;  %6162 = vmatmul.mubr.bf16.vlgmr.msra.gmra.mxu1 %v11588_v42  ;;  %v11764_v31 = vld [vmem:[#allocation4 + $0x4d4] ss:$8 sps:$4 sm:$0xff]   ;;  %v11669_v42 = vld [vmem:[#allocation6 + $0x1b0] ss:$8 sps:$4 sm:$0xff]  }
 0x86a   : > { %6700 = vmatpush1.bf16.msra.mxu0 %v13770_v51  ;;  %7374 = vmatpush1.bf16.msra.mxu1 %v13770_v51  ;;  %v11597_v51 = vld [vmem:[#allocation6 + $0x20] ss:$8 sps:$4 sm:$0xff]  }
 0x86b   : > { %6701 = vmatprep.subr.bf16.mxu0 %v15780_v25  ;;  %7375 = vmatprep.subr.bf16.mxu1 %v15780_v25 }
 0x86c   : > { %6065 = vmatprep.mubr.bf16.mxu0 %v11593_v32  ;;  %6169 = vmatprep.mubr.bf16.mxu1 %v11596_v50  ;;  %v11672_v32 = vld [vmem:[#allocation6 + $0x210] ss:$8 sps:$4 sm:$0xff]   ;;  %v11677_v50 = vld [vmem:[#allocation6 + $0x1c4] ss:$8 sps:$4 sm:$0xff]  }
 0x86e   : > { %6702 = vmatpush1.bf16.msra.mxu0 %v13789_v55  ;;  %7376 = vmatpush1.bf16.msra.mxu1 %v13789_v55  ;;  %v11600_v55 = vld [vmem:[#allocation6 + $0xf0] ss:$8 sps:$4 sm:$0xff]  }
 0x86f   : > { %6703 = vmatprep.subr.bf16.mxu0 %v15780_v25  ;;  %7377 = vmatprep.subr.bf16.mxu1 %v15780_v25 }
 0x871   : > { %6066 = vmatmul.mubr.bf16.gmra.mxu0 %v11591_v59  ;;  %6170 = vmatmul.mubr.bf16.gmra.mxu1 %v11594_v11  ;;  %v11680_v59 = vld [vmem:[#allocation6 + $0x224] ss:$8 sps:$4 sm:$0xff]   ;;  %v11762_v11 = vld [vmem:[#allocation4 + $0x4d0] ss:$8 sps:$4 sm:$0xff]  }
 0x872   : > { %6704 = vmatpush1.bf16.msra.mxu0 %v13800_v41  ;;  %7378 = vmatpush1.bf16.msra.mxu1 %v13800_v41  ;;  %v11603_v41 = vld [vmem:[#allocation6 + $0x30] ss:$8 sps:$4 sm:$0xff]  }
 0x873   : > { %6705 = vmatprep.subr.bf16.mxu0 %v15780_v25  ;;  %7379 = vmatprep.subr.bf16.mxu1 %v15780_v25 }
 0x874   : > { %6073 = vmatprep.mubr.bf16.mxu0 %v11599_v21  ;;  %6177 = vmatprep.mubr.bf16.mxu1 %v11602_v47  ;;  %v11782_v21 = vld [vmem:[#allocation4 + $0x4c4] ss:$8 sps:$4 sm:$0xff]   ;;  %v11780_v47 = vld [vmem:[#allocation4 + $0x4c0] ss:$8 sps:$4 sm:$0xff]  }
 0x876   : > { %6706 = vmatpush1.bf16.msra.mxu0 %v13691_v35  ;;  %7380 = vmatpush1.bf16.msra.mxu1 %v13691_v35  ;;  %v11606_v35 = vld [vmem:[#allocation6 + $0x100] ss:$8 sps:$4 sm:$0xff]  }
 0x877   : > { %6707 = vmatprep.subr.bf16.mxu0 %v15780_v25  ;;  %7381 = vmatprep.subr.bf16.mxu1 %v15780_v25 }
 0x879   : > { %6074 = vmatmul.mubr.bf16.gmra.mxu0 %v11597_v51  ;;  %6178 = vmatmul.mubr.bf16.gmra.mxu1 %v11600_v55  ;;  %v11675_v51 = vld [vmem:[#allocation6 + $0x1c0] ss:$8 sps:$4 sm:$0xff]  }
 0x87a   : > { %6708 = vmatpush1.bf16.msra.mxu0 %v13671_v4  ;;  %7382 = vmatpush1.bf16.msra.mxu1 %v13671_v4  ;;  %v11609_v4 = vld [vmem:[#allocation6 + $0x40] ss:$8 sps:$4 sm:$0xff]  }
 0x87b   : > { %6709 = vmatprep.subr.bf16.mxu0 %v15780_v25  ;;  %7383 = vmatprep.subr.bf16.mxu1 %v15780_v25  ;;  %v11678_v55 = vld [vmem:[#allocation6 + $0x220] ss:$8 sps:$4 sm:$0xff]  }
 0x87c   : > { %6081 = vmatprep.mubr.bf16.mxu0 %v11605_v62  ;;  %6185 = vmatprep.mubr.bf16.mxu1 %v11608_v16  ;;  %v11683_v62 = vld [vmem:[#allocation6 + $0x1d4] ss:$8 sps:$4 sm:$0xff]  }
 0x87d   : > { %v11686_v16 = vld [vmem:[#allocation6 + $0x234] ss:$8 sps:$4 sm:$0xff]  }
 0x87e   : > { %6710 = vmatpush1.bf16.msra.mxu0 %v13646_v18  ;;  %7384 = vmatpush1.bf16.msra.mxu1 %v13646_v18  ;;  %v11612_v18 = vld [vmem:[#allocation6 + $0x110] ss:$8 sps:$4 sm:$0xff]  }
 0x87f   : > { %6711 = vmatprep.subr.bf16.mxu0 %v15780_v25  ;;  %7385 = vmatprep.subr.bf16.mxu1 %v15780_v25 }
 0x881   : > { %6082 = vmatmul.mubr.bf16.gmra.mxu0 %v11603_v41  ;;  %6186 = vmatmul.mubr.bf16.gmra.mxu1 %v11606_v35  ;;  %v11795_v41 = vld [vmem:[#allocation4 + $0x4b0] ss:$8 sps:$4 sm:$0xff]   ;;  %v11797_v35 = vld [vmem:[#allocation4 + $0x4b4] ss:$8 sps:$4 sm:$0xff]  }
 0x882   : > { %6712 = vmatpush1.bf16.msra.mxu0 %v13622_v43  ;;  %7386 = vmatpush1.bf16.msra.mxu1 %v13622_v43  ;;  %v11615_v43 = vld [vmem:[#allocation6 + $0x50] ss:$8 sps:$4 sm:$0xff]  }
 0x883   : > { %6713 = vmatprep.subr.bf16.mxu0 %v15780_v25  ;;  %7387 = vmatprep.subr.bf16.mxu1 %v15780_v25 }
 0x884   : > { %6089 = vmatprep.mubr.bf16.mxu0 %v11611_v40  ;;  %6193 = vmatprep.mubr.bf16.mxu1 %v11614_v9  ;;  %v11681_v40 = vld [vmem:[#allocation6 + $0x1d0] ss:$8 sps:$4 sm:$0xff]  }
 0x885   : > { %v11684_v9 = vld [vmem:[#allocation6 + $0x230] ss:$8 sps:$4 sm:$0xff]  }
 0x886   : > { %6714 = vmatpush1.bf16.msra.mxu0 %v13602_v7  ;;  %7388 = vmatpush1.bf16.msra.mxu1 %v13602_v7  ;;  %v11618_v7 = vld [vmem:[#allocation6 + $0x120] ss:$8 sps:$4 sm:$0xff]  }
 0x887   : > { %6715 = vmatprep.subr.bf16.mxu0 %v15780_v25  ;;  %7389 = vmatprep.subr.bf16.mxu1 %v15780_v25 }
 0x889   : > { %6090 = vmatmul.mubr.bf16.gmra.mxu0 %v11609_v4  ;;  %6194 = vmatmul.mubr.bf16.gmra.mxu1 %v11612_v18  ;;  %v11689_v4 = vld [vmem:[#allocation6 + $0x1e4] ss:$8 sps:$4 sm:$0xff]  }
 0x88a   : > { %6716 = vmatpush2.bf16.msra.mxu0 %v13903_v26  ;;  %7390 = vmatpush2.bf16.msra.mxu1 %v13903_v26  ;;  %v11657_v26 = vld [vmem:[#allocation6 + $0xc0] ss:$8 sps:$4 sm:$0xff]   ;;  %v11692_v18 = vld [vmem:[#allocation6 + $0x244] ss:$8 sps:$4 sm:$0xff]  }
 0x88b   : > { %6717 = vmatprep.subr.bf16.mxu0 %v15780_v25  ;;  %7391 = vmatprep.subr.bf16.mxu1 %v15780_v25 }
 0x88c   : > { %6097 = vmatprep.mubr.bf16.mxu0 %v11617_v5  ;;  %6201 = vmatprep.mubr.bf16.mxu1 %v11620_v0  ;;  %v11687_v5 = vld [vmem:[#allocation6 + $0x1e0] ss:$8 sps:$4 sm:$0xff]  }
 0x88d   : > { %v11690_v0 = vld [vmem:[#allocation6 + $0x240] ss:$8 sps:$4 sm:$0xff]  }
 0x88e   : > { %6718 = vmatpush2.bf16.msra.mxu0 %v13911_v58  ;;  %7392 = vmatpush2.bf16.msra.mxu1 %v13911_v58  ;;  %v11674_v58 = vld [vmem:[#allocation6 + $0x214] ss:$8 sps:$4 sm:$0xff]  }
 0x88f   : > { %6719 = vmatprep.subr.bf16.mxu0 %v15780_v25  ;;  %7393 = vmatprep.subr.bf16.mxu1 %v15780_v25 }
 0x891   : > { %6098 = vmatmul.mubr.bf16.gmra.mxu0 %v11615_v43  ;;  %6202 = vmatmul.mubr.bf16.gmra.mxu1 %v11618_v7  ;;  %v11695_v43 = vld [vmem:[#allocation6 + $0x1f4] ss:$8 sps:$4 sm:$0xff]  }
 0x892   : > { %6720 = vmatpush2.bf16.msra.mxu0 %v13917_v54  ;;  %7394 = vmatpush2.bf16.msra.mxu1 %v13917_v54  ;;  %v11747_v54 = vld [vmem:[#allocation4 + $0x4e0] ss:$8 sps:$4 sm:$0xff]   ;;  %v11698_v7 = vld [vmem:[#allocation6 + $0x254] ss:$8 sps:$4 sm:$0xff]  }
 0x893   : > { %6721 = vmatprep.subr.bf16.mxu0 %v15780_v25  ;;  %7395 = vmatprep.subr.bf16.mxu1 %v15780_v25 }
 0x894   : > { %6105 = vmatprep.mubr.bf16.mxu0 %v11623_v53  ;;  %6209 = vmatprep.mubr.bf16.mxu1 %v11626_v48  ;;  %v11813_v53 = vld [vmem:[#allocation4 + $0x4a0] ss:$8 sps:$4 sm:$0xff]   ;;  %v11815_v48 = vld [vmem:[#allocation4 + $0x4a4] ss:$8 sps:$4 sm:$0xff]  }
 0x896   : > { %6722 = vmatpush2.bf16.msra.mxu0 %v13879_v17  ;;  %7396 = vmatpush2.bf16.msra.mxu1 %v13879_v17  ;;  %v11630_v17 = vld [vmem:[#allocation6 + $0x140] ss:$8 sps:$4 sm:$0xff]  }
 0x897   : > { %6723 = vmatprep.subr.bf16.mxu0 %v15780_v25  ;;  %7397 = vmatprep.subr.bf16.mxu1 %v15780_v25 }
 0x899   : > { %6106 = vmatmul.mubr.bf16.gmra.mxu0 %v11621_v1  ;;  %6210 = vmatmul.mubr.bf16.gmra.mxu1 %v11624_v45  ;;  %v11693_v1 = vld [vmem:[#allocation6 + $0x1f0] ss:$8 sps:$4 sm:$0xff]  }
 0x89a   : > { %6724 = vmatpush2.bf16.msra.mxu0 %v13875_v10  ;;  %7398 = vmatpush2.bf16.msra.mxu1 %v13875_v10  ;;  %v11731_v10 = vld [vmem:[#allocation4 + $0x4f4] ss:$8 sps:$4 sm:$0xff]   ;;  %v11696_v45 = vld [vmem:[#allocation6 + $0x250] ss:$8 sps:$4 sm:$0xff]  }
 0x89b   : > { %6725 = vmatprep.subr.bf16.mxu0 %v15780_v25  ;;  %7399 = vmatprep.subr.bf16.mxu1 %v15780_v25 }
 0x89c   : > { %6113 = vmatprep.mubr.bf16.mxu0 %v11629_v46  ;;  %6217 = vmatprep.mubr.bf16.mxu1 %v11632_v36  ;;  %v11701_v46 = vld [vmem:[#allocation6 + $0x264] ss:$8 sps:$4 sm:$0xff]  }
 0x89d   : > { %v11704_v36 = vld [vmem:[#allocation6 + $0x404] ss:$8 sps:$4 sm:$0xff]  }
 0x89e   : > { %6726 = vmatpush2.bf16.msra.mxu0 %v13856_v29  ;;  %7400 = vmatpush2.bf16.msra.mxu1 %v13856_v29  ;;  %v11633_v29 = vld [vmem:[#allocation6 + $0x80] ss:$8 sps:$4 sm:$0xff]  }
 0x89f   : > { %6727 = vmatprep.subr.bf16.mxu0 %v15780_v25  ;;  %7401 = vmatprep.subr.bf16.mxu1 %v15780_v25 }
 0x8a1   : > { %6114 = vmatmul.mubr.bf16.gmra.mxu0 %v11627_v20  ;;  %6218 = vmatmul.mubr.bf16.gmra.mxu1 %v11630_v17  ;;  %v11699_v20 = vld [vmem:[#allocation6 + $0x260] ss:$8 sps:$4 sm:$0xff]  }
 0x8a2   : > { %6728 = vmatpush2.bf16.msra.mxu0 %v13826_v38  ;;  %7402 = vmatpush2.bf16.msra.mxu1 %v13826_v38  ;;  %v11639_v38 = vld [vmem:[#allocation6 + $0x90] ss:$8 sps:$4 sm:$0xff]   ;;  %v11702_v17 = vld [vmem:[#allocation6 + $0x400] ss:$8 sps:$4 sm:$0xff]  }
 0x8a3   : > { %6729 = vmatprep.subr.bf16.mxu0 %v15780_v25  ;;  %7403 = vmatprep.subr.bf16.mxu1 %v15780_v25  ;;  %v11825_v25 = vld [vmem:[#allocation6 + $0x500] ss:$8 sps:$4 sm:$0xff]  }
 0x8a4   : > { %6121 = vmatprep.mubr.bf16.mxu0 %v11635_v52  ;;  %6225 = vmatprep.mubr.bf16.mxu1 %v11638_v37  ;;  %v11707_v52 = vld [vmem:[#allocation6 + $0x274] ss:$8 sps:$4 sm:$0xff]  }
 0x8a5   : > { %v11710_v37 = vld [vmem:[#allocation6 + $0x414] ss:$8 sps:$4 sm:$0xff]  }
 0x8a6   : > { %6730 = vmatpush2.bf16.msra.mxu0 %v13802_v28  ;;  %7404 = vmatpush2.bf16.msra.mxu1 %v13802_v28  ;;  %v11656_v28 = vld [vmem:[#allocation6 + $0x184] ss:$8 sps:$4 sm:$0xff]  }
 0x8a7   : > { %8047 = vmatprep.subr.bf16.mxu0 %v11731_v10  ;;  %8400 = vmatprep.subr.bf16.mxu1 %v11734_v39  ;;  %v11732_v10 = vld [vmem:[#allocation4 + $0x5f0] ss:$8 sps:$4 sm:$0xff]   ;;  %v11767_v39 = vld [vmem:[#allocation4 + $0x5e4] ss:$8 sps:$4 sm:$0xff]  }
 0x8a9   : > { %6122 = vmatmul.mubr.bf16.gmra.mxu0 %v11633_v29  ;;  %6226 = vmatmul.mubr.bf16.gmra.mxu1 %v11636_v15  ;;  %v11828_v29 = vld [vmem:[#allocation4 + $0x490] ss:$8 sps:$4 sm:$0xff]   ;;  %v11830_v15 = vld [vmem:[#allocation4 + $0x494] ss:$8 sps:$4 sm:$0xff]  }
 0x8aa   : > { %6129 = vmatprep.mubr.bf16.mxu0 %v11641_v57  ;;  %6233 = vmatprep.mubr.bf16.mxu1 %v11644_v30  ;;  %v11765_v57 = vld [vmem:[#allocation4 + $0x5e0] ss:$8 sps:$4 sm:$0xff]   ;;  %v11800_v30 = vld [vmem:[#allocation4 + $0x5d4] ss:$8 sps:$4 sm:$0xff]  }
 0x8b1   : > { %6130 = vmatmul.mubr.bf16.gmra.mxu0 %v11639_v38  ;;  %6234 = vmatmul.mubr.bf16.gmra.mxu1 %v11642_v23  ;;  %v11705_v38 = vld [vmem:[#allocation6 + $0x270] ss:$8 sps:$4 sm:$0xff]  }
 0x8b2   : > { %6137 = vmatprep.mubr.bf16.mxu0 %v11647_v19  ;;  %6241 = vmatprep.mubr.bf16.mxu1 %v11650_v63  ;;  %v11708_v23 = vld [vmem:[#allocation6 + $0x410] ss:$8 sps:$4 sm:$0xff]   ;;  %v11713_v19 = vld [vmem:[#allocation6 + $0x284] ss:$8 sps:$4 sm:$0xff]  }
 0x8b3   : > { %v11716_v63 = vld [vmem:[#allocation6 + $0x424] ss:$8 sps:$4 sm:$0xff]  }
 0x8b9   : > { %6138 = vmatmul.mubr.bf16.gmra.mxu0 %v11645_v49  ;;  %6242 = vmatmul.mubr.bf16.gmra.mxu1 %v11648_v8  ;;  %v11798_v49 = vld [vmem:[#allocation4 + $0x5d0] ss:$8 sps:$4 sm:$0xff]   ;;  %v11833_v8 = vld [vmem:[#allocation4 + $0x5c4] ss:$8 sps:$4 sm:$0xff]  }
 0x8ba   : > { %6145 = vmatprep.mubr.bf16.mxu0 %v11653_v34  ;;  %6249 = vmatprep.mubr.bf16.mxu1 %v11656_v28  ;;  %v11831_v34 = vld [vmem:[#allocation4 + $0x5c0] ss:$8 sps:$4 sm:$0xff]  }
 0x8bb   : > { %v11711_v28 = vld [vmem:[#allocation6 + $0x280] ss:$8 sps:$4 sm:$0xff]  }
 0x8c1   : > { %6146 = vmatmul.mubr.bf16.gmra.mxu0 %v11651_v12  ;;  %6250 = vmatmul.mubr.bf16.gmra.mxu1 %v11654_v14  ;;  %v11714_v12 = vld [vmem:[#allocation6 + $0x420] ss:$8 sps:$4 sm:$0xff]   ;;  %v11719_v14 = vld [vmem:[#allocation6 + $0x294] ss:$8 sps:$4 sm:$0xff]  }
 0x8c2   : > { %6153 = vmatprep.mubr.bf16.mxu0 %v11659_v3  ;;  %6257 = vmatprep.mubr.bf16.mxu1 %v11662_v13  ;;  %v11722_v3 = vld [vmem:[#allocation6 + $0x434] ss:$8 sps:$4 sm:$0xff]   ;;  %v11846_v13 = vld [vmem:[#allocation4 + $0x480] ss:$8 sps:$4 sm:$0xff]  }
 0x8c9   : > { %6154 = vmatmul.mubr.bf16.gmra.mxu0 %v11657_v26  ;;  %6258 = vmatmul.mubr.bf16.gmra.mxu1 %v11660_v2  ;;  %v11848_v26 = vld [vmem:[#allocation4 + $0x484] ss:$8 sps:$4 sm:$0xff]   ;;  %v11717_v2 = vld [vmem:[#allocation6 + $0x290] ss:$8 sps:$4 sm:$0xff]  }
 0x8ca   : > { %6265 = vmatprep.mubr.bf16.mxu1 %v11665_v44  ;;  %6731 = vmatprep.mubr.bf16.mxu0 %v11668_v33  ;;  %v11720_v44 = vld [vmem:[#allocation6 + $0x430] ss:$8 sps:$4 sm:$0xff]   ;;  %v11725_v33 = vld [vmem:[#allocation6 + $0x2a4] ss:$8 sps:$4 sm:$0xff]  }
 0x8d1   : > { %6266 = vmatmul.mubr.bf16.gmra.mxu1 %v11663_v27  ;;  %6732 = vmatmul.mubr.bf16.vlgmr.msra.gmra.mxu0 %v11666_v56  ;;  %v11728_v27 = vld [vmem:[#allocation6 + $0x444] ss:$8 sps:$4 sm:$0xff]   ;;  %v11723_v56 = vld [vmem:[#allocation6 + $0x2a0] ss:$8 sps:$4 sm:$0xff]  }
 0x8d2   : > { %6273 = vmatprep.mubr.bf16.mxu1 %v11671_v6  ;;  %6739 = vmatprep.mubr.bf16.mxu0 %v11674_v58  ;;  %v11726_v6 = vld [vmem:[#allocation6 + $0x440] ss:$8 sps:$4 sm:$0xff]   ;;  %v11737_v58 = vld [vmem:[#allocation6 + $0x2b4] ss:$8 sps:$4 sm:$0xff]  }
 0x8d3   : > { %8048 = vmatpush1.bf16.msra.mxu0 %v11729_v24  ;;  %v11740_v24 = vld [vmem:[#allocation6 + $0x454] ss:$8 sps:$4 sm:$0xff]  }
 0x8d4   : > { %8049 = vmatprep.subr.bf16.mxu0 %v11749_v22  ;;  %v11861_v22 = vld [vmem:[#allocation4 + $0x570] ss:$8 sps:$4 sm:$0xff]  }
 0x8d7   : > { %8050 = vmatpush1.bf16.msra.mxu0 %v11747_v54  ;;  %v11863_v54 = vld [vmem:[#allocation4 + $0x574] ss:$8 sps:$4 sm:$0xff]  }
 0x8d8   : > { %8051 = vmatprep.subr.bf16.mxu0 %v11764_v31  ;;  %v11864_v31 = vld [vmem:[#allocation4 + $0x5b0] ss:$8 sps:$4 sm:$0xff]  }
 0x8d9   : > { %6274 = vmatmul.mubr.bf16.gmra.mxu1 %v11669_v42  ;;  %6740 = vmatmul.mubr.bf16.gmra.mxu0 %v11672_v32  ;;  %v11866_v42 = vld [vmem:[#allocation4 + $0x5b4] ss:$8 sps:$4 sm:$0xff]   ;;  %v11735_v32 = vld [vmem:[#allocation6 + $0x2b0] ss:$8 sps:$4 sm:$0xff]  }
 0x8da   : > { %6281 = vmatprep.mubr.bf16.mxu1 %v11677_v50  ;;  %6747 = vmatprep.mubr.bf16.mxu0 %v11680_v59  ;;  %v11738_v50 = vld [vmem:[#allocation6 + $0x450] ss:$8 sps:$4 sm:$0xff]   ;;  %v11743_v59 = vld [vmem:[#allocation6 + $0x2c4] ss:$8 sps:$4 sm:$0xff]  }
 0x8db   : > { %8052 = vmatpush1.bf16.msra.mxu0 %v11762_v11  ;;  %v11746_v11 = vld [vmem:[#allocation6 + $0x464] ss:$8 sps:$4 sm:$0xff]  }
 0x8dc   : > { %8053 = vmatprep.subr.bf16.mxu0 %v11782_v21 }
 0x8df   : > { %8054 = vmatpush1.bf16.msra.mxu0 %v11780_v47 }
 0x8e0   : > { %8055 = vmatprep.subr.bf16.mxu0 %v11797_v35  ;;  %v11744_v35 = vld [vmem:[#allocation6 + $0x460] ss:$8 sps:$4 sm:$0xff]  }
 0x8e1   : > { %6282 = vmatmul.mubr.bf16.gmra.mxu1 %v11675_v51  ;;  %6748 = vmatmul.mubr.bf16.gmra.mxu0 %v11678_v55 }
 0x8e2   : > { %6289 = vmatprep.mubr.bf16.mxu1 %v11683_v62  ;;  %6755 = vmatprep.mubr.bf16.mxu0 %v11686_v16 }
 0x8e3   : > { %8056 = vmatpush1.bf16.msra.mxu0 %v11795_v41  ;;  %v11741_v41 = vld [vmem:[#allocation6 + $0x2c0] ss:$8 sps:$4 sm:$0xff]  }
 0x8e4   : > { %8057 = vmatprep.subr.bf16.mxu0 %v11815_v48  ;;  %v11881_v48 = vld [vmem:[#allocation4 + $0x564] ss:$8 sps:$4 sm:$0xff]  }
 0x8e7   : > { %8058 = vmatpush1.bf16.msra.mxu0 %v11813_v53  ;;  %v11879_v53 = vld [vmem:[#allocation4 + $0x560] ss:$8 sps:$4 sm:$0xff]  }
 0x8e8   : > { %8059 = vmatprep.subr.bf16.mxu0 %v11830_v15 }
 0x8e9   : > { %6290 = vmatmul.mubr.bf16.gmra.mxu1 %v11681_v40  ;;  %6756 = vmatmul.mubr.bf16.gmra.mxu0 %v11684_v9  ;;  %v11827_v9 = vld [vmem:[#allocation6 + $0x504] ss:$8 sps:$4 sm:$0xff]   ;;  %v11840_v40 = vld [vmem:[#allocation6 + $0x380] ss:$8 sps:$4 sm:$0xff]  }
 0x8ea   : > { %6297 = vmatprep.mubr.bf16.mxu1 %v11689_v4  ;;  %6763 = vmatprep.mubr.bf16.mxu0 %v11692_v18  ;;  %v11752_v4 = vld [vmem:[#allocation6 + $0x2d4] ss:$8 sps:$4 sm:$0xff]  }
 0x8eb   : > { %8060 = vmatpush1.bf16.msra.mxu0 %v11828_v29  ;;  %v11755_v18 = vld [vmem:[#allocation6 + $0x474] ss:$8 sps:$4 sm:$0xff]  }
 0x8ec   : > { %8061 = vmatprep.subr.bf16.mxu0 %v11848_v26  ;;  %v11770_v26 = vld [vmem:[#allocation6 + $0x2f4] ss:$8 sps:$4 sm:$0xff]  }
 0x8ef   : > { %8062 = vmatpush1.bf16.msra.mxu0 %v11846_v13  ;;  %v11816_v13 = vld [vmem:[#allocation6 + $0x350] ss:$8 sps:$4 sm:$0xff]  }
 0x8f0   : > { %8063 = vmatprep.subr.bf16.mxu0 %v11863_v54 }
 0x8f1   : > { %6298 = vmatmul.mubr.bf16.gmra.mxu1 %v11687_v5  ;;  %6764 = vmatmul.mubr.bf16.gmra.mxu0 %v11690_v0 }
 0x8f2   : > { %6305 = vmatprep.mubr.bf16.mxu1 %v11695_v43  ;;  %6771 = vmatprep.mubr.bf16.mxu0 %v11698_v7 }
 0x8f3   : > { %8064 = vmatpush2.bf16.msra.mxu0 %v11861_v22  ;;  %v11905_v22 = vld [vmem:[#allocation4 + $0x5a4] ss:$8 sps:$4 sm:$0xff]  }
 0x8f4   : > { %8065 = vmatprep.subr.bf16.mxu0 %v11881_v48 }
 0x8f7   : > { %8066 = vmatpush2.bf16.msra.mxu0 %v11879_v53  ;;  %v11915_v53 = vld [vmem:[#allocation4 + $0x510] ss:$8 sps:$4 sm:$0xff]  }
 0x8f9   : > { %6306 = vmatmul.mubr.bf16.gmra.mxu1 %v11693_v1  ;;  %6772 = vmatmul.mubr.bf16.gmra.mxu0 %v11696_v45 }
 0x8fa   : > { %6779 = vmatprep.mubr.bf16.mxu0 %v11701_v46  ;;  %7405 = vmatprep.mubr.bf16.mxu1 %v11704_v36 }
 0x901   : > { %6780 = vmatmul.mubr.bf16.gmra.mxu0 %v11699_v20  ;;  %7406 = vmatmul.mubr.bf16.vlgmr.msra.gmra.mxu1 %v11702_v17  ;;  %v11750_v20 = vld [vmem:[#allocation6 + $0x2d0] ss:$8 sps:$4 sm:$0xff]  }
 0x902   : > { %6787 = vmatprep.mubr.bf16.mxu0 %v11707_v52  ;;  %7413 = vmatprep.mubr.bf16.mxu1 %v11710_v37  ;;  %v11753_v17 = vld [vmem:[#allocation6 + $0x470] ss:$8 sps:$4 sm:$0xff]   ;;  %v11824_v37 = vld [vmem:[#allocation6 + $0x364] ss:$8 sps:$4 sm:$0xff]  }
 0x903   : > { %8401 = vmatpush1.bf16.msra.mxu1 %v11732_v10  ;;  %v11758_v10 = vld [vmem:[#allocation6 + $0x2e4] ss:$8 sps:$4 sm:$0xff]  }
 0x904   : > { %8402 = vmatprep.subr.bf16.mxu1 %v11767_v39  ;;  %v11761_v39 = vld [vmem:[#allocation6 + $0x484] ss:$8 sps:$4 sm:$0xff]  }
 0x907   : > { %8403 = vmatpush1.bf16.msra.mxu1 %v11765_v57  ;;  %v11890_v57 = vld [vmem:[#allocation4 + $0x554] ss:$8 sps:$4 sm:$0xff]  }
 0x908   : > { %8404 = vmatprep.subr.bf16.mxu1 %v11800_v30  ;;  %v11888_v30 = vld [vmem:[#allocation4 + $0x550] ss:$8 sps:$4 sm:$0xff]   ;;  %8067 = vmatprep.subr.bf16.mxu0 %v11890_v57  ;;  %v11777_v57 = vld [vmem:[#allocation6 + $0x4a0] ss:$8 sps:$4 sm:$0xff]  }
 0x909   : > { %6788 = vmatmul.mubr.bf16.gmra.mxu0 %v11705_v38  ;;  %7414 = vmatmul.mubr.bf16.gmra.mxu1 %v11708_v23 }
 0x90a   : > { %6795 = vmatprep.mubr.bf16.mxu0 %v11713_v19  ;;  %7421 = vmatprep.mubr.bf16.mxu1 %v11716_v63 }
 0x90b   : > { %8405 = vmatpush1.bf16.msra.mxu1 %v11798_v49  ;;  %v11893_v49 = vld [vmem:[#allocation4 + $0x544] ss:$8 sps:$4 sm:$0xff]   ;;  %8068 = vmatpush2.bf16.msra.mxu0 %v11888_v30 }
 0x90c   : > { %8406 = vmatprep.subr.bf16.mxu1 %v11833_v8  ;;  %v11891_v8 = vld [vmem:[#allocation4 + $0x540] ss:$8 sps:$4 sm:$0xff]   ;;  %8069 = vmatprep.subr.bf16.mxu0 %v11893_v49  ;;  %v11788_v49 = vld [vmem:[#allocation6 + $0x4b4] ss:$8 sps:$4 sm:$0xff]  }
 0x90f   : > { %8407 = vmatpush1.bf16.msra.mxu1 %v11831_v34  ;;  %8070 = vmatpush2.bf16.msra.mxu0 %v11891_v8 }
 0x910   : > { %8408 = vmatprep.subr.bf16.mxu1 %v11866_v42  ;;  %v11908_v42 = vld [vmem:[#allocation4 + $0x524] ss:$8 sps:$4 sm:$0xff]  }
 0x911   : > { %6796 = vmatmul.mubr.bf16.gmra.mxu0 %v11711_v28  ;;  %7422 = vmatmul.mubr.bf16.gmra.mxu1 %v11714_v12  ;;  %v11756_v12 = vld [vmem:[#allocation6 + $0x2e0] ss:$8 sps:$4 sm:$0xff]  }
 0x912   : > { %6803 = vmatprep.mubr.bf16.mxu0 %v11719_v14  ;;  %7429 = vmatprep.mubr.bf16.mxu1 %v11722_v3  ;;  %v11759_v14 = vld [vmem:[#allocation6 + $0x480] ss:$8 sps:$4 sm:$0xff]   ;;  %v11845_v3 = vld [vmem:[#allocation6 + $0x524] ss:$8 sps:$4 sm:$0xff]  }
 0x913   : > { %8409 = vmatpush1.bf16.msra.mxu1 %v11864_v31 }
 0x914   : > { %8410 = vmatprep.subr.bf16.mxu1 %v11905_v22 }
 0x919   : > { %6804 = vmatmul.mubr.bf16.gmra.mxu0 %v11717_v2  ;;  %7430 = vmatmul.mubr.bf16.gmra.mxu1 %v11720_v44  ;;  %v11773_v2 = vld [vmem:[#allocation6 + $0x494] ss:$8 sps:$4 sm:$0xff]  }
 0x91a   : > { %6811 = vmatprep.mubr.bf16.mxu0 %v11725_v33  ;;  %7437 = vmatprep.mubr.bf16.mxu1 %v11728_v27  ;;  %v11902_v27 = vld [vmem:[#allocation4 + $0x534] ss:$8 sps:$4 sm:$0xff]  }
 0x91b   : > { %8071 = vmatprep.subr.bf16.mxu0 %v11902_v27 }
 0x921   : > { %6812 = vmatmul.mubr.bf16.gmra.mxu0 %v11723_v56  ;;  %7438 = vmatmul.mubr.bf16.gmra.mxu1 %v11726_v6  ;;  %v11900_v56 = vld [vmem:[#allocation4 + $0x530] ss:$8 sps:$4 sm:$0xff]  }
 0x922   : > { %6819 = vmatprep.mubr.bf16.mxu0 %v11737_v58  ;;  %7445 = vmatprep.mubr.bf16.mxu1 %v11740_v24  ;;  %v11903_v24 = vld [vmem:[#allocation4 + $0x5a0] ss:$8 sps:$4 sm:$0xff]  }
 0x923   : > { %8072 = vmatpush2.bf16.msra.mxu0 %v11900_v56  ;;  %8411 = vmatpush1.bf16.msra.mxu1 %v11903_v24  ;;  %v11783_v56 = vld [vmem:[#allocation6 + $0x310] ss:$8 sps:$4 sm:$0xff]  }
 0x924   : > { %8073 = vmatprep.subr.bf16.mxu0 %v11908_v42  ;;  %v11786_v24 = vld [vmem:[#allocation6 + $0x4b0] ss:$8 sps:$4 sm:$0xff]   ;;  %v11794_v42 = vld [vmem:[#allocation6 + $0x4c4] ss:$8 sps:$4 sm:$0xff]  }
 0x929   : > { %v14005_v21 = vpop.f32.mrf.mxu0  ;;  %v14007_v47 = vpop.f32.mrf.mxu1  ;;  %6820 = vmatmul.mubr.bf16.gmra.mxu0 %v11735_v32  ;;  %7446 = vmatmul.mubr.bf16.gmra.mxu1 %v11738_v50  ;;  %v11906_v32 = vld [vmem:[#allocation4 + $0x520] ss:$8 sps:$4 sm:$0xff]  }
 0x92a   : > { %6827 = vmatprep.mubr.bf16.mxu0 %v11743_v59  ;;  %7453 = vmatprep.mubr.bf16.mxu1 %v11746_v11  ;;  %v11768_v11 = vld [vmem:[#allocation6 + $0x2f0] ss:$8 sps:$4 sm:$0xff]  }
 0x92b   : > { %v6061_v51 = vpop.f32.mrf.mxu0  ;;  %v6165_v55 = vpop.f32.mrf.mxu1  ;;  %8074 = vmatpush2.bf16.msra.mxu0 %v11906_v32 }
 0x92c   : > { %v11771_v51 = vld [vmem:[#allocation6 + $0x490] ss:$8 sps:$4 sm:$0xff]  }
 0x92d   : > { %v14009_v62 = vpop.f32.mrf.mxu0  ;;  %v14011_v16 = vpop.f32.mrf.mxu1  ;;  %v11837_v55 = vld [vmem:[#allocation6 + $0x510] ss:$8 sps:$4 sm:$0xff]  }
 0x92f   : > { %v6064_v5 = vpop.f32.mrf.mxu0  ;;  %v6168_v0 = vpop.f32.mrf.mxu1 }
 0x930   : > { %v11917_v0 = vld [vmem:[#allocation4 + $0x514] ss:$8 sps:$4 sm:$0xff]  }
 0x931   : > { %v14017_v43 = vpop.f32.mrf.mxu0  ;;  %v14019_v7 = vpop.f32.mrf.mxu1  ;;  %6828 = vmatmul.mubr.bf16.gmra.mxu0 %v11741_v41  ;;  %7454 = vmatmul.mubr.bf16.gmra.mxu1 %v11744_v35  ;;  %v11776_v35 = vld [vmem:[#allocation6 + $0x304] ss:$8 sps:$4 sm:$0xff]  }
 0x932   : > { %6835 = vmatprep.mubr.bf16.mxu0 %v11752_v4  ;;  %7461 = vmatprep.mubr.bf16.mxu1 %v11755_v18  ;;  %v11779_v4 = vld [vmem:[#allocation6 + $0x4a4] ss:$8 sps:$4 sm:$0xff]  }
 0x933   : > { %v6069_v1 = vpop.f32.mrf.mxu0  ;;  %v6173_v45 = vpop.f32.mrf.mxu1  ;;  %8075 = vmatprep.subr.bf16.mxu0 %v11917_v0 }
 0x934   : > { %8076 = vmatpush2.bf16.msra.mxu0 %v11915_v53  ;;  %v11789_v53 = vld [vmem:[#allocation6 + $0x320] ss:$8 sps:$4 sm:$0xff]  }
 0x935   : > { %v14021_v46 = vpop.f32.mrf.mxu0  ;;  %v14023_v36 = vpop.f32.mrf.mxu1 }
 0x937   : > { %v6072_v29 = vpop.f32.mrf.mxu0  ;;  %v6176_v15 = vpop.f32.mrf.mxu1 }
 0x938   : > { %v11774_v15 = vld [vmem:[#allocation6 + $0x300] ss:$8 sps:$4 sm:$0xff]  }
 0x939   : > { %v14029_v38 = vpop.f32.mrf.mxu0  ;;  %v14031_v23 = vpop.f32.mrf.mxu1  ;;  %6836 = vmatmul.mubr.bf16.gmra.mxu0 %v11750_v20  ;;  %7462 = vmatmul.mubr.bf16.gmra.mxu1 %v11753_v17  ;;  %v11920_v17 = vld [vmem:[#allocation4 + $0x504] ss:$8 sps:$4 sm:$0xff]  }
 0x93a   : > { %6843 = vmatprep.mubr.bf16.mxu0 %v11758_v10  ;;  %7469 = vmatprep.mubr.bf16.mxu1 %v11761_v39  ;;  %v11918_v10 = vld [vmem:[#allocation4 + $0x500] ss:$8 sps:$4 sm:$0xff]  }
 0x93b   : > { %v6077_v19 = vpop.f32.mrf.mxu0  ;;  %v6181_v63 = vpop.f32.mrf.mxu1  ;;  %8077 = vmatprep.subr.bf16.mxu0 %v11920_v17  ;;  %v11818_v17 = vld [vmem:[#allocation6 + $0x354] ss:$8 sps:$4 sm:$0xff]  }
 0x93c   : > { %v11785_v63 = vld [vmem:[#allocation6 + $0x314] ss:$8 sps:$4 sm:$0xff]   ;;  %8078 = vmatpush2.bf16.msra.mxu0 %v11918_v10 }
 0x93d   : > { %v14033_v34 = vpop.f32.mrf.mxu0  ;;  %v14035_v28 = vpop.f32.mrf.mxu1  ;;  %v11803_v10 = vld [vmem:[#allocation6 + $0x334] ss:$8 sps:$4 sm:$0xff]  }
 0x93f   : > { %v6080_v44 = vpop.f32.mrf.mxu0  ;;  %v6184_v33 = vpop.f32.mrf.mxu1 }
 0x941   : > { %v14041_v6 = vpop.f32.mrf.mxu0  ;;  %v14043_v58 = vpop.f32.mrf.mxu1  ;;  %6844 = vmatmul.mubr.bf16.gmra.mxu0 %v11756_v12  ;;  %7470 = vmatmul.mubr.bf16.gmra.mxu1 %v11759_v14 }
 0x942   : > { %15823 = vst [vmem:[#allocation12_spill] sm:$0xff] %v14043_v58  ;;  %6851 = vmatprep.mubr.bf16.mxu0 %v11770_v26  ;;  %7477 = vmatprep.mubr.bf16.mxu1 %v11773_v2 }
 0x943   : > { %v6085_v54 = vpop.f32.mrf.mxu0  ;;  %v6189_v31 = vpop.f32.mrf.mxu1 }
 0x944   : > { %v11791_v31 = vld [vmem:[#allocation6 + $0x324] ss:$8 sps:$4 sm:$0xff]   ;;  %v11821_v54 = vld [vmem:[#allocation6 + $0x4f4] ss:$8 sps:$4 sm:$0xff]  }
 0x945   : > { %v14045_v50 = vpop.f32.mrf.mxu0  ;;  %v14047_v59 = vpop.f32.mrf.mxu1 }
 0x946   : > { %15824 = vst [vmem:[#allocation13_spill] sm:$0xff] %v14047_v59 }
 0x947   : > { %v6088_v18 = vpop.f32.mrf.mxu0  ;;  %v6192_v5 = vpop.f32.mrf.mxu1 }
 0x949   : > { %v14053_v48 = vpop.f32.mrf.mxu0  ;;  %v14055_v1 = vpop.f32.mrf.mxu1  ;;  %6852 = vmatmul.mubr.bf16.gmra.mxu0 %v11768_v11  ;;  %7478 = vmatmul.mubr.bf16.gmra.mxu1 %v11771_v51 }
 0x94a   : > { %15825 = vst [vmem:[#allocation14_spill] sm:$0xff] %v14055_v1  ;;  %6859 = vmatprep.mubr.bf16.mxu0 %v11776_v35  ;;  %7485 = vmatprep.mubr.bf16.mxu1 %v11779_v4  ;;  %v11921_v1 = vld [vmem:[#allocation6 + $0x5a0] ss:$8 sps:$4 sm:$0xff]  }
 0x94b   : > { %v6093_v45 = vpop.f32.mrf.mxu0  ;;  %v6197_v20 = vpop.f32.mrf.mxu1 }
 0x94c   : > { %v11792_v45 = vld [vmem:[#allocation6 + $0x4c0] ss:$8 sps:$4 sm:$0xff]  }
 0x94d   : > { %v14057_v39 = vpop.f32.mrf.mxu0  ;;  %v14059_v29 = vpop.f32.mrf.mxu1 }
 0x94e   : > { %15826 = vst [vmem:[#allocation15_spill] sm:$0xff] %v14059_v29 }
 0x94f   : > { %v6096_v8 = vpop.f32.mrf.mxu0  ;;  %v6200_v12 = vpop.f32.mrf.mxu1 }
 0x950   : > { %v11930_v12 = vld [vmem:[#allocation4 + $0x590] ss:$8 sps:$4 sm:$0xff]  }
 0x951   : > { %v14065_v14 = vpop.f32.mrf.mxu0  ;;  %v14067_v26 = vpop.f32.mrf.mxu1  ;;  %6860 = vmatmul.mubr.bf16.gmra.mxu0 %v11774_v15  ;;  %7486 = vmatmul.mubr.bf16.gmra.mxu1 %v11777_v57  ;;  %v11806_v15 = vld [vmem:[#allocation6 + $0x4d4] ss:$8 sps:$4 sm:$0xff]  }
 0x952   : > { %15827 = vst [vmem:[#allocation16_spill] sm:$0xff] %v14067_v26  ;;  %6867 = vmatprep.mubr.bf16.mxu0 %v11785_v63  ;;  %7493 = vmatprep.mubr.bf16.mxu1 %v11788_v49 }
 0x953   : > { %v6101_v2 = vpop.f32.mrf.mxu0  ;;  %v6205_v44 = vpop.f32.mrf.mxu1 }
 0x954   : > { %v11932_v2 = vld [vmem:[#allocation4 + $0x594] ss:$8 sps:$4 sm:$0xff]  }
 0x955   : > { %v14069_v33 = vpop.f32.mrf.mxu0  ;;  %v14071_v27 = vpop.f32.mrf.mxu1  ;;  %8412 = vmatprep.subr.bf16.mxu1 %v11932_v2 }
 0x956   : > { %15828 = vst [vmem:[#allocation17_spill] sm:$0xff] %v14071_v27  ;;  %8413 = vmatpush1.bf16.msra.mxu1 %v11930_v12 }
 0x957   : > { %v6104_v32 = vpop.f32.mrf.mxu0  ;;  %v6208_v11 = vpop.f32.mrf.mxu1 }
 0x958   : > { %v11804_v32 = vld [vmem:[#allocation6 + $0x4d0] ss:$8 sps:$4 sm:$0xff]   ;;  %v11942_v11 = vld [vmem:[#allocation4 + $0x580] ss:$8 sps:$4 sm:$0xff]  }
 0x959   : > { %v14077_v51 = vpop.f32.mrf.mxu0  ;;  %v14079_v35 = vpop.f32.mrf.mxu1  ;;  %6868 = vmatmul.mubr.bf16.gmra.mxu0 %v11783_v56  ;;  %7494 = vmatmul.mubr.bf16.gmra.mxu1 %v11786_v24 }
 0x95a   : > { %15829 = vst [vmem:[#allocation18_spill] sm:$0xff] %v14079_v35  ;;  %6875 = vmatprep.mubr.bf16.mxu0 %v11791_v31  ;;  %7501 = vmatprep.mubr.bf16.mxu1 %v11794_v42  ;;  %v11801_v42 = vld [vmem:[#allocation6 + $0x330] ss:$8 sps:$4 sm:$0xff]  }
 0x95b   : > { %v6109_v4 = vpop.f32.mrf.mxu0  ;;  %v6213_v18 = vpop.f32.mrf.mxu1 }
 0x95c   : > { %v11809_v18 = vld [vmem:[#allocation6 + $0x344] ss:$8 sps:$4 sm:$0xff]   ;;  %v11810_v4 = vld [vmem:[#allocation6 + $0x4e0] ss:$8 sps:$4 sm:$0xff]  }
 0x95d   : > { %v14081_v5 = vpop.f32.mrf.mxu0  ;;  %v14083_v0 = vpop.f32.mrf.mxu1 }
 0x95e   : > { %15830 = vst [vmem:[#allocation19_spill] sm:$0xff] %v14083_v0 }
 0x95f   : > { %v6112_v57 = vpop.f32.mrf.mxu0  ;;  %v6216_v63 = vpop.f32.mrf.mxu1 }
 0x961   : > { %v14089_v49 = vpop.f32.mrf.mxu0  ;;  %v14091_v8 = vpop.f32.mrf.mxu1  ;;  %6876 = vmatmul.mubr.bf16.gmra.mxu0 %v11789_v53  ;;  %7502 = vmatmul.mubr.bf16.gmra.mxu1 %v11792_v45  ;;  %v11812_v53 = vld [vmem:[#allocation6 + $0x4e4] ss:$8 sps:$4 sm:$0xff]  }
 0x962   : > { %15831 = vst [vmem:[#allocation20_spill] sm:$0xff] %v14091_v8  ;;  %6883 = vmatprep.mubr.bf16.mxu0 %v11803_v10  ;;  %7509 = vmatprep.mubr.bf16.mxu1 %v11806_v15 }
 0x963   : > { %v6117_v44 = vpop.f32.mrf.mxu0  ;;  %v6221_v56 = vpop.f32.mrf.mxu1 }
 0x964   : > { %v11807_v56 = vld [vmem:[#allocation6 + $0x340] ss:$8 sps:$4 sm:$0xff]  }
 0x965   : > { %v14093_v24 = vpop.f32.mrf.mxu0  ;;  %v14095_v31 = vpop.f32.mrf.mxu1 }
 0x966   : > { %15832 = vst [vmem:[#allocation21_spill] sm:$0xff] %v14095_v31 }
 0x967   : > { %v6120_v45 = vpop.f32.mrf.mxu0  ;;  %v6224_v10 = vpop.f32.mrf.mxu1 }
 0x968   : > { %v11819_v10 = vld [vmem:[#allocation6 + $0x4f0] ss:$8 sps:$4 sm:$0xff]   ;;  %v11944_v45 = vld [vmem:[#allocation4 + $0x584] ss:$8 sps:$4 sm:$0xff]  }
 0x969   : > { %v14101_v15 = vpop.f32.mrf.mxu0  ;;  %v14103_v57 = vpop.f32.mrf.mxu1  ;;  %6884 = vmatmul.mubr.bf16.gmra.mxu0 %v11801_v42  ;;  %7510 = vmatmul.mubr.bf16.gmra.mxu1 %v11804_v32 }
 0x96a   : > { %15833 = vst [vmem:[#allocation22_spill] sm:$0xff] %v14103_v57  ;;  %6891 = vmatprep.mubr.bf16.mxu0 %v11809_v18  ;;  %7517 = vmatprep.mubr.bf16.mxu1 %v11812_v53 }
 0x96b   : > { %v6125_v63 = vpop.f32.mrf.mxu0  ;;  %v6229_v12 = vpop.f32.mrf.mxu1  ;;  %8414 = vmatprep.subr.bf16.mxu1 %v11944_v45 }
 0x96c   : > { %8415 = vmatpush1.bf16.msra.mxu1 %v11942_v11 }
 0x96d   : > { %v14105_v2 = vpop.f32.mrf.mxu0  ;;  %v14107_v44 = vpop.f32.mrf.mxu1 }
 0x96e   : > { %15834 = vst [vmem:[#allocation23_spill] sm:$0xff] %v14107_v44 }
 0x96f   : > { %v6128_v42 = vpop.f32.mrf.mxu0  ;;  %v6232_v32 = vpop.f32.mrf.mxu1 }
 0x970   : > { %v11822_v32 = vld [vmem:[#allocation6 + $0x360] ss:$8 sps:$4 sm:$0xff]  }
 0x971   : > { %v14113_v18 = vpop.f32.mrf.mxu0  ;;  %v14115_v53 = vpop.f32.mrf.mxu1  ;;  %6892 = vmatmul.mubr.bf16.gmra.mxu0 %v11807_v56  ;;  %7518 = vmatmul.mubr.bf16.gmra.mxu1 %v11810_v4 }
 0x972   : > { %15835 = vst [vmem:[#allocation24_spill] sm:$0xff] %v14115_v53  ;;  %6899 = vmatprep.mubr.bf16.mxu0 %v11818_v17  ;;  %7525 = vmatprep.mubr.bf16.mxu1 %v11821_v54 }
 0x973   : > { %v6133_v63 = vpop.f32.mrf.mxu0  ;;  %v6237_v12 = vpop.f32.mrf.mxu1 }
 0x975   : > { %v14117_v19 = vpop.f32.mrf.mxu0  ;;  %v14119_v41 = vpop.f32.mrf.mxu1 }
 0x976   : > { %15836 = vst [vmem:[#allocation25_spill] sm:$0xff] %v14119_v41 }
 0x977   : > { %v6136_v56 = vpop.f32.mrf.mxu0  ;;  %v6240_v4 = vpop.f32.mrf.mxu1 }
 0x979   : > { %v14125_v17 = vpop.f32.mrf.mxu0  ;;  %v14127_v54 = vpop.f32.mrf.mxu1  ;;  %6900 = vmatmul.mubr.bf16.gmra.mxu0 %v11816_v13  ;;  %7526 = vmatmul.mubr.bf16.gmra.mxu1 %v11819_v10  ;;  %v11836_v10 = vld [vmem:[#allocation6 + $0x374] ss:$8 sps:$4 sm:$0xff]   ;;  %v11834_v13 = vld [vmem:[#allocation6 + $0x370] ss:$8 sps:$4 sm:$0xff]  }
 0x97a   : > { %15837 = vst [vmem:[#allocation26_spill] sm:$0xff] %v14127_v54  ;;  %6907 = vmatprep.mubr.bf16.mxu0 %v11824_v37  ;;  %7533 = vmatprep.mubr.bf16.mxu1 %v11827_v9  ;;  %v11839_v37 = vld [vmem:[#allocation6 + $0x514] ss:$8 sps:$4 sm:$0xff]  }
 0x97b   : > { %v6141_v63 = vpop.f32.mrf.mxu0  ;;  %v6245_v12 = vpop.f32.mrf.mxu1 }
 0x97d   : > { %v14129_v42 = vpop.f32.mrf.mxu0  ;;  %v14131_v20 = vpop.f32.mrf.mxu1 }
 0x97e   : > { %15838 = vst [vmem:[#allocation27_spill] sm:$0xff] %v14131_v20 }
 0x97f   : > { %v6144_v9 = vpop.f32.mrf.mxu0  ;;  %v6248_v4 = vpop.f32.mrf.mxu1 }
 0x980   : > { %v11842_v4 = vld [vmem:[#allocation6 + $0x384] ss:$8 sps:$4 sm:$0xff]   ;;  %v11843_v9 = vld [vmem:[#allocation6 + $0x520] ss:$8 sps:$4 sm:$0xff]  }
 0x981   : > { %v14137_v63 = vpop.f32.mrf.mxu0  ;;  %v14139_v12 = vpop.f32.mrf.mxu1  ;;  %6908 = vmatmul.mubr.bf16.gmra.mxu0 %v11822_v32  ;;  %7534 = vmatmul.mubr.bf16.gmra.mxu1 %v11825_v25 }
 0x982   : > { %15839 = vst [vmem:[#allocation28_spill] sm:$0xff] %v14139_v12  ;;  %6915 = vmatprep.mubr.bf16.mxu0 %v11836_v10  ;;  %7541 = vmatprep.mubr.bf16.mxu1 %v11839_v37 }
 0x983   : > { %v6149_v45 = vpop.f32.mrf.mxu0  ;;  %v6253_v22 = vpop.f32.mrf.mxu1 }
 0x985   : > { %v14141_v30 = vpop.f32.mrf.mxu0  ;;  %v14143_v56 = vpop.f32.mrf.mxu1 }
 0x986   : > { %15840 = vst [vmem:[#allocation29_spill] sm:$0xff] %v14143_v56  ;;  %v11849_v56 = vld [vmem:[#allocation6 + $0x390] ss:$8 sps:$4 sm:$0xff]  }
 0x987   : > { %v6152_v32 = vpop.f32.mrf.mxu0  ;;  %v6256_v25 = vpop.f32.mrf.mxu1 }
 0x988   : > { %v11852_v25 = vld [vmem:[#allocation6 + $0x530] ss:$8 sps:$4 sm:$0xff]  }
 0x989   : > { %v14149_v10 = vpop.f32.mrf.mxu0  ;;  %v14151_v37 = vpop.f32.mrf.mxu1  ;;  %6916 = vmatmul.mubr.bf16.gmra.mxu0 %v11834_v13  ;;  %7542 = vmatmul.mubr.bf16.gmra.mxu1 %v11837_v55 }
 0x98a   : > { %15841 = vst [vmem:[#allocation30_spill] sm:$0xff] %v14151_v37  ;;  %6923 = vmatprep.mubr.bf16.mxu0 %v11842_v4  ;;  %7549 = vmatprep.mubr.bf16.mxu1 %v11845_v3  ;;  %v11860_v37 = vld [vmem:[#allocation6 + $0x544] ss:$8 sps:$4 sm:$0xff]  }
 0x98b   : > { %v6157_v22 = vpop.f32.mrf.mxu0  ;;  %v6261_v45 = vpop.f32.mrf.mxu1 }
 0x98d   : > { %v14153_v52 = vpop.f32.mrf.mxu0  ;;  %v14155_v11 = vpop.f32.mrf.mxu1 }
 0x98e   : > { %15842 = vst [vmem:[#allocation31_spill] sm:$0xff] %v14155_v11 }
 0x98f   : > { %v6160_v13 = vpop.f32.mrf.mxu0  ;;  %v6264_v55 = vpop.f32.mrf.mxu1 }
 0x990   : > { %v11857_v55 = vld [vmem:[#allocation6 + $0x3a4] ss:$8 sps:$4 sm:$0xff]   ;;  %v11858_v13 = vld [vmem:[#allocation6 + $0x540] ss:$8 sps:$4 sm:$0xff]  }
 0x991   : > { %v14161_v4 = vpop.f32.mrf.mxu1  ;;  %v14163_v3 = vpop.f32.mrf.mxu0  ;;  %6924 = vmatmul.mubr.bf16.gmra.mxu0 %v11840_v40  ;;  %7550 = vmatmul.mubr.bf16.gmra.mxu1 %v11843_v9 }
 0x992   : > { %15843 = vst [vmem:[#allocation32_spill] sm:$0xff] %v14161_v4  ;;  %6931 = vmatprep.mubr.bf16.mxu0 %v11851_v60  ;;  %7557 = vmatprep.mubr.bf16.mxu1 %v11854_v61  ;;  %v11872_v4 = vld [vmem:[#allocation6 + $0x554] ss:$8 sps:$4 sm:$0xff]  }
 0x993   : > { %v6269_v22 = vpop.f32.mrf.mxu1  ;;  %v6735_v45 = vpop.f32.mrf.mxu0 }
 0x994   : > { %v11855_v45 = vld [vmem:[#allocation6 + $0x3a0] ss:$8 sps:$4 sm:$0xff]  }
 0x995   : > { %v14165_v12 = vpop.f32.mrf.mxu1  ;;  %v14167_v32 = vpop.f32.mrf.mxu0 }
 0x996   : > { %15844 = vst [vmem:[#allocation33_spill] sm:$0xff] %v14165_v12 }
 0x997   : > { %v6272_v11 = vpop.f32.mrf.mxu1  ;;  %v6738_v54 = vpop.f32.mrf.mxu0 }
 0x998   : > { %v11869_v54 = vld [vmem:[#allocation6 + $0x3b4] ss:$8 sps:$4 sm:$0xff]   ;;  %v11870_v11 = vld [vmem:[#allocation6 + $0x550] ss:$8 sps:$4 sm:$0xff]  }
 0x999   : > { %v14171_v20 = vpop.f32.mrf.mxu1  ;;  %v14173_v40 = vpop.f32.mrf.mxu0  ;;  %6932 = vmatmul.mubr.bf16.gmra.mxu0 %v11849_v56  ;;  %7558 = vmatmul.mubr.bf16.gmra.mxu1 %v11852_v25 }
 0x99a   : > { %15845 = vst [vmem:[#allocation34_spill] sm:$0xff] %v14171_v20  ;;  %6939 = vmatprep.mubr.bf16.mxu0 %v11857_v55  ;;  %7565 = vmatprep.mubr.bf16.mxu1 %v11860_v37  ;;  %v11878_v20 = vld [vmem:[#allocation6 + $0x564] ss:$8 sps:$4 sm:$0xff]  }
 0x99b   : > { %v6277_v60 = vpop.f32.mrf.mxu1  ;;  %v6743_v61 = vpop.f32.mrf.mxu0 }
 0x99c   : > { %v11867_v61 = vld [vmem:[#allocation6 + $0x3b0] ss:$8 sps:$4 sm:$0xff]  }
 0x99d   : > { %v14175_v9 = vpop.f32.mrf.mxu1  ;;  %v14177_v22 = vpop.f32.mrf.mxu0 }
 0x99e   : > { %15846 = vst [vmem:[#allocation35_spill] sm:$0xff] %v14175_v9 }
 0x99f   : > { %v6280_v12 = vpop.f32.mrf.mxu1  ;;  %v6746_v53 = vpop.f32.mrf.mxu0 }
 0x9a0   : > { %v11875_v53 = vld [vmem:[#allocation6 + $0x3c4] ss:$8 sps:$4 sm:$0xff]   ;;  %v11876_v12 = vld [vmem:[#allocation6 + $0x560] ss:$8 sps:$4 sm:$0xff]  }
 0x9a1   : > { %v14181_v41 = vpop.f32.mrf.mxu1  ;;  %v14183_v56 = vpop.f32.mrf.mxu0  ;;  %6940 = vmatmul.mubr.bf16.gmra.mxu0 %v11855_v45  ;;  %7566 = vmatmul.mubr.bf16.gmra.mxu1 %v11858_v13 }
 0x9a2   : > { %15847 = vst [vmem:[#allocation36_spill] sm:$0xff] %v14181_v41  ;;  %6947 = vmatprep.mubr.bf16.mxu0 %v11869_v54  ;;  %7573 = vmatprep.mubr.bf16.mxu1 %v11872_v4  ;;  %v11887_v41 = vld [vmem:[#allocation6 + $0x574] ss:$8 sps:$4 sm:$0xff]  }
 0x9a3   : > { %v6285_v37 = vpop.f32.mrf.mxu1  ;;  %v6751_v25 = vpop.f32.mrf.mxu0 }
 0x9a4   : > { %v11873_v25 = vld [vmem:[#allocation6 + $0x3c0] ss:$8 sps:$4 sm:$0xff]  }
 0x9a5   : > { %v14185_v55 = vpop.f32.mrf.mxu1  ;;  %v14187_v60 = vpop.f32.mrf.mxu0 }
 0x9a6   : > { %15848 = vst [vmem:[#allocation37_spill] sm:$0xff] %v14185_v55  ;;  %v7669_v58 = vpack.c.bf16 %v14187_v60, %v14183_v56 }
 0x9a7   : > { %v6288_v9 = vpop.f32.mrf.mxu1  ;;  %v6754_v57 = vpop.f32.mrf.mxu0 }
 0x9a8   : > { %v11884_v57 = vld [vmem:[#allocation6 + $0x3d4] ss:$8 sps:$4 sm:$0xff]   ;;  %v11885_v9 = vld [vmem:[#allocation6 + $0x570] ss:$8 sps:$4 sm:$0xff]  }
 0x9a9   : > { %v14191_v44 = vpop.f32.mrf.mxu1  ;;  %v14193_v13 = vpop.f32.mrf.mxu0  ;;  %6948 = vmatmul.mubr.bf16.gmra.mxu0 %v11867_v61  ;;  %7574 = vmatmul.mubr.bf16.gmra.mxu1 %v11870_v11 }
 0x9aa   : > { %15849 = vst [vmem:[#allocation38_spill] sm:$0xff] %v14191_v44  ;;  %6955 = vmatprep.mubr.bf16.mxu0 %v11875_v53  ;;  %7581 = vmatprep.mubr.bf16.mxu1 %v11878_v20  ;;  %v11899_v44 = vld [vmem:[#allocation6 + $0x584] ss:$8 sps:$4 sm:$0xff]  }
 0x9ab   : > { %v6293_v4 = vpop.f32.mrf.mxu1  ;;  %v6759_v45 = vpop.f32.mrf.mxu0 }
 0x9ac   : > { %v11882_v45 = vld [vmem:[#allocation6 + $0x3d0] ss:$8 sps:$4 sm:$0xff]  }
 0x9ad   : > { %v14195_v54 = vpop.f32.mrf.mxu1  ;;  %v14197_v37 = vpop.f32.mrf.mxu0 }
 0x9ae   : > { %15850 = vst [vmem:[#allocation39_spill] sm:$0xff] %v14195_v54 }
 0x9af   : > { %v6296_v55 = vpop.f32.mrf.mxu1  ;;  %v6762_v8 = vpop.f32.mrf.mxu0 }
 0x9b0   : > { %v11896_v8 = vld [vmem:[#allocation6 + $0x3e4] ss:$8 sps:$4 sm:$0xff]   ;;  %v11897_v55 = vld [vmem:[#allocation6 + $0x580] ss:$8 sps:$4 sm:$0xff]  }
 0x9b1   : > { %v14201_v31 = vpop.f32.mrf.mxu1  ;;  %v14203_v11 = vpop.f32.mrf.mxu0  ;;  %6956 = vmatmul.mubr.bf16.gmra.mxu0 %v11873_v25  ;;  %7582 = vmatmul.mubr.bf16.gmra.mxu1 %v11876_v12 }
 0x9b2   : > { %15851 = vst [vmem:[#allocation40_spill] sm:$0xff] %v14201_v31  ;;  %6963 = vmatprep.mubr.bf16.mxu0 %v11884_v57  ;;  %7589 = vmatprep.mubr.bf16.mxu1 %v11887_v41  ;;  %v11914_v31 = vld [vmem:[#allocation6 + $0x594] ss:$8 sps:$4 sm:$0xff]  }
 0x9b3   : > { %v6301_v20 = vpop.f32.mrf.mxu1  ;;  %v6767_v61 = vpop.f32.mrf.mxu0 }
 0x9b4   : > { %v11894_v61 = vld [vmem:[#allocation6 + $0x3e0] ss:$8 sps:$4 sm:$0xff]  }
 0x9b5   : > { %v14205_v53 = vpop.f32.mrf.mxu1  ;;  %v14207_v4 = vpop.f32.mrf.mxu0 }
 0x9b6   : > { %15852 = vst [vmem:[#allocation41_spill] sm:$0xff] %v14205_v53 }
 0x9b7   : > { %v6304_v54 = vpop.f32.mrf.mxu1  ;;  %v6770_v35 = vpop.f32.mrf.mxu0 }
 0x9b8   : > { %v11911_v35 = vld [vmem:[#allocation6 + $0x3f4] ss:$8 sps:$4 sm:$0xff]   ;;  %v11912_v54 = vld [vmem:[#allocation6 + $0x590] ss:$8 sps:$4 sm:$0xff]  }
 0x9b9   : > { %v14211_v0 = vpop.f32.mrf.mxu1  ;;  %v14213_v12 = vpop.f32.mrf.mxu0  ;;  %6964 = vmatmul.mubr.bf16.gmra.mxu0 %v11882_v45  ;;  %7590 = vmatmul.mubr.bf16.gmra.mxu1 %v11885_v9 }
 0x9ba   : > { %15853 = vst [vmem:[#allocation42_spill] sm:$0xff] %v14211_v0  ;;  %6971 = vmatprep.mubr.bf16.mxu0 %v11896_v8  ;;  %7597 = vmatprep.mubr.bf16.mxu1 %v11899_v44  ;;  %v11923_v0 = vld [vmem:[#allocation6 + $0x5a4] ss:$8 sps:$4 sm:$0xff]  }
 0x9bb   : > { %v6309_v41 = vpop.f32.mrf.mxu1  ;;  %v6775_v25 = vpop.f32.mrf.mxu0 }
 0x9bc   : > { %v11909_v25 = vld [vmem:[#allocation6 + $0x3f0] ss:$8 sps:$4 sm:$0xff]  }
 0x9bd   : > { %v14215_v57 = vpop.f32.mrf.mxu1  ;;  %v14217_v20 = vpop.f32.mrf.mxu0 }
 0x9be   : > { %15854 = vst [vmem:[#allocation43_spill] sm:$0xff] %v14215_v57 }
 0x9bf   : > { %v6312_v53 = vpop.f32.mrf.mxu1  ;;  %v6778_v26 = vpop.f32.mrf.mxu0 }
 0x9c0   : > { %v7663_v26 = vpack.c.bf16 %v14167_v32, %v14163_v3  ;;  %v7666_v32 = vpack.c.bf16 %v14177_v22, %v14173_v40 }
 0x9c1   : > { %v14221_v27 = vpop.f32.mrf.mxu0  ;;  %6972 = vmatmul.mubr.bf16.gmra.mxu0 %v11894_v61  ;;  %v14223_v9 = vpop.f32.mrf.mxu1  ;;  %7598 = vmatmul.mubr.bf16.gmra.mxu1 %v11897_v55 }
 0x9c2   : > { %6979 = vmatprep.mubr.bf16.mxu0 %v11911_v35  ;;  %7605 = vmatprep.mubr.bf16.mxu1 %v11914_v31 }
 0x9c3   : > { %v6783_v44 = vpop.f32.mrf.mxu0  ;;  %v7409_v45 = vpop.f32.mrf.mxu1 }
 0x9c5   : > { %v14225_v8 = vpop.f32.mrf.mxu0  ;;  %v14227_v41 = vpop.f32.mrf.mxu1 }
 0x9c7   : > { %v6786_v57 = vpop.f32.mrf.mxu0  ;;  %v7412_v53 = vpop.f32.mrf.mxu1 }
 0x9c8   : > { %v11926_v57 = vld [vmem:[#allocation6 + $0x5b4] ss:$8 sps:$4 sm:$0xff]  }
 0x9c9   : > { %v14231_v61 = vpop.f32.mrf.mxu0  ;;  %6980 = vmatmul.mubr.bf16.gmra.mxu0 %v11909_v25  ;;  %v14233_v55 = vpop.f32.mrf.mxu1  ;;  %7606 = vmatmul.mubr.bf16.gmra.mxu1 %v11912_v54 }
 0x9ca   : > { %7613 = vmatprep.mubr.bf16.mxu1 %v11923_v0  ;;  %8079 = vmatprep.mubr.bf16.mxu0 %v7663_v26  ;;  %v15855_v0 = vpack.c.bf16 %v14009_v62, %v14005_v21  ;;  %v15856_v21 = vpack.c.bf16 %v14021_v46, %v14017_v43  ;;  %v15857_v43 = vpack.c.bf16 %v14033_v34, %v14029_v38 }
 0x9cb   : > { %v6791_v31 = vpop.f32.mrf.mxu0  ;;  %v7417_v35 = vpop.f32.mrf.mxu1  ;;  %v15858_v38 = vpack.c.bf16 %v14045_v50, %v14041_v6  ;;  %v15859_v6 = vpack.c.bf16 %v14057_v39, %v14053_v48  ;;  %v15860_v48 = vpack.c.bf16 %v14069_v33, %v14065_v14  ;;  %v15861_v39 = vmov 0  }
 0x9cc   : > { %v15862_v33 = vpack.c.bf16 %v14081_v5, %v14077_v51 }
 0x9cd   : > { %v14235_v44 = vpop.f32.mrf.mxu0  ;;  %v14237_v45 = vpop.f32.mrf.mxu1 }
 0x9cf   : > { %v6794_v53 = vpop.f32.mrf.mxu0  ;;  %v7420_v29 = vpop.f32.mrf.mxu1 }
 0x9d0   : > { %v11924_v29 = vld [vmem:[#allocation6 + $0x5b0] ss:$8 sps:$4 sm:$0xff]   ;;  %v11929_v53 = vld [vmem:[#allocation6 + $0x5c4] ss:$8 sps:$4 sm:$0xff]  }
 0x9d1   : > { %v14241_v3 = vpop.f32.mrf.mxu0  ;;  %v14243_v25 = vpop.f32.mrf.mxu1  ;;  %7614 = vmatmul.mubr.bf16.gmra.mxu1 %v11921_v1  ;;  %8080 = vmatmul.mubr.bf16.vlgmr.msra.gmra.mxu0 %v15855_v0 }
 0x9d2   : > { %7621 = vmatprep.mubr.bf16.mxu1 %v11926_v57  ;;  %8089 = vmatprep.mubr.bf16.mxu0 %v7666_v32 }
 0x9d3   : > { %v6799_v54 = vpop.f32.mrf.mxu0  ;;  %v7425_v26 = vpop.f32.mrf.mxu1 }
 0x9d4   : > { %v11927_v54 = vld [vmem:[#allocation6 + $0x5c0] ss:$8 sps:$4 sm:$0xff]   ;;  %v11935_v26 = vld [vmem:[#allocation6 + $0x5d4] ss:$8 sps:$4 sm:$0xff]  }
 0x9d5   : > { %v14248_v31 = vpop.f32.mrf.mxu0  ;;  %v14250_v35 = vpop.f32.mrf.mxu1 }
 0x9d7   : > { %v6802_v40 = vpop.f32.mrf.mxu0  ;;  %v7428_v22 = vpop.f32.mrf.mxu1 }
 0x9d8   : > { %v7672_v40 = vpack.c.bf16 %v14197_v37, %v14193_v13 }
 0x9d9   : > { %v14254_v1 = vpop.f32.mrf.mxu0  ;;  %v14256_v59 = vpop.f32.mrf.mxu1  ;;  %7622 = vmatmul.mubr.bf16.gmra.mxu1 %v11924_v29  ;;  %8090 = vmatmul.mubr.bf16.gmra.mxu0 %v15856_v21 }
 0x9da   : > { %7629 = vmatprep.mubr.bf16.mxu1 %v11929_v53  ;;  %8099 = vmatprep.mubr.bf16.mxu0 %v7669_v58 }
 0x9db   : > { %v6807_v62 = vpop.f32.mrf.mxu0  ;;  %v7433_v57 = vpop.f32.mrf.mxu1 }
 0x9dc   : > { %v11933_v62 = vld [vmem:[#allocation6 + $0x5d0] ss:$8 sps:$4 sm:$0xff]   ;;  %v11938_v57 = vld [vmem:[#allocation6 + $0x5e4] ss:$8 sps:$4 sm:$0xff]  }
 0x9dd   : > { %v14261_v32 = vpop.f32.mrf.mxu0  ;;  %v14263_v0 = vpop.f32.mrf.mxu1 }
 0x9df   : > { %v6810_v56 = vpop.f32.mrf.mxu0  ;;  %v7436_v60 = vpop.f32.mrf.mxu1 }
 0x9e0   : > { %v7675_v56 = vpack.c.bf16 %v14207_v4, %v14203_v11 }
 0x9e1   : > { %v14267_v29 = vpop.f32.mrf.mxu0  ;;  %v14269_v22 = vpop.f32.mrf.mxu1  ;;  %7630 = vmatmul.mubr.bf16.gmra.mxu1 %v11927_v54  ;;  %8100 = vmatmul.mubr.bf16.gmra.mxu0 %v15857_v43 }
 0x9e2   : > { %7637 = vmatprep.mubr.bf16.mxu1 %v11935_v26  ;;  %8109 = vmatprep.mubr.bf16.mxu0 %v7672_v40 }
 0x9e3   : > { %v6815_v46 = vpop.f32.mrf.mxu0  ;;  %v7441_v58 = vpop.f32.mrf.mxu1 }
 0x9e4   : > { %v11936_v46 = vld [vmem:[#allocation6 + $0x5e0] ss:$8 sps:$4 sm:$0xff]   ;;  %v11941_v58 = vld [vmem:[#allocation6 + $0x5f4] ss:$8 sps:$4 sm:$0xff]  }
 0x9e5   : > { %v14274_v53 = vpop.f32.mrf.mxu0  ;;  %v14276_v21 = vpop.f32.mrf.mxu1 }
 0x9e7   : > { %v6818_v13 = vpop.f32.mrf.mxu0  ;;  %v7444_v37 = vpop.f32.mrf.mxu1 }
 0x9e8   : > { %v7678_v13 = vpack.c.bf16 %v14217_v20, %v14213_v12  ;;  %v7681_v20 = vpack.c.bf16 %v14225_v8, %v14221_v27  ;;  %v7664_v27 = vpack.c.bf16 %v14227_v41, %v14223_v9 }
 0x9e9   : > { %v14280_v54 = vpop.f32.mrf.mxu0  ;;  %v14282_v60 = vpop.f32.mrf.mxu1  ;;  %7638 = vmatmul.mubr.bf16.gmra.mxu1 %v11933_v62  ;;  %8110 = vmatmul.mubr.bf16.gmra.mxu0 %v15858_v38 }
 0x9ea   : > { %7645 = vmatprep.mubr.bf16.mxu1 %v11938_v57  ;;  %8119 = vmatprep.mubr.bf16.mxu0 %v7675_v56 }
 0x9eb   : > { %v6823_v34 = vpop.f32.mrf.mxu0  ;;  %v7449_v26 = vpop.f32.mrf.mxu1 }
 0x9ec   : > { %v11939_v34 = vld [vmem:[#allocation6 + $0x5f0] ss:$8 sps:$4 sm:$0xff]  }
 0x9ed   : > { %v14287_v40 = vpop.f32.mrf.mxu0  ;;  %v14289_v43 = vpop.f32.mrf.mxu1 }
 0x9ef   : > { %v6826_v11 = vpop.f32.mrf.mxu0  ;;  %v7452_v4 = vpop.f32.mrf.mxu1 }
 0x9f1   : > { %v14293_v62 = vpop.f32.mrf.mxu0  ;;  %v14295_v37 = vpop.f32.mrf.mxu1  ;;  %7646 = vmatmul.mubr.bf16.gmra.mxu1 %v11936_v46  ;;  %8120 = vmatmul.mubr.bf16.gmra.mxu0 %v15859_v6 }
 0x9f2   : > { %7653 = vmatprep.mubr.bf16.mxu1 %v11941_v58  ;;  %8129 = vmatprep.mubr.bf16.mxu0 %v7678_v13 }
 0x9f3   : > { %v6831_v50 = vpop.f32.mrf.mxu0  ;;  %v7457_v57 = vpop.f32.mrf.mxu1 }
 0x9f4   : > { %v7684_v57 = vpack.c.bf16 %v14235_v44, %v14231_v61  ;;  %v7667_v61 = vpack.c.bf16 %v14237_v45, %v14233_v55 }
 0x9f5   : > { %v14300_v56 = vpop.f32.mrf.mxu0  ;;  %v14302_v38 = vpop.f32.mrf.mxu1 }
 0x9f7   : > { %v6834_v26 = vpop.f32.mrf.mxu0  ;;  %v7460_v12 = vpop.f32.mrf.mxu1 }
 0x9f9   : > { %v14306_v11 = vpop.f32.mrf.mxu0  ;;  %v14308_v46 = vpop.f32.mrf.mxu1  ;;  %7654 = vmatmul.mubr.bf16.gmra.mxu1 %v11939_v34  ;;  %8130 = vmatmul.mubr.bf16.gmra.mxu0 %v15860_v48  ;;  %v7687_v48 = vpack.c.bf16 %v14248_v31, %v14241_v3  ;;  %v7670_v3 = vpack.c.bf16 %v14250_v35, %v14243_v25 }
 0x9fa   : > { %8139 = vmatprep.mubr.bf16.mxu0 %v7681_v20  ;;  %8432 = vmatprep.mubr.bf16.mxu1 %v15861_v39 }
 0x9fb   : > { %v6839_v58 = vpop.f32.mrf.mxu0  ;;  %v7465_v4 = vpop.f32.mrf.mxu1 }
 0x9fc   : > { %v15863_v58 = vpack.c.bf16 %v14093_v24, %v14089_v49 }
 0x9fd   : > { %v14314_v13 = vpop.f32.mrf.mxu0  ;;  %v14316_v6 = vpop.f32.mrf.mxu1 }
 0x9ff   : > { %v6842_v8 = vpop.f32.mrf.mxu0  ;;  %v7468_v50 = vpop.f32.mrf.mxu1 }
 0xa00   : > { %v7690_v50 = vpack.c.bf16 %v14261_v32, %v14254_v1  ;;  %v7673_v1 = vpack.c.bf16 %v14263_v0, %v14256_v59 }
 0xa01   : > { %v14322_v34 = vpop.f32.mrf.mxu0  ;;  %v14324_v14 = vpop.f32.mrf.mxu1  ;;  %8140 = vmatmul.mubr.bf16.gmra.mxu0 %v15862_v33  ;;  %8433 = vmatmul.mubr.bf16.vlgmr.msra.gmra.mxu1 %v7664_v27 }
 0xa02   : > { %8149 = vmatprep.mubr.bf16.mxu0 %v7684_v57  ;;  %8442 = vmatprep.mubr.bf16.mxu1 %v15861_v39  ;;  %v15864_v57 = vpack.c.bf16 %v14105_v2, %v14101_v15 }
 0xa03   : > { %v6847_v26 = vpop.f32.mrf.mxu0  ;;  %v7473_v12 = vpop.f32.mrf.mxu1 }
 0xa05   : > { %v14330_v9 = vpop.f32.mrf.mxu0  ;;  %v14332_v41 = vpop.f32.mrf.mxu1 }
 0xa07   : > { %v6850_v44 = vpop.f32.mrf.mxu0  ;;  %v7476_v20 = vpop.f32.mrf.mxu1 }
 0xa08   : > { %v15865_v44 = vpack.c.bf16 %v14117_v19, %v14113_v18 }
 0xa09   : > { %v14338_v51 = vpop.f32.mrf.mxu0  ;;  %v14340_v5 = vpop.f32.mrf.mxu1  ;;  %8150 = vmatmul.mubr.bf16.gmra.mxu0 %v15863_v58  ;;  %8443 = vmatmul.mubr.bf16.gmra.mxu1 %v7667_v61  ;;  %v7693_v61 = vpack.c.bf16 %v14274_v53, %v14267_v29  ;;  %v7676_v29 = vpack.c.bf16 %v14276_v21, %v14269_v22 }
 0xa0a   : > { %8159 = vmatprep.mubr.bf16.mxu0 %v7687_v48  ;;  %8452 = vmatprep.mubr.bf16.mxu1 %v15861_v39 }
 0xa0b   : > { %v6855_v4 = vpop.f32.mrf.mxu0  ;;  %v7481_v27 = vpop.f32.mrf.mxu1 }
 0xa0c   : > { %v7696_v4 = vpack.c.bf16 %v14287_v40, %v14280_v54  ;;  %v15866_v27 = vpack.c.bf16 %v14129_v42, %v14125_v17  ;;  %v7679_v54 = vpack.c.bf16 %v14289_v43, %v14282_v60 }
 0xa0d   : > { %v14346_v55 = vpop.f32.mrf.mxu0  ;;  %v14348_v45 = vpop.f32.mrf.mxu1 }
 0xa0f   : > { %v6858_v31 = vpop.f32.mrf.mxu0  ;;  %v7484_v8 = vpop.f32.mrf.mxu1 }
 0xa11   : > { %v14354_v49 = vpop.f32.mrf.mxu0  ;;  %v14356_v24 = vpop.f32.mrf.mxu1  ;;  %8160 = vmatmul.mubr.bf16.gmra.mxu0 %v15864_v57  ;;  %8453 = vmatmul.mubr.bf16.gmra.mxu1 %v7670_v3  ;;  %v15867_v57 = vpack.c.bf16 %v14141_v30, %v14137_v63 }
 0xa12   : > { %8169 = vmatprep.mubr.bf16.mxu0 %v7690_v50  ;;  %8462 = vmatprep.mubr.bf16.mxu1 %v15861_v39  ;;  %v7699_v50 = vpack.c.bf16 %v14300_v56, %v14293_v62  ;;  %v7682_v62 = vpack.c.bf16 %v14302_v38, %v14295_v37 }
 0xa13   : > { %v6863_v33 = vpop.f32.mrf.mxu0  ;;  %v7489_v26 = vpop.f32.mrf.mxu1 }
 0xa15   : > { %v14362_v25 = vpop.f32.mrf.mxu0  ;;  %v14364_v35 = vpop.f32.mrf.mxu1 }
 0xa17   : > { %v6866_v32 = vpop.f32.mrf.mxu0  ;;  %v7492_v12 = vpop.f32.mrf.mxu1 }
 0xa18   : > { %v7702_v32 = vpack.c.bf16 %v14314_v13, %v14306_v11  ;;  %v15868_v12 = vpack.c.bf16 %v14153_v52, %v14149_v10  ;;  %v7685_v11 = vpack.c.bf16 %v14316_v6, %v14308_v46 }
 0xa19   : > { %v14370_v15 = vpop.f32.mrf.mxu0  ;;  %v14372_v2 = vpop.f32.mrf.mxu1  ;;  %8170 = vmatmul.mubr.bf16.gmra.mxu0 %v15865_v44  ;;  %8463 = vmatmul.mubr.bf16.gmra.mxu1 %v7673_v1 }
 0xa1a   : > { %8179 = vmatprep.mubr.bf16.mxu0 %v7693_v61  ;;  %8472 = vmatprep.mubr.bf16.mxu1 %v15861_v39 }
 0xa1b   : > { %v6871_v20 = vpop.f32.mrf.mxu0  ;;  %v7497_v48 = vpop.f32.mrf.mxu1 }
 0xa1c   : > { %v7705_v48 = vpack.c.bf16 %v14330_v9, %v14322_v34  ;;  %v7688_v34 = vpack.c.bf16 %v14332_v41, %v14324_v14 }
 0xa1d   : > { %v14378_v59 = vpop.f32.mrf.mxu0  ;;  %v14380_v0 = vpop.f32.mrf.mxu1 }
 0xa1f   : > { %v6874_v53 = vpop.f32.mrf.mxu0  ;;  %v7500_v58 = vpop.f32.mrf.mxu1 }
 0xa21   : > { %v14386_v19 = vpop.f32.mrf.mxu0  ;;  %v14388_v18 = vpop.f32.mrf.mxu1  ;;  %8180 = vmatmul.mubr.bf16.gmra.mxu0 %v15866_v27  ;;  %8473 = vmatmul.mubr.bf16.gmra.mxu1 %v7676_v29  ;;  %v15869_v29 = vpack.c.bf16 %v14011_v16, %v14007_v47  ;;  %v7708_v27 = vpack.c.bf16 %v14346_v55, %v14338_v51  ;;  %v7691_v51 = vpack.c.bf16 %v14348_v45, %v14340_v5 }
 0xa22   : > { %8189 = vmatprep.mubr.bf16.mxu0 %v7696_v4  ;;  %8482 = vmatprep.mubr.bf16.mxu1 %v15861_v39 }
 0xa23   : > { %v6879_v3 = vpop.f32.mrf.mxu0  ;;  %v7505_v31 = vpop.f32.mrf.mxu1 }
 0xa24   : > { %v15870_v3 = vpack.c.bf16 %v14023_v36, %v14019_v7 }
 0xa25   : > { %v14394_v22 = vpop.f32.mrf.mxu0  ;;  %v14396_v21 = vpop.f32.mrf.mxu1 }
 0xa27   : > { %v6882_v40 = vpop.f32.mrf.mxu0  ;;  %v7508_v8 = vpop.f32.mrf.mxu1 }
 0xa28   : > { %v7711_v8 = vpack.c.bf16 %v14362_v25, %v14354_v49  ;;  %v7694_v49 = vpack.c.bf16 %v14364_v35, %v14356_v24 }
 0xa29   : > { %v14402_v42 = vpop.f32.mrf.mxu0  ;;  %v14404_v17 = vpop.f32.mrf.mxu1  ;;  %8190 = vmatmul.mubr.bf16.gmra.mxu0 %v15867_v57  ;;  %8483 = vmatmul.mubr.bf16.gmra.mxu1 %v7679_v54 }
 0xa2a   : > { %8199 = vmatprep.mubr.bf16.mxu0 %v7699_v50  ;;  %8492 = vmatprep.mubr.bf16.mxu1 %v15861_v39  ;;  %v15871_v50 = vpack.c.bf16 %v14035_v28, %v14031_v23 }
 0xa2b   : > { %v6887_v33 = vpop.f32.mrf.mxu0  ;;  %v7513_v26 = vpop.f32.mrf.mxu1 }
 0xa2d   : > { %v14410_v60 = vpop.f32.mrf.mxu0  ;;  %v14412_v43 = vpop.f32.mrf.mxu1 }
 0xa2f   : > { %v6890_v56 = vpop.f32.mrf.mxu0  ;;  %v7516_v1 = vpop.f32.mrf.mxu1 }
 0xa30   : > { %v15872_v56 = vld [vmem:[#allocation13_spill] sm:$0xff]  ;;  %v15873_v1 = vld [vmem:[#allocation12_spill] sm:$0xff] }
 0xa31   : > { %v14418_v30 = vpop.f32.mrf.mxu0  ;;  %v14420_v63 = vpop.f32.mrf.mxu1  ;;  %8200 = vmatmul.mubr.bf16.gmra.mxu0 %v15868_v12  ;;  %8493 = vmatmul.mubr.bf16.gmra.mxu1 %v7682_v62  ;;  %v7714_v62 = vpack.c.bf16 %v14378_v59, %v14370_v15  ;;  %v7697_v15 = vpack.c.bf16 %v14380_v0, %v14372_v2 }
 0xa32   : > { %8209 = vmatprep.mubr.bf16.mxu0 %v7702_v32  ;;  %8502 = vmatprep.mubr.bf16.mxu1 %v15861_v39  ;;  %v15874_v32 = vpack.c.bf16 %v15872_v56, %v15873_v1 }
 0xa33   : > { %v6895_v61 = vpop.f32.mrf.mxu0  ;;  %v7521_v44 = vpop.f32.mrf.mxu1 }
 0xa35   : > { %v14426_v37 = vpop.f32.mrf.mxu0  ;;  %v14428_v38 = vpop.f32.mrf.mxu1 }
 0xa37   : > { %v6898_v13 = vpop.f32.mrf.mxu0  ;;  %v7524_v20 = vpop.f32.mrf.mxu1 }
 0xa39   : > { %v14434_v52 = vpop.f32.mrf.mxu0  ;;  %v14436_v10 = vpop.f32.mrf.mxu1  ;;  %8210 = vmatmul.mubr.bf16.gmra.mxu0 %v15869_v29  ;;  %8503 = vmatmul.mubr.bf16.gmra.mxu1 %v7685_v11  ;;  %v7717_v11 = vpack.c.bf16 %v14394_v22, %v14386_v19  ;;  %v15876_v29 = vld [vmem:[#allocation14_spill] sm:$0xff]  ;;  %v7700_v19 = vpack.c.bf16 %v14396_v21, %v14388_v18 }
 0xa3a   : > { %8219 = vmatprep.mubr.bf16.mxu0 %v7705_v48  ;;  %8512 = vmatprep.mubr.bf16.mxu1 %v15861_v39  ;;  %v15875_v48 = vld [vmem:[#allocation15_spill] sm:$0xff] }
 0xa3b   : > { %v6903_v53 = vpop.f32.mrf.mxu0  ;;  %v7529_v58 = vpop.f32.mrf.mxu1 }
 0xa3c   : > { %v15877_v53 = vpack.c.bf16 %v15875_v48, %v15876_v29 }
 0xa3d   : > { %v14442_v46 = vpop.f32.mrf.mxu0  ;;  %v14444_v6 = vpop.f32.mrf.mxu1 }
 0xa3f   : > { %v6906_v9 = vpop.f32.mrf.mxu0  ;;  %v7532_v4 = vpop.f32.mrf.mxu1 }
 0xa40   : > { %v7720_v4 = vpack.c.bf16 %v14410_v60, %v14402_v42  ;;  %v7703_v42 = vpack.c.bf16 %v14412_v43, %v14404_v17 }
 0xa41   : > { %v14450_v47 = vpop.f32.mrf.mxu0  ;;  %v14452_v16 = vpop.f32.mrf.mxu1  ;;  %8220 = vmatmul.mubr.bf16.gmra.mxu0 %v15870_v3  ;;  %8513 = vmatmul.mubr.bf16.gmra.mxu1 %v7688_v34 }
 0xa42   : > { %8229 = vmatprep.mubr.bf16.mxu0 %v7708_v27  ;;  %8522 = vmatprep.mubr.bf16.mxu1 %v15861_v39 }
 0xa43   : > { %v6911_v31 = vpop.f32.mrf.mxu0  ;;  %v7537_v54 = vpop.f32.mrf.mxu1 }
 0xa44   : > { %v15878_v31 = vld [vmem:[#allocation17_spill] sm:$0xff]  ;;  %v15879_v54 = vld [vmem:[#allocation16_spill] sm:$0xff] }
 0xa45   : > { %v14458_v14 = vpop.f32.mrf.mxu0  ;;  %v14460_v41 = vpop.f32.mrf.mxu1 }
 0xa47   : > { %v6914_v55 = vpop.f32.mrf.mxu0  ;;  %v7540_v40 = vpop.f32.mrf.mxu1 }
 0xa49   : > { %v14466_v7 = vpop.f32.mrf.mxu0  ;;  %v14468_v36 = vpop.f32.mrf.mxu1  ;;  %8230 = vmatmul.mubr.bf16.gmra.mxu0 %v15871_v50  ;;  %8523 = vmatmul.mubr.bf16.gmra.mxu1 %v7691_v51  ;;  %v15880_v51 = vpack.c.bf16 %v15878_v31, %v15879_v54  ;;  %v7723_v50 = vpack.c.bf16 %v14426_v37, %v14418_v30  ;;  %v7706_v30 = vpack.c.bf16 %v14428_v38, %v14420_v63 }
 0xa4a   : > { %8239 = vmatprep.mubr.bf16.mxu0 %v7711_v8  ;;  %8532 = vmatprep.mubr.bf16.mxu1 %v15861_v39 }
 0xa4b   : > { %v6919_v57 = vpop.f32.mrf.mxu0  ;;  %v7545_v33 = vpop.f32.mrf.mxu1 }
 0xa4d   : > { %v14474_v5 = vpop.f32.mrf.mxu0  ;;  %v14476_v45 = vpop.f32.mrf.mxu1 }
 0xa4f   : > { %v6922_v25 = vpop.f32.mrf.mxu0  ;;  %v7548_v26 = vpop.f32.mrf.mxu1 }
 0xa50   : > { %v15882_v25 = vld [vmem:[#allocation18_spill] sm:$0xff] }
 0xa51   : > { %v14482_v23 = vpop.f32.mrf.mxu0  ;;  %v14484_v28 = vpop.f32.mrf.mxu1  ;;  %8240 = vmatmul.mubr.bf16.gmra.mxu0 %v15874_v32  ;;  %8533 = vmatmul.mubr.bf16.gmra.mxu1 %v7694_v49  ;;  %v15881_v49 = vld [vmem:[#allocation19_spill] sm:$0xff]  ;;  %v7726_v32 = vpack.c.bf16 %v14442_v46, %v14434_v52  ;;  %v7709_v52 = vpack.c.bf16 %v14444_v6, %v14436_v10 }
 0xa52   : > { %8249 = vmatprep.mubr.bf16.mxu0 %v7714_v62  ;;  %8542 = vmatprep.mubr.bf16.mxu1 %v15861_v39  ;;  %v15883_v26 = vpack.c.bf16 %v15881_v49, %v15882_v25 }
 0xa53   : > { %v6927_v12 = vpop.f32.mrf.mxu0  ;;  %v7553_v61 = vpop.f32.mrf.mxu1 }
 0xa55   : > { %v14490_v24 = vpop.f32.mrf.mxu0  ;;  %v14492_v35 = vpop.f32.mrf.mxu1 }
 0xa57   : > { %v6930_v59 = vpop.f32.mrf.mxu0  ;;  %v7556_v44 = vpop.f32.mrf.mxu1 }
 0xa58   : > { %v15885_v59 = vld [vmem:[#allocation20_spill] sm:$0xff] }
 0xa59   : > { %v14498_v13 = vpop.f32.mrf.mxu0  ;;  %v14500_v20 = vpop.f32.mrf.mxu1  ;;  %8250 = vmatmul.mubr.bf16.gmra.mxu0 %v15877_v53  ;;  %8543 = vmatmul.mubr.bf16.gmra.mxu1 %v7697_v15  ;;  %v15884_v15 = vld [vmem:[#allocation21_spill] sm:$0xff]  ;;  %v7729_v53 = vpack.c.bf16 %v14458_v14, %v14450_v47  ;;  %v7712_v47 = vpack.c.bf16 %v14460_v41, %v14452_v16 }
 0xa5a   : > { %8259 = vmatprep.mubr.bf16.mxu0 %v7717_v11  ;;  %8552 = vmatprep.mubr.bf16.mxu1 %v15861_v39  ;;  %v15886_v44 = vpack.c.bf16 %v15884_v15, %v15885_v59 }
 0xa5b   : > { %v6935_v58 = vpop.f32.mrf.mxu0  ;;  %v7561_v34 = vpop.f32.mrf.mxu1 }
 0xa5d   : > { %v14506_v2 = vpop.f32.mrf.mxu0  ;;  %v14508_v0 = vpop.f32.mrf.mxu1 }
 0xa5f   : > { %v6938_v22 = vpop.f32.mrf.mxu0  ;;  %v7564_v9 = vpop.f32.mrf.mxu1 }
 0xa60   : > { %v15888_v22 = vld [vmem:[#allocation22_spill] sm:$0xff] }
 0xa61   : > { %v14514_v27 = vpop.f32.mrf.mxu0  ;;  %v14516_v3 = vpop.f32.mrf.mxu1  ;;  %8260 = vmatmul.mubr.bf16.gmra.mxu0 %v15880_v51  ;;  %8553 = vmatmul.mubr.bf16.gmra.mxu1 %v7700_v19  ;;  %v15887_v19 = vld [vmem:[#allocation23_spill] sm:$0xff]  ;;  %v7732_v51 = vpack.c.bf16 %v14474_v5, %v14466_v7  ;;  %v7715_v7 = vpack.c.bf16 %v14476_v45, %v14468_v36 }
 0xa62   : > { %8269 = vmatprep.mubr.bf16.mxu0 %v7720_v4  ;;  %8562 = vmatprep.mubr.bf16.mxu1 %v15861_v39  ;;  %v15889_v9 = vpack.c.bf16 %v15887_v19, %v15888_v22 }
 0xa63   : > { %v6943_v55 = vpop.f32.mrf.mxu0  ;;  %v7569_v40 = vpop.f32.mrf.mxu1 }
 0xa65   : > { %v14522_v18 = vpop.f32.mrf.mxu0  ;;  %v14524_v21 = vpop.f32.mrf.mxu1 }
 0xa67   : > { %v6946_v60 = vpop.f32.mrf.mxu0  ;;  %v7572_v8 = vpop.f32.mrf.mxu1 }
 0xa68   : > { %v15891_v60 = vld [vmem:[#allocation24_spill] sm:$0xff] }
 0xa69   : > { %v14530_v57 = vpop.f32.mrf.mxu0  ;;  %v14532_v33 = vpop.f32.mrf.mxu1  ;;  %8270 = vmatmul.mubr.bf16.gmra.mxu0 %v15883_v26  ;;  %8563 = vmatmul.mubr.bf16.gmra.mxu1 %v7703_v42  ;;  %v15890_v42 = vld [vmem:[#allocation25_spill] sm:$0xff]  ;;  %v7735_v26 = vpack.c.bf16 %v14490_v24, %v14482_v23  ;;  %v7718_v23 = vpack.c.bf16 %v14492_v35, %v14484_v28 }
 0xa6a   : > { %8279 = vmatprep.mubr.bf16.mxu0 %v7723_v50  ;;  %8572 = vmatprep.mubr.bf16.mxu1 %v15861_v39  ;;  %v15892_v8 = vpack.c.bf16 %v15890_v42, %v15891_v60 }
 0xa6b   : > { %v6951_v62 = vpop.f32.mrf.mxu0  ;;  %v7577_v56 = vpop.f32.mrf.mxu1 }
 0xa6d   : > { %v14538_v17 = vpop.f32.mrf.mxu0  ;;  %v14540_v43 = vpop.f32.mrf.mxu1 }
 0xa6f   : > { %v6954_v37 = vpop.f32.mrf.mxu0  ;;  %v7580_v1 = vpop.f32.mrf.mxu1 }
 0xa70   : > { %v15894_v37 = vld [vmem:[#allocation26_spill] sm:$0xff] }
 0xa71   : > { %v14546_v12 = vpop.f32.mrf.mxu0  ;;  %v14548_v61 = vpop.f32.mrf.mxu1  ;;  %8280 = vmatmul.mubr.bf16.gmra.mxu0 %v15886_v44  ;;  %8573 = vmatmul.mubr.bf16.gmra.mxu1 %v7706_v30  ;;  %v15893_v30 = vld [vmem:[#allocation27_spill] sm:$0xff]  ;;  %v7738_v44 = vpack.c.bf16 %v14506_v2, %v14498_v13  ;;  %v7721_v13 = vpack.c.bf16 %v14508_v0, %v14500_v20 }
 0xa72   : > { %8289 = vmatprep.mubr.bf16.mxu0 %v7726_v32  ;;  %8582 = vmatprep.mubr.bf16.mxu1 %v15861_v39  ;;  %v15895_v1 = vpack.c.bf16 %v15893_v30, %v15894_v37 }
 0xa73   : > { %v6959_v11 = vpop.f32.mrf.mxu0  ;;  %v7585_v48 = vpop.f32.mrf.mxu1 }
 0xa75   : > { %v14554_v63 = vpop.f32.mrf.mxu0  ;;  %v14556_v38 = vpop.f32.mrf.mxu1 }
 0xa77   : > { %v6962_v46 = vpop.f32.mrf.mxu0  ;;  %v7588_v29 = vpop.f32.mrf.mxu1 }
 0xa78   : > { %v15897_v46 = vld [vmem:[#allocation28_spill] sm:$0xff] }
 0xa79   : > { %v14562_v58 = vpop.f32.mrf.mxu0  ;;  %v14564_v34 = vpop.f32.mrf.mxu1  ;;  %8290 = vmatmul.mubr.bf16.gmra.mxu0 %v15889_v9  ;;  %8583 = vmatmul.mubr.bf16.gmra.mxu1 %v7709_v52  ;;  %v15896_v52 = vld [vmem:[#allocation29_spill] sm:$0xff]  ;;  %v7741_v9 = vpack.c.bf16 %v14522_v18, %v14514_v27  ;;  %v7724_v27 = vpack.c.bf16 %v14524_v21, %v14516_v3 }
 0xa7a   : > { %8299 = vmatprep.mubr.bf16.mxu0 %v7729_v53  ;;  %8592 = vmatprep.mubr.bf16.mxu1 %v15861_v39  ;;  %v15898_v29 = vpack.c.bf16 %v15896_v52, %v15897_v46 }
 0xa7b   : > { %v6967_v4 = vpop.f32.mrf.mxu0  ;;  %v7593_v31 = vpop.f32.mrf.mxu1 }
 0xa7d   : > { %v14570_v10 = vpop.f32.mrf.mxu0  ;;  %v14572_v6 = vpop.f32.mrf.mxu1 }
 0xa7f   : > { %v6970_v14 = vpop.f32.mrf.mxu0  ;;  %v7596_v54 = vpop.f32.mrf.mxu1 }
 0xa80   : > { %v15900_v14 = vld [vmem:[#allocation30_spill] sm:$0xff] }
 0xa81   : > { %v14578_v55 = vpop.f32.mrf.mxu0  ;;  %v14580_v40 = vpop.f32.mrf.mxu1  ;;  %8300 = vmatmul.mubr.bf16.gmra.mxu0 %v15892_v8  ;;  %8593 = vmatmul.mubr.bf16.gmra.mxu1 %v7712_v47  ;;  %v15899_v47 = vld [vmem:[#allocation31_spill] sm:$0xff]  ;;  %v7744_v8 = vpack.c.bf16 %v14538_v17, %v14530_v57  ;;  %v7727_v57 = vpack.c.bf16 %v14540_v43, %v14532_v33 }
 0xa82   : > { %8309 = vmatprep.mubr.bf16.mxu0 %v7732_v51  ;;  %8602 = vmatprep.mubr.bf16.mxu1 %v15861_v39  ;;  %v15901_v54 = vpack.c.bf16 %v15899_v47, %v15900_v14 }
 0xa83   : > { %v6975_v50 = vpop.f32.mrf.mxu0  ;;  %v7601_v49 = vpop.f32.mrf.mxu1 }
 0xa85   : > { %v14586_v16 = vpop.f32.mrf.mxu0  ;;  %v14588_v41 = vpop.f32.mrf.mxu1 }
 0xa87   : > { %v6978_v5 = vpop.f32.mrf.mxu0  ;;  %v7604_v25 = vpop.f32.mrf.mxu1 }
 0xa88   : > { %v15903_v5 = vld [vmem:[#allocation32_spill] sm:$0xff] }
 0xa89   : > { %v14594_v62 = vpop.f32.mrf.mxu0  ;;  %v14596_v56 = vpop.f32.mrf.mxu1  ;;  %8310 = vmatmul.mubr.bf16.gmra.mxu0 %v15895_v1  ;;  %8603 = vmatmul.mubr.bf16.gmra.mxu1 %v7715_v7  ;;  %v15902_v7 = vld [vmem:[#allocation33_spill] sm:$0xff]  ;;  %v7747_v1 = vpack.c.bf16 %v14554_v63, %v14546_v12  ;;  %v7730_v12 = vpack.c.bf16 %v14556_v38, %v14548_v61 }
 0xa8a   : > { %8319 = vmatprep.mubr.bf16.mxu0 %v7735_v26  ;;  %8612 = vmatprep.mubr.bf16.mxu1 %v15861_v39  ;;  %v15904_v25 = vpack.c.bf16 %v15902_v7, %v15903_v5  ;;  %v15911_v7 = vld [vmem:[#allocation39_spill] sm:$0xff]  ;;  %v15912_v5 = vld [vmem:[#allocation38_spill] sm:$0xff] }
 0xa8b   : > { %v6983_v32 = vpop.f32.mrf.mxu0  ;;  %v7609_v15 = vpop.f32.mrf.mxu1 }
 0xa8d   : > { %v14602_v36 = vpop.f32.mrf.mxu0  ;;  %v14604_v45 = vpop.f32.mrf.mxu1 }
 0xa8f   : > { %v6986_v24 = vpop.f32.mrf.mxu0  ;;  %v7612_v59 = vpop.f32.mrf.mxu1 }
 0xa90   : > { %v15906_v24 = vld [vmem:[#allocation34_spill] sm:$0xff] }
 0xa91   : > { %v14610_v11 = vpop.f32.mrf.mxu1  ;;  %v14612_v48 = vpop.f32.mrf.mxu0  ;;  %8320 = vmatmul.mubr.bf16.gmra.mxu0 %v15898_v29  ;;  %8613 = vmatmul.mubr.bf16.gmra.mxu1 %v7718_v23  ;;  %v15905_v23 = vld [vmem:[#allocation35_spill] sm:$0xff]  ;;  %v7750_v29 = vpack.c.bf16 %v14570_v10, %v14562_v58  ;;  %v7733_v58 = vpack.c.bf16 %v14572_v6, %v14564_v34 }
 0xa92   : > { %8329 = vmatprep.mubr.bf16.mxu0 %v7738_v44  ;;  %8622 = vmatprep.mubr.bf16.mxu1 %v15861_v39  ;;  %v15907_v59 = vpack.c.bf16 %v15905_v23, %v15906_v24  ;;  %v15914_v24 = vld [vmem:[#allocation41_spill] sm:$0xff] }
 0xa93   : > { %v7617_v53 = vpop.f32.mrf.mxu1  ;;  %v14618_v19 = vpop.f32.mrf.mxu0 }
 0xa95   : > { %v14620_v28 = vpop.f32.mrf.mxu1  ;;  %v14622_v35 = vpop.f32.mrf.mxu0 }
 0xa97   : > { %v7620_v2 = vpop.f32.mrf.mxu1  ;;  %v14626_v22 = vpop.f32.mrf.mxu0 }
 0xa98   : > { %v15908_v2 = vld [vmem:[#allocation37_spill] sm:$0xff] }
 0xa99   : > { %v14630_v4 = vpop.f32.mrf.mxu1  ;;  %v14632_v31 = vpop.f32.mrf.mxu0  ;;  %8330 = vmatmul.mubr.bf16.gmra.mxu0 %v15901_v54  ;;  %8623 = vmatmul.mubr.bf16.gmra.mxu1 %v7721_v13 }
 0xa9a   : > { %8339 = vmatprep.mubr.bf16.mxu0 %v7741_v9  ;;  %8632 = vmatprep.mubr.bf16.mxu1 %v15861_v39  ;;  %v15909_v9 = vld [vmem:[#allocation36_spill] sm:$0xff] }
 0xa9b   : > { %v7625_v51 = vpop.f32.mrf.mxu1  ;;  %v14638_v20 = vpop.f32.mrf.mxu0  ;;  %v15910_v47 = vpack.c.bf16 %v15908_v2, %v15909_v9 }
 0xa9d   : > { %v14640_v0 = vpop.f32.mrf.mxu1  ;;  %v14642_v42 = vpop.f32.mrf.mxu0 }
 0xa9f   : > { %v7628_v18 = vpop.f32.mrf.mxu1  ;;  %v14646_v60 = vpop.f32.mrf.mxu0 }
 0xaa1   : > { %v14650_v50 = vpop.f32.mrf.mxu1  ;;  %v14652_v49 = vpop.f32.mrf.mxu0  ;;  %8340 = vmatmul.mubr.bf16.gmra.mxu0 %v15904_v25  ;;  %8633 = vmatmul.mubr.bf16.gmra.mxu1 %v7724_v27  ;;  %v7753_v27 = vpack.c.bf16 %v14586_v16, %v14578_v55  ;;  %v15913_v25 = vpack.c.bf16 %v15911_v7, %v15912_v5  ;;  %v7736_v55 = vpack.c.bf16 %v14588_v41, %v14580_v40  ;;  %v15917_v40 = vld [vmem:[#allocation11_spill] sm:$0xff] }
 0xaa2   : > { %8349 = vmatprep.mubr.bf16.mxu0 %v7744_v8  ;;  %8642 = vmatprep.mubr.bf16.mxu1 %v15861_v39 }
 0xaa3   : > { %v7633_v26 = vpop.f32.mrf.mxu1  ;;  %v14658_v3 = vpop.f32.mrf.mxu0 }
 0xaa5   : > { %v14660_v21 = vpop.f32.mrf.mxu1  ;;  %v14662_v30 = vpop.f32.mrf.mxu0 }
 0xaa7   : > { %v7636_v17 = vpop.f32.mrf.mxu1  ;;  %v14666_v37 = vpop.f32.mrf.mxu0 }
 0xaa9   : > { %v14670_v32 = vpop.f32.mrf.mxu1  ;;  %v14672_v15 = vpop.f32.mrf.mxu0  ;;  %8350 = vmatmul.mubr.bf16.gmra.mxu0 %v15907_v59  ;;  %8643 = vmatmul.mubr.bf16.gmra.mxu1 %v7727_v57  ;;  %v15915_v59 = vld [vmem:[#allocation40_spill] sm:$0xff] }
 0xaaa   : > { %8359 = vmatprep.mubr.bf16.mxu0 %v7747_v1  ;;  %8652 = vmatprep.mubr.bf16.mxu1 %v15861_v39  ;;  %v7756_v1 = vpack.c.bf16 %v14602_v36, %v14594_v62  ;;  %v14750_v62 = vld [vmem:[%s15774_s6 + $0x6] sm:$0x3] }
 0xaab   : > { %v7641_v44 = vpop.f32.mrf.mxu1  ;;  %v14678_v33 = vpop.f32.mrf.mxu0  ;;  %v14757_v9 = vrot.slane %v14750_v62, %v15917_v40 }
 0xaac   : > { %v15916_v44 = vpack.c.bf16 %v15914_v24, %v15915_v59 }
 0xaad   : > { %v14680_v43 = vpop.f32.mrf.mxu1  ;;  %v14682_v52 = vpop.f32.mrf.mxu0 }
 0xaaf   : > { %v7644_v63 = vpop.f32.mrf.mxu1  ;;  %v14686_v46 = vpop.f32.mrf.mxu0 }
 0xab0   : > { %v14740_v63 = vld [vmem:[%s15773_s5 + $0x6] sm:$0x3] }
 0xab1   : > { %v14690_v53 = vpop.f32.mrf.mxu1  ;;  %v14692_v13 = vpop.f32.mrf.mxu0  ;;  %8360 = vmatmul.mubr.bf16.gmra.mxu0 %v15910_v47  ;;  %8653 = vmatmul.mubr.bf16.gmra.mxu1 %v7730_v12  ;;  %v14744_v41 = vrot.slane %v14740_v63, %v15917_v40 }
 0xab2   : > { %8369 = vmatprep.mubr.bf16.mxu0 %v7750_v29  ;;  %8662 = vmatprep.mubr.bf16.mxu1 %v15861_v39 }
 0xab3   : > { %v7649_v14 = vpop.f32.mrf.mxu1  ;;  %v14698_v61 = vpop.f32.mrf.mxu0 }
 0xab5   : > { %v14700_v38 = vpop.f32.mrf.mxu1  ;;  %v14702_v54 = vpop.f32.mrf.mxu0 }
 0xab7   : > { %v7652_v10 = vpop.f32.mrf.mxu1  ;;  %v14706_v51 = vpop.f32.mrf.mxu0 }
 0xab8   : > { %v7739_v10 = vpack.c.bf16 %v14604_v45, %v14596_v56 }
 0xab9   : > { %v14710_v18 = vpop.f32.mrf.mxu1  ;;  %v14712_v8 = vpop.f32.mrf.mxu0  ;;  %8370 = vmatmul.mubr.bf16.gmra.mxu0 %v15913_v25  ;;  %8663 = vmatmul.mubr.bf16.gmra.mxu1 %v7733_v58 }
 0xaba   : > { %8379 = vmatprep.mubr.bf16.mxu0 %v7753_v27  ;;  %8672 = vmatprep.mubr.bf16.mxu1 %v15861_v39 }
 0xabb   : > { %v7657_v26 = vpop.f32.mrf.mxu1  ;;  %v14718_v34 = vpop.f32.mrf.mxu0 }
 0xabc   : > { %v15918_v26 = vld [vmem:[#allocation43_spill] sm:$0xff] }
 0xabd   : > { %v14720_v6 = vpop.f32.mrf.mxu1  ;;  %v14722_v57 = vpop.f32.mrf.mxu0 }
 0xabf   : > { %v7660_v16 = vpop.f32.mrf.mxu1  ;;  %v14726_v17 = vpop.f32.mrf.mxu0 }
 0xac1   : > { %v14730_v23 = vpop.f32.mrf.mxu0  ;;  %8380 = vmatmul.mubr.bf16.gmra.mxu0 %v15916_v44  ;;  %v14735_v12 = vpop.f32.mrf.mxu1  ;;  %8673 = vmatmul.mubr.bf16.gmra.mxu1 %v7736_v55  ;;  %v15919_v55 = vld [vmem:[#allocation42_spill] sm:$0xff] }
 0xac2   : > { %8389 = vmatprep.mubr.bf16.mxu0 %v7756_v1  ;;  %8682 = vmatprep.mubr.bf16.mxu1 %v15861_v39  ;;  %v15920_v16 = vpack.c.bf16 %v15918_v26, %v15919_v55 }
 0xac3   : > { %v14752_v36 = vpop.f32.mrf.mxu0  ;;  %v8436_v29 = vpop.f32.mrf.mxu1 }
 0xac4   : > { %v8437_v2 = vadd.f32 %v8436_v29, %v14618_v19 }
 0xac5   : > { %v14759_v47 = vpop.f32.mrf.mxu0  ;;  %v14761_v14 = vpop.f32.mrf.mxu1 }
 0xac6   : > { %v8767_v58 = vmul.f32 %v14744_v41, %v8437_v2 }
 0xac7   : > { %v14766_v27 = vpop.f32.mrf.mxu0  ;;  %v8440_v7 = vpop.f32.mrf.mxu1 }
 0xac8   : > { %v8908_v5 = vadd.f32 %v14757_v9, %v8767_v58  ;;  %v8441_v19 = vadd.f32 %v8440_v7, %v14626_v22 }
 0xac9   : > { %v14770_v25 = vpop.f32.mrf.mxu0  ;;  %8390 = vmatmul.mubr.bf16.gmra.mxu0 %v15920_v16  ;;  %v14775_v1 = vpop.f32.mrf.mxu1  ;;  %8683 = vmatmul.mubr.bf16.gmra.mxu1 %v7739_v10  ;;  %v7742_v10 = vpack.c.bf16 %v14620_v28, %v14610_v11 }
 0xaca   : > { %v10746_v24 = vmul.f32 -1.442695, %v8908_v5  ;;  %v8769_v59 = vmul.f32 %v14744_v41, %v8441_v19  ;;  %8692 = vmatprep.mubr.bf16.mxu1 %v15861_v39 }
 0xacb   : > { %v14779_v56 = vpop.f32.mrf.mxu0  ;;  %v8446_v45 = vpop.f32.mrf.mxu1 }
 0xacc   : > { %12185 = vpow2.f32 %v10746_v24  ;;  %v8910_v22 = vadd.f32 %v14757_v9, %v8769_v59  ;;  %v8447_v44 = vadd.f32 %v8446_v45, %v14638_v20 }
 0xacd   : > { %v14783_v40 = vpop.f32.mrf.mxu0  ;;  %v14785_v29 = vpop.f32.mrf.mxu1 }
 0xace   : > { %v10747_v2 = vmul.f32 -1.442695, %v8910_v22  ;;  %v8771_v58 = vmul.f32 %v14744_v41, %v8447_v44 }
 0xacf   : > { %v14790_v7 = vpop.f32.mrf.mxu0  ;;  %v8450_v5 = vpop.f32.mrf.mxu1 }
 0xad0   : > { %12187 = vpow2.f32 %v10747_v2  ;;  %v8912_v19 = vadd.f32 %v14757_v9, %v8771_v58  ;;  %v8451_v26 = vadd.f32 %v8450_v5, %v14646_v60  ;;  %v7745_v58 = vpack.c.bf16 %v14640_v0, %v14630_v4 }
 0xad1   : > { %v14794_v55 = vpop.f32.mrf.mxu0  ;;  %v14796_v20 = vpop.f32.mrf.mxu1  ;;  %8693 = vmatmul.mubr.bf16.gmra.mxu1 %v7742_v10 }
 0xad2   : > { %v10748_v16 = vmul.f32 -1.442695, %v8912_v19  ;;  %v8773_v24 = vmul.f32 %v14744_v41, %v8451_v26  ;;  %8702 = vmatprep.mubr.bf16.mxu1 %v15861_v39 }
 0xad3   : > { %v14800_v59 = vpop.f32.mrf.mxu0  ;;  %v8456_v11 = vpop.f32.mrf.mxu1 }
 0xad4   : > { %12189 = vpow2.f32 %v10748_v16  ;;  %v8914_v28 = vadd.f32 %v14757_v9, %v8773_v24  ;;  %v8457_v45 = vadd.f32 %v8456_v11, %v14658_v3 }
 0xad5   : > { %v14804_v22 = vpop.f32.mrf.mxu0  ;;  %v14806_v60 = vpop.f32.mrf.mxu1 }
 0xad6   : > { %15921 = vst [vmem:[#allocation13_spill] sm:$0xff] %v14804_v22  ;;  %v10749_v44 = vmul.f32 -1.442695, %v8914_v28  ;;  %v8775_v2 = vmul.f32 %v14744_v41, %v8457_v45  ;;  %v15924_v22 = vld [vmem:[#allocation10_spill] sm:$0xff] }
 0xad7   : > { %v14811_v10 = vpop.f32.mrf.mxu0  ;;  %v8460_v5 = vpop.f32.mrf.mxu1 }
 0xad8   : > { %12191 = vpow2.f32 %v10749_v44  ;;  %v8916_v19 = vadd.f32 %v14757_v9, %v8775_v2  ;;  %v8461_v26 = vadd.f32 %v8460_v5, %v14666_v37 }
 0xad9   : > { %v12186_v16 = vpop.eup %12185  ;;  %v14815_v3 = vpop.f32.mrf.mxu0  ;;  %8703 = vmatmul.mubr.bf16.gmra.mxu1 %v7745_v58 }
 0xada   : > { %15922 = vst [vmem:[#allocation12_spill] sm:$0xff] %v14815_v3  ;;  %v14817_v24 = vpop.f32.mrf.mxu1  ;;  %v9227_v11 = vadd.f32 1.0, %v12186_v16  ;;  %v10750_v28 = vmul.f32 -1.442695, %v8916_v19  ;;  %v8777_v45 = vmul.f32 %v14744_v41, %v8461_v26  ;;  %8712 = vmatprep.mubr.bf16.mxu1 %v15861_v39  ;;  %v7748_v16 = vpack.c.bf16 %v14660_v21, %v14650_v50 }
 0xadb   : > { %v14821_v4 = vpop.f32.mrf.mxu0 }
 0xadc   : > { %v8466_v0 = vpop.f32.mrf.mxu1  ;;  %12193 = vrcp.f32 %v9227_v11  ;;  %v8918_v44 = vadd.f32 %v14757_v9, %v8777_v45  ;;  %v14834_v11 = vrot.slane %v14740_v63, %v15924_v22 }
 0xadd   : > { %v8467_v37 = vadd.f32 %v8466_v0, %v14678_v33  ;;  %v12188_v2 = vpop.eup %12187  ;;  %12195 = vpow2.f32 %v10750_v28  ;;  %v14825_v5 = vpop.f32.mrf.mxu0  ;;  %v8435_v28 = vadd.f32 %v14735_v12, %v14612_v48  ;;  %v14850_v48 = vrot.slane %v14750_v62, %v15924_v22 }
 0xade   : > { %15923 = vst [vmem:[#allocation15_spill] sm:$0xff] %v14825_v5  ;;  %v14827_v3 = vpop.f32.mrf.mxu1  ;;  %v9228_v58 = vadd.f32 1.0, %v12188_v2  ;;  %v10751_v19 = vmul.f32 -1.442695, %v8918_v44 }
 0xadf   : > { %v8779_v26 = vmul.f32 %v14744_v41, %v8467_v37  ;;  %v14836_v45 = vpop.f32.mrf.mxu0 }
 0xae0   : > { %v8470_v33 = vpop.f32.mrf.mxu1  ;;  %12197 = vrcp.f32 %v9228_v58 }
 0xae1   : > { %v8920_v0 = vadd.f32 %v14757_v9, %v8779_v26  ;;  %v8471_v44 = vadd.f32 %v8470_v33, %v14686_v46  ;;  %v12190_v37 = vpop.eup %12189  ;;  %12199 = vpow2.f32 %v10751_v19  ;;  %v14842_v2 = vpop.f32.mrf.mxu0  ;;  %8713 = vmatmul.mubr.bf16.gmra.mxu1 %v7748_v16  ;;  %v8439_v46 = vadd.f32 %v14761_v14, %v14622_v35 }
 0xae2   : > { %v14844_v50 = vpop.f32.mrf.mxu1  ;;  %v9229_v21 = vadd.f32 1.0, %v12190_v37  ;;  %8722 = vmatprep.mubr.bf16.mxu1 %v15861_v39  ;;  %v8766_v19 = vmul.f32 %v14834_v11, %v8435_v28  ;;  %v7751_v14 = vpack.c.bf16 %v14680_v43, %v14670_v32 }
 0xae3   : > { %v10752_v63 = vmul.f32 -1.442695, %v8920_v0  ;;  %v8781_v5 = vmul.f32 %v14744_v41, %v8471_v44  ;;  %v14855_v12 = vpop.f32.mrf.mxu0  ;;  %v8768_v28 = vmul.f32 %v14834_v11, %v8439_v46 }
 0xae4   : > { %v8476_v58 = vpop.f32.mrf.mxu1  ;;  %12201 = vrcp.f32 %v9229_v21  ;;  %v8907_v21 = vadd.f32 %v14850_v48, %v8766_v19 }
 0xae5   : > { %v8922_v26 = vadd.f32 %v14757_v9, %v8781_v5  ;;  %v8477_v16 = vadd.f32 %v8476_v58, %v14698_v61  ;;  %v12192_v33 = vpop.eup %12191  ;;  %12203 = vpow2.f32 %v10752_v63  ;;  %v14860_v0 = vpop.f32.mrf.mxu0  ;;  %v8445_v5 = vadd.f32 %v14775_v1, %v14632_v31 }
 0xae6   : > { %v14862_v62 = vpop.f32.mrf.mxu1  ;;  %v9230_v22 = vadd.f32 1.0, %v12192_v33  ;;  %v8909_v19 = vadd.f32 %v14850_v48, %v8768_v28 }
 0xae7   : > { %v10753_v44 = vmul.f32 -1.442695, %v8922_v26  ;;  %v8783_v35 = vmul.f32 %v14744_v41, %v8477_v16  ;;  %v14870_v61 = vpop.f32.mrf.mxu0  ;;  %v8770_v33 = vmul.f32 %v14834_v11, %v8445_v5 }
 0xae8   : > { %v8480_v37 = vpop.f32.mrf.mxu1  ;;  %12205 = vrcp.f32 %v9230_v22 }
 0xae9   : > { %v8924_v63 = vadd.f32 %v14757_v9, %v8783_v35  ;;  %v8481_v58 = vadd.f32 %v8480_v37, %v14706_v51  ;;  %v12194_v26 = vpop.eup %12193  ;;  %12207 = vpow2.f32 %v10753_v44  ;;  %v14875_v16 = vpop.f32.mrf.mxu0  ;;  %8723 = vmatmul.mubr.bf16.gmra.mxu1 %v7751_v14  ;;  %v8449_v35 = vadd.f32 %v14785_v29, %v14642_v42 }
 0xaea   : > { %v14877_v32 = vpop.f32.mrf.mxu1  ;;  %v12196_v43 = vpop.eup %12195  ;;  %v9419_v46 = vmul.f32 %v12194_v26, %v8907_v21  ;;  %8732 = vmatprep.mubr.bf16.mxu1 %v15861_v39  ;;  %v7754_v42 = vpack.c.bf16 %v14700_v38, %v14690_v53  ;;  %v8911_v29 = vadd.f32 %v14850_v48, %v8770_v33 }
 0xaeb   : > { %v10754_v31 = vmul.f32 -1.442695, %v8924_v63  ;;  %v8785_v1 = vmul.f32 %v14744_v41, %v8481_v58  ;;  %v9231_v22 = vadd.f32 1.0, %v12196_v43  ;;  %v14883_v51 = vpop.f32.mrf.mxu0 }
 0xaec   : > { %v8486_v44 = vpop.f32.mrf.mxu1  ;;  %9483 = vst [vmem:[%s14885_s22] sm:$0xff] %v9419_v46 }
 0xaed   : > { %12209 = vpow2.f32 %v10754_v31  ;;  %v8926_v14 = vadd.f32 %v14757_v9, %v8785_v1  ;;  %v8487_v37 = vadd.f32 %v8486_v44, %v14718_v34  ;;  %v12198_v28 = vpop.eup %12197  ;;  %v14892_v5 = vpop.f32.mrf.mxu0  ;;  %v8772_v1 = vmul.f32 %v14834_v11, %v8449_v35 }
 0xaee   : > { %12211 = vrcp.f32 %v9231_v22  ;;  %v14894_v21 = vpop.f32.mrf.mxu1  ;;  %v12200_v63 = vpop.eup %12199  ;;  %v9420_v58 = vmul.f32 %v12198_v28, %v8909_v19 }
 0xaef   : > { %v10755_v26 = vmul.f32 -1.442695, %v8926_v14  ;;  %v8787_v43 = vmul.f32 %v14744_v41, %v8487_v37  ;;  %v9232_v46 = vadd.f32 1.0, %v12200_v63  ;;  %v14900_v31 = vpop.f32.mrf.mxu0  ;;  %v8455_v14 = vadd.f32 %v14796_v20, %v14652_v49 }
 0xaf0   : > { %v8490_v34 = vpop.f32.mrf.mxu1  ;;  %9484 = vst [vmem:[%s14885_s22 + $0x8] sm:$0xff] %v9420_v58  ;;  %v8913_v49 = vadd.f32 %v14850_v48, %v8772_v1 }
 0xaf1   : > { %12213 = vpow2.f32 %v10755_v26  ;;  %v8928_v22 = vadd.f32 %v14757_v9, %v8787_v43  ;;  %v8491_v19 = vadd.f32 %v8490_v34, %v14726_v17  ;;  %v12202_v44 = vpop.eup %12201  ;;  %v14908_v53 = vpop.f32.mrf.mxu0  ;;  %8733 = vmatmul.mubr.bf16.gmra.mxu1 %v7754_v42  ;;  %v8774_v42 = vmul.f32 %v14834_v11, %v8455_v14 }
 0xaf2   : > { %12215 = vrcp.f32 %v9232_v46  ;;  %v14910_v38 = vpop.f32.mrf.mxu1  ;;  %v12204_v33 = vpop.eup %12203  ;;  %v9421_v37 = vmul.f32 %v12202_v44, %v8911_v29  ;;  %8742 = vmatprep.mubr.bf16.mxu1 %v15861_v39  ;;  %v8459_v29 = vadd.f32 %v14806_v60, %v14662_v30  ;;  %v7757_v44 = vpack.c.bf16 %v14720_v6, %v14710_v18 }
 0xaf3   : > { %v10756_v28 = vmul.f32 -1.442695, %v8928_v22  ;;  %v8789_v35 = vmul.f32 %v14744_v41, %v8491_v19  ;;  %v9233_v63 = vadd.f32 1.0, %v12204_v33  ;;  %v14914_v58 = vpop.f32.mrf.mxu0 }
 0xaf4   : > { %v8496_v17 = vpop.f32.mrf.mxu1  ;;  %9485 = vst [vmem:[%s14885_s22 + $0x10] sm:$0xff] %v9421_v37 }
 0xaf5   : > { %12217 = vpow2.f32 %v10756_v28  ;;  %v8930_v20 = vadd.f32 %v14757_v9, %v8789_v35  ;;  %v8497_v26 = vadd.f32 %v8496_v17, %v14752_v36  ;;  %v12206_v43 = vpop.eup %12205  ;;  %v14923_v39 = vpop.f32.mrf.mxu0  ;;  %v8915_v28 = vadd.f32 %v14850_v48, %v8774_v42 }
 0xaf6   : > { %12219 = vrcp.f32 %v9233_v63  ;;  %v14925_v46 = vpop.f32.mrf.mxu1  ;;  %v12208_v34 = vpop.eup %12207  ;;  %v9422_v22 = vmul.f32 %v12206_v43, %v8913_v49  ;;  %v8776_v35 = vmul.f32 %v14834_v11, %v8459_v29  ;;  %v8465_v63 = vadd.f32 %v14817_v24, %v14672_v15 }
 0xaf7   : > { %v10757_v1 = vmul.f32 -1.442695, %v8930_v20  ;;  %v8791_v19 = vmul.f32 %v14744_v41, %v8497_v26  ;;  %v9234_v36 = vadd.f32 1.0, %v12208_v34  ;;  %v14930_v33 = vpop.f32.mrf.mxu0 }
 0xaf8   : > { %v8500_v14 = vpop.f32.mrf.mxu1  ;;  %9486 = vst [vmem:[%s14885_s22 + $0x18] sm:$0xff] %v9422_v22  ;;  %v8917_v34 = vadd.f32 %v14850_v48, %v8776_v35  ;;  %v8778_v22 = vmul.f32 %v14834_v11, %v8465_v63  ;;  %v8475_v35 = vadd.f32 %v14844_v50, %v14692_v13 }
 0xaf9   : > { %12221 = vpow2.f32 %v10757_v1  ;;  %v8932_v30 = vadd.f32 %v14757_v9, %v8791_v19  ;;  %v8501_v60 = vadd.f32 %v8500_v14, %v14766_v27  ;;  %v14939_v18 = vpop.f32.mrf.mxu0  ;;  %8743 = vmatmul.mubr.bf16.gmra.mxu1 %v7757_v44  ;;  %v8469_v1 = vadd.f32 %v14827_v3, %v14682_v52 }
 0xafa   : > { %v12210_v37 = vpop.eup %12209  ;;  %12223 = vrcp.f32 %v9234_v36  ;;  %v14941_v6 = vpop.f32.mrf.mxu1 }
 0xafb   : > { %v12212_v17 = vpop.eup %12211  ;;  %v9235_v49 = vadd.f32 1.0, %v12210_v37  ;;  %v10758_v20 = vmul.f32 -1.442695, %v8932_v30  ;;  %v8793_v27 = vmul.f32 %v14744_v41, %v8501_v60  ;;  %v14944_v43 = vpop.f32.mrf.mxu0 }
 0xafc   : > { %v9423_v26 = vmul.f32 %v12212_v17, %v8915_v28  ;;  %v8506_v42 = vpop.f32.mrf.mxu1  ;;  %v8919_v17 = vadd.f32 %v14850_v48, %v8778_v22 }
 0xafd   : > { %12225 = vrcp.f32 %v9235_v49  ;;  %v8934_v29 = vadd.f32 %v14757_v9, %v8793_v27  ;;  %v8507_v15 = vadd.f32 %v8506_v42, %v14779_v56  ;;  %v14953_v19 = vpop.f32.mrf.mxu0  ;;  %v8780_v49 = vmul.f32 %v14834_v11, %v8469_v1 }
 0xafe   : > { %v12214_v24 = vpop.eup %12213  ;;  %9487 = vst [vmem:[%s14885_s22 + $0x20] sm:$0xff] %v9423_v26  ;;  %12227 = vpow2.f32 %v10758_v20  ;;  %v14955_v44 = vpop.f32.mrf.mxu1 }
 0xaff   : > { %v12216_v36 = vpop.eup %12215  ;;  %v9236_v14 = vadd.f32 1.0, %v12214_v24  ;;  %v10759_v30 = vmul.f32 -1.442695, %v8934_v29  ;;  %v8795_v56 = vmul.f32 %v14744_v41, %v8507_v15  ;;  %v14958_v37 = vpop.f32.mrf.mxu0 }
 0xb00   : > { %v9424_v60 = vmul.f32 %v12216_v36, %v8917_v34  ;;  %v8510_v28 = vpop.f32.mrf.mxu1  ;;  %v8782_v34 = vmul.f32 %v14834_v11, %v8475_v35 }
 0xb01   : > { %12229 = vrcp.f32 %v9236_v14  ;;  %v8936_v52 = vadd.f32 %v14757_v9, %v8795_v56  ;;  %v8511_v3 = vadd.f32 %v8510_v28, %v14790_v7  ;;  %v14967_v20 = vpop.f32.mrf.mxu0  ;;  %v8479_v7 = vadd.f32 %v14862_v62, %v14702_v54 }
 0xb02   : > { %v12218_v63 = vpop.eup %12217  ;;  %9488 = vst [vmem:[%s14885_s22 + $0x28] sm:$0xff] %v9424_v60  ;;  %12231 = vpow2.f32 %v10759_v30  ;;  %v14969_v27 = vpop.f32.mrf.mxu1  ;;  %v8921_v14 = vadd.f32 %v14850_v48, %v8780_v49 }
 0xb03   : > { %v12220_v26 = vpop.eup %12219  ;;  %v9237_v42 = vadd.f32 1.0, %v12218_v63  ;;  %v10760_v13 = vmul.f32 -1.442695, %v8936_v52  ;;  %v8797_v50 = vmul.f32 %v14744_v41, %v8511_v3  ;;  %v14974_v15 = vpop.f32.mrf.mxu0  ;;  %v8784_v52 = vmul.f32 %v14834_v11, %v8479_v7 }
 0xb04   : > { %v9425_v29 = vmul.f32 %v12220_v26, %v8919_v17  ;;  %v8516_v24 = vpop.f32.mrf.mxu1  ;;  %v8923_v17 = vadd.f32 %v14850_v48, %v8782_v34 }
 0xb05   : > { %12233 = vrcp.f32 %v9237_v42  ;;  %v8938_v22 = vadd.f32 %v14757_v9, %v8797_v50  ;;  %v8517_v1 = vadd.f32 %v8516_v24, %v14800_v59  ;;  %v14981_v30 = vpop.f32.mrf.mxu0  ;;  %v8485_v59 = vadd.f32 %v14877_v32, %v14712_v8 }
 0xb06   : > { %v12222_v36 = vpop.eup %12221  ;;  %9489 = vst [vmem:[%s14885_s22 + $0x30] sm:$0xff] %v9425_v29  ;;  %12235 = vpow2.f32 %v10760_v13  ;;  %v14983_v56 = vpop.f32.mrf.mxu1  ;;  %v8925_v24 = vadd.f32 %v14850_v48, %v8784_v52 }
 0xb07   : > { %v12224_v54 = vpop.eup %12223  ;;  %v9238_v62 = vadd.f32 1.0, %v12222_v36  ;;  %v10761_v60 = vmul.f32 -1.442695, %v8938_v22  ;;  %v8799_v28 = vmul.f32 %v14744_v41, %v8517_v1  ;;  %v14989_v3 = vpop.f32.mrf.mxu0  ;;  %v8786_v34 = vmul.f32 %v14834_v11, %v8485_v59 }
 0xb08   : > { %v9426_v35 = vmul.f32 %v12224_v54, %v8921_v14  ;;  %v8520_v63 = vpop.f32.mrf.mxu1  ;;  %v8489_v36 = vadd.f32 %v14894_v21, %v14722_v57 }
 0xb09   : > { %12237 = vrcp.f32 %v9238_v62  ;;  %v8940_v49 = vadd.f32 %v14757_v9, %v8799_v28  ;;  %v8521_v26 = vadd.f32 %v8520_v63, %v14811_v10  ;;  %v14995_v13 = vpop.f32.mrf.mxu0 }
 0xb0a   : > { %v12226_v42 = vpop.eup %12225  ;;  %9490 = vst [vmem:[%s14885_s22 + $0x38] sm:$0xff] %v9426_v35  ;;  %12239 = vpow2.f32 %v10761_v60  ;;  %v14997_v50 = vpop.f32.mrf.mxu1 }
 0xb0b   : > { %v12228_v29 = vpop.eup %12227  ;;  %v9427_v8 = vmul.f32 %v12226_v42, %v8923_v17  ;;  %v10762_v32 = vmul.f32 -1.442695, %v8940_v49  ;;  %v8801_v7 = vmul.f32 %v14744_v41, %v8521_v26  ;;  %v15002_v1 = vpop.f32.mrf.mxu0  ;;  %v8927_v17 = vadd.f32 %v14850_v48, %v8786_v34 }
 0xb0c   : > { %v9239_v22 = vadd.f32 1.0, %v12228_v29  ;;  %v8526_v10 = vpop.f32.mrf.mxu1 }
 0xb0d   : > { %9491 = vst [vmem:[%s14885_s22 + $0x40] sm:$0xff] %v9427_v8  ;;  %12241 = vpow2.f32 %v10762_v32  ;;  %v8942_v14 = vadd.f32 %v14757_v9, %v8801_v7  ;;  %v8527_v54 = vadd.f32 %v8526_v10, %v14821_v4  ;;  %v15009_v60 = vpop.f32.mrf.mxu0  ;;  %v8788_v4 = vmul.f32 %v14834_v11, %v8489_v36 }
 0xb0e   : > { %v12230_v62 = vpop.eup %12229  ;;  %12243 = vrcp.f32 %v9239_v22  ;;  %v15011_v28 = vpop.f32.mrf.mxu1  ;;  %v8495_v8 = vadd.f32 %v14910_v38, %v14730_v23 }
 0xb0f   : > { %v12232_v35 = vpop.eup %12231  ;;  %v9428_v52 = vmul.f32 %v12230_v62, %v8925_v24  ;;  %v10763_v59 = vmul.f32 -1.442695, %v8942_v14  ;;  %v8803_v63 = vmul.f32 %v14744_v41, %v8527_v54  ;;  %v15015_v21 = vpop.f32.mrf.mxu0 }
 0xb10   : > { %v9240_v57 = vadd.f32 1.0, %v12232_v35  ;;  %v8530_v49 = vpop.f32.mrf.mxu1  ;;  %v8790_v35 = vmul.f32 %v14834_v11, %v8495_v8 }
 0xb11   : > { %9492 = vst [vmem:[%s14885_s22 + $0x48] sm:$0xff] %v9428_v52  ;;  %12245 = vpow2.f32 %v10763_v59  ;;  %v8944_v26 = vadd.f32 %v14757_v9, %v8803_v63  ;;  %v8531_v42 = vadd.f32 %v8530_v49, %v14836_v45  ;;  %v15023_v32 = vpop.f32.mrf.mxu0  ;;  %v8929_v45 = vadd.f32 %v14850_v48, %v8788_v4 }
 0xb12   : > { %v12234_v29 = vpop.eup %12233  ;;  %12247 = vrcp.f32 %v9240_v57  ;;  %v15025_v7 = vpop.f32.mrf.mxu1  ;;  %v8499_v52 = vadd.f32 %v14925_v46, %v14759_v47  ;;  %v8931_v8 = vadd.f32 %v14850_v48, %v8790_v35 }
 0xb13   : > { %v12236_v24 = vpop.eup %12235  ;;  %v9429_v34 = vmul.f32 %v12234_v29, %v8927_v17  ;;  %v10764_v22 = vmul.f32 -1.442695, %v8944_v26  ;;  %v8805_v10 = vmul.f32 %v14744_v41, %v8531_v42  ;;  %v15028_v14 = vpop.f32.mrf.mxu0 }
 0xb14   : > { %v9241_v36 = vadd.f32 1.0, %v12236_v24  ;;  %v8536_v54 = vpop.f32.mrf.mxu1  ;;  %v8792_v24 = vmul.f32 %v14834_v11, %v8499_v52 }
 0xb15   : > { %9493 = vst [vmem:[%s14885_s22 + $0x50] sm:$0xff] %v9429_v34  ;;  %12249 = vpow2.f32 %v10764_v22  ;;  %v8946_v23 = vadd.f32 %v14757_v9, %v8805_v10  ;;  %v8537_v38 = vadd.f32 %v8536_v54, %v14855_v12  ;;  %v15037_v59 = vpop.f32.mrf.mxu0  ;;  %v8505_v34 = vadd.f32 %v14941_v6, %v14770_v25 }
 0xb16   : > { %v12238_v62 = vpop.eup %12237  ;;  %12251 = vrcp.f32 %v9241_v36  ;;  %v15039_v63 = vpop.f32.mrf.mxu1  ;;  %v8933_v6 = vadd.f32 %v14850_v48, %v8792_v24  ;;  %v8515_v24 = vadd.f32 %v14969_v27, %v14794_v55 }
 0xb17   : > { %v12240_v17 = vpop.eup %12239  ;;  %v9430_v57 = vmul.f32 %v12238_v62, %v8929_v45  ;;  %v10765_v49 = vmul.f32 -1.442695, %v8946_v23  ;;  %v8807_v4 = vmul.f32 %v14744_v41, %v8537_v38  ;;  %v15042_v42 = vpop.f32.mrf.mxu0 }
 0xb18   : > { %v9242_v26 = vadd.f32 1.0, %v12240_v17  ;;  %v8540_v12 = vpop.f32.mrf.mxu1  ;;  %v8794_v17 = vmul.f32 %v14834_v11, %v8505_v34 }
 0xb19   : > { %9494 = vst [vmem:[%s14885_s22 + $0x58] sm:$0xff] %v9430_v57  ;;  %12253 = vpow2.f32 %v10765_v49  ;;  %v8948_v29 = vadd.f32 %v14757_v9, %v8807_v4  ;;  %v8541_v47 = vadd.f32 %v8540_v12, %v14870_v61  ;;  %v15051_v22 = vpop.f32.mrf.mxu0  ;;  %v8509_v57 = vadd.f32 %v14955_v44, %v14783_v40 }
 0xb1a   : > { %v12242_v46 = vpop.eup %12241  ;;  %12255 = vrcp.f32 %v9242_v26  ;;  %v15053_v10 = vpop.f32.mrf.mxu1 }
 0xb1b   : > { %v12244_v36 = vpop.eup %12243  ;;  %v9243_v54 = vadd.f32 1.0, %v12242_v46  ;;  %v10766_v45 = vmul.f32 -1.442695, %v8948_v29  ;;  %v8809_v23 = vmul.f32 %v14744_v41, %v8541_v47  ;;  %v15056_v38 = vpop.f32.mrf.mxu0 }
 0xb1c   : > { %v9431_v61 = vmul.f32 %v12244_v36, %v8931_v8  ;;  %v8546_v62 = vpop.f32.mrf.mxu1  ;;  %v8935_v36 = vadd.f32 %v14850_v48, %v8794_v17  ;;  %v8798_v17 = vmul.f32 %v14834_v11, %v8515_v24 }
 0xb1d   : > { %12257 = vrcp.f32 %v9243_v54  ;;  %v8950_v35 = vadd.f32 %v14757_v9, %v8809_v23  ;;  %v8547_v52 = vadd.f32 %v8546_v62, %v14883_v51  ;;  %v15065_v49 = vpop.f32.mrf.mxu0  ;;  %v8796_v54 = vmul.f32 %v14834_v11, %v8509_v57 }
 0xb1e   : > { %v12246_v25 = vpop.eup %12245  ;;  %9495 = vst [vmem:[%s14885_s22 + $0x60] sm:$0xff] %v9431_v61  ;;  %12259 = vpow2.f32 %v10766_v45  ;;  %v15067_v4 = vpop.f32.mrf.mxu1 }
 0xb1f   : > { %v12248_v26 = vpop.eup %12247  ;;  %v9244_v12 = vadd.f32 1.0, %v12246_v25  ;;  %v10767_v29 = vmul.f32 -1.442695, %v8950_v35  ;;  %v8811_v51 = vmul.f32 %v14744_v41, %v8547_v52  ;;  %v15070_v46 = vpop.f32.mrf.mxu0  ;;  %v15925_v52 = vld [vmem:[#allocation13_spill] sm:$0xff] }
 0xb20   : > { %v9432_v47 = vmul.f32 %v12248_v26, %v8933_v6  ;;  %v8550_v8 = vpop.f32.mrf.mxu1 }
 0xb21   : > { %12261 = vrcp.f32 %v9244_v12  ;;  %v8952_v40 = vadd.f32 %v14757_v9, %v8811_v51  ;;  %v8551_v44 = vadd.f32 %v8550_v8, %v14900_v31  ;;  %v15079_v45 = vpop.f32.mrf.mxu0  ;;  %v8519_v31 = vadd.f32 %v14983_v56, %v15925_v52 }
 0xb22   : > { %v12250_v34 = vpop.eup %12249  ;;  %9496 = vst [vmem:[%s14885_s22 + $0x68] sm:$0xff] %v9432_v47  ;;  %12263 = vpow2.f32 %v10767_v29  ;;  %v15081_v23 = vpop.f32.mrf.mxu1  ;;  %v8937_v29 = vadd.f32 %v14850_v48, %v8796_v54 }
 0xb23   : > { %v12252_v61 = vpop.eup %12251  ;;  %v9245_v62 = vadd.f32 1.0, %v12250_v34  ;;  %v10768_v55 = vmul.f32 -1.442695, %v8952_v40  ;;  %v8813_v27 = vmul.f32 %v14744_v41, %v8551_v44  ;;  %v15086_v25 = vpop.f32.mrf.mxu0  ;;  %v8800_v34 = vmul.f32 %v14834_v11, %v8519_v31 }
 0xb24   : > { %v9433_v35 = vmul.f32 %v12252_v61, %v8935_v36  ;;  %v8556_v6 = vpop.f32.mrf.mxu1  ;;  %v15926_v36 = vld [vmem:[#allocation12_spill] sm:$0xff] }
 0xb25   : > { %12265 = vrcp.f32 %v9245_v62  ;;  %v8954_v57 = vadd.f32 %v14757_v9, %v8813_v27  ;;  %v8557_v26 = vadd.f32 %v8556_v6, %v14914_v58  ;;  %v15093_v51 = vpop.f32.mrf.mxu0  ;;  %v8525_v58 = vadd.f32 %v14997_v50, %v15926_v36 }
 0xb26   : > { %v12254_v12 = vpop.eup %12253  ;;  %9497 = vst [vmem:[%s14885_s22 + $0x70] sm:$0xff] %v9433_v35  ;;  %12267 = vpow2.f32 %v10768_v55  ;;  %v15095_v47 = vpop.f32.mrf.mxu1  ;;  %v8939_v62 = vadd.f32 %v14850_v48, %v8798_v17  ;;  %v8941_v17 = vadd.f32 %v14850_v48, %v8800_v34 }
 0xb27   : > { %v12256_v56 = vpop.eup %12255  ;;  %v9246_v8 = vadd.f32 1.0, %v12254_v12  ;;  %v10769_v40 = vmul.f32 -1.442695, %v8954_v57  ;;  %v8815_v24 = vmul.f32 %v14744_v41, %v8557_v26  ;;  %v15101_v61 = vpop.f32.mrf.mxu0  ;;  %v8802_v12 = vmul.f32 %v14834_v11, %v8525_v58 }
 0xb28   : > { %v9434_v44 = vmul.f32 %v12256_v56, %v8937_v29  ;;  %v8560_v54 = vpop.f32.mrf.mxu1 }
 0xb29   : > { %12269 = vrcp.f32 %v9246_v8  ;;  %v8956_v55 = vadd.f32 %v14757_v9, %v8815_v24  ;;  %v8561_v27 = vadd.f32 %v8560_v54, %v14930_v33  ;;  %v15107_v52 = vpop.f32.mrf.mxu0  ;;  %v15927_v8 = vld [vmem:[#allocation15_spill] sm:$0xff] }
 0xb2a   : > { %v12258_v35 = vpop.eup %12257  ;;  %9498 = vst [vmem:[%s14885_s22 + $0x78] sm:$0xff] %v9434_v44  ;;  %12271 = vpow2.f32 %v10769_v40  ;;  %v15109_v31 = vpop.f32.mrf.mxu1  ;;  %v8529_v40 = vadd.f32 %v15011_v28, %v15927_v8 }
 0xb2b   : > { %v12260_v6 = vpop.eup %12259  ;;  %v9435_v50 = vmul.f32 %v12258_v35, %v8939_v62  ;;  %v10770_v57 = vmul.f32 -1.442695, %v8956_v55  ;;  %v8817_v26 = vmul.f32 %v14744_v41, %v8561_v27  ;;  %v15114_v56 = vpop.f32.mrf.mxu0  ;;  %v8943_v35 = vadd.f32 %v14850_v48, %v8802_v12 }
 0xb2c   : > { %v9247_v29 = vadd.f32 1.0, %v12260_v6  ;;  %v8566_v33 = vpop.f32.mrf.mxu1 }
 0xb2d   : > { %9499 = vst [vmem:[%s14885_s22 + $0x80] sm:$0xff] %v9435_v50  ;;  %12273 = vpow2.f32 %v10770_v57  ;;  %v8958_v24 = vadd.f32 %v14757_v9, %v8817_v26  ;;  %v8567_v44 = vadd.f32 %v8566_v33, %v14944_v43  ;;  %v15121_v54 = vpop.f32.mrf.mxu0  ;;  %v8804_v43 = vmul.f32 %v14834_v11, %v8529_v40 }
 0xb2e   : > { %v12262_v36 = vpop.eup %12261  ;;  %12275 = vrcp.f32 %v9247_v29  ;;  %v15123_v34 = vpop.f32.mrf.mxu1 }
 0xb2f   : > { %v12264_v58 = vpop.eup %12263  ;;  %v9436_v62 = vmul.f32 %v12262_v36, %v8941_v17  ;;  %v10771_v55 = vmul.f32 -1.442695, %v8958_v24  ;;  %v8819_v27 = vmul.f32 %v14744_v41, %v8567_v44  ;;  %v15127_v6 = vpop.f32.mrf.mxu0  ;;  %v8535_v17 = vadd.f32 %v15025_v7, %v14842_v2 }
 0xb30   : > { %v9248_v28 = vadd.f32 1.0, %v12264_v58  ;;  %v8570_v50 = vpop.f32.mrf.mxu1 }
 0xb31   : > { %9500 = vst [vmem:[%s14885_s22 + $0x88] sm:$0xff] %v9436_v62  ;;  %12277 = vpow2.f32 %v10771_v55  ;;  %v8960_v57 = vadd.f32 %v14757_v9, %v8819_v27  ;;  %v8571_v26 = vadd.f32 %v8570_v50, %v14958_v37  ;;  %v15135_v33 = vpop.f32.mrf.mxu0  ;;  %v8945_v37 = vadd.f32 %v14850_v48, %v8804_v43 }
 0xb32   : > { %v12266_v29 = vpop.eup %12265  ;;  %12279 = vrcp.f32 %v9248_v28  ;;  %v15137_v12 = vpop.f32.mrf.mxu1  ;;  %v8806_v27 = vmul.f32 %v14834_v11, %v8535_v17 }
 0xb33   : > { %v12268_v8 = vpop.eup %12267  ;;  %v9437_v24 = vmul.f32 %v12266_v29, %v8943_v35  ;;  %v10772_v44 = vmul.f32 -1.442695, %v8960_v57  ;;  %v8821_v40 = vmul.f32 %v14744_v41, %v8571_v26  ;;  %v15140_v58 = vpop.f32.mrf.mxu0  ;;  %v8539_v35 = vadd.f32 %v15039_v63, %v14860_v0 }
 0xb34   : > { %v9249_v36 = vadd.f32 1.0, %v12268_v8  ;;  %v8576_v62 = vpop.f32.mrf.mxu1 }
 0xb35   : > { %9501 = vst [vmem:[%s14885_s22 + $0x90] sm:$0xff] %v9437_v24  ;;  %12281 = vpow2.f32 %v10772_v44  ;;  %v8962_v2 = vadd.f32 %v14757_v9, %v8821_v40  ;;  %v8577_v7 = vadd.f32 %v8576_v62, %v14974_v15  ;;  %v15149_v28 = vpop.f32.mrf.mxu0  ;;  %v8947_v44 = vadd.f32 %v14850_v48, %v8806_v27 }
 0xb36   : > { %v12270_v55 = vpop.eup %12269  ;;  %12283 = vrcp.f32 %v9249_v36  ;;  %v15151_v50 = vpop.f32.mrf.mxu1  ;;  %v8808_v40 = vmul.f32 %v14834_v11, %v8539_v35  ;;  %v8545_v36 = vadd.f32 %v15053_v10, %v14875_v16 }
 0xb37   : > { %v12272_v57 = vpop.eup %12271  ;;  %v9438_v26 = vmul.f32 %v12270_v55, %v8945_v37  ;;  %v10773_v43 = vmul.f32 -1.442695, %v8962_v2  ;;  %v8823_v29 = vmul.f32 %v14744_v41, %v8577_v7  ;;  %v15154_v24 = vpop.f32.mrf.mxu0 }
 0xb38   : > { %v9250_v8 = vadd.f32 1.0, %v12272_v57  ;;  %v8580_v15 = vpop.f32.mrf.mxu1  ;;  %v8949_v10 = vadd.f32 %v14850_v48, %v8808_v40 }
 0xb39   : > { %9502 = vst [vmem:[%s14885_s22 + $0x98] sm:$0xff] %v9438_v26  ;;  %12285 = vpow2.f32 %v10773_v43  ;;  %v8964_v17 = vadd.f32 %v14757_v9, %v8823_v29  ;;  %v8581_v0 = vadd.f32 %v8580_v15, %v14989_v3  ;;  %v15163_v62 = vpop.f32.mrf.mxu0  ;;  %v8810_v29 = vmul.f32 %v14834_v11, %v8545_v36 }
 0xb3a   : > { %v12274_v63 = vpop.eup %12273  ;;  %12287 = vrcp.f32 %v9250_v8  ;;  %v15165_v37 = vpop.f32.mrf.mxu1  ;;  %v8549_v8 = vadd.f32 %v15067_v4, %v14892_v5  ;;  %v8555_v36 = vadd.f32 %v15081_v23, %v14908_v53 }
 0xb3b   : > { %v12276_v2 = vpop.eup %12275  ;;  %v9251_v7 = vadd.f32 1.0, %v12274_v63  ;;  %v10774_v55 = vmul.f32 -1.442695, %v8964_v17  ;;  %v8825_v57 = vmul.f32 %v14744_v41, %v8581_v0  ;;  %v15168_v26 = vpop.f32.mrf.mxu0 }
 0xb3c   : > { %v9439_v3 = vmul.f32 %v12276_v2, %v8947_v44  ;;  %v8586_v27 = vpop.f32.mrf.mxu1 }
 0xb3d   : > { %12289 = vrcp.f32 %v9251_v7  ;;  %v8966_v35 = vadd.f32 %v14757_v9, %v8825_v57  ;;  %v8587_v43 = vadd.f32 %v8586_v27, %v15002_v1  ;;  %v15177_v15 = vpop.f32.mrf.mxu0  ;;  %v8951_v57 = vadd.f32 %v14850_v48, %v8810_v29 }
 0xb3e   : > { %v12278_v16 = vpop.eup %12277  ;;  %9503 = vst [vmem:[%s14885_s22 + $0xa0] sm:$0xff] %v9439_v3  ;;  %12291 = vpow2.f32 %v10774_v55  ;;  %v15179_v17 = vpop.f32.mrf.mxu1  ;;  %v8812_v3 = vmul.f32 %v14834_v11, %v8549_v8  ;;  %v8814_v8 = vmul.f32 %v14834_v11, %v8555_v36 }
 0xb3f   : > { %v12280_v0 = vpop.eup %12279  ;;  %v9252_v63 = vadd.f32 1.0, %v12278_v16  ;;  %v10775_v44 = vmul.f32 -1.442695, %v8966_v35  ;;  %v8827_v1 = vmul.f32 %v14744_v41, %v8587_v43  ;;  %v15182_v7 = vpop.f32.mrf.mxu0 }
 0xb40   : > { %v9440_v2 = vmul.f32 %v12280_v0, %v8949_v10  ;;  %v8590_v40 = vpop.f32.mrf.mxu1 }
 0xb41   : > { %12293 = vrcp.f32 %v9252_v63  ;;  %v8968_v5 = vadd.f32 %v14757_v9, %v8827_v1  ;;  %v8591_v4 = vadd.f32 %v8590_v40, %v15015_v21  ;;  %v15191_v27 = vpop.f32.mrf.mxu0  ;;  %v8559_v21 = vadd.f32 %v15095_v47, %v14923_v39 }
 0xb42   : > { %v12282_v55 = vpop.eup %12281  ;;  %9504 = vst [vmem:[%s14885_s22 + $0xa8] sm:$0xff] %v9440_v2  ;;  %12295 = vpow2.f32 %v10775_v44  ;;  %v15193_v35 = vpop.f32.mrf.mxu1  ;;  %v8953_v2 = vadd.f32 %v14850_v48, %v8812_v3 }
 0xb43   : > { %v12284_v43 = vpop.eup %12283  ;;  %v9253_v16 = vadd.f32 1.0, %v12282_v55  ;;  %v10776_v53 = vmul.f32 -1.442695, %v8968_v5  ;;  %v8829_v23 = vmul.f32 %v14744_v41, %v8591_v4  ;;  %v15198_v0 = vpop.f32.mrf.mxu0 }
 0xb44   : > { %v9441_v10 = vmul.f32 %v12284_v43, %v8951_v57  ;;  %v8596_v29 = vpop.f32.mrf.mxu1  ;;  %v8816_v57 = vmul.f32 %v14834_v11, %v8559_v21 }
 0xb45   : > { %12297 = vrcp.f32 %v9253_v16  ;;  %v8970_v63 = vadd.f32 %v14757_v9, %v8829_v23  ;;  %v8597_v44 = vadd.f32 %v8596_v29, %v15028_v14  ;;  %v15205_v40 = vpop.f32.mrf.mxu0  ;;  %v8565_v14 = vadd.f32 %v15109_v31, %v14939_v18 }
 0xb46   : > { %v12286_v1 = vpop.eup %12285  ;;  %9505 = vst [vmem:[%s14885_s22 + $0xb0] sm:$0xff] %v9441_v10  ;;  %12299 = vpow2.f32 %v10776_v53  ;;  %v15207_v5 = vpop.f32.mrf.mxu1  ;;  %v8955_v16 = vadd.f32 %v14850_v48, %v8814_v8  ;;  %v8957_v8 = vadd.f32 %v14850_v48, %v8816_v57 }
 0xb47   : > { %v12288_v39 = vpop.eup %12287  ;;  %v9254_v47 = vadd.f32 1.0, %v12286_v1  ;;  %v10777_v4 = vmul.f32 -1.442695, %v8970_v63  ;;  %v8831_v36 = vmul.f32 %v14744_v41, %v8597_v44  ;;  %v15213_v43 = vpop.f32.mrf.mxu0  ;;  %v8818_v1 = vmul.f32 %v14834_v11, %v8565_v14 }
 0xb48   : > { %v9442_v55 = vmul.f32 %v12288_v39, %v8953_v2  ;;  %v8600_v3 = vpop.f32.mrf.mxu1 }
 0xb49   : > { %12301 = vrcp.f32 %v9254_v47  ;;  %v8972_v53 = vadd.f32 %v14757_v9, %v8831_v36  ;;  %v8601_v23 = vadd.f32 %v8600_v3, %v15042_v42  ;;  %v15219_v29 = vpop.f32.mrf.mxu0  ;;  %v8569_v47 = vadd.f32 %v15123_v34, %v14953_v19 }
 0xb4a   : > { %v12290_v10 = vpop.eup %12289  ;;  %9506 = vst [vmem:[%s14885_s22 + $0xb8] sm:$0xff] %v9442_v55  ;;  %12303 = vpow2.f32 %v10777_v4  ;;  %v15221_v21 = vpop.f32.mrf.mxu1 }
 0xb4b   : > { %v12292_v63 = vpop.eup %12291  ;;  %v9443_v18 = vmul.f32 %v12290_v10, %v8955_v16  ;;  %v10778_v31 = vmul.f32 -1.442695, %v8972_v53  ;;  %v8833_v44 = vmul.f32 %v14744_v41, %v8601_v23  ;;  %v15226_v39 = vpop.f32.mrf.mxu0  ;;  %v8959_v10 = vadd.f32 %v14850_v48, %v8818_v1 }
 0xb4c   : > { %v9255_v2 = vadd.f32 1.0, %v12292_v63  ;;  %v8606_v42 = vpop.f32.mrf.mxu1 }
 0xb4d   : > { %9507 = vst [vmem:[%s14885_s22 + $0xc0] sm:$0xff] %v9443_v18  ;;  %12305 = vpow2.f32 %v10778_v31  ;;  %v8974_v4 = vadd.f32 %v14757_v9, %v8833_v44  ;;  %v8607_v36 = vadd.f32 %v8606_v42, %v15056_v38  ;;  %v15233_v3 = vpop.f32.mrf.mxu0  ;;  %v8820_v38 = vmul.f32 %v14834_v11, %v8569_v47 }
 0xb4e   : > { %v12294_v55 = vpop.eup %12293  ;;  %12307 = vrcp.f32 %v9255_v2  ;;  %v15235_v57 = vpop.f32.mrf.mxu1 }
 0xb4f   : > { %v12296_v14 = vpop.eup %12295  ;;  %v9444_v16 = vmul.f32 %v12294_v55, %v8957_v8  ;;  %v10779_v53 = vmul.f32 -1.442695, %v8974_v4  ;;  %v8835_v23 = vmul.f32 %v14744_v41, %v8607_v36  ;;  %v15239_v34 = vpop.f32.mrf.mxu0  ;;  %v8575_v8 = vadd.f32 %v15137_v12, %v14967_v20 }
 0xb50   : > { %v9256_v19 = vadd.f32 1.0, %v12296_v14  ;;  %v8610_v63 = vpop.f32.mrf.mxu1 }
 0xb51   : > { %9508 = vst [vmem:[%s14885_s22 + $0xc8] sm:$0xff] %v9444_v16  ;;  %12309 = vpow2.f32 %v10779_v53  ;;  %v8976_v18 = vadd.f32 %v14757_v9, %v8835_v23  ;;  %v8611_v31 = vadd.f32 %v8610_v63, %v15070_v46  ;;  %v15247_v2 = vpop.f32.mrf.mxu0  ;;  %v8961_v46 = vadd.f32 %v14850_v48, %v8820_v38 }
 0xb52   : > { %v12298_v44 = vpop.eup %12297  ;;  %12311 = vrcp.f32 %v9256_v19  ;;  %v15249_v1 = vpop.f32.mrf.mxu1  ;;  %v8822_v23 = vmul.f32 %v14834_v11, %v8575_v8 }
 0xb53   : > { %v12300_v42 = vpop.eup %12299  ;;  %v9445_v4 = vmul.f32 %v12298_v44, %v8959_v10  ;;  %v10780_v36 = vmul.f32 -1.442695, %v8976_v18  ;;  %v8837_v47 = vmul.f32 %v14744_v41, %v8611_v31  ;;  %v15252_v14 = vpop.f32.mrf.mxu0  ;;  %v8579_v10 = vadd.f32 %v15151_v50, %v14981_v30 }
 0xb54   : > { %v9257_v55 = vadd.f32 1.0, %v12300_v42  ;;  %v8616_v16 = vpop.f32.mrf.mxu1 }
 0xb55   : > { %9509 = vst [vmem:[%s14885_s22 + $0xd0] sm:$0xff] %v9445_v4  ;;  %12313 = vpow2.f32 %v10780_v36  ;;  %v8978_v20 = vadd.f32 %v14757_v9, %v8837_v47  ;;  %v8617_v12 = vadd.f32 %v8616_v16, %v15086_v25  ;;  %v15261_v19 = vpop.f32.mrf.mxu0  ;;  %v8963_v36 = vadd.f32 %v14850_v48, %v8822_v23 }
 0xb56   : > { %v12302_v53 = vpop.eup %12301  ;;  %12315 = vrcp.f32 %v9257_v55  ;;  %v15263_v63 = vpop.f32.mrf.mxu1  ;;  %v8824_v47 = vmul.f32 %v14834_v11, %v8579_v10  ;;  %v8585_v55 = vadd.f32 %v15165_v37, %v14995_v13 }
 0xb57   : > { %v12304_v18 = vpop.eup %12303  ;;  %v9446_v31 = vmul.f32 %v12302_v53, %v8961_v46  ;;  %v10781_v38 = vmul.f32 -1.442695, %v8978_v20  ;;  %v8839_v44 = vmul.f32 %v14744_v41, %v8617_v12  ;;  %v15266_v4 = vpop.f32.mrf.mxu0 }
 0xb58   : > { %v9258_v42 = vadd.f32 1.0, %v12304_v18  ;;  %v8620_v25 = vpop.f32.mrf.mxu1  ;;  %v8965_v37 = vadd.f32 %v14850_v48, %v8824_v47 }
 0xb59   : > { %9510 = vst [vmem:[%s14885_s22 + $0xd8] sm:$0xff] %v9446_v31  ;;  %12317 = vpow2.f32 %v10781_v38  ;;  %v8980_v8 = vadd.f32 %v14757_v9, %v8839_v44  ;;  %v8621_v30 = vadd.f32 %v8620_v25, %v15101_v61  ;;  %v15275_v16 = vpop.f32.mrf.mxu0  ;;  %v8826_v44 = vmul.f32 %v14834_v11, %v8585_v55 }
 0xb5a   : > { %v12306_v50 = vpop.eup %12305  ;;  %12319 = vrcp.f32 %v9258_v42  ;;  %v15277_v46 = vpop.f32.mrf.mxu1  ;;  %v8589_v42 = vadd.f32 %v15179_v17, %v15009_v60  ;;  %v8595_v55 = vadd.f32 %v15193_v35, %v15023_v32 }
 0xb5b   : > { %v12308_v20 = vpop.eup %12307  ;;  %v9259_v12 = vadd.f32 1.0, %v12306_v50  ;;  %v10782_v53 = vmul.f32 -1.442695, %v8980_v8  ;;  %v8841_v18 = vmul.f32 %v14744_v41, %v8621_v30  ;;  %v15280_v31 = vpop.f32.mrf.mxu0 }
 0xb5c   : > { %v9447_v61 = vmul.f32 %v12308_v20, %v8963_v36  ;;  %v8626_v23 = vpop.f32.mrf.mxu1 }
 0xb5d   : > { %12321 = vrcp.f32 %v9259_v12  ;;  %v8982_v10 = vadd.f32 %v14757_v9, %v8841_v18  ;;  %v8627_v38 = vadd.f32 %v8626_v23, %v15114_v56  ;;  %v15289_v25 = vpop.f32.mrf.mxu0  ;;  %v8967_v18 = vadd.f32 %v14850_v48, %v8826_v44 }
 0xb5e   : > { %v12310_v13 = vpop.eup %12309  ;;  %9511 = vst [vmem:[%s14885_s22 + $0xe0] sm:$0xff] %v9447_v61  ;;  %12323 = vpow2.f32 %v10782_v53  ;;  %v15291_v8 = vpop.f32.mrf.mxu1  ;;  %v8828_v61 = vmul.f32 %v14834_v11, %v8589_v42  ;;  %v8830_v44 = vmul.f32 %v14834_v11, %v8595_v55 }
 0xb5f   : > { %v12312_v30 = vpop.eup %12311  ;;  %v9260_v50 = vadd.f32 1.0, %v12310_v13  ;;  %v10783_v36 = vmul.f32 -1.442695, %v8982_v10  ;;  %v8843_v56 = vmul.f32 %v14744_v41, %v8627_v38  ;;  %v15294_v12 = vpop.f32.mrf.mxu0 }
 0xb60   : > { %v9448_v20 = vmul.f32 %v12312_v30, %v8965_v37  ;;  %v8630_v47 = vpop.f32.mrf.mxu1  ;;  %v8599_v37 = vadd.f32 %v15207_v5, %v15037_v59 }
 0xb61   : > { %12325 = vrcp.f32 %v9260_v50  ;;  %v8984_v60 = vadd.f32 %v14757_v9, %v8843_v56  ;;  %v8631_v17 = vadd.f32 %v8630_v47, %v15127_v6  ;;  %v15308_v6 = vpop.f32.mrf.mxu0  ;;  %v8969_v56 = vadd.f32 %v14850_v48, %v8828_v61 }
 0xb62   : > { %v12314_v53 = vpop.eup %12313  ;;  %9512 = vst [vmem:[%s14885_s22 + $0xe8] sm:$0xff] %v9448_v20  ;;  %12327 = vpow2.f32 %v10783_v36  ;;  %v15303_v23 = vpop.f32.mrf.mxu1  ;;  %v8832_v55 = vmul.f32 %v14834_v11, %v8599_v37  ;;  %v8971_v61 = vadd.f32 %v14850_v48, %v8830_v44 }
 0xb63   : > { %v12316_v10 = vpop.eup %12315  ;;  %v9261_v38 = vadd.f32 1.0, %v12314_v53  ;;  %v10784_v13 = vmul.f32 -1.442695, %v8984_v60  ;;  %v8845_v32 = vmul.f32 %v14744_v41, %v8631_v17  ;;  %v8605_v53 = vadd.f32 %v15221_v21, %v15051_v22 }
 0xb64   : > { %v9449_v35 = vmul.f32 %v12316_v10, %v8967_v18  ;;  %v8636_v30 = vpop.f32.mrf.mxu1  ;;  %v8973_v21 = vadd.f32 %v14850_v48, %v8832_v55 }
 0xb65   : > { %12329 = vrcp.f32 %v9261_v38  ;;  %v8986_v42 = vadd.f32 %v14757_v9, %v8845_v32  ;;  %v8637_v50 = vadd.f32 %v8636_v30, %v15140_v58  ;;  %v15321_v58 = vpop.f32.mrf.mxu0  ;;  %v8834_v44 = vmul.f32 %v14834_v11, %v8605_v53 }
 0xb66   : > { %v12318_v36 = vpop.eup %12317  ;;  %9513 = vst [vmem:[%s14885_s22 + $0xf0] sm:$0xff] %v9449_v35  ;;  %12331 = vpow2.f32 %v10784_v13  ;;  %v15315_v20 = vpop.f32.mrf.mxu1 }
 0xb67   : > { %v12320_v47 = vpop.eup %12319  ;;  %v9262_v59 = vadd.f32 1.0, %v12318_v36  ;;  %v10785_v5 = vmul.f32 -1.442695, %v8986_v42  ;;  %v8847_v60 = vmul.f32 %v14744_v41, %v8637_v50  ;;  %v15332_v50 = vpop.f32.mrf.mxu0 }
 0xb68   : > { %v9450_v17 = vmul.f32 %v12320_v47, %v8969_v56  ;;  %v8640_v18 = vpop.f32.mrf.mxu1 }
 0xb69   : > { %12333 = vrcp.f32 %v9262_v59  ;;  %v8988_v10 = vadd.f32 %v14757_v9, %v8847_v60  ;;  %v8641_v38 = vadd.f32 %v8640_v18, %v15154_v24  ;;  %v8609_v24 = vadd.f32 %v15235_v57, %v15065_v49 }
 0xb6a   : > { %v12322_v13 = vpop.eup %12321  ;;  %9514 = vst [vmem:[%s14885_s22 + $0xf8] sm:$0xff] %v9450_v17  ;;  %12335 = vpow2.f32 %v10785_v5  ;;  %v15327_v32 = vpop.f32.mrf.mxu1  ;;  %v8975_v18 = vadd.f32 %v14850_v48, %v8834_v44 }
 0xb6b   : > { %v12324_v35 = vpop.eup %12323  ;;  %v9451_v37 = vmul.f32 %v12322_v13, %v8971_v61  ;;  %v10786_v30 = vmul.f32 -1.442695, %v8988_v10  ;;  %v8849_v22 = vmul.f32 %v14744_v41, %v8641_v38  ;;  %v15343_v10 = vpop.f32.mrf.mxu0  ;;  %v8836_v57 = vmul.f32 %v14834_v11, %v8609_v24 }
 0xb6c   : > { %v9263_v42 = vadd.f32 1.0, %v12324_v35  ;;  %v8646_v36 = vpop.f32.mrf.mxu1  ;;  %v8615_v35 = vadd.f32 %v15249_v1, %v15079_v45 }
 0xb6d   : > { %9515 = vst [vmem:[%s14885_s22 + $0x100] sm:$0xff] %v9451_v37  ;;  %12337 = vpow2.f32 %v10786_v30  ;;  %v8990_v56 = vadd.f32 %v14757_v9, %v8849_v22  ;;  %v8647_v47 = vadd.f32 %v8646_v36, %v15168_v26  ;;  %v15354_v36 = vpop.f32.mrf.mxu0 }
 0xb6e   : > { %v12326_v59 = vpop.eup %12325  ;;  %12339 = vrcp.f32 %v9263_v42  ;;  %v15339_v5 = vpop.f32.mrf.mxu1 }
 0xb6f   : > { %v12328_v60 = vpop.eup %12327  ;;  %v9452_v17 = vmul.f32 %v12326_v59, %v8973_v21  ;;  %v10787_v55 = vmul.f32 -1.442695, %v8990_v56  ;;  %v8851_v53 = vmul.f32 %v14744_v41, %v8647_v47  ;;  %v8977_v56 = vadd.f32 %v14850_v48, %v8836_v57 }
 0xb70   : > { %v9264_v61 = vadd.f32 1.0, %v12328_v60  ;;  %v8650_v49 = vpop.f32.mrf.mxu1  ;;  %v8838_v47 = vmul.f32 %v14834_v11, %v8615_v35  ;;  %v8619_v59 = vadd.f32 %v15263_v63, %v15093_v51 }
 0xb71   : > { %9516 = vst [vmem:[%s14885_s22 + $0x108] sm:$0xff] %v9452_v17  ;;  %12341 = vpow2.f32 %v10787_v55  ;;  %v8992_v26 = vadd.f32 %v14757_v9, %v8851_v53  ;;  %v8651_v38 = vadd.f32 %v8650_v49, %v15182_v7  ;;  %v15366_v49 = vpop.f32.mrf.mxu0 }
 0xb72   : > { %v12330_v13 = vpop.eup %12329  ;;  %12343 = vrcp.f32 %v9264_v61  ;;  %v15351_v37 = vpop.f32.mrf.mxu1  ;;  %v8979_v51 = vadd.f32 %v14850_v48, %v8838_v47  ;;  %v8840_v63 = vmul.f32 %v14834_v11, %v8619_v59 }
 0xb73   : > { %v12332_v30 = vpop.eup %12331  ;;  %v9453_v22 = vmul.f32 %v12330_v13, %v8975_v18  ;;  %v10788_v21 = vmul.f32 -1.442695, %v8992_v26  ;;  %v8853_v44 = vmul.f32 %v14744_v41, %v8651_v38  ;;  %v8625_v13 = vadd.f32 %v15277_v46, %v15107_v52 }
 0xb74   : > { %v9265_v42 = vadd.f32 1.0, %v12332_v30  ;;  %v8656_v24 = vpop.f32.mrf.mxu1  ;;  %v8981_v52 = vadd.f32 %v14850_v48, %v8840_v63 }
 0xb75   : > { %9517 = vst [vmem:[%s14885_s22 + $0x110] sm:$0xff] %v9453_v22  ;;  %12345 = vpow2.f32 %v10788_v21  ;;  %v8994_v7 = vadd.f32 %v14757_v9, %v8853_v44  ;;  %v8657_v45 = vadd.f32 %v8656_v24, %v15198_v0  ;;  %v15378_v24 = vpop.f32.mrf.mxu0  ;;  %v8842_v46 = vmul.f32 %v14834_v11, %v8625_v13 }
 0xb76   : > { %v12334_v1 = vpop.eup %12333  ;;  %12347 = vrcp.f32 %v9265_v42  ;;  %v15363_v60 = vpop.f32.mrf.mxu1 }
 0xb77   : > { %v12336_v17 = vpop.eup %12335  ;;  %v9454_v55 = vmul.f32 %v12334_v1, %v8977_v56  ;;  %v10789_v53 = vmul.f32 -1.442695, %v8994_v7  ;;  %v8855_v18 = vmul.f32 %v14744_v41, %v8657_v45  ;;  %v8629_v1 = vadd.f32 %v15291_v8, %v15121_v54 }
 0xb78   : > { %v9266_v61 = vadd.f32 1.0, %v12336_v17  ;;  %v8660_v57 = vpop.f32.mrf.mxu1 }
 0xb79   : > { %9518 = vst [vmem:[%s14885_s22 + $0x118] sm:$0xff] %v9454_v55  ;;  %12349 = vpow2.f32 %v10789_v53  ;;  %v8996_v0 = vadd.f32 %v14757_v9, %v8855_v18  ;;  %v8661_v26 = vadd.f32 %v8660_v57, %v15213_v43  ;;  %v8635_v57 = vadd.f32 %v15303_v23, %v15135_v33 }
 0xb7a   : > { %v12338_v38 = vpop.eup %12337  ;;  %12351 = vrcp.f32 %v9266_v61  ;;  %v15375_v35 = vpop.f32.mrf.mxu1 }
 0xb7b   : > { %v12340_v30 = vpop.eup %12339  ;;  %v9267_v22 = vadd.f32 1.0, %v12338_v38  ;;  %v10790_v21 = vmul.f32 -1.442695, %v8996_v0  ;;  %v8857_v44 = vmul.f32 %v14744_v41, %v8661_v26  ;;  %v8983_v26 = vadd.f32 %v14850_v48, %v8842_v46 }
 0xb7c   : > { %v9455_v42 = vmul.f32 %v12340_v30, %v8979_v51  ;;  %v8666_v43 = vpop.f32.mrf.mxu1  ;;  %v8844_v38 = vmul.f32 %v14834_v11, %v8629_v1 }
 0xb7d   : > { %12353 = vrcp.f32 %v9267_v22  ;;  %v8998_v56 = vadd.f32 %v14757_v9, %v8857_v44  ;;  %v8667_v7 = vadd.f32 %v8666_v43, %v15226_v39  ;;  %v15390_v39 = vpop.f32.mrf.mxu0  ;;  %v8639_v22 = vadd.f32 %v15315_v20, %v15149_v28 }
 0xb7e   : > { %v12342_v45 = vpop.eup %12341  ;;  %9519 = vst [vmem:[%s14885_s22 + $0x120] sm:$0xff] %v9455_v42  ;;  %12355 = vpow2.f32 %v10790_v21  ;;  %v15387_v47 = vpop.f32.mrf.mxu1  ;;  %v8846_v44 = vmul.f32 %v14834_v11, %v8635_v57 }
 0xb7f   : > { %v12344_v59 = vpop.eup %12343  ;;  %v9268_v17 = vadd.f32 1.0, %v12342_v45  ;;  %v10791_v55 = vmul.f32 -1.442695, %v8998_v56  ;;  %v8859_v53 = vmul.f32 %v14744_v41, %v8667_v7  ;;  %v8985_v7 = vadd.f32 %v14850_v48, %v8844_v38 }
 0xb80   : > { %v9456_v18 = vmul.f32 %v12344_v59, %v8981_v52  ;;  %v8670_v61 = vpop.f32.mrf.mxu1  ;;  %v8848_v59 = vmul.f32 %v14834_v11, %v8639_v22 }
 0xb81   : > { %12357 = vrcp.f32 %v9268_v17  ;;  %v9000_v0 = vadd.f32 %v14757_v9, %v8859_v53  ;;  %v8671_v54 = vadd.f32 %v8670_v61, %v15239_v34  ;;  %v15404_v34 = vpop.f32.mrf.mxu0  ;;  %v8645_v17 = vadd.f32 %v15327_v32, %v15163_v62 }
 0xb82   : > { %v12346_v8 = vpop.eup %12345  ;;  %9520 = vst [vmem:[%s14885_s22 + $0x128] sm:$0xff] %v9456_v18  ;;  %12359 = vpow2.f32 %v10791_v55  ;;  %v15399_v51 = vpop.f32.mrf.mxu1  ;;  %v8987_v53 = vadd.f32 %v14850_v48, %v8846_v44  ;;  %v8989_v32 = vadd.f32 %v14850_v48, %v8848_v59 }
 0xb83   : > { %v12348_v63 = vpop.eup %12347  ;;  %v9269_v13 = vadd.f32 1.0, %v12346_v8  ;;  %v10792_v30 = vmul.f32 -1.442695, %v9000_v0  ;;  %v8861_v33 = vmul.f32 %v14744_v41, %v8671_v54  ;;  %v8850_v38 = vmul.f32 %v14834_v11, %v8645_v17 }
 0xb84   : > { %v9457_v23 = vmul.f32 %v12348_v63, %v8983_v26  ;;  %v8676_v21 = vpop.f32.mrf.mxu1 }
 0xb85   : > { %12361 = vrcp.f32 %v9269_v13  ;;  %v9002_v42 = vadd.f32 %v14757_v9, %v8861_v33  ;;  %v8677_v43 = vadd.f32 %v8676_v21, %v15252_v14  ;;  %v15417_v14 = vpop.f32.mrf.mxu0 }
 0xb86   : > { %v12350_v56 = vpop.eup %12349  ;;  %9521 = vst [vmem:[%s14885_s22 + $0x130] sm:$0xff] %v9457_v23  ;;  %12363 = vpow2.f32 %v10792_v30  ;;  %v15411_v45 = vpop.f32.mrf.mxu1 }
 0xb87   : > { %v12352_v52 = vpop.eup %12351  ;;  %v9270_v28 = vadd.f32 1.0, %v12350_v56  ;;  %v10793_v20 = vmul.f32 -1.442695, %v9002_v42  ;;  %v8863_v46 = vmul.f32 %v14744_v41, %v8677_v43  ;;  %v15428_v13 = vpop.f32.mrf.mxu0 }
 0xb88   : > { %v9458_v1 = vmul.f32 %v12352_v52, %v8985_v7  ;;  %v8680_v55 = vpop.f32.mrf.mxu1  ;;  %v8991_v7 = vadd.f32 %v14850_v48, %v8850_v38 }
 0xb89   : > { %12365 = vrcp.f32 %v9270_v28  ;;  %v9004_v18 = vadd.f32 %v14757_v9, %v8863_v46  ;;  %v8681_v61 = vadd.f32 %v8680_v55, %v15266_v4  ;;  %v8649_v4 = vadd.f32 %v15339_v5, %v15177_v15  ;;  %v15439_v52 = vpop.f32.mrf.mxu0 }
 0xb8a   : > { %v12354_v57 = vpop.eup %12353  ;;  %9522 = vst [vmem:[%s14885_s22 + $0x138] sm:$0xff] %v9458_v1  ;;  %12367 = vpow2.f32 %v10793_v20  ;;  %v15423_v0 = vpop.f32.mrf.mxu1  ;;  %v8655_v1 = vadd.f32 %v15351_v37, %v15191_v27 }
 0xb8b   : > { %v12356_v54 = vpop.eup %12355  ;;  %v9459_v8 = vmul.f32 %v12354_v57, %v8987_v53  ;;  %v10794_v26 = vmul.f32 -1.442695, %v9004_v18  ;;  %v8865_v62 = vmul.f32 %v14744_v41, %v8681_v61  ;;  %v8852_v5 = vmul.f32 %v14834_v11, %v8649_v4  ;;  %v15450_v61 = vpop.f32.mrf.mxu0 }
 0xb8c   : > { %v9271_v63 = vadd.f32 1.0, %v12356_v54  ;;  %v8686_v30 = vpop.f32.mrf.mxu1 }
 0xb8d   : > { %9523 = vst [vmem:[%s14885_s22 + $0x140] sm:$0xff] %v9459_v8  ;;  %12369 = vpow2.f32 %v10794_v26  ;;  %v9006_v33 = vadd.f32 %v14757_v9, %v8865_v62  ;;  %v8687_v23 = vadd.f32 %v8686_v30, %v15280_v31  ;;  %v8993_v8 = vadd.f32 %v14850_v48, %v8852_v5 }
 0xb8e   : > { %v12358_v22 = vpop.eup %12357  ;;  %12371 = vrcp.f32 %v9271_v63  ;;  %v15435_v21 = vpop.f32.mrf.mxu1  ;;  %v8854_v26 = vmul.f32 %v14834_v11, %v8655_v1  ;;  %v8659_v62 = vadd.f32 %v15363_v60, %v15205_v40 }
 0xb8f   : > { %v12360_v44 = vpop.eup %12359  ;;  %v9460_v42 = vmul.f32 %v12358_v22, %v8989_v32  ;;  %v10795_v43 = vmul.f32 -1.442695, %v9006_v33  ;;  %v8867_v56 = vmul.f32 %v14744_v41, %v8687_v23  ;;  %v15462_v33 = vpop.f32.mrf.mxu0 }
 0xb90   : > { %v9272_v28 = vadd.f32 1.0, %v12360_v44  ;;  %v8690_v15 = vpop.f32.mrf.mxu1  ;;  %v8995_v40 = vadd.f32 %v14850_v48, %v8854_v26  ;;  %v8856_v60 = vmul.f32 %v14834_v11, %v8659_v62 }
 0xb91   : > { %9524 = vst [vmem:[%s14885_s22 + $0x148] sm:$0xff] %v9460_v42  ;;  %12373 = vpow2.f32 %v10795_v43  ;;  %v9008_v31 = vadd.f32 %v14757_v9, %v8867_v56  ;;  %v8691_v20 = vadd.f32 %v8690_v15, %v15294_v12  ;;  %v8665_v43 = vadd.f32 %v15375_v35, %v15219_v29 }
 0xb92   : > { %v12362_v46 = vpop.eup %12361  ;;  %12375 = vrcp.f32 %v9272_v28  ;;  %v15447_v59 = vpop.f32.mrf.mxu1  ;;  %v8997_v29 = vadd.f32 %v14850_v48, %v8856_v60 }
 0xb93   : > { %v12364_v17 = vpop.eup %12363  ;;  %v9461_v55 = vmul.f32 %v12362_v46, %v8991_v7  ;;  %v10796_v53 = vmul.f32 -1.442695, %v9008_v31  ;;  %v8869_v18 = vmul.f32 %v14744_v41, %v8691_v20  ;;  %v15474_v20 = vpop.f32.mrf.mxu0  ;;  %v8858_v35 = vmul.f32 %v14834_v11, %v8665_v43 }
 0xb94   : > { %v9273_v57 = vadd.f32 1.0, %v12364_v17  ;;  %v8696_v54 = vpop.f32.mrf.mxu1 }
 0xb95   : > { %9525 = vst [vmem:[%s14885_s22 + $0x150] sm:$0xff] %v9461_v55  ;;  %12377 = vpow2.f32 %v10796_v53  ;;  %v9010_v12 = vadd.f32 %v14757_v9, %v8869_v18  ;;  %v8697_v27 = vadd.f32 %v8696_v54, %v15321_v58  ;;  %v8669_v55 = vadd.f32 %v15387_v47, %v15233_v3 }
 0xb96   : > { %v12366_v37 = vpop.eup %12365  ;;  %12379 = vrcp.f32 %v9273_v57  ;;  %v15459_v32 = vpop.f32.mrf.mxu1  ;;  %v8999_v62 = vadd.f32 %v14850_v48, %v8858_v35 }
 0xb97   : > { %v12368_v38 = vpop.eup %12367  ;;  %v9462_v63 = vmul.f32 %v12366_v37, %v8993_v8  ;;  %v10797_v30 = vmul.f32 -1.442695, %v9010_v12  ;;  %v8871_v4 = vmul.f32 %v14744_v41, %v8697_v27  ;;  %v8675_v37 = vadd.f32 %v15399_v51, %v15247_v2 }
 0xb98   : > { %v9274_v23 = vadd.f32 1.0, %v12368_v38  ;;  %v8700_v22 = vpop.f32.mrf.mxu1  ;;  %v8860_v38 = vmul.f32 %v14834_v11, %v8669_v55 }
 0xb99   : > { %9526 = vst [vmem:[%s14885_s22 + $0x158] sm:$0xff] %v9462_v63  ;;  %12381 = vpow2.f32 %v10797_v30  ;;  %v9012_v58 = vadd.f32 %v14757_v9, %v8871_v4  ;;  %v8701_v44 = vadd.f32 %v8700_v22, %v15343_v10 }
 0xb9a   : > { %v12370_v42 = vpop.eup %12369  ;;  %12383 = vrcp.f32 %v9274_v23  ;;  %v15471_v56 = vpop.f32.mrf.mxu1  ;;  %v9001_v43 = vadd.f32 %v14850_v48, %v8860_v38 }
 0xb9b   : > { %v12372_v7 = vpop.eup %12371  ;;  %v9275_v28 = vadd.f32 1.0, %v12370_v42  ;;  %v10798_v15 = vmul.f32 -1.442695, %v9012_v58  ;;  %v8873_v5 = vmul.f32 %v14744_v41, %v8701_v44  ;;  %v8862_v44 = vmul.f32 %v14834_v11, %v8675_v37 }
 0xb9c   : > { %v9463_v31 = vmul.f32 %v12372_v7, %v8995_v40  ;;  %v8706_v10 = vpop.f32.mrf.mxu1 }
 0xb9d   : > { %12385 = vrcp.f32 %v9275_v28  ;;  %v9014_v46 = vadd.f32 %v14757_v9, %v8873_v5  ;;  %v8707_v1 = vadd.f32 %v8706_v10, %v15366_v49  ;;  %v15486_v49 = vpop.f32.mrf.mxu0 }
 0xb9e   : > { %v12374_v17 = vpop.eup %12373  ;;  %9527 = vst [vmem:[%s14885_s22 + $0x160] sm:$0xff] %v9463_v31  ;;  %12387 = vpow2.f32 %v10798_v15  ;;  %v15483_v53 = vpop.f32.mrf.mxu1 }
 0xb9f   : > { %v12376_v18 = vpop.eup %12375  ;;  %v9276_v57 = vadd.f32 1.0, %v12374_v17  ;;  %v10799_v54 = vmul.f32 -1.442695, %v9014_v46  ;;  %v8875_v8 = vmul.f32 %v14744_v41, %v8707_v1  ;;  %v15498_v22 = vpop.f32.mrf.mxu0  ;;  %v9003_v1 = vadd.f32 %v14850_v48, %v8862_v44 }
 0xba0   : > { %v9464_v12 = vmul.f32 %v12376_v18, %v8997_v29  ;;  %v8710_v27 = vpop.f32.mrf.mxu1 }
 0xba1   : > { %12389 = vrcp.f32 %v9276_v57  ;;  %v9016_v26 = vadd.f32 %v14757_v9, %v8875_v8  ;;  %v8711_v3 = vadd.f32 %v8710_v27, %v15390_v39  ;;  %v8679_v39 = vadd.f32 %v15411_v45, %v15261_v19  ;;  %v8383_v31 = vpop.f32.mrf.mxu0 }
 0xba2   : > { %v12378_v47 = vpop.eup %12377  ;;  %9528 = vst [vmem:[%s14885_s22 + $0x168] sm:$0xff] %v9464_v12  ;;  %12391 = vpow2.f32 %v10799_v54  ;;  %v15495_v63 = vpop.f32.mrf.mxu1 }
 0xba3   : > { %v12380_v30 = vpop.eup %12379  ;;  %v9277_v4 = vadd.f32 1.0, %v12378_v47  ;;  %v10800_v23 = vmul.f32 -1.442695, %v9016_v26  ;;  %v8877_v2 = vmul.f32 %v14744_v41, %v8711_v3  ;;  %v8864_v10 = vmul.f32 %v14834_v11, %v8679_v39 }
 0xba4   : > { %v9465_v51 = vmul.f32 %v12380_v30, %v8999_v62  ;;  %v8716_v58 = vpop.f32.mrf.mxu1 }
 0xba5   : > { %12393 = vrcp.f32 %v9277_v4  ;;  %v9018_v42 = vadd.f32 %v14757_v9, %v8877_v2  ;;  %v8717_v40 = vadd.f32 %v8716_v58, %v15417_v14  ;;  %v8685_v14 = vadd.f32 %v15423_v0, %v15275_v16  ;;  %v15520_v16 = vpop.f32.mrf.mxu0 }
 0xba6   : > { %v12382_v60 = vpop.eup %12381  ;;  %9529 = vst [vmem:[%s14885_s22 + $0x170] sm:$0xff] %v9465_v51  ;;  %12395 = vpow2.f32 %v10800_v23  ;;  %v15507_v7 = vpop.f32.mrf.mxu1  ;;  %v9005_v0 = vadd.f32 %v14850_v48, %v8864_v10 }
 0xba7   : > { %v12384_v28 = vpop.eup %12383  ;;  %v9278_v15 = vadd.f32 1.0, %v12382_v60  ;;  %v10801_v5 = vmul.f32 -1.442695, %v9018_v42  ;;  %v8879_v19 = vmul.f32 %v14744_v41, %v8717_v40  ;;  %v8866_v12 = vmul.f32 %v14834_v11, %v8685_v14  ;;  %v8387_v2 = vpop.f32.mrf.mxu0 }
 0xba8   : > { %v9466_v45 = vmul.f32 %v12384_v28, %v9001_v43  ;;  %v8720_v46 = vpop.f32.mrf.mxu1  ;;  %v8695_v42 = vadd.f32 %v15447_v59, %v15308_v6 }
 0xba9   : > { %12397 = vrcp.f32 %v9278_v15  ;;  %v9020_v17 = vadd.f32 %v14757_v9, %v8879_v19  ;;  %v8721_v29 = vadd.f32 %v8720_v46, %v15439_v52  ;;  %v8689_v52 = vadd.f32 %v15435_v21, %v15289_v25 }
 0xbaa   : > { %v12386_v35 = vpop.eup %12385  ;;  %9530 = vst [vmem:[%s14885_s22 + $0x178] sm:$0xff] %v9466_v45  ;;  %12399 = vpow2.f32 %v10801_v5  ;;  %v15517_v55 = vpop.f32.mrf.mxu1  ;;  %v9007_v51 = vadd.f32 %v14850_v48, %v8866_v12  ;;  %v8870_v14 = vmul.f32 %v14834_v11, %v8695_v42  ;;  %v8699_v46 = vadd.f32 %v15459_v32, %v15332_v50 }
 0xbab   : > { %v12388_v18 = vpop.eup %12387  ;;  %v9467_v57 = vmul.f32 %v12386_v35, %v9003_v1  ;;  %v10802_v54 = vmul.f32 -1.442695, %v9020_v17  ;;  %v8881_v8 = vmul.f32 %v14744_v41, %v8721_v29  ;;  %v8868_v25 = vmul.f32 %v14834_v11, %v8689_v52  ;;  %v15542_v5 = vpop.f32.mrf.mxu0 }
 0xbac   : > { %v9279_v27 = vadd.f32 1.0, %v12388_v18  ;;  %v8726_v37 = vpop.f32.mrf.mxu1  ;;  %v8872_v50 = vmul.f32 %v14834_v11, %v8699_v46  ;;  %v8705_v32 = vadd.f32 %v15471_v56, %v15354_v36 }
 0xbad   : > { %9531 = vst [vmem:[%s14885_s22 + $0x180] sm:$0xff] %v9467_v57  ;;  %12401 = vpow2.f32 %v10802_v54  ;;  %v9022_v26 = vadd.f32 %v14757_v9, %v8881_v8  ;;  %v8727_v3 = vadd.f32 %v8726_v37, %v15462_v33  ;;  %v9009_v10 = vadd.f32 %v14850_v48, %v8868_v25  ;;  %v8393_v57 = vpop.f32.mrf.mxu0 }
 0xbae   : > { %v12390_v47 = vpop.eup %12389  ;;  %12403 = vrcp.f32 %v9279_v27  ;;  %v15529_v62 = vpop.f32.mrf.mxu1  ;;  %v9011_v27 = vadd.f32 %v14850_v48, %v8870_v14  ;;  %v9013_v36 = vadd.f32 %v14850_v48, %v8872_v50  ;;  %v8874_v56 = vmul.f32 %v14834_v11, %v8705_v32 }
 0xbaf   : > { %v12392_v38 = vpop.eup %12391  ;;  %v9468_v30 = vmul.f32 %v12390_v47, %v9005_v0  ;;  %v10803_v4 = vmul.f32 -1.442695, %v9022_v26  ;;  %v8883_v23 = vmul.f32 %v14744_v41, %v8727_v3  ;;  %v8729_v50 = vadd.f32 %v15529_v62, %v15474_v20 }
 0xbb0   : > { %v9280_v39 = vadd.f32 1.0, %v12392_v38  ;;  %v8730_v58 = vpop.f32.mrf.mxu1  ;;  %v15562_v38 = vpop.f32.mrf.mxu0 }
 0xbb1   : > { %9532 = vst [vmem:[%s14885_s22 + $0x188] sm:$0xff] %v9468_v30  ;;  %12405 = vpow2.f32 %v10803_v4  ;;  %v9024_v21 = vadd.f32 %v14757_v9, %v8883_v23  ;;  %v8731_v33 = vadd.f32 %v8730_v58, %v15486_v49 }
 0xbb2   : > { %v12394_v44 = vpop.eup %12393  ;;  %12407 = vrcp.f32 %v9280_v39  ;;  %v15539_v40 = vpop.f32.mrf.mxu1  ;;  %v8709_v39 = vadd.f32 %v15483_v53, %v15378_v24  ;;  %v9015_v53 = vadd.f32 %v14850_v48, %v8874_v56 }
 0xbb3   : > { %v12396_v60 = vpop.eup %12395  ;;  %v9469_v43 = vmul.f32 %v12394_v44, %v9007_v51  ;;  %v10804_v28 = vmul.f32 -1.442695, %v9024_v21  ;;  %v8885_v15 = vmul.f32 %v14744_v41, %v8731_v33  ;;  %v8397_v42 = vpop.f32.mrf.mxu0 }
 0xbb4   : > { %v9281_v19 = vadd.f32 1.0, %v12396_v60  ;;  %v8736_v45 = vpop.f32.mrf.mxu1 }
 0xbb5   : > { %9533 = vst [vmem:[%s14885_s22 + $0x190] sm:$0xff] %v9469_v43  ;;  %12409 = vpow2.f32 %v10804_v28  ;;  %v9026_v49 = vadd.f32 %v14757_v9, %v8885_v15  ;;  %v8737_v6 = vadd.f32 %v8736_v45, %v8383_v31  ;;  %v8715_v28 = vadd.f32 %v15495_v63, %v15404_v34 }
 0xbb6   : > { %v12398_v59 = vpop.eup %12397  ;;  %12411 = vrcp.f32 %v9281_v19  ;;  %v15550_v1 = vpop.f32.mrf.mxu1  ;;  %v8876_v45 = vmul.f32 %v14834_v11, %v8709_v39  ;;  %v8719_v63 = vadd.f32 %v15507_v7, %v15428_v13  ;;  %v8725_v13 = vadd.f32 %v15517_v55, %v15450_v61 }
 0xbb7   : > { %v12400_v17 = vpop.eup %12399  ;;  %v9470_v29 = vmul.f32 %v12398_v59, %v9009_v10  ;;  %v10805_v35 = vmul.f32 -1.442695, %v9026_v49  ;;  %v8887_v18 = vmul.f32 %v14744_v41, %v8737_v6  ;;  %v8878_v34 = vmul.f32 %v14834_v11, %v8715_v28 }
 0xbb8   : > { %v9282_v54 = vadd.f32 1.0, %v12400_v17  ;;  %v8740_v8 = vpop.f32.mrf.mxu1 }
 0xbb9   : > { %9534 = vst [vmem:[%s14885_s22 + $0x198] sm:$0xff] %v9470_v29  ;;  %12413 = vpow2.f32 %v10805_v35  ;;  %v9028_v31 = vadd.f32 %v14757_v9, %v8887_v18  ;;  %v8741_v0 = vadd.f32 %v8740_v8, %v8387_v2  ;;  %v9017_v29 = vadd.f32 %v14850_v48, %v8876_v45  ;;  %v9718_v45 = vld [vmem:[%s14885_s22 + $0x20] sm:$0xff] (%p12644_p4) }
 0xbba   : > { %v12402_v12 = vpop.eup %12401  ;;  %12415 = vrcp.f32 %v9282_v54  ;;  %v15559_v37 = vpop.f32.mrf.mxu1  ;;  %v9019_v54 = vadd.f32 %v14850_v48, %v8878_v34  ;;  %v8880_v8 = vmul.f32 %v14834_v11, %v8719_v63  ;;  %9719 = vst [vmem:[%s15631_s15 + $0x40] sm:$0xff] (%p12644_p4), %v9718_v45  ;;  %v9730_v34 = vld [vmem:[%s14885_s22 + $0x50] sm:$0xff] (%p12644_p4)  ;;  %v9732_v63 = vld [vmem:[%s14885_s22 + $0x58] sm:$0xff] (%p12644_p4) }
 0xbbb   : > { %v12404_v52 = vpop.eup %12403  ;;  %v9283_v26 = vadd.f32 1.0, %v12402_v12  ;;  %v10806_v3 = vmul.f32 -1.442695, %v9028_v31  ;;  %v8889_v47 = vmul.f32 %v14744_v41, %v8741_v0  ;;  %9731 = vst [vmem:[%s15631_s15 + $0xa0] sm:$0xff] (%p12644_p4), %v9730_v34  ;;  %9733 = vst [vmem:[%s15631_s15 + $0xb0] sm:$0xff] (%p12644_p4), %v9732_v63 }
 0xbbc   : > { %v9471_v30 = vmul.f32 %v12404_v52, %v9011_v27  ;;  %v8746_v4 = vpop.f32.mrf.mxu1  ;;  %v9021_v12 = vadd.f32 %v14850_v48, %v8880_v8  ;;  %v8882_v27 = vmul.f32 %v14834_v11, %v8725_v13  ;;  %v9750_v8 = vld [vmem:[%s14885_s22 + $0xa0] sm:$0xff] (%p12644_p4)  ;;  %v9752_v13 = vld [vmem:[%s14885_s22 + $0xa8] sm:$0xff] (%p12644_p4) }
 0xbbd   : > { %12417 = vrcp.f32 %v9283_v26  ;;  %v9030_v23 = vadd.f32 %v14757_v9, %v8889_v47  ;;  %v8747_v2 = vadd.f32 %v8746_v4, %v8393_v57  ;;  %9751 = vst [vmem:[%s15631_s15 + $0x140] sm:$0xff] (%p12644_p4), %v9750_v8  ;;  %9753 = vst [vmem:[%s15631_s15 + $0x150] sm:$0xff] (%p12644_p4), %v9752_v13 }
 0xbbe   : > { %v12406_v51 = vpop.eup %12405  ;;  %9535 = vst [vmem:[%s14885_s22 + $0x1a0] sm:$0xff] %v9471_v30  ;;  %12419 = vpow2.f32 %v10806_v3  ;;  %v15570_v58 = vpop.f32.mrf.mxu1  ;;  %v9023_v26 = vadd.f32 %v14850_v48, %v8882_v27  ;;  %v8884_v3 = vmul.f32 %v14834_v11, %v8729_v50  ;;  %v8735_v30 = vadd.f32 %v15539_v40, %v15498_v22  ;;  %v9764_v27 = vld [vmem:[%s14885_s22 + $0xd8] sm:$0xff] (%p12644_p4)  ;;  %v9766_v50 = vld [vmem:[%s14885_s22 + $0xe0] sm:$0xff] (%p12644_p4) }
 0xbbf   : > { %v12408_v25 = vpop.eup %12407  ;;  %v9284_v21 = vadd.f32 1.0, %v12406_v51  ;;  %v10807_v33 = vmul.f32 -1.442695, %v9030_v23  ;;  %v8891_v44 = vmul.f32 %v14744_v41, %v8747_v2  ;;  %9765 = vst [vmem:[%s15631_s15 + $0x1b0] sm:$0xff] (%p12644_p4), %v9764_v27  ;;  %9767 = vst [vmem:[%s15631_s15 + $0x1c0] sm:$0xff] (%p12644_p4), %v9766_v50 }
 0xbc0   : > { %v9472_v60 = vmul.f32 %v12408_v25, %v9013_v36  ;;  %v8750_v43 = vpop.f32.mrf.mxu1  ;;  %v9025_v20 = vadd.f32 %v14850_v48, %v8884_v3  ;;  %v8886_v51 = vmul.f32 %v14834_v11, %v8735_v30  ;;  %v8739_v36 = vadd.f32 %v15550_v1, %v15520_v16  ;;  %v9778_v3 = vld [vmem:[%s14885_s22 + $0x110] sm:$0xff] (%p12644_p4)  ;;  %v9782_v30 = vld [vmem:[%s14885_s22 + $0x120] sm:$0xff] (%p12644_p4) }
 0xbc1   : > { %12421 = vrcp.f32 %v9284_v21  ;;  %v9032_v15 = vadd.f32 %v14757_v9, %v8891_v44  ;;  %v8751_v19 = vadd.f32 %v8750_v43, %v8397_v42  ;;  %v8745_v21 = vadd.f32 %v15559_v37, %v15542_v5  ;;  %9779 = vst [vmem:[%s15631_s15 + $0x220] sm:$0xff] (%p12644_p4), %v9778_v3  ;;  %9783 = vst [vmem:[%s15631_s15 + $0x240] sm:$0xff] (%p12644_p4), %v9782_v30 }
 0xbc2   : > { %v12410_v24 = vpop.eup %12409  ;;  %9536 = vst [vmem:[%s14885_s22 + $0x1a8] sm:$0xff] %v9472_v60  ;;  %12423 = vpow2.f32 %v10807_v33  ;;  %v9027_v22 = vadd.f32 %v14850_v48, %v8886_v51  ;;  %v8888_v40 = vmul.f32 %v14834_v11, %v8739_v36  ;;  %v8749_v42 = vadd.f32 %v15570_v58, %v15562_v38  ;;  %v9712_v38 = vld [vmem:[%s14885_s22 + $0x8] sm:$0xff] (%p12644_p4)  ;;  %v9716_v58 = vld [vmem:[%s14885_s22 + $0x18] sm:$0xff] (%p12644_p4)  ;;  %v9794_v51 = vld [vmem:[%s14885_s22 + $0x150] sm:$0xff] (%p12644_p4) }
 0xbc3   : > { %v12412_v10 = vpop.eup %12411  ;;  %v9285_v49 = vadd.f32 1.0, %v12410_v24  ;;  %v10808_v6 = vmul.f32 -1.442695, %v9032_v15  ;;  %v8893_v59 = vmul.f32 %v14744_v41, %v8751_v19  ;;  %v8890_v1 = vmul.f32 %v14834_v11, %v8745_v21  ;;  %9713 = vst [vmem:[%s15631_s15 + $0x10] sm:$0xff] (%p12644_p4), %v9712_v38  ;;  %9717 = vst [vmem:[%s15631_s15 + $0x30] sm:$0xff] (%p12644_p4), %v9716_v58  ;;  %v9796_v36 = vld [vmem:[%s14885_s22 + $0x158] sm:$0xff] (%p12644_p4) }
 0xbc4   : > { %v9473_v14 = vmul.f32 %v12412_v10, %v9015_v53  ;;  %v9029_v16 = vadd.f32 %v14850_v48, %v8888_v40  ;;  %v8892_v15 = vmul.f32 %v14834_v11, %v8749_v42  ;;  %v9710_v11 = vld [vmem:[%s14885_s22] sm:$0xff] (%p12644_p4)  ;;  %v9720_v10 = vld [vmem:[%s14885_s22 + $0x28] sm:$0xff] (%p12644_p4)  ;;  %9795 = vst [vmem:[%s15631_s15 + $0x2a0] sm:$0xff] (%p12644_p4), %v9794_v51  ;;  %9797 = vst [vmem:[%s15631_s15 + $0x2b0] sm:$0xff] (%p12644_p4), %v9796_v36 }
 0xbc5   : > { %12425 = vrcp.f32 %v9285_v49  ;;  %v9034_v46 = vadd.f32 %v14757_v9, %v8893_v59  ;;  %v9031_v28 = vadd.f32 %v14850_v48, %v8890_v1  ;;  %9711 = vst [vmem:[%s15631_s15] sm:$0xff] (%p12644_p4), %v9710_v11  ;;  %9721 = vst [vmem:[%s15631_s15 + $0x50] sm:$0xff] (%p12644_p4), %v9720_v10  ;;  %v9722_v49 = vld [vmem:[%s14885_s22 + $0x30] sm:$0xff] (%p12644_p4)  ;;  %v9726_v59 = vld [vmem:[%s14885_s22 + $0x40] sm:$0xff] (%p12644_p4) }
 0xbc6   : > { %v12414_v17 = vpop.eup %12413  ;;  %9537 = vst [vmem:[%s14885_s22 + $0x1b0] sm:$0xff] %v9473_v14  ;;  %12427 = vpow2.f32 %v10808_v6  ;;  %v9033_v19 = vadd.f32 %v14850_v48, %v8892_v15  ;;  %v9714_v48 = vld [vmem:[%s14885_s22 + $0x10] sm:$0xff] (%p12644_p4)  ;;  %v9724_v6 = vld [vmem:[%s14885_s22 + $0x38] sm:$0xff] (%p12644_p4)  ;;  %9723 = vst [vmem:[%s15631_s15 + $0x60] sm:$0xff] (%p12644_p4), %v9722_v49 }
 0xbc7   : > { %v12416_v35 = vpop.eup %12415  ;;  %v9286_v18 = vadd.f32 1.0, %v12414_v17  ;;  %v10809_v57 = vmul.f32 -1.442695, %v9034_v46  ;;  %9715 = vst [vmem:[%s15631_s15 + $0x20] sm:$0xff] (%p12644_p4), %v9714_v48  ;;  %9725 = vst [vmem:[%s15631_s15 + $0x70] sm:$0xff] (%p12644_p4), %v9724_v6  ;;  %v9728_v14 = vld [vmem:[%s14885_s22 + $0x48] sm:$0xff] (%p12644_p4) }
 0xbc8   : > { %v9474_v41 = vmul.f32 %v12416_v35, %v9017_v29  ;;  %9727 = vst [vmem:[%s15631_s15 + $0x80] sm:$0xff] (%p12644_p4), %v9726_v59  ;;  %9729 = vst [vmem:[%s15631_s15 + $0x90] sm:$0xff] (%p12644_p4), %v9728_v14  ;;  %v9734_v46 = vld [vmem:[%s14885_s22 + $0x60] sm:$0xff] (%p12644_p4)  ;;  %v9736_v17 = vld [vmem:[%s14885_s22 + $0x68] sm:$0xff] (%p12644_p4) }
 0xbc9   : > { %12429 = vrcp.f32 %v9286_v18  ;;  %v9738_v29 = vld [vmem:[%s14885_s22 + $0x70] sm:$0xff] (%p12644_p4)  ;;  %9735 = vst [vmem:[%s15631_s15 + $0xc0] sm:$0xff] (%p12644_p4), %v9734_v46  ;;  %9737 = vst [vmem:[%s15631_s15 + $0xd0] sm:$0xff] (%p12644_p4), %v9736_v17  ;;  %v9740_v35 = vld [vmem:[%s14885_s22 + $0x78] sm:$0xff] (%p12644_p4) }
 0xbca   : > { %v12418_v9 = vpop.eup %12417  ;;  %9538 = vst [vmem:[%s14885_s22 + $0x1b8] sm:$0xff] %v9474_v41  ;;  %12431 = vpow2.f32 %v10809_v57  ;;  %9739 = vst [vmem:[%s15631_s15 + $0xe0] sm:$0xff] (%p12644_p4), %v9738_v29  ;;  %v9742_v18 = vld [vmem:[%s14885_s22 + $0x80] sm:$0xff] (%p12644_p4)  ;;  %v9744_v57 = vld [vmem:[%s14885_s22 + $0x88] sm:$0xff] (%p12644_p4) }
 0xbcb   : > { %v12420_v7 = vpop.eup %12419  ;;  %v9475_v31 = vmul.f32 %v12418_v9, %v9019_v54  ;;  %9741 = vst [vmem:[%s15631_s15 + $0xf0] sm:$0xff] (%p12644_p4), %v9740_v35  ;;  %9743 = vst [vmem:[%s15631_s15 + $0x100] sm:$0xff] (%p12644_p4), %v9742_v18  ;;  %v9746_v41 = vld [vmem:[%s14885_s22 + $0x90] sm:$0xff] (%p12644_p4)  ;;  %v9748_v54 = vld [vmem:[%s14885_s22 + $0x98] sm:$0xff] (%p12644_p4) }
 0xbcc   : > { %v9287_v0 = vadd.f32 1.0, %v12420_v7  ;;  %9745 = vst [vmem:[%s15631_s15 + $0x110] sm:$0xff] (%p12644_p4), %v9744_v57  ;;  %9747 = vst [vmem:[%s15631_s15 + $0x120] sm:$0xff] (%p12644_p4), %v9746_v41  ;;  %v9754_v9 = vld [vmem:[%s14885_s22 + $0xb0] sm:$0xff] (%p12644_p4)  ;;  %v9756_v7 = vld [vmem:[%s14885_s22 + $0xb8] sm:$0xff] (%p12644_p4) }
 0xbcd   : > { %9539 = vst [vmem:[%s14885_s22 + $0x1c0] sm:$0xff] %v9475_v31  ;;  %9749 = vst [vmem:[%s15631_s15 + $0x130] sm:$0xff] (%p12644_p4), %v9748_v54  ;;  %v9758_v31 = vld [vmem:[%s14885_s22 + $0xc0] sm:$0xff] (%p12644_p4)  ;;  %v9808_v21 = vld [vmem:[%s14885_s22 + $0x188] sm:$0xff] (%p12644_p4) }
 0xbce   : > { %v12422_v32 = vpop.eup %12421  ;;  %12433 = vrcp.f32 %v9287_v0  ;;  %9755 = vst [vmem:[%s15631_s15 + $0x160] sm:$0xff] (%p12644_p4), %v9754_v9  ;;  %9757 = vst [vmem:[%s15631_s15 + $0x170] sm:$0xff] (%p12644_p4), %v9756_v7  ;;  %v9760_v0 = vld [vmem:[%s14885_s22 + $0xc8] sm:$0xff] (%p12644_p4)  ;;  %v9806_v40 = vld [vmem:[%s14885_s22 + $0x180] sm:$0xff] (%p12644_p4) }
 0xbcf   : > { %v12424_v61 = vpop.eup %12423  ;;  %v9476_v55 = vmul.f32 %v12422_v32, %v9021_v12  ;;  %v9762_v12 = vld [vmem:[%s14885_s22 + $0xd0] sm:$0xff] (%p12644_p4)  ;;  %9759 = vst [vmem:[%s15631_s15 + $0x180] sm:$0xff] (%p12644_p4), %v9758_v31  ;;  %9761 = vst [vmem:[%s15631_s15 + $0x190] sm:$0xff] (%p12644_p4), %v9760_v0  ;;  %v9768_v32 = vld [vmem:[%s14885_s22 + $0xe8] sm:$0xff] (%p12644_p4) }
 0xbd0   : > { %v9288_v52 = vadd.f32 1.0, %v12424_v61  ;;  %9763 = vst [vmem:[%s15631_s15 + $0x1a0] sm:$0xff] (%p12644_p4), %v9762_v12  ;;  %9769 = vst [vmem:[%s15631_s15 + $0x1d0] sm:$0xff] (%p12644_p4), %v9768_v32  ;;  %v9770_v61 = vld [vmem:[%s14885_s22 + $0xf0] sm:$0xff] (%p12644_p4)  ;;  %v9816_v1 = vld [vmem:[%s14885_s22 + $0x1a8] sm:$0xff] (%p12644_p4) }
 0xbd1   : > { %9540 = vst [vmem:[%s14885_s22 + $0x1c8] sm:$0xff] %v9476_v55  ;;  %v9772_v55 = vld [vmem:[%s14885_s22 + $0xf8] sm:$0xff] (%p12644_p4)  ;;  %9771 = vst [vmem:[%s15631_s15 + $0x1e0] sm:$0xff] (%p12644_p4), %v9770_v61  ;;  %v9818_v42 = vld [vmem:[%s14885_s22 + $0x1b0] sm:$0xff] (%p12644_p4) }
 0xbd2   : > { %v12426_v47 = vpop.eup %12425  ;;  %12435 = vrcp.f32 %v9288_v52  ;;  %v9774_v52 = vld [vmem:[%s14885_s22 + $0x100] sm:$0xff] (%p12644_p4)  ;;  %9773 = vst [vmem:[%s15631_s15 + $0x1f0] sm:$0xff] (%p12644_p4), %v9772_v55  ;;  %9807 = vst [vmem:[%s15631_s15 + $0x300] sm:$0xff] (%p12644_p4), %v9806_v40 }
 0xbd3   : > { %v12428_v4 = vpop.eup %12427  ;;  %v9477_v23 = vmul.f32 %v12426_v47, %v9023_v26  ;;  %9775 = vst [vmem:[%s15631_s15 + $0x200] sm:$0xff] (%p12644_p4), %v9774_v52  ;;  %v9776_v26 = vld [vmem:[%s14885_s22 + $0x108] sm:$0xff] (%p12644_p4)  ;;  %v9780_v47 = vld [vmem:[%s14885_s22 + $0x118] sm:$0xff] (%p12644_p4)  ;;  %9809 = vst [vmem:[%s15631_s15 + $0x310] sm:$0xff] (%p12644_p4), %v9808_v21 }
 0xbd4   : > { %v9289_v2 = vadd.f32 1.0, %v12428_v4  ;;  %9777 = vst [vmem:[%s15631_s15 + $0x210] sm:$0xff] (%p12644_p4), %v9776_v26  ;;  %9781 = vst [vmem:[%s15631_s15 + $0x230] sm:$0xff] (%p12644_p4), %v9780_v47  ;;  %v9784_v4 = vld [vmem:[%s14885_s22 + $0x128] sm:$0xff] (%p12644_p4) }
 0xbd5   : > { %9541 = vst [vmem:[%s14885_s22 + $0x1d0] sm:$0xff] %v9477_v23  ;;  %v9786_v23 = vld [vmem:[%s14885_s22 + $0x130] sm:$0xff] (%p12644_p4)  ;;  %9785 = vst [vmem:[%s15631_s15 + $0x250] sm:$0xff] (%p12644_p4), %v9784_v4 }
 0xbd6   : > { %v12430_v62 = vpop.eup %12429  ;;  %12437 = vrcp.f32 %v9289_v2  ;;  %9787 = vst [vmem:[%s15631_s15 + $0x260] sm:$0xff] (%p12644_p4), %v9786_v23  ;;  %v9788_v2 = vld [vmem:[%s14885_s22 + $0x138] sm:$0xff] (%p12644_p4)  ;;  %9817 = vst [vmem:[%s15631_s15 + $0x350] sm:$0xff] (%p12644_p4), %v9816_v1 }
 0xbd7   : > { %v12432_v56 = vpop.eup %12431  ;;  %v9478_v39 = vmul.f32 %v12430_v62, %v9025_v20  ;;  %v9790_v20 = vld [vmem:[%s14885_s22 + $0x140] sm:$0xff] (%p12644_p4)  ;;  %v9792_v62 = vld [vmem:[%s14885_s22 + $0x148] sm:$0xff] (%p12644_p4)  ;;  %9789 = vst [vmem:[%s15631_s15 + $0x270] sm:$0xff] (%p12644_p4), %v9788_v2  ;;  %9819 = vst [vmem:[%s15631_s15 + $0x360] sm:$0xff] (%p12644_p4), %v9818_v42 }
 0xbd8   : > { %v9290_v25 = vadd.f32 1.0, %v12432_v56  ;;  %9791 = vst [vmem:[%s15631_s15 + $0x280] sm:$0xff] (%p12644_p4), %v9790_v20  ;;  %9793 = vst [vmem:[%s15631_s15 + $0x290] sm:$0xff] (%p12644_p4), %v9792_v62  ;;  %v9798_v56 = vld [vmem:[%s14885_s22 + $0x160] sm:$0xff] (%p12644_p4) }
 0xbd9   : > { %9542 = vst [vmem:[%s14885_s22 + $0x1d8] sm:$0xff] %v9478_v39  ;;  %9799 = vst [vmem:[%s15631_s15 + $0x2c0] sm:$0xff] (%p12644_p4), %v9798_v56  ;;  %v9800_v39 = vld [vmem:[%s14885_s22 + $0x168] sm:$0xff] (%p12644_p4) }
 0xbda   : > { %12439 = vrcp.f32 %v9290_v25  ;;  %v9802_v25 = vld [vmem:[%s14885_s22 + $0x170] sm:$0xff] (%p12644_p4)  ;;  %9801 = vst [vmem:[%s15631_s15 + $0x2d0] sm:$0xff] (%p12644_p4), %v9800_v39 }
 0xbdb   : > { %v12434_v33 = vpop.eup %12433  ;;  %9803 = vst [vmem:[%s15631_s15 + $0x2e0] sm:$0xff] (%p12644_p4), %v9802_v25 }
 0xbdc   : > { %v9479_v44 = vmul.f32 %v12434_v33, %v9027_v22  ;;  %v9804_v22 = vld [vmem:[%s14885_s22 + $0x178] sm:$0xff] (%p12644_p4)  ;;  %v9810_v33 = vld [vmem:[%s14885_s22 + $0x190] sm:$0xff] (%p12644_p4) }
 0xbdd   : > { %9805 = vst [vmem:[%s15631_s15 + $0x2f0] sm:$0xff] (%p12644_p4), %v9804_v22  ;;  %9811 = vst [vmem:[%s15631_s15 + $0x320] sm:$0xff] (%p12644_p4), %v9810_v33  ;;  %v9826_v15 = vld [vmem:[%s14885_s22 + $0x1d0] sm:$0xff] (%p12644_p4) }
 0xbde   : > { %9543 = vst [vmem:[%s14885_s22 + $0x1e0] sm:$0xff] %v9479_v44  ;;  %v9812_v44 = vld [vmem:[%s14885_s22 + $0x198] sm:$0xff] (%p12644_p4)  ;;  %9827 = vst [vmem:[%s15631_s15 + $0x3a0] sm:$0xff] (%p12644_p4), %v9826_v15 }
 0xbdf   : > { %v12436_v60 = vpop.eup %12435  ;;  %9813 = vst [vmem:[%s15631_s15 + $0x330] sm:$0xff] (%p12644_p4), %v9812_v44 }
 0xbe0   : > { %v9480_v43 = vmul.f32 %v12436_v60, %v9029_v16  ;;  %v9814_v16 = vld [vmem:[%s14885_s22 + $0x1a0] sm:$0xff] (%p12644_p4)  ;;  %v9820_v60 = vld [vmem:[%s14885_s22 + $0x1b8] sm:$0xff] (%p12644_p4) }
 0xbe1   : > { %9815 = vst [vmem:[%s15631_s15 + $0x340] sm:$0xff] (%p12644_p4), %v9814_v16  ;;  %9821 = vst [vmem:[%s15631_s15 + $0x370] sm:$0xff] (%p12644_p4), %v9820_v60 }
 0xbe2   : > { %9544 = vst [vmem:[%s14885_s22 + $0x1e8] sm:$0xff] %v9480_v43  ;;  %v9822_v43 = vld [vmem:[%s14885_s22 + $0x1c0] sm:$0xff] (%p12644_p4) }
 0xbe3   : > { %v12438_v5 = vpop.eup %12437  ;;  %9823 = vst [vmem:[%s15631_s15 + $0x380] sm:$0xff] (%p12644_p4), %v9822_v43 }
 0xbe4   : > { %v9481_v37 = vmul.f32 %v12438_v5, %v9031_v28  ;;  %v9824_v28 = vld [vmem:[%s14885_s22 + $0x1c8] sm:$0xff] (%p12644_p4)  ;;  %v9828_v5 = vld [vmem:[%s14885_s22 + $0x1d8] sm:$0xff] (%p12644_p4) }
 0xbe5   : > { %9825 = vst [vmem:[%s15631_s15 + $0x390] sm:$0xff] (%p12644_p4), %v9824_v28  ;;  %9829 = vst [vmem:[%s15631_s15 + $0x3b0] sm:$0xff] (%p12644_p4), %v9828_v5 }
 0xbe6   : > { %9545 = vst [vmem:[%s14885_s22 + $0x1f0] sm:$0xff] %v9481_v37  ;;  %9553 = sbr.rel (!%p12644_p4) target bundleno = 3059 (0xbf3), region = 80  ;;  %v9830_v37 = vld [vmem:[%s14885_s22 + $0x1e0] sm:$0xff] (%p12644_p4) }
 0xbe7   : > { %v12440_v24 = vpop.eup %12439  ;;  %9831 = vst [vmem:[%s15631_s15 + $0x3c0] sm:$0xff] (%p12644_p4), %v9830_v37 }
 0xbe8   : > { %v9482_v53 = vmul.f32 %v12440_v24, %v9033_v19 }
 0xbe9   : > { %v9832_v19 = vld [vmem:[%s14885_s22 + $0x1e8] sm:$0xff] (%p12644_p4) }
 0xbea   : > { %9546 = vst [vmem:[%s14885_s22 + $0x1f8] sm:$0xff] %v9482_v53  ;;  %9833 = vst [vmem:[%s15631_s15 + $0x3d0] sm:$0xff] (%p12644_p4), %v9832_v19 }
 0xbed   : > { %v9834_v24 = vld [vmem:[%s14885_s22 + $0x1f0] sm:$0xff] }
 0xbee   : > { %9835 = vst [vmem:[%s15631_s15 + $0x3e0] sm:$0xff] %v9834_v24 }
 0xbf1   : > { %v9836_v53 = vld [vmem:[%s14885_s22 + $0x1f8] sm:$0xff] }
 0xbf2   : > { %9837 = vst [vmem:[%s15631_s15 + $0x3f0] sm:$0xff] %v9836_v53 }
 0xbf3 PF: > { %p20_p4 = scmp.ge.s32.totalorder %s12634_s21, 4   ;;  %s15928_s17 = smov %s12545_s18 }
 0xbf4   : > { %s15929_s18 = smov %s12642_s24  ;;  %s15930_s19 = smov %s12634_s21 }
 0xbf5   :  { %22 = sbr.rel (!%p20_p4) target bundleno = 3 (0x3), region = 162 }
 0xbfa   :  { %9853 = vsyncpa [#allocation3], 1 }
 0xbfb   :  { %9855 = vsyncpa [#allocation3 + $0x1], 1 }
 0xbfc   :  { %9856 = vsyncpa [#allocation5], 1 }

</bundles_post_ra>
